<compile_context>
chip_gen: v7x
topology: tpu7x:2x2x1
jax: 0.10.0
libtpu: 0.0.40
codegen_flags: <defaults>
</compile_context>

<pallas_src>
import functools

import jax
import jax.numpy as jnp
from jax.experimental import pallas as pl
from jax.experimental.pallas import tpu as pltpu


def _round_up(x, m):
    return (x + m - 1) // m * m


# ----------------------------------------------------------------------------
# Fused DoubleConv Pallas kernel
# ----------------------------------------------------------------------------

def _double_conv_kernel(xp_ref, w1_ref, w2_ref, shift_ref, mask_ref, o_ref,
                        h1_ref, *, W, Cout, M, MB, OFF1, NPAD_H1):
    """One batch element: conv3x3+BN+ReLU -> conv3x3+BN+ReLU, fully in VMEM.

    xp_ref    : (1, NPAD_IN, Cin) f32  zero-padded input, flattened row-major
                                       over (H+2, W+2) spatial positions
    w1_ref    : (9, Cin, Cout)  bf16   conv1 taps (kh*3+kw), BN1 scale folded
    w2_ref    : (9, Cout, Cout) bf16   conv2 taps,           BN2 scale folded
    shift_ref : (2, Cout)       f32    folded BN shifts (beta - scale*mean)
    mask_ref  : (M, 1)          f32    1.0 where (q mod (W+2)) < W else 0.0
    o_ref     : (1, M, Cout)    f32    flattened output incl. 2 junk cols/row
    h1_ref    : (NPAD_H1, Cout) f32    zero-haloed intermediate; buffer row p
                                       holds padded-flat position p - D2
    """
    W2 = W + 2
    D2 = OFF1 - (W + 3)          # buffer-coordinate shift for conv2 reads
    sh1 = shift_ref[0:1, :]
    sh2 = shift_ref[1:2, :]

    # Zero only the two halo strips of the scratch (the interior is fully
    # overwritten below).  Re-done every grid step because the batch axis is
    # "parallel"; it is two tiny aligned strips, not a full memset.
    h1_ref[0:OFF1, :] = jnp.zeros((OFF1, Cout), jnp.float32)
    h1_ref[OFF1 + M:NPAD_H1, :] = jnp.zeros((NPAD_H1 - (OFF1 + M), Cout),
                                            jnp.float32)

    # ---- conv1 + BN1 shift + ReLU, staged into the haloed VMEM scratch ----
    # Each tap is one contiguous (MB, Cin) sublane slice -> no relayouts.
    # TODO(synk): fuse taps into the matmul K dimension (9*Cin / 9*Cout) via
    # an in-VMEM im2col slab to better fill the 256-deep MXU on v6e/v7x.
    for c0 in range(0, M, MB):
        acc = None
        for t in range(9):
            off = (t // 3) * W2 + (t % 3)
            win = xp_ref[0, pl.ds(c0 + off, MB), :].astype(jnp.bfloat16)
            p = jnp.dot(win, w1_ref[t], preferred_element_type=jnp.float32)
            acc = p if acc is None else acc + p
        # shift + ReLU, then zero the 2 junk columns per image row so they
        # become the interspersed left/right zero halo of the conv2 input.
        y1 = jnp.maximum(acc + sh1, 0.0) * mask_ref[pl.ds(c0, MB), :]
        # Sublane-aligned contiguous store (OFF1 and c0 are multiples of 8).
        h1_ref[pl.ds(OFF1 + c0, MB), :] = y1
        # TODO(synk): stage h1 in bf16 (cast once here) after verifying
        # odd-sublane-offset packed loads are relayout-free for these shapes.

    # ---- conv2 + BN2 shift + ReLU ----
    for c0 in range(0, M, MB):
        acc = None
        for t in range(9):
            off = (t // 3) * W2 + (t % 3)
            win = h1_ref[pl.ds(c0 + off + D2, MB), :].astype(jnp.bfloat16)
            p = jnp.dot(win, w2_ref[t], preferred_element_type=jnp.float32)
            acc = p if acc is None else acc + p
        # Junk columns are sliced away by the wrapper; no masking needed.
        o_ref[0, pl.ds(c0, MB), :] = jnp.maximum(acc + sh2,
                                                 0.0).astype(o_ref.dtype)


def double_conv_nhwc(x, w1, w2, s1, sh1, s2, sh2):
    """x: (N, H, W, Cin) f32.  w1: (3,3,Cin,Cout) HWIO, w2: (3,3,Cout,Cout).

    Returns (N, H, W, Cout) f32 = ReLU(BN2(conv(ReLU(BN1(conv(x, w1))), w2))).
    BN (inference / running stats) is folded: scale into the bf16 weights,
    shift applied inside the kernel.
    """
    n, h, w, cin = x.shape
    cout = w1.shape[-1]
    w2p = w + 2
    m = h * w2p                                   # flat rows incl. junk cols
    npad_in = _round_up(m + 2 * w + 6, 8)         # covers max tap slice
    off1 = _round_up(w + 3, 8)                    # aligned y1 store offset
    npad_h1 = _round_up(off1 + m + w + 3, 8)      # covers max conv2 read
    # Row-chunking inside the kernel to bound vreg live ranges.
    mb = m // 2 if (m % 16 == 0) else m

    # Zero-pad spatially, flatten (H+2, W+2) row-major, and append a few zero
    # rows so every tap window is a single in-bounds contiguous slice.
    # TODO(synk): build the halo in-kernel (row-tiled DMA) to drop this extra
    # HBM pass once inputs are large enough for it to matter.
    xp = jnp.pad(x.astype(jnp.float32), ((0, 0), (1, 1), (1, 1), (0, 0)))
    xp = xp.reshape(n, (h + 2) * w2p, cin)
    xp = jnp.pad(xp, ((0, 0), (0, npad_in - (h + 2) * w2p), (0, 0)))

    # Fold BN scale into the conv weights (per output channel).
    w1m = (w1 * s1).reshape(9, cin, cout).astype(jnp.bfloat16)
    w2m = (w2 * s2).reshape(9, cout, cout).astype(jnp.bfloat16)
    shifts = jnp.stack([sh1, sh2]).astype(jnp.float32)            # (2, Cout)

    # 1.0 for the W real columns of each image row, 0.0 for the 2 pad columns.
    colmask = (jnp.arange(m) % w2p < w).astype(jnp.float32).reshape(m, 1)

    kernel = functools.partial(_double_conv_kernel, W=w, Cout=cout, M=m,
                               MB=mb, OFF1=off1, NPAD_H1=npad_h1)
    out_flat = pl.pallas_call(
        kernel,
        out_shape=jax.ShapeDtypeStruct((n, m, cout), jnp.float32),
        grid=(n,),
        in_specs=[
            pl.BlockSpec((1, npad_in, cin), lambda i: (i, 0, 0)),
            pl.BlockSpec((9, cin, cout), lambda i: (0, 0, 0)),
            pl.BlockSpec((9, cout, cout), lambda i: (0, 0, 0)),
            pl.BlockSpec((2, cout), lambda i: (0, 0)),
            pl.BlockSpec((m, 1), lambda i: (0, 0)),
        ],
        out_specs=pl.BlockSpec((1, m, cout), lambda i: (i, 0, 0)),
        scratch_shapes=[pltpu.VMEM((npad_h1, cout), jnp.float32)],
        compiler_params=pltpu.CompilerParams(
            dimension_semantics=("parallel",),
            vmem_limit_bytes=32 * 1024 * 1024),
        # TODO(synk): for large H*W / C, add a row-tile "parallel" grid axis
        # (with a 2-row halo recompute for the fused second conv) and size
        # tiles per generation (v7x 64 MiB VMEM / 2 TCs vs v5e/v6e 128 MiB).
    )(xp, w1m, w2m, shifts, colmask)

    # Drop the 2 junk columns per image row (carried so every tap could be a
    # contiguous slice) and restore (N, H, W, Cout).
    return out_flat.reshape(n, h, w2p, cout)[:, :, :w, :]


# ----------------------------------------------------------------------------
# Module-level forward (PyTorch NCHW boundary, BN folded at call time)
# ----------------------------------------------------------------------------

def _fold_bn(gamma, beta, mean, var, eps=1e-5):
    # TODO(synk): BatchNorm2d is applied in inference mode (running stats);
    # training-mode batch statistics are not implemented.
    scale = gamma / jnp.sqrt(var + eps)
    shift = beta - scale * mean
    return scale, shift


@jax.jit
def double_conv_forward(x_nchw, params):
    # TODO(synk): a Cout-on-sublane / spatial-on-lane (NCHW-native) kernel
    # orientation would delete these two full-array transposes and make the
    # activation stores lane-dense; kept NHWC to match the contiguous-tap
    # (rows, C) layout used by the kernel.
    x = jnp.transpose(x_nchw, (0, 2, 3, 1))                      # NCHW -> NHWC
    s1, sh1 = _fold_bn(params["bn1_gamma"], params["bn1_beta"],
                       params["bn1_mean"], params["bn1_var"])
    s2, sh2 = _fold_bn(params["bn2_gamma"], params["bn2_beta"],
                       params["bn2_mean"], params["bn2_var"])
    y = double_conv_nhwc(x, params["w1"], params["w2"], s1, sh1, s2, sh2)
    return jnp.transpose(y, (0, 3, 1, 2))                        # NHWC -> NCHW


# ----------------------------------------------------------------------------
# Pure-JAX reference (f32, explicit BN) for a correctness check
# ----------------------------------------------------------------------------

def double_conv_reference(x_nchw, params, eps=1e-5):
    x = jnp.transpose(x_nchw, (0, 2, 3, 1)).astype(jnp.float32)

    def conv_bn_relu(h, w, gamma, beta, mean, var):
        y = jax.lax.conv_general_dilated(
            h, w, window_strides=(1, 1), padding="SAME",
            dimension_numbers=("NHWC", "HWIO", "NHWC"))
        y = (y - mean) / jnp.sqrt(var + eps) * gamma + beta
        return jnp.maximum(y, 0.0)

    y = conv_bn_relu(x, params["w1"], params["bn1_gamma"], params["bn1_beta"],
                     params["bn1_mean"], params["bn1_var"])
    y = conv_bn_relu(y, params["w2"], params["bn2_gamma"], params["bn2_beta"],
                     params["bn2_mean"], params["bn2_var"])
    return jnp.transpose(y, (0, 3, 1, 2))


# ----------------------------------------------------------------------------
# Deterministic parameter initialization
# ----------------------------------------------------------------------------

def init_params(key, cin, cout):
    ks = jax.random.split(key, 10)
    p = {}
    p["w1"] = (jax.random.normal(ks[0], (3, 3, cin, cout), jnp.float32)
               / jnp.sqrt(9.0 * cin))
    p["w2"] = (jax.random.normal(ks[1], (3, 3, cout, cout), jnp.float32)
               / jnp.sqrt(9.0 * cout))
    p["bn1_gamma"] = jax.random.uniform(ks[2], (cout,), jnp.float32, 0.5, 1.5)
    p["bn1_beta"] = 0.1 * jax.random.normal(ks[3], (cout,), jnp.float32)
    p["bn1_mean"] = 0.1 * jax.random.normal(ks[4], (cout,), jnp.float32)
    p["bn1_var"] = jax.random.uniform(ks[5], (cout,), jnp.float32, 0.5, 1.5)
    p["bn2_gamma"] = jax.random.uniform(ks[6], (cout,), jnp.float32, 0.5, 1.5)
    p["bn2_beta"] = 0.1 * jax.random.normal(ks[7], (cout,), jnp.float32)
    p["bn2_mean"] = 0.1 * jax.random.normal(ks[8], (cout,), jnp.float32)
    p["bn2_var"] = jax.random.uniform(ks[9], (cout,), jnp.float32, 0.5, 1.5)
    return p


if __name__ == "__main__":
    key = jax.random.PRNGKey(0)
    k_x, k_p = jax.random.split(key)

    batch, in_channels, height, width = 2, 4, 16, 16
    out_channels = 64

    x = jax.random.normal(k_x, (batch, in_channels, height, width), jnp.float32)
    params = init_params(k_p, in_channels, out_channels)

    y = double_conv_forward(x, params)
    jax.block_until_ready(y)
    assert y.shape == (batch, out_channels, height, width), y.shape

    y_ref = double_conv_reference(x, params)
    rel_err = float(jnp.max(jnp.abs(y - y_ref)) / (jnp.max(jnp.abs(y_ref)) + 1e-6))
    # bf16 MXU inputs with f32 accumulation -> loose tolerance vs f32 reference.
    assert rel_err < 5e-2, f"rel_err={rel_err}"

    print("KERNEL_OK")
</pallas_src>

<mosaic_0001>
module attributes {stable_mosaic.version = 11 : i64} {
  func.func @_double_conv_kernel(%arg0: i32, %arg1: memref<1x328x4xf32, #tpu.memory_space<vmem>>, %arg2: memref<9x4x64xbf16, #tpu.memory_space<vmem>>, %arg3: memref<9x64x64xbf16, #tpu.memory_space<vmem>>, %arg4: memref<2x64xf32, #tpu.memory_space<vmem>>, %arg5: memref<288x1xf32, #tpu.memory_space<vmem>>, %arg6: memref<1x288x64xf32, #tpu.memory_space<vmem>>, %arg7: memref<336x64xf32, #tpu.memory_space<vmem>>) attributes {dimension_semantics = [#tpu.dimension_semantics<parallel>], iteration_bounds = array<i64: 2>, scalar_prefetch = 0 : i64, scratch_operands = 1 : i64, tpu.core_type = #tpu.core_type<tc>, window_params = [{transform_indices = @transform_0, window_bounds = array<i64: 1, 328, 4>}, {pipeline_mode = #tpu.pipeline_mode<synchronous>, transform_indices = @transform_1, window_bounds = array<i64: 9, 4, 64>}, {pipeline_mode = #tpu.pipeline_mode<synchronous>, transform_indices = @transform_2, window_bounds = array<i64: 9, 64, 64>}, {pipeline_mode = #tpu.pipeline_mode<synchronous>, transform_indices = @transform_3, window_bounds = array<i64: 2, 64>}, {pipeline_mode = #tpu.pipeline_mode<synchronous>, transform_indices = @transform_4, window_bounds = array<i64: 288, 1>}, {transform_indices = @transform_5, window_bounds = array<i64: 1, 288, 64>}]} {
    %c0 = arith.constant 0 : index
    %c0_0 = arith.constant 0 : index
    %0 = vector.load %arg4[%c0, %c0_0] : memref<2x64xf32, #tpu.memory_space<vmem>>, vector<1x64xf32>
    %c1 = arith.constant 1 : index
    %c0_1 = arith.constant 0 : index
    %1 = vector.load %arg4[%c1, %c0_1] : memref<2x64xf32, #tpu.memory_space<vmem>>, vector<1x64xf32>
    %cst = arith.constant 0.000000e+00 : f32
    %2 = vector.broadcast %cst : f32 to vector<24x64xf32>
    %c0_2 = arith.constant 0 : index
    %c0_3 = arith.constant 0 : index
    %3 = vector.load %arg7[%c0_2, %c0_3] : memref<336x64xf32, #tpu.memory_space<vmem>>, vector<24x64xf32>
    tpu.vector_store %arg7[%c0_2, %c0_3], %2 {strides = array<i32>} : memref<336x64xf32, #tpu.memory_space<vmem>>, vector<24x64xf32>,
    %cst_4 = arith.constant 0.000000e+00 : f32
    %4 = vector.broadcast %cst_4 : f32 to vector<24x64xf32>
    %c312 = arith.constant 312 : index
    %c0_5 = arith.constant 0 : index
    %5 = vector.load %arg7[%c312, %c0_5] : memref<336x64xf32, #tpu.memory_space<vmem>>, vector<24x64xf32>
    tpu.vector_store %arg7[%c312, %c0_5], %4 {strides = array<i32>} : memref<336x64xf32, #tpu.memory_space<vmem>>, vector<24x64xf32>,
    %c0_6 = arith.constant 0 : index
    %c0_7 = arith.constant 0 : index
    %c0_8 = arith.constant 0 : index
    %6 = vector.load %arg1[%c0_6, %c0_7, %c0_8] : memref<1x328x4xf32, #tpu.memory_space<vmem>>, vector<1x144x4xf32>
    %7 = vector.shape_cast %6 : vector<1x144x4xf32> to vector<144x4xf32>
    %8 = arith.truncf %7 : vector<144x4xf32> to vector<144x4xbf16>
    %c0_9 = arith.constant 0 : index
    %c0_10 = arith.constant 0 : index
    %c0_11 = arith.constant 0 : index
    %9 = vector.load %arg2[%c0_9, %c0_10, %c0_11] : memref<9x4x64xbf16, #tpu.memory_space<vmem>>, vector<1x4x64xbf16>
    %10 = vector.shape_cast %9 : vector<1x4x64xbf16> to vector<4x64xbf16>
    %cst_12 = arith.constant dense<0.000000e+00> : vector<144x64xf32>
    %11 = tpu.matmul %8, %10, %cst_12 {dimension_numbers = #tpu.dot_dimension_numbers<[1], [0], [0], [1], [0, 0, 1, 1], [], []>} : vector<144x4xbf16>, vector<4x64xbf16>, vector<144x64xf32> -> vector<144x64xf32>
    %c0_13 = arith.constant 0 : index
    %c1_14 = arith.constant 1 : index
    %c0_15 = arith.constant 0 : index
    %12 = vector.load %arg1[%c0_13, %c1_14, %c0_15] : memref<1x328x4xf32, #tpu.memory_space<vmem>>, vector<1x144x4xf32>
    %13 = vector.shape_cast %12 : vector<1x144x4xf32> to vector<144x4xf32>
    %14 = arith.truncf %13 : vector<144x4xf32> to vector<144x4xbf16>
    %c1_16 = arith.constant 1 : index
    %c0_17 = arith.constant 0 : index
    %c0_18 = arith.constant 0 : index
    %15 = vector.load %arg2[%c1_16, %c0_17, %c0_18] : memref<9x4x64xbf16, #tpu.memory_space<vmem>>, vector<1x4x64xbf16>
    %16 = vector.shape_cast %15 : vector<1x4x64xbf16> to vector<4x64xbf16>
    %cst_19 = arith.constant dense<0.000000e+00> : vector<144x64xf32>
    %17 = tpu.matmul %14, %16, %cst_19 {dimension_numbers = #tpu.dot_dimension_numbers<[1], [0], [0], [1], [0, 0, 1, 1], [], []>} : vector<144x4xbf16>, vector<4x64xbf16>, vector<144x64xf32> -> vector<144x64xf32>
    %18 = arith.addf %11, %17 : vector<144x64xf32>
    %c0_20 = arith.constant 0 : index
    %c2 = arith.constant 2 : index
    %c0_21 = arith.constant 0 : index
    %19 = vector.load %arg1[%c0_20, %c2, %c0_21] : memref<1x328x4xf32, #tpu.memory_space<vmem>>, vector<1x144x4xf32>
    %20 = vector.shape_cast %19 : vector<1x144x4xf32> to vector<144x4xf32>
    %21 = arith.truncf %20 : vector<144x4xf32> to vector<144x4xbf16>
    %c2_22 = arith.constant 2 : index
    %c0_23 = arith.constant 0 : index
    %c0_24 = arith.constant 0 : index
    %22 = vector.load %arg2[%c2_22, %c0_23, %c0_24] : memref<9x4x64xbf16, #tpu.memory_space<vmem>>, vector<1x4x64xbf16>
    %23 = vector.shape_cast %22 : vector<1x4x64xbf16> to vector<4x64xbf16>
    %cst_25 = arith.constant dense<0.000000e+00> : vector<144x64xf32>
    %24 = tpu.matmul %21, %23, %cst_25 {dimension_numbers = #tpu.dot_dimension_numbers<[1], [0], [0], [1], [0, 0, 1, 1], [], []>} : vector<144x4xbf16>, vector<4x64xbf16>, vector<144x64xf32> -> vector<144x64xf32>
    %25 = arith.addf %18, %24 : vector<144x64xf32>
    %c0_26 = arith.constant 0 : index
    %c18 = arith.constant 18 : index
    %c0_27 = arith.constant 0 : index
    %26 = vector.load %arg1[%c0_26, %c18, %c0_27] : memref<1x328x4xf32, #tpu.memory_space<vmem>>, vector<1x144x4xf32>
    %27 = vector.shape_cast %26 : vector<1x144x4xf32> to vector<144x4xf32>
    %28 = arith.truncf %27 : vector<144x4xf32> to vector<144x4xbf16>
    %c3 = arith.constant 3 : index
    %c0_28 = arith.constant 0 : index
    %c0_29 = arith.constant 0 : index
    %29 = vector.load %arg2[%c3, %c0_28, %c0_29] : memref<9x4x64xbf16, #tpu.memory_space<vmem>>, vector<1x4x64xbf16>
    %30 = vector.shape_cast %29 : vector<1x4x64xbf16> to vector<4x64xbf16>
    %cst_30 = arith.constant dense<0.000000e+00> : vector<144x64xf32>
    %31 = tpu.matmul %28, %30, %cst_30 {dimension_numbers = #tpu.dot_dimension_numbers<[1], [0], [0], [1], [0, 0, 1, 1], [], []>} : vector<144x4xbf16>, vector<4x64xbf16>, vector<144x64xf32> -> vector<144x64xf32>
    %32 = arith.addf %25, %31 : vector<144x64xf32>
    %c0_31 = arith.constant 0 : index
    %c19 = arith.constant 19 : index
    %c0_32 = arith.constant 0 : index
    %33 = vector.load %arg1[%c0_31, %c19, %c0_32] : memref<1x328x4xf32, #tpu.memory_space<vmem>>, vector<1x144x4xf32>
    %34 = vector.shape_cast %33 : vector<1x144x4xf32> to vector<144x4xf32>
    %35 = arith.truncf %34 : vector<144x4xf32> to vector<144x4xbf16>
    %c4 = arith.constant 4 : index
    %c0_33 = arith.constant 0 : index
    %c0_34 = arith.constant 0 : index
    %36 = vector.load %arg2[%c4, %c0_33, %c0_34] : memref<9x4x64xbf16, #tpu.memory_space<vmem>>, vector<1x4x64xbf16>
    %37 = vector.shape_cast %36 : vector<1x4x64xbf16> to vector<4x64xbf16>
    %cst_35 = arith.constant dense<0.000000e+00> : vector<144x64xf32>
    %38 = tpu.matmul %35, %37, %cst_35 {dimension_numbers = #tpu.dot_dimension_numbers<[1], [0], [0], [1], [0, 0, 1, 1], [], []>} : vector<144x4xbf16>, vector<4x64xbf16>, vector<144x64xf32> -> vector<144x64xf32>
    %39 = arith.addf %32, %38 : vector<144x64xf32>
    %c0_36 = arith.constant 0 : index
    %c20 = arith.constant 20 : index
    %c0_37 = arith.constant 0 : index
    %40 = vector.load %arg1[%c0_36, %c20, %c0_37] : memref<1x328x4xf32, #tpu.memory_space<vmem>>, vector<1x144x4xf32>
    %41 = vector.shape_cast %40 : vector<1x144x4xf32> to vector<144x4xf32>
    %42 = arith.truncf %41 : vector<144x4xf32> to vector<144x4xbf16>
    %c5 = arith.constant 5 : index
    %c0_38 = arith.constant 0 : index
    %c0_39 = arith.constant 0 : index
    %43 = vector.load %arg2[%c5, %c0_38, %c0_39] : memref<9x4x64xbf16, #tpu.memory_space<vmem>>, vector<1x4x64xbf16>
    %44 = vector.shape_cast %43 : vector<1x4x64xbf16> to vector<4x64xbf16>
    %cst_40 = arith.constant dense<0.000000e+00> : vector<144x64xf32>
    %45 = tpu.matmul %42, %44, %cst_40 {dimension_numbers = #tpu.dot_dimension_numbers<[1], [0], [0], [1], [0, 0, 1, 1], [], []>} : vector<144x4xbf16>, vector<4x64xbf16>, vector<144x64xf32> -> vector<144x64xf32>
    %46 = arith.addf %39, %45 : vector<144x64xf32>
    %c0_41 = arith.constant 0 : index
    %c36 = arith.constant 36 : index
    %c0_42 = arith.constant 0 : index
    %47 = vector.load %arg1[%c0_41, %c36, %c0_42] : memref<1x328x4xf32, #tpu.memory_space<vmem>>, vector<1x144x4xf32>
    %48 = vector.shape_cast %47 : vector<1x144x4xf32> to vector<144x4xf32>
    %49 = arith.truncf %48 : vector<144x4xf32> to vector<144x4xbf16>
    %c6 = arith.constant 6 : index
    %c0_43 = arith.constant 0 : index
    %c0_44 = arith.constant 0 : index
    %50 = vector.load %arg2[%c6, %c0_43, %c0_44] : memref<9x4x64xbf16, #tpu.memory_space<vmem>>, vector<1x4x64xbf16>
    %51 = vector.shape_cast %50 : vector<1x4x64xbf16> to vector<4x64xbf16>
    %cst_45 = arith.constant dense<0.000000e+00> : vector<144x64xf32>
    %52 = tpu.matmul %49, %51, %cst_45 {dimension_numbers = #tpu.dot_dimension_numbers<[1], [0], [0], [1], [0, 0, 1, 1], [], []>} : vector<144x4xbf16>, vector<4x64xbf16>, vector<144x64xf32> -> vector<144x64xf32>
    %53 = arith.addf %46, %52 : vector<144x64xf32>
    %c0_46 = arith.constant 0 : index
    %c37 = arith.constant 37 : index
    %c0_47 = arith.constant 0 : index
    %54 = vector.load %arg1[%c0_46, %c37, %c0_47] : memref<1x328x4xf32, #tpu.memory_space<vmem>>, vector<1x144x4xf32>
    %55 = vector.shape_cast %54 : vector<1x144x4xf32> to vector<144x4xf32>
    %56 = arith.truncf %55 : vector<144x4xf32> to vector<144x4xbf16>
    %c7 = arith.constant 7 : index
    %c0_48 = arith.constant 0 : index
    %c0_49 = arith.constant 0 : index
    %57 = vector.load %arg2[%c7, %c0_48, %c0_49] : memref<9x4x64xbf16, #tpu.memory_space<vmem>>, vector<1x4x64xbf16>
    %58 = vector.shape_cast %57 : vector<1x4x64xbf16> to vector<4x64xbf16>
    %cst_50 = arith.constant dense<0.000000e+00> : vector<144x64xf32>
    %59 = tpu.matmul %56, %58, %cst_50 {dimension_numbers = #tpu.dot_dimension_numbers<[1], [0], [0], [1], [0, 0, 1, 1], [], []>} : vector<144x4xbf16>, vector<4x64xbf16>, vector<144x64xf32> -> vector<144x64xf32>
    %60 = arith.addf %53, %59 : vector<144x64xf32>
    %c0_51 = arith.constant 0 : index
    %c38 = arith.constant 38 : index
    %c0_52 = arith.constant 0 : index
    %61 = vector.load %arg1[%c0_51, %c38, %c0_52] : memref<1x328x4xf32, #tpu.memory_space<vmem>>, vector<1x144x4xf32>
    %62 = vector.shape_cast %61 : vector<1x144x4xf32> to vector<144x4xf32>
    %63 = arith.truncf %62 : vector<144x4xf32> to vector<144x4xbf16>
    %c8 = arith.constant 8 : index
    %c0_53 = arith.constant 0 : index
    %c0_54 = arith.constant 0 : index
    %64 = vector.load %arg2[%c8, %c0_53, %c0_54] : memref<9x4x64xbf16, #tpu.memory_space<vmem>>, vector<1x4x64xbf16>
    %65 = vector.shape_cast %64 : vector<1x4x64xbf16> to vector<4x64xbf16>
    %cst_55 = arith.constant dense<0.000000e+00> : vector<144x64xf32>
    %66 = tpu.matmul %63, %65, %cst_55 {dimension_numbers = #tpu.dot_dimension_numbers<[1], [0], [0], [1], [0, 0, 1, 1], [], []>} : vector<144x4xbf16>, vector<4x64xbf16>, vector<144x64xf32> -> vector<144x64xf32>
    %67 = arith.addf %60, %66 : vector<144x64xf32>
    %68 = vector.broadcast %0 : vector<1x64xf32> to vector<144x64xf32>
    %69 = arith.addf %67, %68 : vector<144x64xf32>
    %cst_56 = arith.constant 0.000000e+00 : f32
    %70 = vector.broadcast %cst_56 : f32 to vector<144x64xf32>
    %71 = arith.maximumf %69, %70 : vector<144x64xf32>
    %c0_57 = arith.constant 0 : index
    %c0_58 = arith.constant 0 : index
    %72 = vector.load %arg5[%c0_57, %c0_58] : memref<288x1xf32, #tpu.memory_space<vmem>>, vector<144x1xf32>
    %73 = vector.broadcast %72 : vector<144x1xf32> to vector<144x64xf32>
    %74 = arith.mulf %71, %73 : vector<144x64xf32>
    %c24 = arith.constant 24 : index
    %c0_59 = arith.constant 0 : index
    %75 = vector.load %arg7[%c24, %c0_59] : memref<336x64xf32, #tpu.memory_space<vmem>>, vector<144x64xf32>
    tpu.vector_store %arg7[%c24, %c0_59], %74 {strides = array<i32>} : memref<336x64xf32, #tpu.memory_space<vmem>>, vector<144x64xf32>,
    %c0_60 = arith.constant 0 : index
    %c144 = arith.constant 144 : index
    %c0_61 = arith.constant 0 : index
    %76 = vector.load %arg1[%c0_60, %c144, %c0_61] : memref<1x328x4xf32, #tpu.memory_space<vmem>>, vector<1x144x4xf32>
    %77 = vector.shape_cast %76 : vector<1x144x4xf32> to vector<144x4xf32>
    %78 = arith.truncf %77 : vector<144x4xf32> to vector<144x4xbf16>
    %c0_62 = arith.constant 0 : index
    %c0_63 = arith.constant 0 : index
    %c0_64 = arith.constant 0 : index
    %79 = vector.load %arg2[%c0_62, %c0_63, %c0_64] : memref<9x4x64xbf16, #tpu.memory_space<vmem>>, vector<1x4x64xbf16>
    %80 = vector.shape_cast %79 : vector<1x4x64xbf16> to vector<4x64xbf16>
    %cst_65 = arith.constant dense<0.000000e+00> : vector<144x64xf32>
    %81 = tpu.matmul %78, %80, %cst_65 {dimension_numbers = #tpu.dot_dimension_numbers<[1], [0], [0], [1], [0, 0, 1, 1], [], []>} : vector<144x4xbf16>, vector<4x64xbf16>, vector<144x64xf32> -> vector<144x64xf32>
    %c0_66 = arith.constant 0 : index
    %c145 = arith.constant 145 : index
    %c0_67 = arith.constant 0 : index
    %82 = vector.load %arg1[%c0_66, %c145, %c0_67] : memref<1x328x4xf32, #tpu.memory_space<vmem>>, vector<1x144x4xf32>
    %83 = vector.shape_cast %82 : vector<1x144x4xf32> to vector<144x4xf32>
    %84 = arith.truncf %83 : vector<144x4xf32> to vector<144x4xbf16>
    %c1_68 = arith.constant 1 : index
    %c0_69 = arith.constant 0 : index
    %c0_70 = arith.constant 0 : index
    %85 = vector.load %arg2[%c1_68, %c0_69, %c0_70] : memref<9x4x64xbf16, #tpu.memory_space<vmem>>, vector<1x4x64xbf16>
    %86 = vector.shape_cast %85 : vector<1x4x64xbf16> to vector<4x64xbf16>
    %cst_71 = arith.constant dense<0.000000e+00> : vector<144x64xf32>
    %87 = tpu.matmul %84, %86, %cst_71 {dimension_numbers = #tpu.dot_dimension_numbers<[1], [0], [0], [1], [0, 0, 1, 1], [], []>} : vector<144x4xbf16>, vector<4x64xbf16>, vector<144x64xf32> -> vector<144x64xf32>
    %88 = arith.addf %81, %87 : vector<144x64xf32>
    %c0_72 = arith.constant 0 : index
    %c146 = arith.constant 146 : index
    %c0_73 = arith.constant 0 : index
    %89 = vector.load %arg1[%c0_72, %c146, %c0_73] : memref<1x328x4xf32, #tpu.memory_space<vmem>>, vector<1x144x4xf32>
    %90 = vector.shape_cast %89 : vector<1x144x4xf32> to vector<144x4xf32>
    %91 = arith.truncf %90 : vector<144x4xf32> to vector<144x4xbf16>
    %c2_74 = arith.constant 2 : index
    %c0_75 = arith.constant 0 : index
    %c0_76 = arith.constant 0 : index
    %92 = vector.load %arg2[%c2_74, %c0_75, %c0_76] : memref<9x4x64xbf16, #tpu.memory_space<vmem>>, vector<1x4x64xbf16>
    %93 = vector.shape_cast %92 : vector<1x4x64xbf16> to vector<4x64xbf16>
    %cst_77 = arith.constant dense<0.000000e+00> : vector<144x64xf32>
    %94 = tpu.matmul %91, %93, %cst_77 {dimension_numbers = #tpu.dot_dimension_numbers<[1], [0], [0], [1], [0, 0, 1, 1], [], []>} : vector<144x4xbf16>, vector<4x64xbf16>, vector<144x64xf32> -> vector<144x64xf32>
    %95 = arith.addf %88, %94 : vector<144x64xf32>
    %c0_78 = arith.constant 0 : index
    %c162 = arith.constant 162 : index
    %c0_79 = arith.constant 0 : index
    %96 = vector.load %arg1[%c0_78, %c162, %c0_79] : memref<1x328x4xf32, #tpu.memory_space<vmem>>, vector<1x144x4xf32>
    %97 = vector.shape_cast %96 : vector<1x144x4xf32> to vector<144x4xf32>
    %98 = arith.truncf %97 : vector<144x4xf32> to vector<144x4xbf16>
    %c3_80 = arith.constant 3 : index
    %c0_81 = arith.constant 0 : index
    %c0_82 = arith.constant 0 : index
    %99 = vector.load %arg2[%c3_80, %c0_81, %c0_82] : memref<9x4x64xbf16, #tpu.memory_space<vmem>>, vector<1x4x64xbf16>
    %100 = vector.shape_cast %99 : vector<1x4x64xbf16> to vector<4x64xbf16>
    %cst_83 = arith.constant dense<0.000000e+00> : vector<144x64xf32>
    %101 = tpu.matmul %98, %100, %cst_83 {dimension_numbers = #tpu.dot_dimension_numbers<[1], [0], [0], [1], [0, 0, 1, 1], [], []>} : vector<144x4xbf16>, vector<4x64xbf16>, vector<144x64xf32> -> vector<144x64xf32>
    %102 = arith.addf %95, %101 : vector<144x64xf32>
    %c0_84 = arith.constant 0 : index
    %c163 = arith.constant 163 : index
    %c0_85 = arith.constant 0 : index
    %103 = vector.load %arg1[%c0_84, %c163, %c0_85] : memref<1x328x4xf32, #tpu.memory_space<vmem>>, vector<1x144x4xf32>
    %104 = vector.shape_cast %103 : vector<1x144x4xf32> to vector<144x4xf32>
    %105 = arith.truncf %104 : vector<144x4xf32> to vector<144x4xbf16>
    %c4_86 = arith.constant 4 : index
    %c0_87 = arith.constant 0 : index
    %c0_88 = arith.constant 0 : index
    %106 = vector.load %arg2[%c4_86, %c0_87, %c0_88] : memref<9x4x64xbf16, #tpu.memory_space<vmem>>, vector<1x4x64xbf16>
    %107 = vector.shape_cast %106 : vector<1x4x64xbf16> to vector<4x64xbf16>
    %cst_89 = arith.constant dense<0.000000e+00> : vector<144x64xf32>
    %108 = tpu.matmul %105, %107, %cst_89 {dimension_numbers = #tpu.dot_dimension_numbers<[1], [0], [0], [1], [0, 0, 1, 1], [], []>} : vector<144x4xbf16>, vector<4x64xbf16>, vector<144x64xf32> -> vector<144x64xf32>
    %109 = arith.addf %102, %108 : vector<144x64xf32>
    %c0_90 = arith.constant 0 : index
    %c164 = arith.constant 164 : index
    %c0_91 = arith.constant 0 : index
    %110 = vector.load %arg1[%c0_90, %c164, %c0_91] : memref<1x328x4xf32, #tpu.memory_space<vmem>>, vector<1x144x4xf32>
    %111 = vector.shape_cast %110 : vector<1x144x4xf32> to vector<144x4xf32>
    %112 = arith.truncf %111 : vector<144x4xf32> to vector<144x4xbf16>
    %c5_92 = arith.constant 5 : index
    %c0_93 = arith.constant 0 : index
    %c0_94 = arith.constant 0 : index
    %113 = vector.load %arg2[%c5_92, %c0_93, %c0_94] : memref<9x4x64xbf16, #tpu.memory_space<vmem>>, vector<1x4x64xbf16>
    %114 = vector.shape_cast %113 : vector<1x4x64xbf16> to vector<4x64xbf16>
    %cst_95 = arith.constant dense<0.000000e+00> : vector<144x64xf32>
    %115 = tpu.matmul %112, %114, %cst_95 {dimension_numbers = #tpu.dot_dimension_numbers<[1], [0], [0], [1], [0, 0, 1, 1], [], []>} : vector<144x4xbf16>, vector<4x64xbf16>, vector<144x64xf32> -> vector<144x64xf32>
    %116 = arith.addf %109, %115 : vector<144x64xf32>
    %c0_96 = arith.constant 0 : index
    %c180 = arith.constant 180 : index
    %c0_97 = arith.constant 0 : index
    %117 = vector.load %arg1[%c0_96, %c180, %c0_97] : memref<1x328x4xf32, #tpu.memory_space<vmem>>, vector<1x144x4xf32>
    %118 = vector.shape_cast %117 : vector<1x144x4xf32> to vector<144x4xf32>
    %119 = arith.truncf %118 : vector<144x4xf32> to vector<144x4xbf16>
    %c6_98 = arith.constant 6 : index
    %c0_99 = arith.constant 0 : index
    %c0_100 = arith.constant 0 : index
    %120 = vector.load %arg2[%c6_98, %c0_99, %c0_100] : memref<9x4x64xbf16, #tpu.memory_space<vmem>>, vector<1x4x64xbf16>
    %121 = vector.shape_cast %120 : vector<1x4x64xbf16> to vector<4x64xbf16>
    %cst_101 = arith.constant dense<0.000000e+00> : vector<144x64xf32>
    %122 = tpu.matmul %119, %121, %cst_101 {dimension_numbers = #tpu.dot_dimension_numbers<[1], [0], [0], [1], [0, 0, 1, 1], [], []>} : vector<144x4xbf16>, vector<4x64xbf16>, vector<144x64xf32> -> vector<144x64xf32>
    %123 = arith.addf %116, %122 : vector<144x64xf32>
    %c0_102 = arith.constant 0 : index
    %c181 = arith.constant 181 : index
    %c0_103 = arith.constant 0 : index
    %124 = vector.load %arg1[%c0_102, %c181, %c0_103] : memref<1x328x4xf32, #tpu.memory_space<vmem>>, vector<1x144x4xf32>
    %125 = vector.shape_cast %124 : vector<1x144x4xf32> to vector<144x4xf32>
    %126 = arith.truncf %125 : vector<144x4xf32> to vector<144x4xbf16>
    %c7_104 = arith.constant 7 : index
    %c0_105 = arith.constant 0 : index
    %c0_106 = arith.constant 0 : index
    %127 = vector.load %arg2[%c7_104, %c0_105, %c0_106] : memref<9x4x64xbf16, #tpu.memory_space<vmem>>, vector<1x4x64xbf16>
    %128 = vector.shape_cast %127 : vector<1x4x64xbf16> to vector<4x64xbf16>
    %cst_107 = arith.constant dense<0.000000e+00> : vector<144x64xf32>
    %129 = tpu.matmul %126, %128, %cst_107 {dimension_numbers = #tpu.dot_dimension_numbers<[1], [0], [0], [1], [0, 0, 1, 1], [], []>} : vector<144x4xbf16>, vector<4x64xbf16>, vector<144x64xf32> -> vector<144x64xf32>
    %130 = arith.addf %123, %129 : vector<144x64xf32>
    %c0_108 = arith.constant 0 : index
    %c182 = arith.constant 182 : index
    %c0_109 = arith.constant 0 : index
    %131 = vector.load %arg1[%c0_108, %c182, %c0_109] : memref<1x328x4xf32, #tpu.memory_space<vmem>>, vector<1x144x4xf32>
    %132 = vector.shape_cast %131 : vector<1x144x4xf32> to vector<144x4xf32>
    %133 = arith.truncf %132 : vector<144x4xf32> to vector<144x4xbf16>
    %c8_110 = arith.constant 8 : index
    %c0_111 = arith.constant 0 : index
    %c0_112 = arith.constant 0 : index
    %134 = vector.load %arg2[%c8_110, %c0_111, %c0_112] : memref<9x4x64xbf16, #tpu.memory_space<vmem>>, vector<1x4x64xbf16>
    %135 = vector.shape_cast %134 : vector<1x4x64xbf16> to vector<4x64xbf16>
    %cst_113 = arith.constant dense<0.000000e+00> : vector<144x64xf32>
    %136 = tpu.matmul %133, %135, %cst_113 {dimension_numbers = #tpu.dot_dimension_numbers<[1], [0], [0], [1], [0, 0, 1, 1], [], []>} : vector<144x4xbf16>, vector<4x64xbf16>, vector<144x64xf32> -> vector<144x64xf32>
    %137 = arith.addf %130, %136 : vector<144x64xf32>
    %138 = vector.broadcast %0 : vector<1x64xf32> to vector<144x64xf32>
    %139 = arith.addf %137, %138 : vector<144x64xf32>
    %cst_114 = arith.constant 0.000000e+00 : f32
    %140 = vector.broadcast %cst_114 : f32 to vector<144x64xf32>
    %141 = arith.maximumf %139, %140 : vector<144x64xf32>
    %c144_115 = arith.constant 144 : index
    %c0_116 = arith.constant 0 : index
    %142 = vector.load %arg5[%c144_115, %c0_116] : memref<288x1xf32, #tpu.memory_space<vmem>>, vector<144x1xf32>
    %143 = vector.broadcast %142 : vector<144x1xf32> to vector<144x64xf32>
    %144 = arith.mulf %141, %143 : vector<144x64xf32>
    %c168 = arith.constant 168 : index
    %c0_117 = arith.constant 0 : index
    %145 = vector.load %arg7[%c168, %c0_117] : memref<336x64xf32, #tpu.memory_space<vmem>>, vector<144x64xf32>
    tpu.vector_store %arg7[%c168, %c0_117], %144 {strides = array<i32>} : memref<336x64xf32, #tpu.memory_space<vmem>>, vector<144x64xf32>,
    %c5_118 = arith.constant 5 : index
    %c0_119 = arith.constant 0 : index
    %146 = vector.load %arg7[%c5_118, %c0_119] : memref<336x64xf32, #tpu.memory_space<vmem>>, vector<144x64xf32>
    %147 = arith.truncf %146 : vector<144x64xf32> to vector<144x64xbf16>
    %c0_120 = arith.constant 0 : index
    %c0_121 = arith.constant 0 : index
    %c0_122 = arith.constant 0 : index
    %148 = vector.load %arg3[%c0_120, %c0_121, %c0_122] : memref<9x64x64xbf16, #tpu.memory_space<vmem>>, vector<1x64x64xbf16>
    %149 = vector.shape_cast %148 : vector<1x64x64xbf16> to vector<64x64xbf16>
    %cst_123 = arith.constant dense<0.000000e+00> : vector<144x64xf32>
    %150 = tpu.matmul %147, %149, %cst_123 {dimension_numbers = #tpu.dot_dimension_numbers<[1], [0], [0], [1], [0, 0, 1, 1], [], []>} : vector<144x64xbf16>, vector<64x64xbf16>, vector<144x64xf32> -> vector<144x64xf32>
    %c6_124 = arith.constant 6 : index
    %c0_125 = arith.constant 0 : index
    %151 = vector.load %arg7[%c6_124, %c0_125] : memref<336x64xf32, #tpu.memory_space<vmem>>, vector<144x64xf32>
    %152 = arith.truncf %151 : vector<144x64xf32> to vector<144x64xbf16>
    %c1_126 = arith.constant 1 : index
    %c0_127 = arith.constant 0 : index
    %c0_128 = arith.constant 0 : index
    %153 = vector.load %arg3[%c1_126, %c0_127, %c0_128] : memref<9x64x64xbf16, #tpu.memory_space<vmem>>, vector<1x64x64xbf16>
    %154 = vector.shape_cast %153 : vector<1x64x64xbf16> to vector<64x64xbf16>
    %cst_129 = arith.constant dense<0.000000e+00> : vector<144x64xf32>
    %155 = tpu.matmul %152, %154, %cst_129 {dimension_numbers = #tpu.dot_dimension_numbers<[1], [0], [0], [1], [0, 0, 1, 1], [], []>} : vector<144x64xbf16>, vector<64x64xbf16>, vector<144x64xf32> -> vector<144x64xf32>
    %156 = arith.addf %150, %155 : vector<144x64xf32>
    %c7_130 = arith.constant 7 : index
    %c0_131 = arith.constant 0 : index
    %157 = vector.load %arg7[%c7_130, %c0_131] : memref<336x64xf32, #tpu.memory_space<vmem>>, vector<144x64xf32>
    %158 = arith.truncf %157 : vector<144x64xf32> to vector<144x64xbf16>
    %c2_132 = arith.constant 2 : index
    %c0_133 = arith.constant 0 : index
    %c0_134 = arith.constant 0 : index
    %159 = vector.load %arg3[%c2_132, %c0_133, %c0_134] : memref<9x64x64xbf16, #tpu.memory_space<vmem>>, vector<1x64x64xbf16>
    %160 = vector.shape_cast %159 : vector<1x64x64xbf16> to vector<64x64xbf16>
    %cst_135 = arith.constant dense<0.000000e+00> : vector<144x64xf32>
    %161 = tpu.matmul %158, %160, %cst_135 {dimension_numbers = #tpu.dot_dimension_numbers<[1], [0], [0], [1], [0, 0, 1, 1], [], []>} : vector<144x64xbf16>, vector<64x64xbf16>, vector<144x64xf32> -> vector<144x64xf32>
    %162 = arith.addf %156, %161 : vector<144x64xf32>
    %c23 = arith.constant 23 : index
    %c0_136 = arith.constant 0 : index
    %163 = vector.load %arg7[%c23, %c0_136] : memref<336x64xf32, #tpu.memory_space<vmem>>, vector<144x64xf32>
    %164 = arith.truncf %163 : vector<144x64xf32> to vector<144x64xbf16>
    %c3_137 = arith.constant 3 : index
    %c0_138 = arith.constant 0 : index
    %c0_139 = arith.constant 0 : index
    %165 = vector.load %arg3[%c3_137, %c0_138, %c0_139] : memref<9x64x64xbf16, #tpu.memory_space<vmem>>, vector<1x64x64xbf16>
    %166 = vector.shape_cast %165 : vector<1x64x64xbf16> to vector<64x64xbf16>
    %cst_140 = arith.constant dense<0.000000e+00> : vector<144x64xf32>
    %167 = tpu.matmul %164, %166, %cst_140 {dimension_numbers = #tpu.dot_dimension_numbers<[1], [0], [0], [1], [0, 0, 1, 1], [], []>} : vector<144x64xbf16>, vector<64x64xbf16>, vector<144x64xf32> -> vector<144x64xf32>
    %168 = arith.addf %162, %167 : vector<144x64xf32>
    %c24_141 = arith.constant 24 : index
    %c0_142 = arith.constant 0 : index
    %169 = vector.load %arg7[%c24_141, %c0_142] : memref<336x64xf32, #tpu.memory_space<vmem>>, vector<144x64xf32>
    %170 = arith.truncf %169 : vector<144x64xf32> to vector<144x64xbf16>
    %c4_143 = arith.constant 4 : index
    %c0_144 = arith.constant 0 : index
    %c0_145 = arith.constant 0 : index
    %171 = vector.load %arg3[%c4_143, %c0_144, %c0_145] : memref<9x64x64xbf16, #tpu.memory_space<vmem>>, vector<1x64x64xbf16>
    %172 = vector.shape_cast %171 : vector<1x64x64xbf16> to vector<64x64xbf16>
    %cst_146 = arith.constant dense<0.000000e+00> : vector<144x64xf32>
    %173 = tpu.matmul %170, %172, %cst_146 {dimension_numbers = #tpu.dot_dimension_numbers<[1], [0], [0], [1], [0, 0, 1, 1], [], []>} : vector<144x64xbf16>, vector<64x64xbf16>, vector<144x64xf32> -> vector<144x64xf32>
    %174 = arith.addf %168, %173 : vector<144x64xf32>
    %c25 = arith.constant 25 : index
    %c0_147 = arith.constant 0 : index
    %175 = vector.load %arg7[%c25, %c0_147] : memref<336x64xf32, #tpu.memory_space<vmem>>, vector<144x64xf32>
    %176 = arith.truncf %175 : vector<144x64xf32> to vector<144x64xbf16>
    %c5_148 = arith.constant 5 : index
    %c0_149 = arith.constant 0 : index
    %c0_150 = arith.constant 0 : index
    %177 = vector.load %arg3[%c5_148, %c0_149, %c0_150] : memref<9x64x64xbf16, #tpu.memory_space<vmem>>, vector<1x64x64xbf16>
    %178 = vector.shape_cast %177 : vector<1x64x64xbf16> to vector<64x64xbf16>
    %cst_151 = arith.constant dense<0.000000e+00> : vector<144x64xf32>
    %179 = tpu.matmul %176, %178, %cst_151 {dimension_numbers = #tpu.dot_dimension_numbers<[1], [0], [0], [1], [0, 0, 1, 1], [], []>} : vector<144x64xbf16>, vector<64x64xbf16>, vector<144x64xf32> -> vector<144x64xf32>
    %180 = arith.addf %174, %179 : vector<144x64xf32>
    %c41 = arith.constant 41 : index
    %c0_152 = arith.constant 0 : index
    %181 = vector.load %arg7[%c41, %c0_152] : memref<336x64xf32, #tpu.memory_space<vmem>>, vector<144x64xf32>
    %182 = arith.truncf %181 : vector<144x64xf32> to vector<144x64xbf16>
    %c6_153 = arith.constant 6 : index
    %c0_154 = arith.constant 0 : index
    %c0_155 = arith.constant 0 : index
    %183 = vector.load %arg3[%c6_153, %c0_154, %c0_155] : memref<9x64x64xbf16, #tpu.memory_space<vmem>>, vector<1x64x64xbf16>
    %184 = vector.shape_cast %183 : vector<1x64x64xbf16> to vector<64x64xbf16>
    %cst_156 = arith.constant dense<0.000000e+00> : vector<144x64xf32>
    %185 = tpu.matmul %182, %184, %cst_156 {dimension_numbers = #tpu.dot_dimension_numbers<[1], [0], [0], [1], [0, 0, 1, 1], [], []>} : vector<144x64xbf16>, vector<64x64xbf16>, vector<144x64xf32> -> vector<144x64xf32>
    %186 = arith.addf %180, %185 : vector<144x64xf32>
    %c42 = arith.constant 42 : index
    %c0_157 = arith.constant 0 : index
    %187 = vector.load %arg7[%c42, %c0_157] : memref<336x64xf32, #tpu.memory_space<vmem>>, vector<144x64xf32>
    %188 = arith.truncf %187 : vector<144x64xf32> to vector<144x64xbf16>
    %c7_158 = arith.constant 7 : index
    %c0_159 = arith.constant 0 : index
    %c0_160 = arith.constant 0 : index
    %189 = vector.load %arg3[%c7_158, %c0_159, %c0_160] : memref<9x64x64xbf16, #tpu.memory_space<vmem>>, vector<1x64x64xbf16>
    %190 = vector.shape_cast %189 : vector<1x64x64xbf16> to vector<64x64xbf16>
    %cst_161 = arith.constant dense<0.000000e+00> : vector<144x64xf32>
    %191 = tpu.matmul %188, %190, %cst_161 {dimension_numbers = #tpu.dot_dimension_numbers<[1], [0], [0], [1], [0, 0, 1, 1], [], []>} : vector<144x64xbf16>, vector<64x64xbf16>, vector<144x64xf32> -> vector<144x64xf32>
    %192 = arith.addf %186, %191 : vector<144x64xf32>
    %c43 = arith.constant 43 : index
    %c0_162 = arith.constant 0 : index
    %193 = vector.load %arg7[%c43, %c0_162] : memref<336x64xf32, #tpu.memory_space<vmem>>, vector<144x64xf32>
    %194 = arith.truncf %193 : vector<144x64xf32> to vector<144x64xbf16>
    %c8_163 = arith.constant 8 : index
    %c0_164 = arith.constant 0 : index
    %c0_165 = arith.constant 0 : index
    %195 = vector.load %arg3[%c8_163, %c0_164, %c0_165] : memref<9x64x64xbf16, #tpu.memory_space<vmem>>, vector<1x64x64xbf16>
    %196 = vector.shape_cast %195 : vector<1x64x64xbf16> to vector<64x64xbf16>
    %cst_166 = arith.constant dense<0.000000e+00> : vector<144x64xf32>
    %197 = tpu.matmul %194, %196, %cst_166 {dimension_numbers = #tpu.dot_dimension_numbers<[1], [0], [0], [1], [0, 0, 1, 1], [], []>} : vector<144x64xbf16>, vector<64x64xbf16>, vector<144x64xf32> -> vector<144x64xf32>
    %198 = arith.addf %192, %197 : vector<144x64xf32>
    %199 = vector.broadcast %1 : vector<1x64xf32> to vector<144x64xf32>
    %200 = arith.addf %198, %199 : vector<144x64xf32>
    %cst_167 = arith.constant 0.000000e+00 : f32
    %201 = vector.broadcast %cst_167 : f32 to vector<144x64xf32>
    %202 = arith.maximumf %200, %201 : vector<144x64xf32>
    %c0_168 = arith.constant 0 : index
    %c0_169 = arith.constant 0 : index
    %c0_170 = arith.constant 0 : index
    %203 = vector.load %arg6[%c0_168, %c0_169, %c0_170] : memref<1x288x64xf32, #tpu.memory_space<vmem>>, vector<1x144x64xf32>
    %204 = vector.shape_cast %203 : vector<1x144x64xf32> to vector<144x64xf32>
    %205 = vector.shape_cast %202 : vector<144x64xf32> to vector<1x144x64xf32>
    tpu.vector_store %arg6[%c0_168, %c0_169, %c0_170], %205 {strides = array<i32>} : memref<1x288x64xf32, #tpu.memory_space<vmem>>, vector<1x144x64xf32>,
    %c149 = arith.constant 149 : index
    %c0_171 = arith.constant 0 : index
    %206 = vector.load %arg7[%c149, %c0_171] : memref<336x64xf32, #tpu.memory_space<vmem>>, vector<144x64xf32>
    %207 = arith.truncf %206 : vector<144x64xf32> to vector<144x64xbf16>
    %c0_172 = arith.constant 0 : index
    %c0_173 = arith.constant 0 : index
    %c0_174 = arith.constant 0 : index
    %208 = vector.load %arg3[%c0_172, %c0_173, %c0_174] : memref<9x64x64xbf16, #tpu.memory_space<vmem>>, vector<1x64x64xbf16>
    %209 = vector.shape_cast %208 : vector<1x64x64xbf16> to vector<64x64xbf16>
    %cst_175 = arith.constant dense<0.000000e+00> : vector<144x64xf32>
    %210 = tpu.matmul %207, %209, %cst_175 {dimension_numbers = #tpu.dot_dimension_numbers<[1], [0], [0], [1], [0, 0, 1, 1], [], []>} : vector<144x64xbf16>, vector<64x64xbf16>, vector<144x64xf32> -> vector<144x64xf32>
    %c150 = arith.constant 150 : index
    %c0_176 = arith.constant 0 : index
    %211 = vector.load %arg7[%c150, %c0_176] : memref<336x64xf32, #tpu.memory_space<vmem>>, vector<144x64xf32>
    %212 = arith.truncf %211 : vector<144x64xf32> to vector<144x64xbf16>
    %c1_177 = arith.constant 1 : index
    %c0_178 = arith.constant 0 : index
    %c0_179 = arith.constant 0 : index
    %213 = vector.load %arg3[%c1_177, %c0_178, %c0_179] : memref<9x64x64xbf16, #tpu.memory_space<vmem>>, vector<1x64x64xbf16>
    %214 = vector.shape_cast %213 : vector<1x64x64xbf16> to vector<64x64xbf16>
    %cst_180 = arith.constant dense<0.000000e+00> : vector<144x64xf32>
    %215 = tpu.matmul %212, %214, %cst_180 {dimension_numbers = #tpu.dot_dimension_numbers<[1], [0], [0], [1], [0, 0, 1, 1], [], []>} : vector<144x64xbf16>, vector<64x64xbf16>, vector<144x64xf32> -> vector<144x64xf32>
    %216 = arith.addf %210, %215 : vector<144x64xf32>
    %c151 = arith.constant 151 : index
    %c0_181 = arith.constant 0 : index
    %217 = vector.load %arg7[%c151, %c0_181] : memref<336x64xf32, #tpu.memory_space<vmem>>, vector<144x64xf32>
    %218 = arith.truncf %217 : vector<144x64xf32> to vector<144x64xbf16>
    %c2_182 = arith.constant 2 : index
    %c0_183 = arith.constant 0 : index
    %c0_184 = arith.constant 0 : index
    %219 = vector.load %arg3[%c2_182, %c0_183, %c0_184] : memref<9x64x64xbf16, #tpu.memory_space<vmem>>, vector<1x64x64xbf16>
    %220 = vector.shape_cast %219 : vector<1x64x64xbf16> to vector<64x64xbf16>
    %cst_185 = arith.constant dense<0.000000e+00> : vector<144x64xf32>
    %221 = tpu.matmul %218, %220, %cst_185 {dimension_numbers = #tpu.dot_dimension_numbers<[1], [0], [0], [1], [0, 0, 1, 1], [], []>} : vector<144x64xbf16>, vector<64x64xbf16>, vector<144x64xf32> -> vector<144x64xf32>
    %222 = arith.addf %216, %221 : vector<144x64xf32>
    %c167 = arith.constant 167 : index
    %c0_186 = arith.constant 0 : index
    %223 = vector.load %arg7[%c167, %c0_186] : memref<336x64xf32, #tpu.memory_space<vmem>>, vector<144x64xf32>
    %224 = arith.truncf %223 : vector<144x64xf32> to vector<144x64xbf16>
    %c3_187 = arith.constant 3 : index
    %c0_188 = arith.constant 0 : index
    %c0_189 = arith.constant 0 : index
    %225 = vector.load %arg3[%c3_187, %c0_188, %c0_189] : memref<9x64x64xbf16, #tpu.memory_space<vmem>>, vector<1x64x64xbf16>
    %226 = vector.shape_cast %225 : vector<1x64x64xbf16> to vector<64x64xbf16>
    %cst_190 = arith.constant dense<0.000000e+00> : vector<144x64xf32>
    %227 = tpu.matmul %224, %226, %cst_190 {dimension_numbers = #tpu.dot_dimension_numbers<[1], [0], [0], [1], [0, 0, 1, 1], [], []>} : vector<144x64xbf16>, vector<64x64xbf16>, vector<144x64xf32> -> vector<144x64xf32>
    %228 = arith.addf %222, %227 : vector<144x64xf32>
    %c168_191 = arith.constant 168 : index
    %c0_192 = arith.constant 0 : index
    %229 = vector.load %arg7[%c168_191, %c0_192] : memref<336x64xf32, #tpu.memory_space<vmem>>, vector<144x64xf32>
    %230 = arith.truncf %229 : vector<144x64xf32> to vector<144x64xbf16>
    %c4_193 = arith.constant 4 : index
    %c0_194 = arith.constant 0 : index
    %c0_195 = arith.constant 0 : index
    %231 = vector.load %arg3[%c4_193, %c0_194, %c0_195] : memref<9x64x64xbf16, #tpu.memory_space<vmem>>, vector<1x64x64xbf16>
    %232 = vector.shape_cast %231 : vector<1x64x64xbf16> to vector<64x64xbf16>
    %cst_196 = arith.constant dense<0.000000e+00> : vector<144x64xf32>
    %233 = tpu.matmul %230, %232, %cst_196 {dimension_numbers = #tpu.dot_dimension_numbers<[1], [0], [0], [1], [0, 0, 1, 1], [], []>} : vector<144x64xbf16>, vector<64x64xbf16>, vector<144x64xf32> -> vector<144x64xf32>
    %234 = arith.addf %228, %233 : vector<144x64xf32>
    %c169 = arith.constant 169 : index
    %c0_197 = arith.constant 0 : index
    %235 = vector.load %arg7[%c169, %c0_197] : memref<336x64xf32, #tpu.memory_space<vmem>>, vector<144x64xf32>
    %236 = arith.truncf %235 : vector<144x64xf32> to vector<144x64xbf16>
    %c5_198 = arith.constant 5 : index
    %c0_199 = arith.constant 0 : index
    %c0_200 = arith.constant 0 : index
    %237 = vector.load %arg3[%c5_198, %c0_199, %c0_200] : memref<9x64x64xbf16, #tpu.memory_space<vmem>>, vector<1x64x64xbf16>
    %238 = vector.shape_cast %237 : vector<1x64x64xbf16> to vector<64x64xbf16>
    %cst_201 = arith.constant dense<0.000000e+00> : vector<144x64xf32>
    %239 = tpu.matmul %236, %238, %cst_201 {dimension_numbers = #tpu.dot_dimension_numbers<[1], [0], [0], [1], [0, 0, 1, 1], [], []>} : vector<144x64xbf16>, vector<64x64xbf16>, vector<144x64xf32> -> vector<144x64xf32>
    %240 = arith.addf %234, %239 : vector<144x64xf32>
    %c185 = arith.constant 185 : index
    %c0_202 = arith.constant 0 : index
    %241 = vector.load %arg7[%c185, %c0_202] : memref<336x64xf32, #tpu.memory_space<vmem>>, vector<144x64xf32>
    %242 = arith.truncf %241 : vector<144x64xf32> to vector<144x64xbf16>
    %c6_203 = arith.constant 6 : index
    %c0_204 = arith.constant 0 : index
    %c0_205 = arith.constant 0 : index
    %243 = vector.load %arg3[%c6_203, %c0_204, %c0_205] : memref<9x64x64xbf16, #tpu.memory_space<vmem>>, vector<1x64x64xbf16>
    %244 = vector.shape_cast %243 : vector<1x64x64xbf16> to vector<64x64xbf16>
    %cst_206 = arith.constant dense<0.000000e+00> : vector<144x64xf32>
    %245 = tpu.matmul %242, %244, %cst_206 {dimension_numbers = #tpu.dot_dimension_numbers<[1], [0], [0], [1], [0, 0, 1, 1], [], []>} : vector<144x64xbf16>, vector<64x64xbf16>, vector<144x64xf32> -> vector<144x64xf32>
    %246 = arith.addf %240, %245 : vector<144x64xf32>
    %c186 = arith.constant 186 : index
    %c0_207 = arith.constant 0 : index
    %247 = vector.load %arg7[%c186, %c0_207] : memref<336x64xf32, #tpu.memory_space<vmem>>, vector<144x64xf32>
    %248 = arith.truncf %247 : vector<144x64xf32> to vector<144x64xbf16>
    %c7_208 = arith.constant 7 : index
    %c0_209 = arith.constant 0 : index
    %c0_210 = arith.constant 0 : index
    %249 = vector.load %arg3[%c7_208, %c0_209, %c0_210] : memref<9x64x64xbf16, #tpu.memory_space<vmem>>, vector<1x64x64xbf16>
    %250 = vector.shape_cast %249 : vector<1x64x64xbf16> to vector<64x64xbf16>
    %cst_211 = arith.constant dense<0.000000e+00> : vector<144x64xf32>
    %251 = tpu.matmul %248, %250, %cst_211 {dimension_numbers = #tpu.dot_dimension_numbers<[1], [0], [0], [1], [0, 0, 1, 1], [], []>} : vector<144x64xbf16>, vector<64x64xbf16>, vector<144x64xf32> -> vector<144x64xf32>
    %252 = arith.addf %246, %251 : vector<144x64xf32>
    %c187 = arith.constant 187 : index
    %c0_212 = arith.constant 0 : index
    %253 = vector.load %arg7[%c187, %c0_212] : memref<336x64xf32, #tpu.memory_space<vmem>>, vector<144x64xf32>
    %254 = arith.truncf %253 : vector<144x64xf32> to vector<144x64xbf16>
    %c8_213 = arith.constant 8 : index
    %c0_214 = arith.constant 0 : index
    %c0_215 = arith.constant 0 : index
    %255 = vector.load %arg3[%c8_213, %c0_214, %c0_215] : memref<9x64x64xbf16, #tpu.memory_space<vmem>>, vector<1x64x64xbf16>
    %256 = vector.shape_cast %255 : vector<1x64x64xbf16> to vector<64x64xbf16>
    %cst_216 = arith.constant dense<0.000000e+00> : vector<144x64xf32>
    %257 = tpu.matmul %254, %256, %cst_216 {dimension_numbers = #tpu.dot_dimension_numbers<[1], [0], [0], [1], [0, 0, 1, 1], [], []>} : vector<144x64xbf16>, vector<64x64xbf16>, vector<144x64xf32> -> vector<144x64xf32>
    %258 = arith.addf %252, %257 : vector<144x64xf32>
    %259 = vector.broadcast %1 : vector<1x64xf32> to vector<144x64xf32>
    %260 = arith.addf %258, %259 : vector<144x64xf32>
    %cst_217 = arith.constant 0.000000e+00 : f32
    %261 = vector.broadcast %cst_217 : f32 to vector<144x64xf32>
    %262 = arith.maximumf %260, %261 : vector<144x64xf32>
    %c0_218 = arith.constant 0 : index
    %c144_219 = arith.constant 144 : index
    %c0_220 = arith.constant 0 : index
    %263 = vector.load %arg6[%c0_218, %c144_219, %c0_220] : memref<1x288x64xf32, #tpu.memory_space<vmem>>, vector<1x144x64xf32>
    %264 = vector.shape_cast %263 : vector<1x144x64xf32> to vector<144x64xf32>
    %265 = vector.shape_cast %262 : vector<144x64xf32> to vector<1x144x64xf32>
    tpu.vector_store %arg6[%c0_218, %c144_219, %c0_220], %265 {strides = array<i32>} : memref<1x288x64xf32, #tpu.memory_space<vmem>>, vector<1x144x64xf32>,
    return
  }
  func.func @transform_0(%arg0: i32) -> (i32, i32, i32) {
    %c0_i32 = arith.constant 0 : i32
    %c0_i32_0 = arith.constant 0 : i32
    %c0_i32_1 = arith.constant 0 : i32
    return %arg0, %c0_i32, %c0_i32_0 : i32, i32, i32
  }
  func.func @transform_1(%arg0: i32) -> (i32, i32, i32) {
    %c0_i32 = arith.constant 0 : i32
    %c0_i32_0 = arith.constant 0 : i32
    %c0_i32_1 = arith.constant 0 : i32
    %c0_i32_2 = arith.constant 0 : i32
    return %c0_i32, %c0_i32_0, %c0_i32_1 : i32, i32, i32
  }
  func.func @transform_2(%arg0: i32) -> (i32, i32, i32) {
    %c0_i32 = arith.constant 0 : i32
    %c0_i32_0 = arith.constant 0 : i32
    %c0_i32_1 = arith.constant 0 : i32
    %c0_i32_2 = arith.constant 0 : i32
    return %c0_i32, %c0_i32_0, %c0_i32_1 : i32, i32, i32
  }
  func.func @transform_3(%arg0: i32) -> (i32, i32) {
    %c0_i32 = arith.constant 0 : i32
    %c0_i32_0 = arith.constant 0 : i32
    %c0_i32_1 = arith.constant 0 : i32
    return %c0_i32, %c0_i32_0 : i32, i32
  }
  func.func @transform_4(%arg0: i32) -> (i32, i32) {
    %c0_i32 = arith.constant 0 : i32
    %c0_i32_0 = arith.constant 0 : i32
    %c0_i32_1 = arith.constant 0 : i32
    return %c0_i32, %c0_i32_0 : i32, i32
  }
  func.func @transform_5(%arg0: i32) -> (i32, i32, i32) {
    %c0_i32 = arith.constant 0 : i32
    %c0_i32_0 = arith.constant 0 : i32
    %c0_i32_1 = arith.constant 0 : i32
    return %arg0, %c0_i32, %c0_i32_0 : i32, i32, i32
  }
}

</mosaic_0001>

<bundles_post_ra>
// kernel: double_conv_forward.1
= control target key start
LH: loop header
LB: loop body
LE: loop exit
PB: predicated region body
PF: predicated region fallthrough
CT: control target
= control target key end

     0   :  { %s10231_s18 = smov 0   ;;  %s13174_s0 = inlined_call_operand.vmem [shape: f32[2,328,4], index: 0, kind: input, shape index: {}]   ;;  %s13175_s1 = inlined_call_operand.vmem [shape: bf16[9,4,64], index: 1, kind: input, shape index: {}]   ;;  %s13176_s2 = inlined_call_operand.vmem [shape: bf16[9,64,64], index: 2, kind: input, shape index: {}]   ;;  %s13177_s3 = inlined_call_operand.vmem [shape: f32[2,64], index: 3, kind: input, shape index: {}]   ;;  %s13178_s4 = inlined_call_operand.vmem [shape: f32[288,1], index: 4, kind: input, shape index: {}]   ;;  %s13179_s5 = inlined_call_operand.vmem [shape: f32[2,288,64], index: 5, kind: output, shape index: {}]  }
   0x1 LB: > { %s7660_s19 = sadd.s32 4294967295, %s10196_s18   ;;  %p7664_p0 = scmp.ge.s32.totalorder %s10196_s18, 1  ;;  %s10196_s18 = sphi %s10231_s18, %s15_s18  }
   0x2   : > { %p187_p1 = scmp.lt.s32.totalorder %s10196_s18, 3 }
   0x4   : > { %p188_p2 = pnand %p7664_p0, %p187_p1 }
   0x5   : > { %v7667_v0 = vld [vmem:[%s13175_s1 + $0x2] sm:$0x3] (!%p188_p2)  ;;  %vm320_vm0 = vcmask (!%p188_p2), 1041408   ;;  %v262_v1 = vld [vmem:[%s13175_s1] sm:$0x3] (!%p188_p2)  ;;  %v10198_v2 = vmov (!%p188_p2), 0.0  }
   0x6   : > { %191 = sbr.rel (%p188_p2) target bundleno = 1531 (0x5fb), region = 40  ;;  %8625 = vmatprep.subr.bf16.mxu0 (!%p188_p2), %v10198_v2  ;;  %v322_v3 = vsel (!%p188_p2), %vm320_vm0, %v7667_v0, 0  ;;  %8663 = vmatprep.subr.bf16.mxu1 (!%p188_p2), %v10198_v2  ;;  %v457_v4 = vsel (!%p188_p2), %vm320_vm0, %v262_v1, 0  ;;  %p215_p3 = scmp.lt.s32.totalorder (!%p188_p2), %s7660_s19, 1  ;;  %vm10199_vm1 = vmmov (!%p188_p2), 0   ;;  %vm292_vm2 = vcmask (!%p188_p2), 31744  }
   0x7   : > { %8626 = vmatpush3.bf16.msra.mxu0 (!%p188_p2), %v322_v3  ;;  %8664 = vmatpush3.bf16.msra.mxu1 (!%p188_p2), %v457_v4  ;;  %v7686_v5 = vld [vmem:[%s13175_s1 + $0x4] sm:$0x3] (!%p188_p2)  ;;  %v7696_v6 = vld [vmem:[%s13175_s1 + $0x6] sm:$0x3] (!%p188_p2)  ;;  %v7706_v1 = vld [vmem:[%s13175_s1 + $0x8] sm:$0x3] (!%p188_p2) }
   0x8   : > { %8627 = vmatprep.mubr.msk.bf16.mxu0 (!%p188_p2), %vm10199_vm1, %v10198_v2  ;;  %8665 = vmatprep.mubr.msk.bf16.mxu1 (!%p188_p2), %vm10199_vm1, %v10198_v2  ;;  %v621_v12 = vsel (!%p188_p2), %vm320_vm0, %v7686_v5, 0  ;;  %v803_v14 = vsel (!%p188_p2), %vm320_vm0, %v7696_v6, 0  ;;  %v7716_v3 = vld [vmem:[%s13175_s1 + $0xa] sm:$0x3] (!%p188_p2)  ;;  %vm228_vm3 = vcmask (!%p188_p2), 523264  }
   0x9   : > { %8701 = vmatprep.subr.bf16.mxu0 (!%p188_p2), %v10198_v2  ;;  %8739 = vmatprep.subr.bf16.mxu1 (!%p188_p2), %v10198_v2  ;;  %231 = vst.msk [vmem:[#allocation2 + $0x10] sm:$0xff] (!%p188_p2), %vm228_vm3, %v10198_v2  ;;  %229 = vst.msk [vmem:[#allocation2] sm:$0xff] (!%p188_p2), %vm228_vm3, %v10198_v2 }
   0xa   : > { %230 = vst.msk [vmem:[#allocation2 + $0x8] sm:$0xff] (!%p188_p2), %vm228_vm3, %v10198_v2  ;;  %232 = vst.msk [vmem:[#allocation2 + $0x138] sm:$0xff] (!%p188_p2), %vm228_vm3, %v10198_v2 }
   0xb   : > { %233 = vst.msk [vmem:[#allocation2 + $0x140] sm:$0xff] (!%p188_p2), %vm228_vm3, %v10198_v2  ;;  %234 = vst.msk [vmem:[#allocation2 + $0x148] sm:$0xff] (!%p188_p2), %vm228_vm3, %v10198_v2 }
   0xd   : > { %s13181_s19 = smov (!%p215_p3, %s7660_s19), 1 }
   0xe   : > { %s10101_s26 = smul.u32 328, %s13181_s19 }
   0xf   : > { %s10102_s14 = smul.u32 288, %s13181_s19 }
  0x10   : > { %s10267_s6 = scalar_lea.vmem %s13174_s0, %s10101_s26 }
  0x11   : > { %v263_v7 = vld [vmem:[%s10267_s6 + $0x1] sm:$0xff]  ;;  %v264_v8 = vld [vmem:[%s10267_s6 + $0x9] sm:$0xff]  ;;  %v265_v15 = vld [vmem:[%s10267_s6 + $0x11] sm:$0xff]  ;;  %s12700_s23 = scalar_lea.vmem %s13179_s5, %s10102_s14 }
  0x12   : > { %v235_v9 = vld [vmem:[%s10267_s6] sm:$0xff]  ;;  %v281_v10 = vpack.c.bf16 %v264_v8, %v263_v7  ;;  %v236_v11 = vld [vmem:[%s10267_s6 + $0x8] sm:$0xff]  ;;  %v237_v17 = vld [vmem:[%s10267_s6 + $0x10] sm:$0xff]  ;;  %v985_v8 = vsel %vm320_vm0, %v7706_v1, 0 }
  0x13   : > { %v253_v13 = vpack.c.bf16 %v236_v11, %v235_v9  ;;  %v266_v16 = vld [vmem:[%s10267_s6 + $0x19] sm:$0xff]  ;;  %v267_v21 = vld [vmem:[%s10267_s6 + $0x21] sm:$0xff]  ;;  %v268_v22 = vld [vmem:[%s10267_s6 + $0x29] sm:$0xff]  ;;  %v1167_v9 = vsel %vm320_vm0, %v7716_v3, 0 }
  0x14   : > { %8628 = vmatmul.mubr.msk.bf16.vlgmr.msra.gmra.mrb[0].mxu0 %vm292_vm2, %v281_v10  ;;  %v238_v18 = vld [vmem:[%s10267_s6 + $0x18] sm:$0xff]  ;;  %v282_v19 = vpack.c.bf16 %v266_v16, %v265_v15  ;;  %v239_v23 = vld [vmem:[%s10267_s6 + $0x20] sm:$0xff]  ;;  %v240_v24 = vld [vmem:[%s10267_s6 + $0x28] sm:$0xff]  ;;  %v283_v25 = vpack.c.bf16 %v268_v22, %v267_v21 }
  0x15   : > { %8666 = vmatmul.mubr.msk.bf16.vlgmr.msra.gmra.mrb[0].mxu1 %vm292_vm2, %v253_v13  ;;  %8702 = vmatpush3.bf16.msra.mxu0 %v621_v12  ;;  %v254_v20 = vpack.c.bf16 %v238_v18, %v237_v17  ;;  %v255_v26 = vpack.c.bf16 %v240_v24, %v239_v23  ;;  %v269_v27 = vld [vmem:[%s10267_s6 + $0x31] sm:$0xff]  ;;  %v270_v28 = vld [vmem:[%s10267_s6 + $0x39] sm:$0xff]  ;;  %v271_v33 = vld [vmem:[%s10267_s6 + $0x41] sm:$0xff] }
  0x16   : > { %8740 = vmatpush3.bf16.msra.mxu1 %v803_v14  ;;  %8631 = vmatprep.mubr.msk.bf16.mxu0 %vm10199_vm1, %v10198_v2  ;;  %v241_v29 = vld [vmem:[%s10267_s6 + $0x30] sm:$0xff]  ;;  %v242_v30 = vld [vmem:[%s10267_s6 + $0x38] sm:$0xff]  ;;  %v284_v31 = vpack.c.bf16 %v270_v28, %v269_v27  ;;  %v243_v35 = vld [vmem:[%s10267_s6 + $0x40] sm:$0xff] }
  0x17   : > { %8669 = vmatprep.mubr.msk.bf16.mxu1 %vm10199_vm1, %v10198_v2  ;;  %8777 = vmatprep.subr.bf16.mxu0 %v10198_v2  ;;  %v256_v32 = vpack.c.bf16 %v242_v30, %v241_v29  ;;  %v272_v34 = vld [vmem:[%s10267_s6 + $0x49] sm:$0xff]  ;;  %v273_v39 = vld [vmem:[%s10267_s6 + $0x51] sm:$0xff]  ;;  %v274_v40 = vld [vmem:[%s10267_s6 + $0x59] sm:$0xff] }
  0x18   : > { %8815 = vmatprep.subr.bf16.mxu1 %v10198_v2  ;;  %v244_v36 = vld [vmem:[%s10267_s6 + $0x48] sm:$0xff]  ;;  %v285_v37 = vpack.c.bf16 %v272_v34, %v271_v33  ;;  %v245_v41 = vld [vmem:[%s10267_s6 + $0x50] sm:$0xff]  ;;  %v246_v42 = vld [vmem:[%s10267_s6 + $0x58] sm:$0xff]  ;;  %v286_v43 = vpack.c.bf16 %v274_v40, %v273_v39 }
  0x19   : > { %v257_v38 = vpack.c.bf16 %v244_v36, %v243_v35  ;;  %v258_v44 = vpack.c.bf16 %v246_v42, %v245_v41  ;;  %v275_v45 = vld [vmem:[%s10267_s6 + $0x61] sm:$0xff]  ;;  %v276_v46 = vld [vmem:[%s10267_s6 + $0x69] sm:$0xff]  ;;  %v277_v51 = vld [vmem:[%s10267_s6 + $0x71] sm:$0xff] }
  0x1a   : > { %v247_v47 = vld [vmem:[%s10267_s6 + $0x60] sm:$0xff]  ;;  %v248_v48 = vld [vmem:[%s10267_s6 + $0x68] sm:$0xff]  ;;  %v287_v49 = vpack.c.bf16 %v276_v46, %v275_v45  ;;  %v249_v53 = vld [vmem:[%s10267_s6 + $0x70] sm:$0xff] }
  0x1b   : > { %v259_v50 = vpack.c.bf16 %v248_v48, %v247_v47  ;;  %v278_v52 = vld [vmem:[%s10267_s6 + $0x79] sm:$0xff]  ;;  %v279_v57 = vld [vmem:[%s10267_s6 + $0x81] sm:$0xff]  ;;  %v280_v58 = vld [vmem:[%s10267_s6 + $0x89] sm:$0xff] }
  0x1c   : > { %8632 = vmatmul.mubr.msk.bf16.gmra.mrb[4].mxu0 %vm292_vm2, %v282_v19  ;;  %v250_v54 = vld [vmem:[%s10267_s6 + $0x78] sm:$0xff]  ;;  %v288_v55 = vpack.c.bf16 %v278_v52, %v277_v51  ;;  %v251_v59 = vld [vmem:[%s10267_s6 + $0x80] sm:$0xff]  ;;  %v252_v60 = vld [vmem:[%s10267_s6 + $0x88] sm:$0xff]  ;;  %v289_v61 = vpack.c.bf16 %v280_v58, %v279_v57 }
  0x1d   : > { %8670 = vmatmul.mubr.msk.bf16.gmra.mrb[4].mxu1 %vm292_vm2, %v254_v20  ;;  %8635 = vmatprep.mubr.msk.bf16.mxu0 %vm10199_vm1, %v10198_v2  ;;  %v260_v56 = vpack.c.bf16 %v250_v54, %v249_v53  ;;  %v261_v62 = vpack.c.bf16 %v252_v60, %v251_v59  ;;  %v564_v63 = vld [vmem:[%s10267_s6 + $0x2] sm:$0xff]  ;;  %v565_v0 = vld [vmem:[%s10267_s6 + $0xa] sm:$0xff]  ;;  %v746_v4 = vld [vmem:[%s10267_s6 + $0x12] sm:$0xff] }
  0x1e   : > { %8673 = vmatprep.mubr.msk.bf16.mxu1 %vm10199_vm1, %v10198_v2  ;;  %v747_v5 = vld [vmem:[%s10267_s6 + $0x1a] sm:$0xff]  ;;  %v582_v6 = vpack.c.bf16 %v565_v0, %v564_v63  ;;  %v748_v10 = vld [vmem:[%s10267_s6 + $0x22] sm:$0xff]  ;;  %v749_v11 = vld [vmem:[%s10267_s6 + $0x2a] sm:$0xff] }
  0x1f   : > { %v764_v7 = vpack.c.bf16 %v747_v5, %v746_v4  ;;  %v765_v12 = vpack.c.bf16 %v749_v11, %v748_v10  ;;  %v750_v13 = vld [vmem:[%s10267_s6 + $0x32] sm:$0xff]  ;;  %v751_v14 = vld [vmem:[%s10267_s6 + $0x3a] sm:$0xff]  ;;  %v752_v16 = vld [vmem:[%s10267_s6 + $0x42] sm:$0xff] }
  0x20   : > { %v766_v15 = vpack.c.bf16 %v751_v14, %v750_v13  ;;  %v753_v17 = vld [vmem:[%s10267_s6 + $0x4a] sm:$0xff]  ;;  %v754_v19 = vld [vmem:[%s10267_s6 + $0x52] sm:$0xff]  ;;  %v755_v20 = vld [vmem:[%s10267_s6 + $0x5a] sm:$0xff] }
  0x21   : > { %v767_v18 = vpack.c.bf16 %v753_v17, %v752_v16  ;;  %v768_v21 = vpack.c.bf16 %v755_v20, %v754_v19  ;;  %v756_v22 = vld [vmem:[%s10267_s6 + $0x62] sm:$0xff]  ;;  %v757_v23 = vld [vmem:[%s10267_s6 + $0x6a] sm:$0xff]  ;;  %v928_v34 = vld [vmem:[%s10267_s6 + $0x13] sm:$0xff] }
  0x22   : > { %v769_v24 = vpack.c.bf16 %v757_v23, %v756_v22  ;;  %v760_v28 = vld [vmem:[%s10267_s6 + $0x82] sm:$0xff]  ;;  %v761_v29 = vld [vmem:[%s10267_s6 + $0x8a] sm:$0xff]  ;;  %v1110_v36 = vld [vmem:[%s10267_s6 + $0x14] sm:$0xff] }
  0x23   : > { %v771_v30 = vpack.c.bf16 %v761_v29, %v760_v28  ;;  %v929_v35 = vld [vmem:[%s10267_s6 + $0x1b] sm:$0xff]  ;;  %v7736_v40 = vld [vmem:[%s13175_s1 + $0xe] sm:$0x3]  ;;  %v1112_v46 = vld [vmem:[%s10267_s6 + $0x24] sm:$0xff] }
  0x24   : > { %8636 = vmatmul.mubr.msk.bf16.gmra.mrb[8].mxu0 %vm292_vm2, %v283_v25  ;;  %v758_v25 = vld [vmem:[%s10267_s6 + $0x72] sm:$0xff]  ;;  %v946_v39 = vpack.c.bf16 %v929_v35, %v928_v34  ;;  %v933_v51 = vld [vmem:[%s10267_s6 + $0x3b] sm:$0xff]  ;;  %v1116_v58 = vld [vmem:[%s10267_s6 + $0x44] sm:$0xff] }
  0x25   : > { %8674 = vmatmul.mubr.msk.bf16.gmra.mrb[8].mxu1 %vm292_vm2, %v255_v26  ;;  %8639 = vmatprep.mubr.msk.bf16.mxu0 %vm10199_vm1, %v10198_v2  ;;  %v759_v26 = vld [vmem:[%s10267_s6 + $0x7a] sm:$0xff]  ;;  %v931_v45 = vld [vmem:[%s10267_s6 + $0x2b] sm:$0xff]  ;;  %v938_v5 = vld [vmem:[%s10267_s6 + $0x63] sm:$0xff] }
  0x26   : > { %8677 = vmatprep.mubr.msk.bf16.mxu1 %vm10199_vm1, %v10198_v2  ;;  %v770_v27 = vpack.c.bf16 %v759_v26, %v758_v25  ;;  %v1113_v47 = vld [vmem:[%s10267_s6 + $0x2c] sm:$0xff]  ;;  %v1114_v52 = vld [vmem:[%s10267_s6 + $0x34] sm:$0xff]  ;;  %v1115_v53 = vld [vmem:[%s10267_s6 + $0x3c] sm:$0xff] }
  0x27   : > { %v935_v57 = vld [vmem:[%s10267_s6 + $0x4b] sm:$0xff]  ;;  %v937_v63 = vld [vmem:[%s10267_s6 + $0x5b] sm:$0xff]  ;;  %v940_v11 = vld [vmem:[%s10267_s6 + $0x73] sm:$0xff] }
  0x28   : > { %v1117_v59 = vld [vmem:[%s10267_s6 + $0x4c] sm:$0xff]  ;;  %v1118_v0 = vld [vmem:[%s10267_s6 + $0x54] sm:$0xff]  ;;  %v1119_v1 = vld [vmem:[%s10267_s6 + $0x5c] sm:$0xff] }
  0x29   : > { %v10510_v4 = vpack.c.bf16 %v1119_v1, %v1118_v0  ;;  %v1122_v13 = vld [vmem:[%s10267_s6 + $0x74] sm:$0xff]  ;;  %v1123_v14 = vld [vmem:[%s10267_s6 + $0x7c] sm:$0xff]  ;;  %v1124_v19 = vld [vmem:[%s10267_s6 + $0x84] sm:$0xff] }
  0x2a   : > { %v10536_v16 = vpack.c.bf16 %v1123_v14, %v1122_v13  ;;  %v942_v17 = vld [vmem:[%s10267_s6 + $0x83] sm:$0xff]  ;;  %v1125_v20 = vld [vmem:[%s10267_s6 + $0x8c] sm:$0xff]  ;;  %v1126_v25 = vld [vmem:[%s10267_s6 + $0x94] sm:$0xff] }
  0x2b   : > { %v10549_v22 = vpack.c.bf16 %v1125_v20, %v1124_v19  ;;  %v944_v23 = vld [vmem:[%s10267_s6 + $0x93] sm:$0xff]  ;;  %v1127_v26 = vld [vmem:[%s10267_s6 + $0x9c] sm:$0xff]  ;;  %v1474_v29 = vld [vmem:[%s10267_s6 + $0x25] sm:$0xff] }
  0x2c   : > { %8640 = vmatmul.mubr.msk.bf16.gmra.mrb[12].mxu0 %vm292_vm2, %v284_v31  ;;  %v762_v31 = vld [vmem:[%s10267_s6 + $0x92] sm:$0xff]  ;;  %v10562_v28 = vpack.c.bf16 %v1127_v26, %v1126_v25  ;;  %v7757_v35 = vld [vmem:[%s13175_s1 + $0x2] sm:$0x3]  ;;  %v1482_v26 = vld [vmem:[%s10267_s6 + $0x65] sm:$0xff] }
  0x2d   : > { %8678 = vmatmul.mubr.msk.bf16.gmra.mrb[12].mxu1 %vm292_vm2, %v256_v32  ;;  %8643 = vmatprep.mubr.msk.bf16.mxu0 %vm10199_vm1, %v10198_v2  ;;  %v763_v32 = vld [vmem:[%s10267_s6 + $0x9a] sm:$0xff] }
  0x2e   : > { %8681 = vmatprep.mubr.msk.bf16.mxu1 %vm10199_vm1, %v10198_v2  ;;  %v772_v33 = vpack.c.bf16 %v763_v32, %v762_v31  ;;  %v7746_v32 = vld [vmem:[%s13175_s1 + $0x10] sm:$0x3]  ;;  %v1481_v13 = vld [vmem:[%s10267_s6 + $0x5d] sm:$0xff] }
  0x34   : > { %8644 = vmatmul.mubr.msk.bf16.gmra.mrb[16].mxu0 %vm292_vm2, %v285_v37  ;;  %v1111_v37 = vld [vmem:[%s10267_s6 + $0x1c] sm:$0xff] }
  0x35   : > { %8682 = vmatmul.mubr.msk.bf16.gmra.mrb[16].mxu1 %vm292_vm2, %v257_v38  ;;  %8647 = vmatprep.mubr.msk.bf16.mxu0 %vm10199_vm1, %v10198_v2  ;;  %v7726_v38 = vld [vmem:[%s13175_s1 + $0xc] sm:$0x3]  ;;  %v1128_v41 = vpack.c.bf16 %v1111_v37, %v1110_v36 }
  0x36   : > { %8685 = vmatprep.mubr.msk.bf16.mxu1 %vm10199_vm1, %v10198_v2  ;;  %v1349_v42 = vsel %vm320_vm0, %v7726_v38, 0 }
  0x3c   : > { %8648 = vmatmul.mubr.msk.bf16.gmra.mrb[20].mxu0 %vm292_vm2, %v286_v43  ;;  %v1531_v43 = vsel %vm320_vm0, %v7736_v40, 0 }
  0x3d   : > { %8686 = vmatmul.mubr.msk.bf16.gmra.mrb[20].mxu1 %vm292_vm2, %v258_v44  ;;  %8651 = vmatprep.mubr.msk.bf16.mxu0 %vm10199_vm1, %v10198_v2  ;;  %v930_v44 = vld [vmem:[%s10267_s6 + $0x23] sm:$0xff] }
  0x3e   : > { %8689 = vmatprep.mubr.msk.bf16.mxu1 %vm10199_vm1, %v10198_v2  ;;  %v947_v48 = vpack.c.bf16 %v931_v45, %v930_v44  ;;  %v2106_v45 = vsel %vm320_vm0, %v7757_v35, 0 }
  0x44   : > { %8652 = vmatmul.mubr.msk.bf16.gmra.mrb[24].mxu0 %vm292_vm2, %v287_v49  ;;  %v10471_v49 = vpack.c.bf16 %v1113_v47, %v1112_v46  ;;  %v1476_v46 = vld [vmem:[%s10267_s6 + $0x35] sm:$0xff]  ;;  %v1477_v47 = vld [vmem:[%s10267_s6 + $0x3d] sm:$0xff] }
  0x45   : > { %8690 = vmatmul.mubr.msk.bf16.gmra.mrb[24].mxu1 %vm292_vm2, %v259_v50  ;;  %8655 = vmatprep.mubr.msk.bf16.mxu0 %vm10199_vm1, %v10198_v2  ;;  %v932_v50 = vld [vmem:[%s10267_s6 + $0x33] sm:$0xff] }
  0x46   : > { %8693 = vmatprep.mubr.msk.bf16.mxu1 %vm10199_vm1, %v10198_v2  ;;  %v948_v54 = vpack.c.bf16 %v933_v51, %v932_v50 }
  0x4c   : > { %8656 = vmatmul.mubr.msk.bf16.gmra.mrb[28].mxu0 %vm292_vm2, %v288_v55  ;;  %v10484_v55 = vpack.c.bf16 %v1115_v53, %v1114_v52 }
  0x4d   : > { %8694 = vmatmul.mubr.msk.bf16.gmra.mrb[28].mxu1 %vm292_vm2, %v260_v56  ;;  %8659 = vmatprep.mubr.msk.bf16.mxu0 %vm10199_vm1, %v10198_v2  ;;  %v934_v56 = vld [vmem:[%s10267_s6 + $0x43] sm:$0xff] }
  0x4e   : > { %8697 = vmatprep.mubr.msk.bf16.mxu1 %vm10199_vm1, %v10198_v2  ;;  %v949_v60 = vpack.c.bf16 %v935_v57, %v934_v56 }
  0x54   : > { %8660 = vmatmul.mubr.msk.bf16.gmra.mrb[32].mxu0 %vm292_vm2, %v289_v61  ;;  %v10497_v61 = vpack.c.bf16 %v1117_v59, %v1116_v58 }
  0x55   : > { %8698 = vmatmul.mubr.msk.bf16.gmra.mrb[32].mxu1 %vm292_vm2, %v261_v62  ;;  %8703 = vmatprep.mubr.msk.bf16.mxu0 %vm10199_vm1, %v10198_v2  ;;  %v936_v62 = vld [vmem:[%s10267_s6 + $0x53] sm:$0xff] }
  0x56   : > { %8741 = vmatprep.mubr.msk.bf16.mxu1 %vm10199_vm1, %v10198_v2  ;;  %v950_v3 = vpack.c.bf16 %v937_v63, %v936_v62  ;;  %v1479_v62 = vld [vmem:[%s10267_s6 + $0x4d] sm:$0xff] }
  0x5c   : > { %8704 = vmatmul.mubr.msk.bf16.vlgmr.msra.gmra.mrb[36].mxu0 %vm292_vm2, %v582_v6  ;;  %v939_v6 = vld [vmem:[%s10267_s6 + $0x6b] sm:$0xff] }
  0x5d   : > { %8742 = vmatmul.mubr.msk.bf16.vlgmr.msra.gmra.mrb[36].mxu1 %vm292_vm2, %v764_v7  ;;  %8778 = vmatpush3.bf16.msra.mxu0 %v985_v8  ;;  %v1121_v8 = vld [vmem:[%s10267_s6 + $0x6c] sm:$0xff] }
  0x5e   : > { %8816 = vmatpush3.bf16.msra.mxu1 %v1167_v9  ;;  %8707 = vmatprep.mubr.msk.bf16.mxu0 %vm10199_vm1, %v10198_v2  ;;  %v951_v9 = vpack.c.bf16 %v939_v6, %v938_v5 }
  0x5f   : > { %8745 = vmatprep.mubr.msk.bf16.mxu1 %vm10199_vm1, %v10198_v2  ;;  %8853 = vmatprep.subr.bf16.mxu0 %v10198_v2 }
  0x60   : > { %8891 = vmatprep.subr.bf16.mxu1 %v10198_v2 }
  0x64   : > { %8708 = vmatmul.mubr.msk.bf16.gmra.mrb[40].mxu0 %vm292_vm2, %v764_v7  ;;  %v1120_v7 = vld [vmem:[%s10267_s6 + $0x64] sm:$0xff] }
  0x65   : > { %8746 = vmatmul.mubr.msk.bf16.gmra.mrb[40].mxu1 %vm292_vm2, %v765_v12  ;;  %8711 = vmatprep.mubr.msk.bf16.mxu0 %vm10199_vm1, %v10198_v2  ;;  %v10523_v10 = vpack.c.bf16 %v1121_v8, %v1120_v7 }
  0x66   : > { %8749 = vmatprep.mubr.msk.bf16.mxu1 %vm10199_vm1, %v10198_v2 }
  0x6c   : > { %8712 = vmatmul.mubr.msk.bf16.gmra.mrb[44].mxu0 %vm292_vm2, %v765_v12  ;;  %v941_v12 = vld [vmem:[%s10267_s6 + $0x7b] sm:$0xff] }
  0x6d   : > { %8750 = vmatmul.mubr.msk.bf16.gmra.mrb[44].mxu1 %vm292_vm2, %v766_v15  ;;  %8715 = vmatprep.mubr.msk.bf16.mxu0 %vm10199_vm1, %v10198_v2 }
  0x6e   : > { %8753 = vmatprep.mubr.msk.bf16.mxu1 %vm10199_vm1, %v10198_v2 }
  0x74   : > { %8716 = vmatmul.mubr.msk.bf16.gmra.mrb[48].mxu0 %vm292_vm2, %v766_v15  ;;  %v952_v15 = vpack.c.bf16 %v941_v12, %v940_v11  ;;  %v1480_v12 = vld [vmem:[%s10267_s6 + $0x55] sm:$0xff] }
  0x75   : > { %8754 = vmatmul.mubr.msk.bf16.gmra.mrb[48].mxu1 %vm292_vm2, %v767_v18  ;;  %8719 = vmatprep.mubr.msk.bf16.mxu0 %vm10199_vm1, %v10198_v2 }
  0x76   : > { %8757 = vmatprep.mubr.msk.bf16.mxu1 %vm10199_vm1, %v10198_v2 }
  0x7c   : > { %8720 = vmatmul.mubr.msk.bf16.gmra.mrb[52].mxu0 %vm292_vm2, %v767_v18  ;;  %v943_v18 = vld [vmem:[%s10267_s6 + $0x8b] sm:$0xff] }
  0x7d   : > { %8758 = vmatmul.mubr.msk.bf16.gmra.mrb[52].mxu1 %vm292_vm2, %v768_v21  ;;  %8723 = vmatprep.mubr.msk.bf16.mxu0 %vm10199_vm1, %v10198_v2 }
  0x7e   : > { %8761 = vmatprep.mubr.msk.bf16.mxu1 %vm10199_vm1, %v10198_v2 }
  0x84   : > { %8724 = vmatmul.mubr.msk.bf16.gmra.mrb[56].mxu0 %vm292_vm2, %v768_v21  ;;  %v953_v21 = vpack.c.bf16 %v943_v18, %v942_v17 }
  0x85   : > { %8762 = vmatmul.mubr.msk.bf16.gmra.mrb[56].mxu1 %vm292_vm2, %v769_v24  ;;  %8727 = vmatprep.mubr.msk.bf16.mxu0 %vm10199_vm1, %v10198_v2 }
  0x86   : > { %8765 = vmatprep.mubr.msk.bf16.mxu1 %vm10199_vm1, %v10198_v2 }
  0x8c   : > { %8728 = vmatmul.mubr.msk.bf16.gmra.mrb[60].mxu0 %vm292_vm2, %v769_v24  ;;  %v945_v24 = vld [vmem:[%s10267_s6 + $0x9b] sm:$0xff] }
  0x8d   : > { %8766 = vmatmul.mubr.msk.bf16.gmra.mrb[60].mxu1 %vm292_vm2, %v770_v27  ;;  %8731 = vmatprep.mubr.msk.bf16.mxu0 %vm10199_vm1, %v10198_v2 }
  0x8e   : > { %8769 = vmatprep.mubr.msk.bf16.mxu1 %vm10199_vm1, %v10198_v2 }
  0x94   : > { %8732 = vmatmul.mubr.msk.bf16.gmra.mrb[64].mxu0 %vm292_vm2, %v770_v27  ;;  %v954_v27 = vpack.c.bf16 %v945_v24, %v944_v23 }
  0x95   : > { %8770 = vmatmul.mubr.msk.bf16.gmra.mrb[64].mxu1 %vm292_vm2, %v771_v30  ;;  %8735 = vmatprep.mubr.msk.bf16.mxu0 %vm10199_vm1, %v10198_v2 }
  0x96   : > { %8773 = vmatprep.mubr.msk.bf16.mxu1 %vm10199_vm1, %v10198_v2 }
  0x9c   : > { %8736 = vmatmul.mubr.msk.bf16.gmra.mrb[68].mxu0 %vm292_vm2, %v771_v30  ;;  %v1475_v30 = vld [vmem:[%s10267_s6 + $0x2d] sm:$0xff] }
  0x9d   : > { %8774 = vmatmul.mubr.msk.bf16.gmra.mrb[68].mxu1 %vm292_vm2, %v772_v33  ;;  %8779 = vmatprep.mubr.msk.bf16.mxu0 %vm10199_vm1, %v10198_v2 }
  0x9e   : > { %8817 = vmatprep.mubr.msk.bf16.mxu1 %vm10199_vm1, %v10198_v2 }
  0xa4   : > { %8780 = vmatmul.mubr.msk.bf16.vlgmr.msra.gmra.mrb[72].mxu0 %vm292_vm2, %v946_v39  ;;  %v1492_v39 = vpack.c.bf16 %v1475_v30, %v1474_v29 }
  0xa5   : > { %8818 = vmatmul.mubr.msk.bf16.vlgmr.msra.gmra.mrb[72].mxu1 %vm292_vm2, %v1128_v41  ;;  %8854 = vmatpush3.bf16.msra.mxu0 %v1349_v42  ;;  %v1713_v42 = vsel %vm320_vm0, %v7746_v32, 0 }
  0xa6   : > { %8892 = vmatpush3.bf16.msra.mxu1 %v1531_v43  ;;  %8783 = vmatprep.mubr.msk.bf16.mxu0 %vm10199_vm1, %v10198_v2 }
  0xa7   : > { %8821 = vmatprep.mubr.msk.bf16.mxu1 %vm10199_vm1, %v10198_v2  ;;  %8929 = vmatprep.subr.bf16.mxu0 %v10198_v2 }
  0xa8   : > { %8967 = vmatprep.subr.bf16.mxu1 %v10198_v2 }
  0xac   : > { %8784 = vmatmul.mubr.msk.bf16.gmra.mrb[76].mxu0 %vm292_vm2, %v947_v48 }
  0xad   : > { %8822 = vmatmul.mubr.msk.bf16.gmra.mrb[76].mxu1 %vm292_vm2, %v10471_v49  ;;  %8787 = vmatprep.mubr.msk.bf16.mxu0 %vm10199_vm1, %v10198_v2 }
  0xae   : > { %8825 = vmatprep.mubr.msk.bf16.mxu1 %vm10199_vm1, %v10198_v2 }
  0xb4   : > { %8788 = vmatmul.mubr.msk.bf16.gmra.mrb[80].mxu0 %vm292_vm2, %v948_v54  ;;  %v1493_v54 = vpack.c.bf16 %v1477_v47, %v1476_v46  ;;  %v1879_v47 = vld [vmem:[%s13178_s4 + $0x8] sm:$0xff] }
  0xb5   : > { %8826 = vmatmul.mubr.msk.bf16.gmra.mrb[80].mxu1 %vm292_vm2, %v10484_v55  ;;  %8791 = vmatprep.mubr.msk.bf16.mxu0 %vm10199_vm1, %v10198_v2 }
  0xb6   : > { %8829 = vmatprep.mubr.msk.bf16.mxu1 %vm10199_vm1, %v10198_v2 }
  0xbc   : > { %8792 = vmatmul.mubr.msk.bf16.gmra.mrb[84].mxu0 %vm292_vm2, %v949_v60  ;;  %v1478_v60 = vld [vmem:[%s10267_s6 + $0x45] sm:$0xff] }
  0xbd   : > { %8830 = vmatmul.mubr.msk.bf16.gmra.mrb[84].mxu1 %vm292_vm2, %v10497_v61  ;;  %8795 = vmatprep.mubr.msk.bf16.mxu0 %vm10199_vm1, %v10198_v2 }
  0xbe   : > { %8833 = vmatprep.mubr.msk.bf16.mxu1 %vm10199_vm1, %v10198_v2 }
  0xc4   : > { %8796 = vmatmul.mubr.msk.bf16.gmra.mrb[88].mxu0 %vm292_vm2, %v950_v3 }
  0xc5   : > { %8834 = vmatmul.mubr.msk.bf16.gmra.mrb[88].mxu1 %vm292_vm2, %v10510_v4  ;;  %8799 = vmatprep.mubr.msk.bf16.mxu0 %vm10199_vm1, %v10198_v2 }
  0xc6   : > { %8837 = vmatprep.mubr.msk.bf16.mxu1 %vm10199_vm1, %v10198_v2 }
  0xcc   : > { %8800 = vmatmul.mubr.msk.bf16.gmra.mrb[92].mxu0 %vm292_vm2, %v951_v9 }
  0xcd   : > { %8838 = vmatmul.mubr.msk.bf16.gmra.mrb[92].mxu1 %vm292_vm2, %v10523_v10  ;;  %8803 = vmatprep.mubr.msk.bf16.mxu0 %vm10199_vm1, %v10198_v2 }
  0xce   : > { %8841 = vmatprep.mubr.msk.bf16.mxu1 %vm10199_vm1, %v10198_v2 }
  0xd4   : > { %8804 = vmatmul.mubr.msk.bf16.gmra.mrb[96].mxu0 %vm292_vm2, %v952_v15 }
  0xd5   : > { %8842 = vmatmul.mubr.msk.bf16.gmra.mrb[96].mxu1 %vm292_vm2, %v10536_v16  ;;  %8807 = vmatprep.mubr.msk.bf16.mxu0 %vm10199_vm1, %v10198_v2 }
  0xd6   : > { %8845 = vmatprep.mubr.msk.bf16.mxu1 %vm10199_vm1, %v10198_v2 }
  0xdc   : > { %8808 = vmatmul.mubr.msk.bf16.gmra.mrb[100].mxu0 %vm292_vm2, %v953_v21 }
  0xdd   : > { %8846 = vmatmul.mubr.msk.bf16.gmra.mrb[100].mxu1 %vm292_vm2, %v10549_v22  ;;  %8811 = vmatprep.mubr.msk.bf16.mxu0 %vm10199_vm1, %v10198_v2 }
  0xde   : > { %8849 = vmatprep.mubr.msk.bf16.mxu1 %vm10199_vm1, %v10198_v2 }
  0xe4   : > { %8812 = vmatmul.mubr.msk.bf16.gmra.mrb[104].mxu0 %vm292_vm2, %v954_v27  ;;  %v1483_v27 = vld [vmem:[%s10267_s6 + $0x6d] sm:$0xff] }
  0xe5   : > { %8850 = vmatmul.mubr.msk.bf16.gmra.mrb[104].mxu1 %vm292_vm2, %v10562_v28  ;;  %8855 = vmatprep.mubr.msk.bf16.mxu0 %vm10199_vm1, %v10198_v2 }
  0xe6   : > { %8893 = vmatprep.mubr.msk.bf16.mxu1 %vm10199_vm1, %v10198_v2 }
  0xe7   : > { %v358_v31 = vpop.f32.mrb[0].mxu0 }
  0xe8   : > { %v493_v33 = vpop.f32.mrb[0].mxu1  ;;  %v8629_v34 = vpop.f32.mrb[1].mxu0 }
  0xe9   : > { %v10579_v36 = vadd.f32 %v493_v33, %v358_v31  ;;  %v8667_v37 = vpop.f32.mrb[1].mxu1  ;;  %v361_v38 = vpop.f32.mrb[2].mxu0 }
  0xea   : > { %v496_v40 = vpop.f32.mrb[2].mxu1  ;;  %v8630_v41 = vpop.f32.mrb[3].mxu0 }
  0xeb   : > { %v10582_v43 = vadd.f32 %v496_v40, %v361_v38  ;;  %v8668_v44 = vpop.f32.mrb[3].mxu1  ;;  %v10200_v40 = vmov 0   ;;  %v1878_v41 = vld [vmem:[%s13178_s4] sm:$0xff] }
  0xec   : > { %8856 = vmatmul.mubr.msk.bf16.vlgmr.msra.gmra.mrb[108].mxu0 %vm292_vm2, %v10471_v49  ;;  %10114 = vset.pattern.permute.xlu0 %v10200_v40  ;;  %v1485_v44 = vld [vmem:[%s10267_s6 + $0x7d] sm:$0xff] }
  0xed   : > { %8894 = vmatmul.mubr.msk.bf16.vlgmr.msra.gmra.mrb[108].mxu1 %vm292_vm2, %v1492_v39  ;;  %8930 = vmatpush3.bf16.msra.mxu0 %v1713_v42  ;;  %v1484_v42 = vld [vmem:[%s10267_s6 + $0x75] sm:$0xff] }
  0xee   : > { %8968 = vmatpush3.bf16.msra.mxu1 %v2106_v45  ;;  %8859 = vmatprep.mubr.msk.bf16.mxu0 %vm10199_vm1, %v10198_v2 }
  0xef   : > { %v366_v48 = vpop.f32.mrb[4].mxu0  ;;  %8897 = vmatprep.mubr.msk.bf16.mxu1 %vm10199_vm1, %v10198_v2  ;;  %9005 = vmatprep.subr.bf16.mxu0 %v10198_v2 }
  0xf0   : > { %v501_v50 = vpop.f32.mrb[4].mxu1  ;;  %v8633_v51 = vpop.f32.mrb[5].mxu0  ;;  %9043 = vmatprep.subr.bf16.mxu1 %v10198_v2  ;;  %1898 = vperm.xlu0 %10114, %v1878_v41  }
  0xf1   : > { %v10596_v49 = vadd.f32 %v501_v50, %v366_v48  ;;  %v8671_v52 = vpop.f32.mrb[5].mxu1  ;;  %v369_v53 = vpop.f32.mrb[6].mxu0  ;;  %10115 = vset.pattern.permute.xlu1 %v10200_v40 }
  0xf2   : > { %v504_v56 = vpop.f32.mrb[6].mxu1  ;;  %v8634_v57 = vpop.f32.mrb[7].mxu0  ;;  %v1497_v52 = vpack.c.bf16 %v1485_v44, %v1484_v42  ;;  %v1885_v42 = vld [vmem:[%s13178_s4 + $0x38] sm:$0xff] }
  0xf3   : > { %v10598_v58 = vadd.f32 %v504_v56, %v369_v53  ;;  %v8672_v59 = vpop.f32.mrb[7].mxu1 }
  0xf4   : > { %8860 = vmatmul.mubr.msk.bf16.gmra.mrb[112].mxu0 %vm292_vm2, %v10484_v55  ;;  %v1494_v55 = vpack.c.bf16 %v1479_v62, %v1478_v60  ;;  %1903 = vperm.xlu0 %10114, %v1879_v47   ;;  %v1880_v59 = vld [vmem:[%s13178_s4 + $0x10] sm:$0xff]  ;;  %v1486_v60 = vld [vmem:[%s10267_s6 + $0x85] sm:$0xff] }
  0xf5   : > { %8898 = vmatmul.mubr.msk.bf16.gmra.mrb[112].mxu1 %vm292_vm2, %v1493_v54  ;;  %8863 = vmatprep.mubr.msk.bf16.mxu0 %vm10199_vm1, %v10198_v2  ;;  %v1487_v62 = vld [vmem:[%s10267_s6 + $0x8d] sm:$0xff] }
  0xf6   : > { %8901 = vmatprep.mubr.msk.bf16.mxu1 %vm10199_vm1, %v10198_v2  ;;  %1908 = vperm.xlu1 %10115, %v1880_v59   ;;  %v2050_v59 = vld [vmem:[%s10267_s6 + $0x91] sm:$0xff] }
  0xf7   : > { %v374_v63 = vpop.f32.mrb[8].mxu0 }
  0xf8   : > { %v509_v0 = vpop.f32.mrb[8].mxu1  ;;  %v8637_v1 = vpop.f32.mrb[9].mxu0 }
  0xf9   : > { %v10609_v3 = vadd.f32 %v509_v0, %v374_v63  ;;  %v8675_v5 = vpop.f32.mrb[9].mxu1  ;;  %v377_v6 = vpop.f32.mrb[10].mxu0 }
  0xfa   : > { %v512_v7 = vpop.f32.mrb[10].mxu1  ;;  %v8638_v8 = vpop.f32.mrb[11].mxu0 }
  0xfb   : > { %v10611_v9 = vadd.f32 %v512_v7, %v377_v6  ;;  %v8676_v11 = vpop.f32.mrb[11].mxu1  ;;  %v1498_v7 = vpack.c.bf16 %v1487_v62, %v1486_v60  ;;  %v2051_v60 = vld [vmem:[%s10267_s6 + $0x99] sm:$0xff] }
  0xfc   : > { %8864 = vmatmul.mubr.msk.bf16.gmra.mrb[116].mxu0 %vm292_vm2, %v10497_v61  ;;  %v1495_v61 = vpack.c.bf16 %v1481_v13, %v1480_v12 }
  0xfd   : > { %8902 = vmatmul.mubr.msk.bf16.gmra.mrb[116].mxu1 %vm292_vm2, %v1494_v55  ;;  %8867 = vmatprep.mubr.msk.bf16.mxu0 %vm10199_vm1, %v10198_v2 }
  0xfe   : > { %8905 = vmatprep.mubr.msk.bf16.mxu1 %vm10199_vm1, %v10198_v2 }
  0xff   : > { %v382_v14 = vpop.f32.mrb[12].mxu0 }
 0x100   : > { %v517_v15 = vpop.f32.mrb[12].mxu1  ;;  %v8641_v17 = vpop.f32.mrb[13].mxu0 }
 0x101   : > { %v10622_v18 = vadd.f32 %v517_v15, %v382_v14  ;;  %v8679_v19 = vpop.f32.mrb[13].mxu1  ;;  %v385_v20 = vpop.f32.mrb[14].mxu0  ;;  %v1882_v14 = vld [vmem:[%s13178_s4 + $0x20] sm:$0xff]  ;;  %v1488_v15 = vld [vmem:[%s10267_s6 + $0x95] sm:$0xff] }
 0x102   : > { %v520_v21 = vpop.f32.mrb[14].mxu1  ;;  %v8642_v23 = vpop.f32.mrb[15].mxu0  ;;  %v1489_v17 = vld [vmem:[%s10267_s6 + $0x9d] sm:$0xff]  ;;  %1918 = vperm.xlu0 %10114, %v1882_v14  }
 0x103   : > { %v10624_v24 = vadd.f32 %v520_v21, %v385_v20  ;;  %v8680_v25 = vpop.f32.mrb[15].mxu1 }
 0x104   : > { %8868 = vmatmul.mubr.msk.bf16.gmra.mrb[120].mxu0 %vm292_vm2, %v10510_v4  ;;  %v1496_v4 = vpack.c.bf16 %v1483_v27, %v1482_v26  ;;  %v1499_v26 = vpack.c.bf16 %v1489_v17, %v1488_v15 }
 0x105   : > { %8906 = vmatmul.mubr.msk.bf16.gmra.mrb[120].mxu1 %vm292_vm2, %v1495_v61  ;;  %8871 = vmatprep.mubr.msk.bf16.mxu0 %vm10199_vm1, %v10198_v2  ;;  %v1883_v61 = vld [vmem:[%s13178_s4 + $0x28] sm:$0xff] }
 0x106   : > { %8909 = vmatprep.mubr.msk.bf16.mxu1 %vm10199_vm1, %v10198_v2 }
 0x107   : > { %v390_v29 = vpop.f32.mrb[16].mxu0 }
 0x108   : > { %v525_v30 = vpop.f32.mrb[16].mxu1  ;;  %v8645_v31 = vpop.f32.mrb[17].mxu0 }
 0x109   : > { %v10635_v32 = vadd.f32 %v525_v30, %v390_v29  ;;  %v8683_v33 = vpop.f32.mrb[17].mxu1  ;;  %v393_v34 = vpop.f32.mrb[18].mxu0 }
 0x10a   : > { %v528_v35 = vpop.f32.mrb[18].mxu1  ;;  %v8646_v37 = vpop.f32.mrb[19].mxu0  ;;  %v1308_v33 = vld [vmem:[%s10267_s6 + $0xa4] sm:$0xff] }
 0x10b   : > { %v10637_v38 = vadd.f32 %v528_v35, %v393_v34  ;;  %v8684_v39 = vpop.f32.mrb[19].mxu1  ;;  %v1309_v34 = vld [vmem:[%s10267_s6 + $0xac] sm:$0xff] }
 0x10c   : > { %8872 = vmatmul.mubr.msk.bf16.gmra.mrb[124].mxu0 %vm292_vm2, %v10523_v10  ;;  %v1490_v35 = vld [vmem:[%s10267_s6 + $0xa5] sm:$0xff]  ;;  %v1491_v37 = vld [vmem:[%s10267_s6 + $0xad] sm:$0xff]  ;;  %v1318_v41 = vpack.c.bf16 %v1309_v34, %v1308_v33 }
 0x10d   : > { %8910 = vmatmul.mubr.msk.bf16.gmra.mrb[124].mxu1 %vm292_vm2, %v1496_v4  ;;  %8875 = vmatprep.mubr.msk.bf16.mxu0 %vm10199_vm1, %v10198_v2  ;;  %v1884_v4 = vld [vmem:[%s13178_s4 + $0x30] sm:$0xff] }
 0x10e   : > { %8913 = vmatprep.mubr.msk.bf16.mxu1 %vm10199_vm1, %v10198_v2  ;;  %1928 = vperm.xlu0 %10114, %v1884_v4  }
 0x10f   : > { %v398_v45 = vpop.f32.mrb[20].mxu0 }
 0x110   : > { %v533_v10 = vpop.f32.mrb[20].mxu1  ;;  %v8649_v46 = vpop.f32.mrb[21].mxu0 }
 0x111   : > { %v10654_v48 = vadd.f32 %v533_v10, %v398_v45  ;;  %v8687_v50 = vpop.f32.mrb[21].mxu1  ;;  %v401_v51 = vpop.f32.mrb[22].mxu0  ;;  %v1500_v46 = vpack.c.bf16 %v1491_v37, %v1490_v35  ;;  %v1889_v35 = vld [vmem:[%s13178_s4 + $0x58] sm:$0xff] }
 0x112   : > { %v536_v53 = vpop.f32.mrb[22].mxu1  ;;  %v8650_v54 = vpop.f32.mrb[23].mxu0 }
 0x113   : > { %v10656_v56 = vadd.f32 %v536_v53, %v401_v51  ;;  %v8688_v57 = vpop.f32.mrb[23].mxu1  ;;  %v1656_v53 = vld [vmem:[%s10267_s6 + $0x26] sm:$0xff]  ;;  %v1657_v54 = vld [vmem:[%s10267_s6 + $0x2e] sm:$0xff] }
 0x114   : > { %8876 = vmatmul.mubr.msk.bf16.gmra.mrb[128].mxu0 %vm292_vm2, %v10536_v16  ;;  %v1881_v16 = vld [vmem:[%s13178_s4 + $0x18] sm:$0xff]  ;;  %v1886_v57 = vld [vmem:[%s13178_s4 + $0x40] sm:$0xff] }
 0x115   : > { %8914 = vmatmul.mubr.msk.bf16.gmra.mrb[128].mxu1 %vm292_vm2, %v1497_v52  ;;  %8879 = vmatprep.mubr.msk.bf16.mxu0 %vm10199_vm1, %v10198_v2 }
 0x116   : > { %8917 = vmatprep.mubr.msk.bf16.mxu1 %vm10199_vm1, %v10198_v2  ;;  %1913 = vperm.xlu1 %10115, %v1881_v16  }
 0x117   : > { %v406_v63 = vpop.f32.mrb[24].mxu0  ;;  %1938 = vperm.xlu0 %10114, %v1886_v57  }
 0x118   : > { %v541_v0 = vpop.f32.mrb[24].mxu1  ;;  %v8653_v1 = vpop.f32.mrb[25].mxu0 }
 0x119   : > { %v10673_v5 = vadd.f32 %v541_v0, %v406_v63  ;;  %v8691_v6 = vpop.f32.mrb[25].mxu1  ;;  %v409_v55 = vpop.f32.mrb[26].mxu0  ;;  %v2049_v63 = vld [vmem:[%s13175_s1] sm:$0x3] }
 0x11a   : > { %v544_v8 = vpop.f32.mrb[26].mxu1  ;;  %v8654_v11 = vpop.f32.mrb[27].mxu0  ;;  %1923 = vperm.xlu1 %10115, %v1883_v61   ;;  %v1674_v6 = vpack.c.bf16 %v1657_v54, %v1656_v53 }
 0x11b   : > { %v10675_v12 = vadd.f32 %v544_v8, %v409_v55  ;;  %v8692_v13 = vpop.f32.mrb[27].mxu1  ;;  %v7776_v55 = vld [vmem:[%s13175_s1 + $0x4] sm:$0x3] }
 0x11c   : > { %8880 = vmatmul.mubr.msk.bf16.gmra.mrb[132].mxu0 %vm292_vm2, %v10549_v22  ;;  %v2068_v13 = vpack.c.bf16 %v2051_v60, %v2050_v59 }
 0x11d   : > { %8918 = vmatmul.mubr.msk.bf16.gmra.mrb[132].mxu1 %vm292_vm2, %v1498_v7  ;;  %8883 = vmatprep.mubr.msk.bf16.mxu0 %vm10199_vm1, %v10198_v2  ;;  %v1887_v7 = vld [vmem:[%s13178_s4 + $0x48] sm:$0xff] }
 0x11e   : > { %8921 = vmatprep.mubr.msk.bf16.mxu1 %vm10199_vm1, %v10198_v2  ;;  %1933 = vperm.xlu1 %10115, %v1885_v42  }
 0x11f   : > { %v414_v19 = vpop.f32.mrb[28].mxu0 }
 0x120   : > { %v549_v20 = vpop.f32.mrb[28].mxu1  ;;  %v8657_v22 = vpop.f32.mrb[29].mxu0 }
 0x121   : > { %v10692_v21 = vadd.f32 %v549_v20, %v414_v19  ;;  %v8695_v23 = vpop.f32.mrb[29].mxu1  ;;  %v417_v25 = vpop.f32.mrb[30].mxu0  ;;  %v2241_v19 = vsel %vm320_vm0, %v2049_v63, 0  ;;  %v2404_v22 = vsel %vm320_vm0, %v7776_v55, 0 }
 0x122   : > { %v552_v27 = vpop.f32.mrb[30].mxu1  ;;  %v8658_v29 = vpop.f32.mrb[31].mxu0  ;;  %1943 = vperm.xlu1 %10115, %v1887_v7   ;;  %v1658_v23 = vld [vmem:[%s10267_s6 + $0x36] sm:$0xff] }
 0x123   : > { %v10694_v30 = vadd.f32 %v552_v27, %v417_v25  ;;  %v8696_v31 = vpop.f32.mrb[31].mxu1  ;;  %v1659_v25 = vld [vmem:[%s10267_s6 + $0x3e] sm:$0xff]  ;;  %v2053_v27 = vld [vmem:[%s10267_s6 + $0xa9] sm:$0xff] }
 0x124   : > { %8884 = vmatmul.mubr.msk.bf16.gmra.mrb[136].mxu0 %vm292_vm2, %v10562_v28  ;;  %v1675_v4 = vpack.c.bf16 %v1659_v25, %v1658_v23  ;;  %v1893_v25 = vld [vmem:[%s13178_s4 + $0x78] sm:$0xff] }
 0x125   : > { %8922 = vmatmul.mubr.msk.bf16.gmra.mrb[136].mxu1 %vm292_vm2, %v1499_v26  ;;  %8887 = vmatprep.mubr.msk.bf16.mxu0 %vm10199_vm1, %v10198_v2  ;;  %v2052_v26 = vld [vmem:[%s10267_s6 + $0xa1] sm:$0xff] }
 0x126   : > { %8925 = vmatprep.mubr.msk.bf16.mxu1 %vm10199_vm1, %v10198_v2  ;;  %1953 = vperm.xlu1 %10115, %v1889_v35   ;;  %v1664_v35 = vld [vmem:[%s10267_s6 + $0x66] sm:$0xff] }
 0x127   : > { %v422_v39 = vpop.f32.mrb[32].mxu0 }
 0x128   : > { %v557_v40 = vpop.f32.mrb[32].mxu1  ;;  %v8661_v28 = vpop.f32.mrb[33].mxu0 }
 0x129   : > { %v10713_v44 = vadd.f32 %v557_v40, %v422_v39  ;;  %v8699_v45 = vpop.f32.mrb[33].mxu1  ;;  %v425_v10 = vpop.f32.mrb[34].mxu0  ;;  %v2069_v40 = vpack.c.bf16 %v2053_v27, %v2052_v26 }
 0x12a   : > { %v560_v47 = vpop.f32.mrb[34].mxu1  ;;  %v8662_v50 = vpop.f32.mrb[35].mxu0 }
 0x12b   : > { %v10715_v51 = vadd.f32 %v560_v47, %v425_v10  ;;  %v8700_v52 = vpop.f32.mrb[35].mxu1  ;;  %v1661_v47 = vld [vmem:[%s10267_s6 + $0x4e] sm:$0xff]  ;;  %v1890_v50 = vld [vmem:[%s13178_s4 + $0x60] sm:$0xff] }
 0x12c   : > { %8888 = vmatmul.mubr.msk.bf16.gmra.mrb[140].mxu0 %vm292_vm2, %v1318_v41  ;;  %v2055_v52 = vld [vmem:[%s10267_s6 + $0xb9] sm:$0xff] }
 0x12d   : > { %8926 = vmatmul.mubr.msk.bf16.gmra.mrb[140].mxu1 %vm292_vm2, %v1500_v46  ;;  %8931 = vmatprep.mubr.msk.bf16.mxu0 %vm10199_vm1, %v10198_v2  ;;  %v1660_v46 = vld [vmem:[%s10267_s6 + $0x46] sm:$0xff] }
 0x12e   : > { %8969 = vmatprep.mubr.msk.bf16.mxu1 %vm10199_vm1, %v10198_v2  ;;  %v1676_v60 = vpack.c.bf16 %v1661_v47, %v1660_v46  ;;  %v1895_v47 = vld [vmem:[%s13178_s4 + $0x88] sm:$0xff] }
 0x12f   : > { %v657_v62 = vpop.f32.mrb[36].mxu0 }
 0x130   : > { %v728_v0 = vadd.f32 %v657_v62, %v10579_v36  ;;  %v839_v1 = vpop.f32.mrb[36].mxu1  ;;  %v8705_v16 = vpop.f32.mrb[37].mxu0  ;;  %v1891_v62 = vld [vmem:[%s13178_s4 + $0x68] sm:$0xff] }
 0x131   : > { %v8743_v8 = vpop.f32.mrb[37].mxu1  ;;  %v660_v11 = vpop.f32.mrb[38].mxu0  ;;  %1963 = vperm.xlu1 %10115, %v1891_v62   ;;  %v1666_v62 = vld [vmem:[%s10267_s6 + $0x76] sm:$0xff] }
 0x132   : > { %v10740_v14 = vadd.f32 %v839_v1, %v728_v0  ;;  %v729_v36 = vadd.f32 %v660_v11, %v10582_v43  ;;  %v842_v15 = vpop.f32.mrb[38].mxu1  ;;  %v8706_v17 = vpop.f32.mrb[39].mxu0  ;;  %v1888_v43 = vld [vmem:[%s13178_s4 + $0x50] sm:$0xff] }
 0x133   : > { %v8744_v20 = vpop.f32.mrb[39].mxu1  ;;  %1948 = vperm.xlu0 %10114, %v1888_v43   ;;  %v1662_v11 = vld [vmem:[%s10267_s6 + $0x56] sm:$0xff] }
 0x134   : > { %v10745_v61 = vadd.f32 %v842_v15, %v729_v36  ;;  %8932 = vmatmul.mubr.msk.bf16.vlgmr.msra.gmra.mrb[144].mxu0 %vm292_vm2, %v1674_v6  ;;  %v1892_v36 = vld [vmem:[%s13178_s4 + $0x70] sm:$0xff] }
 0x135   : > { %8970 = vmatmul.mubr.msk.bf16.vlgmr.msra.gmra.mrb[144].mxu1 %vm292_vm2, %v2068_v13  ;;  %9006 = vmatpush3.bf16.msra.mxu0 %v2241_v19  ;;  %v1663_v13 = vld [vmem:[%s10267_s6 + $0x5e] sm:$0xff]  ;;  %v2057_v15 = vld [vmem:[%s10267_s6 + $0xc9] sm:$0xff] }
 0x136   : > { %9044 = vmatpush3.bf16.msra.mxu1 %v2404_v22  ;;  %8935 = vmatprep.mubr.msk.bf16.mxu0 %vm10199_vm1, %v10198_v2  ;;  %v1677_v23 = vpack.c.bf16 %v1663_v13, %v1662_v11 }
 0x137   : > { %v665_v29 = vpop.f32.mrb[40].mxu0  ;;  %8973 = vmatprep.mubr.msk.bf16.mxu1 %vm10199_vm1, %v10198_v2  ;;  %9081 = vmatprep.subr.bf16.mxu0 %v10198_v2 }
 0x138   : > { %v730_v31 = vadd.f32 %v665_v29, %v10596_v49  ;;  %v847_v33 = vpop.f32.mrb[40].mxu1  ;;  %v8709_v34 = vpop.f32.mrb[41].mxu0  ;;  %9119 = vmatprep.subr.bf16.mxu1 %v10198_v2  ;;  %1958 = vperm.xlu0 %10114, %v1890_v50  }
 0x139   : > { %v8747_v37 = vpop.f32.mrb[41].mxu1  ;;  %v668_v39 = vpop.f32.mrb[42].mxu0  ;;  %1973 = vperm.xlu1 %10115, %v1893_v25   ;;  %v2062_v25 = vld [vmem:[%s10267_s6 + $0xf1] sm:$0xff] }
 0x13a   : > { %v10766_v28 = vadd.f32 %v847_v33, %v730_v31  ;;  %v731_v49 = vadd.f32 %v668_v39, %v10598_v58  ;;  %v850_v41 = vpop.f32.mrb[42].mxu1  ;;  %v8710_v42 = vpop.f32.mrb[43].mxu0  ;;  %v2054_v58 = vld [vmem:[%s10267_s6 + $0xb1] sm:$0xff]  ;;  %v1894_v39 = vld [vmem:[%s13178_s4 + $0x80] sm:$0xff] }
 0x13b   : > { %v8748_v45 = vpop.f32.mrb[43].mxu1  ;;  %v2070_v1 = vpack.c.bf16 %v2055_v52, %v2054_v58  ;;  %v1665_v37 = vld [vmem:[%s10267_s6 + $0x6e] sm:$0xff] }
 0x13c   : > { %v10769_v10 = vadd.f32 %v850_v41, %v731_v49  ;;  %8936 = vmatmul.mubr.msk.bf16.gmra.mrb[148].mxu0 %vm292_vm2, %v1675_v4  ;;  %1968 = vperm.xlu0 %10114, %v1892_v36   ;;  %v1678_v46 = vpack.c.bf16 %v1665_v37, %v1664_v35 }
 0x13d   : > { %8974 = vmatmul.mubr.msk.bf16.gmra.mrb[148].mxu1 %vm292_vm2, %v2069_v40  ;;  %8939 = vmatprep.mubr.msk.bf16.mxu0 %vm10199_vm1, %v10198_v2  ;;  %v2059_v40 = vld [vmem:[%s10267_s6 + $0xd9] sm:$0xff] }
 0x13e   : > { %8977 = vmatprep.mubr.msk.bf16.mxu1 %vm10199_vm1, %v10198_v2  ;;  %1983 = vperm.xlu1 %10115, %v1895_v47  }
 0x13f   : > { %v673_v53 = vpop.f32.mrb[44].mxu0 }
 0x140   : > { %v732_v54 = vadd.f32 %v673_v53, %v10609_v3  ;;  %v855_v57 = vpop.f32.mrb[44].mxu1  ;;  %v8713_v59 = vpop.f32.mrb[45].mxu0  ;;  %1978 = vperm.xlu0 %10114, %v1894_v39  }
 0x141   : > { %v8751_v63 = vpop.f32.mrb[45].mxu1  ;;  %v676_v0 = vpop.f32.mrb[46].mxu0 }
 0x142   : > { %v10788_v16 = vadd.f32 %v855_v57, %v732_v54  ;;  %v733_v6 = vadd.f32 %v676_v0, %v10611_v9  ;;  %v858_v3 = vpop.f32.mrb[46].mxu1  ;;  %v8714_v55 = vpop.f32.mrb[47].mxu0  ;;  %v2056_v9 = vld [vmem:[%s10267_s6 + $0xc1] sm:$0xff] }
 0x143   : > { %v8752_v7 = vpop.f32.mrb[47].mxu1  ;;  %v2071_v27 = vpack.c.bf16 %v2057_v15, %v2056_v9  ;;  %v1667_v63 = vld [vmem:[%s10267_s6 + $0x7e] sm:$0xff] }
 0x144   : > { %v10791_v8 = vadd.f32 %v858_v3, %v733_v6  ;;  %8940 = vmatmul.mubr.msk.bf16.gmra.mrb[152].mxu0 %vm292_vm2, %v1676_v60  ;;  %v2060_v0 = vld [vmem:[%s10267_s6 + $0xe1] sm:$0xff]  ;;  %v1679_v7 = vpack.c.bf16 %v1667_v63, %v1666_v62 }
 0x145   : > { %8978 = vmatmul.mubr.msk.bf16.gmra.mrb[152].mxu1 %vm292_vm2, %v2070_v1  ;;  %8943 = vmatprep.mubr.msk.bf16.mxu0 %vm10199_vm1, %v10198_v2  ;;  %v2061_v1 = vld [vmem:[%s10267_s6 + $0xe9] sm:$0xff] }
 0x146   : > { %8981 = vmatprep.mubr.msk.bf16.mxu1 %vm10199_vm1, %v10198_v2  ;;  %v2073_v36 = vpack.c.bf16 %v2061_v1, %v2060_v0 }
 0x147   : > { %v681_v17 = vpop.f32.mrb[48].mxu0 }
 0x148   : > { %v734_v19 = vadd.f32 %v681_v17, %v10622_v18  ;;  %v863_v20 = vpop.f32.mrb[48].mxu1  ;;  %v8717_v22 = vpop.f32.mrb[49].mxu0 }
 0x149   : > { %v8755_v43 = vpop.f32.mrb[49].mxu1  ;;  %v684_v26 = vpop.f32.mrb[50].mxu0 }
 0x14a   : > { %v10810_v29 = vadd.f32 %v863_v20, %v734_v19  ;;  %v735_v31 = vadd.f32 %v684_v26, %v10624_v24  ;;  %v866_v18 = vpop.f32.mrb[50].mxu1  ;;  %v8718_v33 = vpop.f32.mrb[51].mxu0  ;;  %v2058_v24 = vld [vmem:[%s10267_s6 + $0xd1] sm:$0xff]  ;;  %v2063_v43 = vld [vmem:[%s10267_s6 + $0xf9] sm:$0xff] }
 0x14b   : > { %v8756_v34 = vpop.f32.mrb[51].mxu1  ;;  %v2072_v52 = vpack.c.bf16 %v2059_v40, %v2058_v24  ;;  %v2074_v35 = vpack.c.bf16 %v2063_v43, %v2062_v25 }
 0x14c   : > { %v10813_v4 = vadd.f32 %v866_v18, %v735_v31  ;;  %8944 = vmatmul.mubr.msk.bf16.gmra.mrb[156].mxu0 %vm292_vm2, %v1677_v23  ;;  %v1669_v23 = vld [vmem:[%s10267_s6 + $0x8e] sm:$0xff] }
 0x14d   : > { %8982 = vmatmul.mubr.msk.bf16.gmra.mrb[156].mxu1 %vm292_vm2, %v2071_v27  ;;  %8947 = vmatprep.mubr.msk.bf16.mxu0 %vm10199_vm1, %v10198_v2 }
 0x14e   : > { %8985 = vmatprep.mubr.msk.bf16.mxu1 %vm10199_vm1, %v10198_v2 }
 0x14f   : > { %v689_v49 = vpop.f32.mrb[52].mxu0 }
 0x150   : > { %v736_v41 = vadd.f32 %v689_v49, %v10635_v32  ;;  %v871_v42 = vpop.f32.mrb[52].mxu1  ;;  %v8721_v45 = vpop.f32.mrb[53].mxu0 }
 0x151   : > { %v8759_v50 = vpop.f32.mrb[53].mxu1  ;;  %v692_v58 = vpop.f32.mrb[54].mxu0  ;;  %v2064_v45 = vld [vmem:[%s10267_s6 + $0x101] sm:$0xff] }
 0x152   : > { %v10832_v53 = vadd.f32 %v871_v42, %v736_v41  ;;  %v737_v54 = vadd.f32 %v692_v58, %v10637_v38  ;;  %v874_v32 = vpop.f32.mrb[54].mxu1  ;;  %v8722_v57 = vpop.f32.mrb[55].mxu0  ;;  %v1671_v42 = vld [vmem:[%s10267_s6 + $0x9e] sm:$0xff] }
 0x153   : > { %v8760_v59 = vpop.f32.mrb[55].mxu1 }
 0x154   : > { %v10835_v60 = vadd.f32 %v874_v32, %v737_v54  ;;  %8948 = vmatmul.mubr.msk.bf16.gmra.mrb[160].mxu0 %vm292_vm2, %v1678_v46  ;;  %v2065_v46 = vld [vmem:[%s10267_s6 + $0x109] sm:$0xff] }
 0x155   : > { %8986 = vmatmul.mubr.msk.bf16.gmra.mrb[160].mxu1 %vm292_vm2, %v2072_v52  ;;  %8951 = vmatprep.mubr.msk.bf16.mxu0 %vm10199_vm1, %v10198_v2  ;;  %v2075_v57 = vpack.c.bf16 %v2065_v46, %v2064_v45 }
 0x156   : > { %8989 = vmatprep.mubr.msk.bf16.mxu1 %vm10199_vm1, %v10198_v2 }
 0x157   : > { %v697_v38 = vpop.f32.mrb[56].mxu0 }
 0x158   : > { %v738_v6 = vadd.f32 %v697_v38, %v10654_v48  ;;  %v879_v3 = vpop.f32.mrb[56].mxu1  ;;  %v8725_v55 = vpop.f32.mrb[57].mxu0  ;;  %v1668_v48 = vld [vmem:[%s10267_s6 + $0x86] sm:$0xff] }
 0x159   : > { %v8763_v11 = vpop.f32.mrb[57].mxu1  ;;  %v700_v13 = vpop.f32.mrb[58].mxu0  ;;  %v1680_v18 = vpack.c.bf16 %v1669_v23, %v1668_v48  ;;  %v2067_v55 = vld [vmem:[%s10267_s6 + $0x119] sm:$0xff] }
 0x15a   : > { %v10848_v9 = vadd.f32 %v879_v3, %v738_v6  ;;  %v739_v15 = vadd.f32 %v700_v13, %v10656_v56  ;;  %v882_v17 = vpop.f32.mrb[58].mxu1  ;;  %v8726_v19 = vpop.f32.mrb[59].mxu0  ;;  %v1673_v6 = vld [vmem:[%s10267_s6 + $0xae] sm:$0xff] }
 0x15b   : > { %v8764_v20 = vpop.f32.mrb[59].mxu1  ;;  %v2066_v3 = vld [vmem:[%s10267_s6 + $0x111] sm:$0xff] }
 0x15c   : > { %v10851_v22 = vadd.f32 %v882_v17, %v739_v15  ;;  %8952 = vmatmul.mubr.msk.bf16.gmra.mrb[164].mxu0 %vm292_vm2, %v1679_v7  ;;  %v2076_v19 = vpack.c.bf16 %v2067_v55, %v2066_v3 }
 0x15d   : > { %8990 = vmatmul.mubr.msk.bf16.gmra.mrb[164].mxu1 %vm292_vm2, %v2073_v36  ;;  %8955 = vmatprep.mubr.msk.bf16.mxu0 %vm10199_vm1, %v10198_v2 }
 0x15e   : > { %8993 = vmatprep.mubr.msk.bf16.mxu1 %vm10199_vm1, %v10198_v2 }
 0x15f   : > { %v705_v56 = vpop.f32.mrb[60].mxu0 }
 0x160   : > { %v740_v26 = vadd.f32 %v705_v56, %v10673_v5  ;;  %v887_v27 = vpop.f32.mrb[60].mxu1  ;;  %v8729_v31 = vpop.f32.mrb[61].mxu0  ;;  %v1670_v5 = vld [vmem:[%s10267_s6 + $0x96] sm:$0xff] }
 0x161   : > { %v8767_v33 = vpop.f32.mrb[61].mxu1  ;;  %v708_v34 = vpop.f32.mrb[62].mxu0  ;;  %v1681_v52 = vpack.c.bf16 %v1671_v42, %v1670_v5  ;;  %v2349_v31 = vld [vmem:[%s10267_s6 + $0x9a] sm:$0xff] }
 0x162   : > { %v10864_v37 = vadd.f32 %v887_v27, %v740_v26  ;;  %v741_v39 = vadd.f32 %v708_v34, %v10675_v12  ;;  %v890_v24 = vpop.f32.mrb[62].mxu1  ;;  %v8730_v40 = vpop.f32.mrb[63].mxu0  ;;  %v2022_v26 = vld [vmem:[%s10267_s6 + $0x90] sm:$0xff]  ;;  %v2023_v27 = vld [vmem:[%s10267_s6 + $0x98] sm:$0xff]  ;;  %v7786_v33 = vld [vmem:[%s13175_s1 + $0x6] sm:$0x3] }
 0x163   : > { %v8768_v49 = vpop.f32.mrb[63].mxu1  ;;  %v7796_v40 = vld [vmem:[%s13175_s1 + $0x8] sm:$0x3] }
 0x164   : > { %v10867_v41 = vadd.f32 %v890_v24, %v741_v39  ;;  %8956 = vmatmul.mubr.msk.bf16.gmra.mrb[168].mxu0 %vm292_vm2, %v1680_v18  ;;  %v2040_v24 = vpack.c.bf16 %v2023_v27, %v2022_v26  ;;  %v3653_v49 = vld [vmem:[%s13178_s4 + $0xa0] sm:$0xff] }
 0x165   : > { %8994 = vmatmul.mubr.msk.bf16.gmra.mrb[168].mxu1 %vm292_vm2, %v2074_v35  ;;  %8959 = vmatprep.mubr.msk.bf16.mxu0 %vm10199_vm1, %v10198_v2  ;;  %v2353_v26 = vld [vmem:[%s10267_s6 + $0xba] sm:$0xff] }
 0x166   : > { %8997 = vmatprep.mubr.msk.bf16.mxu1 %vm10199_vm1, %v10198_v2 }
 0x167   : > { %v713_v12 = vpop.f32.mrb[64].mxu0 }
 0x168   : > { %v742_v47 = vadd.f32 %v713_v12, %v10692_v21  ;;  %v895_v50 = vpop.f32.mrb[64].mxu1  ;;  %v8733_v58 = vpop.f32.mrb[65].mxu0  ;;  %v1672_v21 = vld [vmem:[%s10267_s6 + $0xa6] sm:$0xff] }
 0x169   : > { %v8771_v54 = vpop.f32.mrb[65].mxu1  ;;  %v716_v32 = vpop.f32.mrb[66].mxu0  ;;  %v1682_v36 = vpack.c.bf16 %v1673_v6, %v1672_v21 }
 0x16a   : > { %v10880_v59 = vadd.f32 %v895_v50, %v742_v47  ;;  %v743_v62 = vadd.f32 %v716_v32, %v10694_v30  ;;  %v898_v63 = vpop.f32.mrb[66].mxu1  ;;  %v8734_v0 = vpop.f32.mrb[67].mxu0  ;;  %v2585_v50 = vsel %vm320_vm0, %v7786_v33, 0  ;;  %v2024_v32 = vld [vmem:[%s10267_s6 + $0xa0] sm:$0xff] }
 0x16b   : > { %v8772_v1 = vpop.f32.mrb[67].mxu1  ;;  %v3655_v0 = vld [vmem:[%s13178_s4 + $0xb0] sm:$0xff] }
 0x16c   : > { %v10883_v38 = vadd.f32 %v898_v63, %v743_v62  ;;  %8960 = vmatmul.mubr.msk.bf16.gmra.mrb[172].mxu0 %vm292_vm2, %v1681_v52  ;;  %v2766_v52 = vsel %vm320_vm0, %v7796_v40, 0  ;;  %v2350_v62 = vld [vmem:[%s10267_s6 + $0xa2] sm:$0xff]  ;;  %v2351_v63 = vld [vmem:[%s10267_s6 + $0xaa] sm:$0xff] }
 0x16d   : > { %8998 = vmatmul.mubr.msk.bf16.gmra.mrb[172].mxu1 %vm292_vm2, %v2075_v57  ;;  %8963 = vmatprep.mubr.msk.bf16.mxu0 %vm10199_vm1, %v10198_v2  ;;  %v2025_v57 = vld [vmem:[%s10267_s6 + $0xa8] sm:$0xff] }
 0x16e   : > { %9001 = vmatprep.mubr.msk.bf16.mxu1 %vm10199_vm1, %v10198_v2  ;;  %v2041_v55 = vpack.c.bf16 %v2025_v57, %v2024_v32  ;;  %v3658_v40 = vld [vmem:[%s13178_s4 + $0xc8] sm:$0xff]  ;;  %v3663_v57 = vld [vmem:[%s13178_s4 + $0xf0] sm:$0xff] }
 0x16f   : > { %v721_v30 = vpop.f32.mrb[68].mxu0 }
 0x170   : > { %v744_v7 = vadd.f32 %v721_v30, %v10713_v44  ;;  %v903_v11 = vpop.f32.mrb[68].mxu1  ;;  %v8737_v13 = vpop.f32.mrb[69].mxu0  ;;  %v3651_v44 = vld [vmem:[%s13178_s4 + $0x90] sm:$0xff] }
 0x171   : > { %v8775_v15 = vpop.f32.mrb[69].mxu1  ;;  %v724_v17 = vpop.f32.mrb[70].mxu0  ;;  %3671 = vperm.xlu0 %10114, %v3651_v44   ;;  %v3654_v13 = vld [vmem:[%s13178_s4 + $0xa8] sm:$0xff]  ;;  %v2352_v44 = vld [vmem:[%s10267_s6 + $0xb2] sm:$0xff] }
 0x172   : > { %v10896_v20 = vadd.f32 %v903_v11, %v744_v7  ;;  %v745_v48 = vadd.f32 %v724_v17, %v10715_v51  ;;  %v906_v23 = vpop.f32.mrb[70].mxu1  ;;  %v8738_v25 = vpop.f32.mrb[71].mxu0  ;;  %v2348_v51 = vld [vmem:[%s10267_s6 + $0x92] sm:$0xff]  ;;  %v10950_v11 = vpack.c.bf16 %v2351_v63, %v2350_v62 }
 0x173   : > { %v8776_v43 = vpop.f32.mrb[71].mxu1  ;;  %v2366_v45 = vpack.c.bf16 %v2349_v31, %v2348_v51  ;;  %v2026_v25 = vld [vmem:[%s10267_s6 + $0xb0] sm:$0xff] }
 0x174   : > { %v10899_v56 = vadd.f32 %v906_v23, %v745_v48  ;;  %8964 = vmatmul.mubr.msk.bf16.gmra.mrb[176].mxu0 %vm292_vm2, %v1682_v36  ;;  %v3657_v48 = vld [vmem:[%s13178_s4 + $0xc0] sm:$0xff]  ;;  %v3656_v43 = vld [vmem:[%s13178_s4 + $0xb8] sm:$0xff]  ;;  %v3659_v51 = vld [vmem:[%s13178_s4 + $0xd0] sm:$0xff] }
 0x175   : > { %9002 = vmatmul.mubr.msk.bf16.gmra.mrb[176].mxu1 %vm292_vm2, %v2076_v19  ;;  %9007 = vmatprep.mubr.msk.bf16.mxu0 %vm10199_vm1, %v10198_v2 }
 0x176   : > { %9045 = vmatprep.mubr.msk.bf16.mxu1 %vm10199_vm1, %v10198_v2  ;;  %3681 = vperm.xlu0 %10114, %v3653_v49  }
 0x177   : > { %v1021_v18 = vpop.f32.mrb[72].mxu0 }
 0x178   : > { %v1092_v34 = vadd.f32 %v1021_v18, %v10740_v14  ;;  %v1203_v35 = vpop.f32.mrb[72].mxu1  ;;  %v8781_v39 = vpop.f32.mrb[73].mxu0 }
 0x179   : > { %v8819_v5 = vpop.f32.mrb[73].mxu1  ;;  %v1024_v42 = vpop.f32.mrb[74].mxu0 }
 0x17a   : > { %v10924_v46 = vadd.f32 %v1203_v35, %v1092_v34  ;;  %v1093_v14 = vadd.f32 %v1024_v42, %v10745_v61  ;;  %v1206_v12 = vpop.f32.mrb[74].mxu1  ;;  %v8782_v47 = vpop.f32.mrb[75].mxu0  ;;  %v3652_v61 = vld [vmem:[%s13178_s4 + $0x98] sm:$0xff]  ;;  %3691 = vperm.xlu0 %10114, %v3655_v0  }
 0x17b   : > { %v8820_v58 = vpop.f32.mrb[75].mxu1  ;;  %3676 = vperm.xlu1 %10115, %v3652_v61   ;;  %v2029_v47 = vld [vmem:[%s10267_s6 + $0xc8] sm:$0xff] }
 0x17c   : > { %v10929_v54 = vadd.f32 %v1206_v12, %v1093_v14  ;;  %9008 = vmatmul.mubr.msk.bf16.vlgmr.msra.gmra.mrb[180].mxu0 %vm292_vm2, %v2040_v24  ;;  %v10981_v24 = vpack.c.bf16 %v2353_v26, %v2352_v44  ;;  %v3661_v14 = vld [vmem:[%s13178_s4 + $0xe0] sm:$0xff] }
 0x17d   : > { %9046 = vmatmul.mubr.msk.bf16.vlgmr.msra.gmra.mrb[180].mxu1 %vm292_vm2, %v2366_v45  ;;  %9082 = vmatpush3.bf16.msra.mxu0 %v2585_v50  ;;  %v3660_v50 = vld [vmem:[%s13178_s4 + $0xd8] sm:$0xff]  ;;  %v2354_v58 = vld [vmem:[%s10267_s6 + $0xc2] sm:$0xff] }
 0x17e   : > { %9120 = vmatpush3.bf16.msra.mxu1 %v2766_v52  ;;  %9011 = vmatprep.mubr.msk.bf16.mxu0 %vm10199_vm1, %v10198_v2  ;;  %v2355_v52 = vld [vmem:[%s10267_s6 + $0xca] sm:$0xff] }
 0x17f   : > { %v1029_v1 = vpop.f32.mrb[76].mxu0  ;;  %9049 = vmatprep.mubr.msk.bf16.mxu1 %vm10199_vm1, %v10198_v2  ;;  %9157 = vmatprep.subr.bf16.mxu0 %v10198_v2 }
 0x180   : > { %v1094_v21 = vadd.f32 %v1029_v1, %v10766_v28  ;;  %v1211_v6 = vpop.f32.mrb[76].mxu1  ;;  %v8785_v3 = vpop.f32.mrb[77].mxu0  ;;  %9195 = vmatprep.subr.bf16.mxu1 %v10198_v2  ;;  %3686 = vperm.xlu1 %10115, %v3654_v13  }
 0x181   : > { %v8823_v30 = vpop.f32.mrb[77].mxu1  ;;  %v1032_v7 = vpop.f32.mrb[78].mxu0  ;;  %3701 = vperm.xlu0 %10114, %v3657_v48   ;;  %v3662_v3 = vld [vmem:[%s13178_s4 + $0xe8] sm:$0xff]  ;;  %v2356_v48 = vld [vmem:[%s10267_s6 + $0xd2] sm:$0xff] }
 0x182   : > { %v10955_v36 = vadd.f32 %v1211_v6, %v1094_v21  ;;  %v1095_v28 = vadd.f32 %v1032_v7, %v10769_v10  ;;  %v1214_v15 = vpop.f32.mrb[78].mxu1  ;;  %v8786_v17 = vpop.f32.mrb[79].mxu0  ;;  %v2027_v10 = vld [vmem:[%s10267_s6 + $0xb8] sm:$0xff]  ;;  %v11024_v6 = vpack.c.bf16 %v2355_v52, %v2354_v58 }
 0x183   : > { %v8824_v19 = vpop.f32.mrb[79].mxu1  ;;  %v2042_v34 = vpack.c.bf16 %v2027_v10, %v2026_v25  ;;  %v2031_v17 = vld [vmem:[%s10267_s6 + $0xd8] sm:$0xff] }
 0x184   : > { %v10961_v23 = vadd.f32 %v1214_v15, %v1095_v28  ;;  %9012 = vmatmul.mubr.msk.bf16.gmra.mrb[184].mxu0 %vm292_vm2, %v2041_v55  ;;  %3696 = vperm.xlu1 %10115, %v3656_v43   ;;  %v3665_v28 = vld [vmem:[%s13178_s4 + $0x100] sm:$0xff]  ;;  %v3664_v19 = vld [vmem:[%s13178_s4 + $0xf8] sm:$0xff]  ;;  %v3667_v43 = vld [vmem:[%s13178_s4 + $0x110] sm:$0xff] }
 0x185   : > { %9050 = vmatmul.mubr.msk.bf16.gmra.mrb[184].mxu1 %vm292_vm2, %v10950_v11  ;;  %9015 = vmatprep.mubr.msk.bf16.mxu0 %vm10199_vm1, %v10198_v2  ;;  %v2357_v25 = vld [vmem:[%s10267_s6 + $0xda] sm:$0xff] }
 0x186   : > { %9053 = vmatprep.mubr.msk.bf16.mxu1 %vm10199_vm1, %v10198_v2  ;;  %3711 = vperm.xlu0 %10114, %v3659_v51  }
 0x187   : > { %v1037_v27 = vpop.f32.mrb[80].mxu0 }
 0x188   : > { %v1096_v31 = vadd.f32 %v1037_v27, %v10788_v16  ;;  %v1219_v18 = vpop.f32.mrb[80].mxu1  ;;  %v8789_v33 = vpop.f32.mrb[81].mxu0  ;;  %3706 = vperm.xlu1 %10115, %v3658_v40  }
 0x189   : > { %v8827_v35 = vpop.f32.mrb[81].mxu1  ;;  %v1040_v39 = vpop.f32.mrb[82].mxu0  ;;  %v11055_v33 = vpack.c.bf16 %v2357_v25, %v2356_v48 }
 0x18a   : > { %v10986_v49 = vadd.f32 %v1219_v18, %v1096_v31  ;;  %v1097_v5 = vadd.f32 %v1040_v39, %v10791_v8  ;;  %v1222_v42 = vpop.f32.mrb[82].mxu1  ;;  %v8790_v45 = vpop.f32.mrb[83].mxu0  ;;  %v2028_v8 = vld [vmem:[%s10267_s6 + $0xc0] sm:$0xff]  ;;  %3721 = vperm.xlu0 %10114, %v3661_v14  }
 0x18b   : > { %v8828_v16 = vpop.f32.mrb[83].mxu1  ;;  %v2043_v0 = vpack.c.bf16 %v2029_v47, %v2028_v8  ;;  %v2032_v45 = vld [vmem:[%s10267_s6 + $0xe0] sm:$0xff]  ;;  %v2359_v8 = vld [vmem:[%s10267_s6 + $0xea] sm:$0xff] }
 0x18c   : > { %v10992_v12 = vadd.f32 %v1222_v42, %v1097_v5  ;;  %9016 = vmatmul.mubr.msk.bf16.gmra.mrb[188].mxu0 %vm292_vm2, %v2042_v34  ;;  %3716 = vperm.xlu1 %10115, %v3660_v50   ;;  %v3666_v34 = vld [vmem:[%s13178_s4 + $0x108] sm:$0xff] }
 0x18d   : > { %9054 = vmatmul.mubr.msk.bf16.gmra.mrb[188].mxu1 %vm292_vm2, %v10981_v24  ;;  %9019 = vmatprep.mubr.msk.bf16.mxu0 %vm10199_vm1, %v10198_v2  ;;  %v2033_v16 = vld [vmem:[%s10267_s6 + $0xe8] sm:$0xff] }
 0x18e   : > { %9057 = vmatprep.mubr.msk.bf16.mxu1 %vm10199_vm1, %v10198_v2  ;;  %3731 = vperm.xlu0 %10114, %v3663_v57   ;;  %v2358_v14 = vld [vmem:[%s10267_s6 + $0xe2] sm:$0xff] }
 0x18f   : > { %v1045_v32 = vpop.f32.mrb[84].mxu0 }
 0x190   : > { %v1098_v61 = vadd.f32 %v1045_v32, %v10810_v29  ;;  %v1227_v62 = vpop.f32.mrb[84].mxu1  ;;  %v8793_v63 = vpop.f32.mrb[85].mxu0  ;;  %3726 = vperm.xlu1 %10115, %v3662_v3   ;;  %v2045_v32 = vpack.c.bf16 %v2033_v16, %v2032_v45 }
 0x191   : > { %v8831_v1 = vpop.f32.mrb[85].mxu1  ;;  %v1048_v21 = vpop.f32.mrb[86].mxu0 }
 0x192   : > { %v11029_v55 = vadd.f32 %v1227_v62, %v1098_v61  ;;  %v1099_v30 = vadd.f32 %v1048_v21, %v10813_v4  ;;  %v1230_v29 = vpop.f32.mrb[86].mxu1  ;;  %v8794_v7 = vpop.f32.mrb[87].mxu0  ;;  %v2030_v4 = vld [vmem:[%s10267_s6 + $0xd0] sm:$0xff]  ;;  %3741 = vperm.xlu0 %10114, %v3665_v28   ;;  %v11080_v62 = vpack.c.bf16 %v2359_v8, %v2358_v14 }
 0x193   : > { %v8832_v13 = vpop.f32.mrb[87].mxu1  ;;  %v2044_v51 = vpack.c.bf16 %v2031_v17, %v2030_v4  ;;  %v2360_v7 = vld [vmem:[%s10267_s6 + $0xf2] sm:$0xff] }
 0x194   : > { %v11035_v15 = vadd.f32 %v1230_v29, %v1099_v30  ;;  %9020 = vmatmul.mubr.msk.bf16.gmra.mrb[192].mxu0 %vm292_vm2, %v2043_v0  ;;  %3736 = vperm.xlu1 %10115, %v3664_v19   ;;  %v2034_v30 = vld [vmem:[%s10267_s6 + $0xf0] sm:$0xff]  ;;  %v2035_v29 = vld [vmem:[%s10267_s6 + $0xf8] sm:$0xff] }
 0x195   : > { %9058 = vmatmul.mubr.msk.bf16.gmra.mrb[192].mxu1 %vm292_vm2, %v11024_v6  ;;  %9023 = vmatprep.mubr.msk.bf16.mxu0 %vm10199_vm1, %v10198_v2  ;;  %v2046_v19 = vpack.c.bf16 %v2035_v29, %v2034_v30 }
 0x196   : > { %9061 = vmatprep.mubr.msk.bf16.mxu1 %vm10199_vm1, %v10198_v2  ;;  %3751 = vperm.xlu0 %10114, %v3667_v43  }
 0x197   : > { %v1053_v10 = vpop.f32.mrb[88].mxu0 }
 0x198   : > { %v1100_v44 = vadd.f32 %v1053_v10, %v10832_v53  ;;  %v1235_v26 = vpop.f32.mrb[88].mxu1  ;;  %v8797_v27 = vpop.f32.mrb[89].mxu0  ;;  %3746 = vperm.xlu1 %10115, %v3666_v34   ;;  %v2362_v34 = vld [vmem:[%s10267_s6 + $0x102] sm:$0xff] }
 0x199   : > { %v8835_v31 = vpop.f32.mrb[89].mxu1  ;;  %v1056_v18 = vpop.f32.mrb[90].mxu0 }
 0x19a   : > { %v11060_v35 = vadd.f32 %v1235_v26, %v1100_v44  ;;  %v1101_v53 = vadd.f32 %v1056_v18, %v10835_v60  ;;  %v1238_v39 = vpop.f32.mrb[90].mxu1  ;;  %v8798_v40 = vpop.f32.mrb[91].mxu0  ;;  %v3668_v60 = vld [vmem:[%s13178_s4 + $0x118] sm:$0xff]  ;;  %v2037_v18 = vld [vmem:[%s10267_s6 + $0x108] sm:$0xff] }
 0x19b   : > { %v8836_v5 = vpop.f32.mrb[91].mxu1 }
 0x19c   : > { %v11063_v42 = vadd.f32 %v1238_v39, %v1101_v53  ;;  %9024 = vmatmul.mubr.msk.bf16.gmra.mrb[196].mxu0 %vm292_vm2, %v2044_v51  ;;  %3756 = vperm.xlu1 %10115, %v3668_v60  }
 0x19d   : > { %9062 = vmatmul.mubr.msk.bf16.gmra.mrb[196].mxu1 %vm292_vm2, %v11055_v33  ;;  %9027 = vmatprep.mubr.msk.bf16.mxu0 %vm10199_vm1, %v10198_v2 }
 0x19e   : > { %9065 = vmatprep.mubr.msk.bf16.mxu1 %vm10199_vm1, %v10198_v2 }
 0x19f   : > { %v1061_v47 = vpop.f32.mrb[92].mxu0 }
 0x1a0   : > { %v1102_v50 = vadd.f32 %v1061_v47, %v10848_v9  ;;  %v1243_v58 = vpop.f32.mrb[92].mxu1  ;;  %v8801_v52 = vpop.f32.mrb[93].mxu0 }
 0x1a1   : > { %v8839_v57 = vpop.f32.mrb[93].mxu1  ;;  %v1064_v61 = vpop.f32.mrb[94].mxu0 }
 0x1a2   : > { %v11082_v63 = vadd.f32 %v1243_v58, %v1102_v50  ;;  %v1103_v0 = vadd.f32 %v1064_v61, %v10851_v22  ;;  %v1246_v1 = vpop.f32.mrb[94].mxu1  ;;  %v8802_v21 = vpop.f32.mrb[95].mxu0  ;;  %v2361_v22 = vld [vmem:[%s10267_s6 + $0xfa] sm:$0xff]  ;;  %v2364_v61 = vld [vmem:[%s10267_s6 + $0x112] sm:$0xff] }
 0x1a3   : > { %v8840_v3 = vpop.f32.mrb[95].mxu1  ;;  %v11099_v10 = vpack.c.bf16 %v2361_v22, %v2360_v7  ;;  %v2039_v57 = vld [vmem:[%s10267_s6 + $0x118] sm:$0xff] }
 0x1a4   : > { %v11085_v9 = vadd.f32 %v1246_v1, %v1103_v0  ;;  %9028 = vmatmul.mubr.msk.bf16.gmra.mrb[200].mxu0 %vm292_vm2, %v2045_v32 }
 0x1a5   : > { %9066 = vmatmul.mubr.msk.bf16.gmra.mrb[200].mxu1 %vm292_vm2, %v11080_v62  ;;  %9031 = vmatprep.mubr.msk.bf16.mxu0 %vm10199_vm1, %v10198_v2 }
 0x1a6   : > { %9069 = vmatprep.mubr.msk.bf16.mxu1 %vm10199_vm1, %v10198_v2 }
 0x1a7   : > { %v1069_v13 = vpop.f32.mrb[96].mxu0 }
 0x1a8   : > { %v1104_v28 = vadd.f32 %v1069_v13, %v10864_v37  ;;  %v1251_v4 = vpop.f32.mrb[96].mxu1  ;;  %v8805_v17 = vpop.f32.mrb[97].mxu0  ;;  %v2036_v37 = vld [vmem:[%s10267_s6 + $0x100] sm:$0xff] }
 0x1a9   : > { %v8843_v48 = vpop.f32.mrb[97].mxu1  ;;  %v1072_v25 = vpop.f32.mrb[98].mxu0  ;;  %v2047_v45 = vpack.c.bf16 %v2037_v18, %v2036_v37  ;;  %v7816_v37 = vld [vmem:[%s13175_s1 + $0xc] sm:$0x3] }
 0x1aa   : > { %v11101_v43 = vadd.f32 %v1251_v4, %v1104_v28  ;;  %v1105_v44 = vadd.f32 %v1072_v25, %v10867_v41  ;;  %v1254_v26 = vpop.f32.mrb[98].mxu1  ;;  %v8806_v27 = vpop.f32.mrb[99].mxu0  ;;  %v2363_v41 = vld [vmem:[%s10267_s6 + $0x10a] sm:$0xff] }
 0x1ab   : > { %v8844_v51 = vpop.f32.mrb[99].mxu1  ;;  %v11118_v14 = vpack.c.bf16 %v2363_v41, %v2362_v34  ;;  %v2711_v25 = vld [vmem:[%s10267_s6 + $0xab] sm:$0xff] }
 0x1ac   : > { %v11104_v31 = vadd.f32 %v1254_v26, %v1105_v44  ;;  %9032 = vmatmul.mubr.msk.bf16.gmra.mrb[204].mxu0 %vm292_vm2, %v2046_v19 }
 0x1ad   : > { %9070 = vmatmul.mubr.msk.bf16.gmra.mrb[204].mxu1 %vm292_vm2, %v11099_v10  ;;  %9035 = vmatprep.mubr.msk.bf16.mxu0 %vm10199_vm1, %v10198_v2 }
 0x1ae   : > { %9073 = vmatprep.mubr.msk.bf16.mxu1 %vm10199_vm1, %v10198_v2 }
 0x1af   : > { %v1077_v53 = vpop.f32.mrb[100].mxu0 }
 0x1b0   : > { %v1106_v39 = vadd.f32 %v1077_v53, %v10880_v59  ;;  %v1259_v40 = vpop.f32.mrb[100].mxu1  ;;  %v8809_v5 = vpop.f32.mrb[101].mxu0  ;;  %v2038_v59 = vld [vmem:[%s10267_s6 + $0x110] sm:$0xff] }
 0x1b1   : > { %v8847_v16 = vpop.f32.mrb[101].mxu1  ;;  %v1080_v60 = vpop.f32.mrb[102].mxu0  ;;  %v2048_v30 = vpack.c.bf16 %v2039_v57, %v2038_v59 }
 0x1b2   : > { %v11120_v8 = vadd.f32 %v1259_v40, %v1106_v39  ;;  %v1107_v47 = vadd.f32 %v1080_v60, %v10883_v38  ;;  %v1262_v50 = vpop.f32.mrb[102].mxu1  ;;  %v8810_v58 = vpop.f32.mrb[103].mxu0  ;;  %v2365_v38 = vld [vmem:[%s10267_s6 + $0x11a] sm:$0xff]  ;;  %v3128_v16 = vsel %vm320_vm0, %v7816_v37, 0 }
 0x1b3   : > { %v8848_v52 = vpop.f32.mrb[103].mxu1  ;;  %v11137_v22 = vpack.c.bf16 %v2365_v38, %v2364_v61 }
 0x1b4   : > { %v11123_v32 = vadd.f32 %v1262_v50, %v1107_v47  ;;  %9036 = vmatmul.mubr.msk.bf16.gmra.mrb[208].mxu0 %vm292_vm2, %v2047_v45  ;;  %v2713_v47 = vld [vmem:[%s10267_s6 + $0xbb] sm:$0xff] }
 0x1b5   : > { %9074 = vmatmul.mubr.msk.bf16.gmra.mrb[208].mxu1 %vm292_vm2, %v11118_v14  ;;  %9039 = vmatprep.mubr.msk.bf16.mxu0 %vm10199_vm1, %v10198_v2 }
 0x1b6   : > { %9077 = vmatprep.mubr.msk.bf16.mxu1 %vm10199_vm1, %v10198_v2 }
 0x1b7   : > { %v1085_v0 = vpop.f32.mrb[104].mxu0 }
 0x1b8   : > { %v1108_v1 = vadd.f32 %v1085_v0, %v10896_v20  ;;  %v1267_v21 = vpop.f32.mrb[104].mxu1  ;;  %v8813_v3 = vpop.f32.mrb[105].mxu0  ;;  %v2710_v20 = vld [vmem:[%s10267_s6 + $0xa3] sm:$0xff] }
 0x1b9   : > { %v8851_v29 = vpop.f32.mrb[105].mxu1  ;;  %v1088_v7 = vpop.f32.mrb[106].mxu0  ;;  %v2728_v41 = vpack.c.bf16 %v2711_v25, %v2710_v20 }
 0x1ba   : > { %v11139_v13 = vadd.f32 %v1267_v21, %v1108_v1  ;;  %v1109_v28 = vadd.f32 %v1088_v7, %v10899_v56  ;;  %v1270_v4 = vpop.f32.mrb[106].mxu1  ;;  %v8814_v17 = vpop.f32.mrb[107].mxu0  ;;  %v7806_v56 = vld [vmem:[%s13175_s1 + $0xa] sm:$0x3] }
 0x1bb   : > { %v8852_v19 = vpop.f32.mrb[107].mxu1  ;;  %v2947_v45 = vsel %vm320_vm0, %v7806_v56, 0  ;;  %v2715_v29 = vld [vmem:[%s10267_s6 + $0xcb] sm:$0xff] }
 0x1bc   : > { %v11142_v48 = vadd.f32 %v1270_v4, %v1109_v28  ;;  %9040 = vmatmul.mubr.msk.bf16.gmra.mrb[212].mxu0 %vm292_vm2, %v2048_v30 }
 0x1bd   : > { %9078 = vmatmul.mubr.msk.bf16.gmra.mrb[212].mxu1 %vm292_vm2, %v11137_v22  ;;  %9083 = vmatprep.mubr.msk.bf16.mxu0 %vm10199_vm1, %v10198_v2 }
 0x1be   : > { %9121 = vmatprep.mubr.msk.bf16.mxu1 %vm10199_vm1, %v10198_v2 }
 0x1bf   : > { %v1385_v44 = vpop.f32.mrb[108].mxu0 }
 0x1c0   : > { %v1456_v26 = vadd.f32 %v1385_v44, %v10924_v46  ;;  %v1567_v27 = vpop.f32.mrb[108].mxu1  ;;  %v8857_v51 = vpop.f32.mrb[109].mxu0 }
 0x1c1   : > { %v8895_v18 = vpop.f32.mrb[109].mxu1  ;;  %v1388_v34 = vpop.f32.mrb[110].mxu0  ;;  %v2717_v51 = vld [vmem:[%s10267_s6 + $0xdb] sm:$0xff] }
 0x1c2   : > { %v11160_v53 = vadd.f32 %v1567_v27, %v1456_v26  ;;  %v1457_v39 = vadd.f32 %v1388_v34, %v10929_v54  ;;  %v1570_v40 = vpop.f32.mrb[110].mxu1  ;;  %v8858_v5 = vpop.f32.mrb[111].mxu0  ;;  %v2712_v54 = vld [vmem:[%s10267_s6 + $0xb3] sm:$0xff] }
 0x1c3   : > { %v8896_v46 = vpop.f32.mrb[111].mxu1  ;;  %v2729_v61 = vpack.c.bf16 %v2713_v47, %v2712_v54  ;;  %v2719_v47 = vld [vmem:[%s10267_s6 + $0xeb] sm:$0xff] }
 0x1c4   : > { %v11165_v60 = vadd.f32 %v1570_v40, %v1457_v39  ;;  %9084 = vmatmul.mubr.msk.bf16.vlgmr.msra.gmra.mrb[216].mxu0 %vm292_vm2, %v10950_v11 }
 0x1c5   : > { %9122 = vmatmul.mubr.msk.bf16.vlgmr.msra.gmra.mrb[216].mxu1 %vm292_vm2, %v2728_v41  ;;  %9158 = vmatpush3.bf16.msra.mxu0 %v2947_v45 }
 0x1c6   : > { %9196 = vmatpush3.bf16.msra.mxu1 %v3128_v16  ;;  %9087 = vmatprep.mubr.msk.bf16.mxu0 %vm10199_vm1, %v10198_v2 }
 0x1c7   : > { %v1393_v50 = vpop.f32.mrb[112].mxu0  ;;  %9125 = vmatprep.mubr.msk.bf16.mxu1 %vm10199_vm1, %v10198_v2  ;;  %9233 = vmatprep.subr.bf16.mxu0 %v10198_v2 }
 0x1c8   : > { %v1458_v58 = vadd.f32 %v1393_v50, %v10955_v36  ;;  %v1575_v52 = vpop.f32.mrb[112].mxu1  ;;  %v8861_v11 = vpop.f32.mrb[113].mxu0  ;;  %9271 = vmatprep.subr.bf16.mxu1 %v10198_v2  ;;  %v2714_v36 = vld [vmem:[%s10267_s6 + $0xc3] sm:$0xff] }
 0x1c9   : > { %v8899_v59 = vpop.f32.mrb[113].mxu1  ;;  %v1396_v57 = vpop.f32.mrb[114].mxu0 }
 0x1ca   : > { %v11179_v38 = vadd.f32 %v1575_v52, %v1458_v58  ;;  %v1459_v0 = vadd.f32 %v1396_v57, %v10961_v23  ;;  %v1578_v1 = vpop.f32.mrb[114].mxu1  ;;  %v8862_v21 = vpop.f32.mrb[115].mxu0 }
 0x1cb   : > { %v8900_v3 = vpop.f32.mrb[115].mxu1 }
 0x1cc   : > { %v11182_v30 = vadd.f32 %v1578_v1, %v1459_v0  ;;  %9088 = vmatmul.mubr.msk.bf16.gmra.mrb[220].mxu0 %vm292_vm2, %v10981_v24  ;;  %v2730_v24 = vpack.c.bf16 %v2715_v29, %v2714_v36  ;;  %v2721_v36 = vld [vmem:[%s10267_s6 + $0xfb] sm:$0xff] }
 0x1cd   : > { %9126 = vmatmul.mubr.msk.bf16.gmra.mrb[220].mxu1 %vm292_vm2, %v2729_v61  ;;  %9091 = vmatprep.mubr.msk.bf16.mxu0 %vm10199_vm1, %v10198_v2 }
 0x1ce   : > { %9129 = vmatprep.mubr.msk.bf16.mxu1 %vm10199_vm1, %v10198_v2 }
 0x1cf   : > { %v1401_v7 = vpop.f32.mrb[116].mxu0 }
 0x1d0   : > { %v1460_v23 = vadd.f32 %v1401_v7, %v10986_v49  ;;  %v1583_v28 = vpop.f32.mrb[116].mxu1  ;;  %v8865_v4 = vpop.f32.mrb[117].mxu0  ;;  %v2716_v49 = vld [vmem:[%s10267_s6 + $0xd3] sm:$0xff] }
 0x1d1   : > { %v8903_v17 = vpop.f32.mrb[117].mxu1  ;;  %v1404_v19 = vpop.f32.mrb[118].mxu0 }
 0x1d2   : > { %v11194_v20 = vadd.f32 %v1583_v28, %v1460_v23  ;;  %v1461_v25 = vadd.f32 %v1404_v19, %v10992_v12  ;;  %v1586_v44 = vpop.f32.mrb[118].mxu1  ;;  %v8866_v56 = vpop.f32.mrb[119].mxu0 }
 0x1d3   : > { %v8904_v26 = vpop.f32.mrb[119].mxu1 }
 0x1d4   : > { %v11197_v27 = vadd.f32 %v1586_v44, %v1461_v25  ;;  %9092 = vmatmul.mubr.msk.bf16.gmra.mrb[224].mxu0 %vm292_vm2, %v11024_v6  ;;  %v2731_v6 = vpack.c.bf16 %v2717_v51, %v2716_v49  ;;  %v2723_v26 = vld [vmem:[%s10267_s6 + $0x10b] sm:$0xff] }
 0x1d5   : > { %9130 = vmatmul.mubr.msk.bf16.gmra.mrb[224].mxu1 %vm292_vm2, %v2730_v24  ;;  %9095 = vmatprep.mubr.msk.bf16.mxu0 %vm10199_vm1, %v10198_v2 }
 0x1d6   : > { %9133 = vmatprep.mubr.msk.bf16.mxu1 %vm10199_vm1, %v10198_v2 }
 0x1d7   : > { %v1409_v37 = vpop.f32.mrb[120].mxu0 }
 0x1d8   : > { %v1462_v12 = vadd.f32 %v1409_v37, %v11029_v55  ;;  %v1591_v18 = vpop.f32.mrb[120].mxu1  ;;  %v8869_v34 = vpop.f32.mrb[121].mxu0  ;;  %v2718_v55 = vld [vmem:[%s10267_s6 + $0xe3] sm:$0xff] }
 0x1d9   : > { %v8907_v41 = vpop.f32.mrb[121].mxu1  ;;  %v1412_v39 = vpop.f32.mrb[122].mxu0 }
 0x1da   : > { %v11209_v40 = vadd.f32 %v1591_v18, %v1462_v12  ;;  %v1463_v5 = vadd.f32 %v1412_v39, %v11035_v15  ;;  %v1594_v45 = vpop.f32.mrb[122].mxu1  ;;  %v8870_v46 = vpop.f32.mrb[123].mxu0 }
 0x1db   : > { %v8908_v16 = vpop.f32.mrb[123].mxu1  ;;  %v2725_v46 = vld [vmem:[%s10267_s6 + $0x11b] sm:$0xff] }
 0x1dc   : > { %v11212_v54 = vadd.f32 %v1594_v45, %v1463_v5  ;;  %9096 = vmatmul.mubr.msk.bf16.gmra.mrb[228].mxu0 %vm292_vm2, %v11055_v33  ;;  %v2732_v33 = vpack.c.bf16 %v2719_v47, %v2718_v55 }
 0x1dd   : > { %9134 = vmatmul.mubr.msk.bf16.gmra.mrb[228].mxu1 %vm292_vm2, %v2731_v6  ;;  %9099 = vmatprep.mubr.msk.bf16.mxu0 %vm10199_vm1, %v10198_v2 }
 0x1de   : > { %9137 = vmatprep.mubr.msk.bf16.mxu1 %vm10199_vm1, %v10198_v2 }
 0x1df   : > { %v1417_v50 = vpop.f32.mrb[124].mxu0 }
 0x1e0   : > { %v1464_v15 = vadd.f32 %v1417_v50, %v11060_v35  ;;  %v1599_v58 = vpop.f32.mrb[124].mxu1  ;;  %v8873_v52 = vpop.f32.mrb[125].mxu0  ;;  %v2720_v35 = vld [vmem:[%s10267_s6 + $0xf3] sm:$0xff] }
 0x1e1   : > { %v8911_v11 = vpop.f32.mrb[125].mxu1  ;;  %v1420_v59 = vpop.f32.mrb[126].mxu0 }
 0x1e2   : > { %v11224_v57 = vadd.f32 %v1599_v58, %v1464_v15  ;;  %v1465_v61 = vadd.f32 %v1420_v59, %v11063_v42  ;;  %v1602_v0 = vpop.f32.mrb[126].mxu1  ;;  %v8874_v1 = vpop.f32.mrb[127].mxu0 }
 0x1e3   : > { %v8912_v21 = vpop.f32.mrb[127].mxu1  ;;  %v2726_v1 = vld [vmem:[%s10267_s6 + $0x123] sm:$0xff] }
 0x1e4   : > { %v11227_v3 = vadd.f32 %v1602_v0, %v1465_v61  ;;  %9100 = vmatmul.mubr.msk.bf16.gmra.mrb[232].mxu0 %vm292_vm2, %v11080_v62  ;;  %v2733_v62 = vpack.c.bf16 %v2721_v36, %v2720_v35  ;;  %v2546_v0 = vld [vmem:[%s10267_s6 + $0x12a] sm:$0xff] }
 0x1e5   : > { %9138 = vmatmul.mubr.msk.bf16.gmra.mrb[232].mxu1 %vm292_vm2, %v2732_v33  ;;  %9103 = vmatprep.mubr.msk.bf16.mxu0 %vm10199_vm1, %v10198_v2 }
 0x1e6   : > { %9141 = vmatprep.mubr.msk.bf16.mxu1 %vm10199_vm1, %v10198_v2 }
 0x1e7   : > { %v1425_v29 = vpop.f32.mrb[128].mxu0 }
 0x1e8   : > { %v1466_v42 = vadd.f32 %v1425_v29, %v11082_v63  ;;  %v1607_v7 = vpop.f32.mrb[128].mxu1  ;;  %v8877_v23 = vpop.f32.mrb[129].mxu0  ;;  %v2722_v63 = vld [vmem:[%s10267_s6 + $0x103] sm:$0xff] }
 0x1e9   : > { %v8915_v28 = vpop.f32.mrb[129].mxu1  ;;  %v1428_v4 = vpop.f32.mrb[130].mxu0 }
 0x1ea   : > { %v11239_v17 = vadd.f32 %v1607_v7, %v1466_v42  ;;  %v1467_v19 = vadd.f32 %v1428_v4, %v11085_v9  ;;  %v1610_v24 = vpop.f32.mrb[130].mxu1  ;;  %v8878_v25 = vpop.f32.mrb[131].mxu0 }
 0x1eb   : > { %v8916_v44 = vpop.f32.mrb[131].mxu1 }
 0x1ec   : > { %v11242_v56 = vadd.f32 %v1610_v24, %v1467_v19  ;;  %9104 = vmatmul.mubr.msk.bf16.gmra.mrb[236].mxu0 %vm292_vm2, %v11099_v10  ;;  %v2734_v10 = vpack.c.bf16 %v2723_v26, %v2722_v63  ;;  %v2892_v44 = vld [vmem:[%s10267_s6 + $0xac] sm:$0xff]  ;;  %v3072_v63 = vld [vmem:[%s10267_s6 + $0xb4] sm:$0xff]  ;;  %v3073_v26 = vld [vmem:[%s10267_s6 + $0xbc] sm:$0xff] }
 0x1ed   : > { %9142 = vmatmul.mubr.msk.bf16.gmra.mrb[236].mxu1 %vm292_vm2, %v2733_v62  ;;  %9107 = vmatprep.mubr.msk.bf16.mxu0 %vm10199_vm1, %v10198_v2 }
 0x1ee   : > { %9145 = vmatprep.mubr.msk.bf16.mxu1 %vm10199_vm1, %v10198_v2 }
 0x1ef   : > { %v1433_v49 = vpop.f32.mrb[132].mxu0 }
 0x1f0   : > { %v1468_v9 = vadd.f32 %v1433_v49, %v11101_v43  ;;  %v1615_v51 = vpop.f32.mrb[132].mxu1  ;;  %v8881_v37 = vpop.f32.mrb[133].mxu0  ;;  %v2724_v43 = vld [vmem:[%s10267_s6 + $0x113] sm:$0xff] }
 0x1f1   : > { %v8919_v12 = vpop.f32.mrb[133].mxu1  ;;  %v1436_v18 = vpop.f32.mrb[134].mxu0  ;;  %v2735_v15 = vpack.c.bf16 %v2725_v46, %v2724_v43 }
 0x1f2   : > { %v11254_v34 = vadd.f32 %v1615_v51, %v1468_v9  ;;  %v1469_v41 = vadd.f32 %v1436_v18, %v11104_v31  ;;  %v1618_v39 = vpop.f32.mrb[134].mxu1  ;;  %v8882_v6 = vpop.f32.mrb[135].mxu0  ;;  %v11304_v9 = vld [vmem:[%s13177_s3] ss:$0 sm:$0xff]  ;;  %v7826_v51 = vld [vmem:[%s13175_s1 + $0xe] sm:$0x3] }
 0x1f3   : > { %v8920_v5 = vpop.f32.mrb[135].mxu1  ;;  %v1899_v49 = vpop.permute.xlu0 %1898 }
 0x1f4   : > { %v11257_v45 = vadd.f32 %v1618_v39, %v1469_v41  ;;  %9108 = vmatmul.mubr.msk.bf16.gmra.mrb[240].mxu0 %vm292_vm2, %v11118_v14  ;;  %v7836_v41 = vld [vmem:[%s13175_s1 + $0x10] sm:$0x3]  ;;  %v3090_v5 = vpack.c.bf16 %v3073_v26, %v3072_v63 }
 0x1f5   : > { %9146 = vmatmul.mubr.msk.bf16.gmra.mrb[240].mxu1 %vm292_vm2, %v2734_v10  ;;  %9111 = vmatprep.mubr.msk.bf16.mxu0 %vm10199_vm1, %v10198_v2 }
 0x1f6   : > { %9149 = vmatprep.mubr.msk.bf16.mxu1 %vm10199_vm1, %v10198_v2 }
 0x1f7   : > { %v1441_v16 = vpop.f32.mrb[136].mxu0 }
 0x1f8   : > { %v1470_v31 = vadd.f32 %v1441_v16, %v11120_v8  ;;  %v1623_v55 = vpop.f32.mrb[136].mxu1  ;;  %v8885_v47 = vpop.f32.mrb[137].mxu0  ;;  %v2545_v8 = vld [vmem:[%s10267_s6 + $0x122] sm:$0xff] }
 0x1f9   : > { %v8923_v50 = vpop.f32.mrb[137].mxu1  ;;  %v1444_v14 = vpop.f32.mrb[138].mxu0  ;;  %v3490_v47 = vsel %vm320_vm0, %v7836_v41, 0 }
 0x1fa   : > { %v11269_v58 = vadd.f32 %v1623_v55, %v1470_v31  ;;  %v1471_v52 = vadd.f32 %v1444_v14, %v11123_v32  ;;  %v1626_v11 = vpop.f32.mrb[138].mxu1  ;;  %v8886_v59 = vpop.f32.mrb[139].mxu0  ;;  %v2727_v32 = vld [vmem:[%s10267_s6 + $0x12b] sm:$0xff]  ;;  %v3309_v31 = vsel %vm320_vm0, %v7826_v51, 0 }
 0x1fb   : > { %v8924_v33 = vpop.f32.mrb[139].mxu1  ;;  %v2736_v23 = vpack.c.bf16 %v2727_v32, %v2726_v1  ;;  %v3075_v59 = vld [vmem:[%s10267_s6 + $0xcc] sm:$0xff] }
 0x1fc   : > { %v11272_v61 = vadd.f32 %v1626_v11, %v1471_v52  ;;  %9112 = vmatmul.mubr.msk.bf16.gmra.mrb[244].mxu0 %vm292_vm2, %v11137_v22  ;;  %v2555_v22 = vpack.c.bf16 %v2546_v0, %v2545_v8  ;;  %v3074_v11 = vld [vmem:[%s10267_s6 + $0xc4] sm:$0xff]  ;;  %v1909_v8 = vpop.permute.xlu1 %1908 }
 0x1fd   : > { %9150 = vmatmul.mubr.msk.bf16.gmra.mrb[244].mxu1 %vm292_vm2, %v2735_v15  ;;  %9115 = vmatprep.mubr.msk.bf16.mxu0 %vm10199_vm1, %v10198_v2 }
 0x1fe   : > { %9153 = vmatprep.mubr.msk.bf16.mxu1 %vm10199_vm1, %v10198_v2 }
 0x1ff   : > { %v1449_v21 = vpop.f32.mrb[140].mxu0 }
 0x200   : > { %v1472_v35 = vadd.f32 %v1449_v21, %v11139_v13  ;;  %v1631_v36 = vpop.f32.mrb[140].mxu1  ;;  %v8889_v29 = vpop.f32.mrb[141].mxu0  ;;  %v2891_v13 = vld [vmem:[%s10267_s6 + $0xa4] sm:$0xff] }
 0x201   : > { %v8927_v42 = vpop.f32.mrb[141].mxu1  ;;  %v1452_v7 = vpop.f32.mrb[142].mxu0  ;;  %v2909_v10 = vpack.c.bf16 %v2892_v44, %v2891_v13  ;;  %v3091_v29 = vpack.c.bf16 %v3075_v59, %v3074_v11  ;;  %v3077_v44 = vld [vmem:[%s10267_s6 + $0xdc] sm:$0xff] }
 0x202   : > { %v11286_v28 = vadd.f32 %v1631_v36, %v1472_v35  ;;  %v1473_v4 = vadd.f32 %v1452_v7, %v11142_v48  ;;  %v1634_v62 = vpop.f32.mrb[142].mxu1  ;;  %v8890_v19 = vpop.f32.mrb[143].mxu0 }
 0x203   : > { %v8928_v24 = vpop.f32.mrb[143].mxu1  ;;  %v1914_v19 = vpop.permute.xlu1 %1913 }
 0x204   : > { %v11289_v25 = vadd.f32 %v1634_v62, %v1473_v4  ;;  %9116 = vmatmul.mubr.msk.bf16.gmra.mrb[248].mxu0 %vm292_vm2, %v2555_v22 }
 0x205   : > { %9154 = vmatmul.mubr.msk.bf16.gmra.mrb[248].mxu1 %vm292_vm2, %v2736_v23  ;;  %9159 = vmatprep.mubr.msk.bf16.mxu0 %vm10199_vm1, %v10198_v2 }
 0x206   : > { %9197 = vmatprep.mubr.msk.bf16.mxu1 %vm10199_vm1, %v10198_v2 }
 0x207   : > { %v1749_v48 = vpop.f32.mrb[144].mxu0 }
 0x208   : > { %v1820_v37 = vadd.f32 %v1749_v48, %v11160_v53  ;;  %v11310_v12 = vpop.f32.mrb[144].mxu1  ;;  %v8933_v18 = vpop.f32.mrb[145].mxu0 }
 0x209   : > { %v8971_v39 = vpop.f32.mrb[145].mxu1  ;;  %v1752_v6 = vpop.f32.mrb[146].mxu0 }
 0x20a   : > { %v1821_v43 = vadd.f32 %v1752_v6, %v11165_v60  ;;  %v11316_v46 = vpop.f32.mrb[146].mxu1  ;;  %v8934_v16 = vpop.f32.mrb[147].mxu0  ;;  %v1842_v53 = vadd.f32 %v11304_v9, %v1820_v37 }
 0x20b   : > { %v8972_v55 = vpop.f32.mrb[147].mxu1  ;;  %v1904_v60 = vpop.permute.xlu0 %1903 }
 0x20c   : > { %v1860_v50 = vmax.f32 %v1842_v53, 0.0  ;;  %9160 = vmatmul.mubr.msk.bf16.vlgmr.msra.gmra.mrb[252].mxu0 %vm292_vm2, %v2909_v10  ;;  %v1843_v14 = vadd.f32 %v11304_v9, %v1821_v43 }
 0x20d   : > { %9198 = vmatmul.mubr.msk.bf16.vlgmr.msra.gmra.mrb[252].mxu1 %vm292_vm2, %v3090_v5  ;;  %9234 = vmatpush3.bf16.msra.mxu0 %v3309_v31  ;;  %v1924_v31 = vpop.permute.xlu1 %1923 }
 0x20e   : > { %v1986_v15 = vmul.f32 %v1899_v49, %v1860_v50  ;;  %9272 = vmatpush3.bf16.msra.mxu1 %v3490_v47  ;;  %v1861_v52 = vmax.f32 %v1843_v14, 0.0  ;;  %9163 = vmatprep.mubr.msk.bf16.mxu0 %vm10199_vm1, %v10198_v2  ;;  %v3078_v47 = vld [vmem:[%s10267_s6 + $0xe4] sm:$0xff]  ;;  %v3079_v50 = vld [vmem:[%s10267_s6 + $0xec] sm:$0xff] }
 0x20f   : > { %v1757_v33 = vpop.f32.mrb[148].mxu0  ;;  %9201 = vmatprep.mubr.msk.bf16.mxu1 %vm10199_vm1, %v10198_v2  ;;  %9309 = vmatprep.subr.bf16.mxu0 %v10198_v2  ;;  %v1919_v16 = vpop.permute.xlu0 %1918 }
 0x210   : > { %2004 = vst.msk [vmem:[#allocation2 + $0x18] sm:$0xff] %vm228_vm3, %v1986_v15  ;;  %v1987_v0 = vmul.f32 %v1904_v60, %v1861_v52  ;;  %v1822_v1 = vadd.f32 %v1757_v33, %v11179_v38  ;;  %v11333_v32 = vpop.f32.mrb[148].mxu1  ;;  %v8937_v21 = vpop.f32.mrb[149].mxu0  ;;  %9353 = vmatprep.subr.bf16.mxu1 %v10198_v2 }
 0x211   : > { %v8975_v35 = vpop.f32.mrb[149].mxu1  ;;  %v1760_v36 = vpop.f32.mrb[150].mxu0 }
 0x212   : > { %2005 = vst.msk [vmem:[#allocation2 + $0x20] sm:$0xff] %vm228_vm3, %v1987_v0  ;;  %v1823_v22 = vadd.f32 %v1760_v36, %v11182_v30  ;;  %v11338_v42 = vpop.f32.mrb[150].mxu1  ;;  %v8938_v7 = vpop.f32.mrb[151].mxu0  ;;  %v1844_v23 = vadd.f32 %v11304_v9, %v1822_v1  ;;  %v3076_v30 = vld [vmem:[%s10267_s6 + $0xd4] sm:$0xff] }
 0x213   : > { %v8976_v38 = vpop.f32.mrb[151].mxu1  ;;  %v3092_v10 = vpack.c.bf16 %v3077_v44, %v3076_v30  ;;  %v1934_v7 = vpop.permute.xlu1 %1933 }
 0x214   : > { %v1862_v4 = vmax.f32 %v1844_v23, 0.0  ;;  %9164 = vmatmul.mubr.msk.bf16.gmra.mrb[0].mxu0 %vm292_vm2, %v3090_v5  ;;  %v1845_v62 = vadd.f32 %v11304_v9, %v1823_v22  ;;  %v3080_v38 = vld [vmem:[%s10267_s6 + $0xf4] sm:$0xff] }
 0x215   : > { %9202 = vmatmul.mubr.msk.bf16.gmra.mrb[0].mxu1 %vm292_vm2, %v3091_v29  ;;  %9167 = vmatprep.mubr.msk.bf16.mxu0 %vm10199_vm1, %v10198_v2 }
 0x216   : > { %v1988_v24 = vmul.f32 %v1909_v8, %v1862_v4  ;;  %v1863_v13 = vmax.f32 %v1845_v62, 0.0  ;;  %9205 = vmatprep.mubr.msk.bf16.mxu1 %vm10199_vm1, %v10198_v2  ;;  %v3093_v8 = vpack.c.bf16 %v3079_v50, %v3078_v47  ;;  %v3081_v4 = vld [vmem:[%s10267_s6 + $0xfc] sm:$0xff] }
 0x217   : > { %v1765_v63 = vpop.f32.mrb[152].mxu0 }
 0x218   : > { %2006 = vst.msk [vmem:[#allocation2 + $0x28] sm:$0xff] %vm228_vm3, %v1988_v24  ;;  %v1989_v26 = vmul.f32 %v1914_v19, %v1863_v13  ;;  %v1824_v48 = vadd.f32 %v1765_v63, %v11194_v20  ;;  %v11352_v49 = vpop.f32.mrb[152].mxu1  ;;  %v8941_v51 = vpop.f32.mrb[153].mxu0 }
 0x219   : > { %v8979_v37 = vpop.f32.mrb[153].mxu1  ;;  %v1768_v18 = vpop.f32.mrb[154].mxu0 }
 0x21a   : > { %2007 = vst.msk [vmem:[#allocation2 + $0x30] sm:$0xff] %vm228_vm3, %v1989_v26  ;;  %v1825_v41 = vadd.f32 %v1768_v18, %v11197_v27  ;;  %v11356_v39 = vpop.f32.mrb[154].mxu1  ;;  %v8942_v6 = vpop.f32.mrb[155].mxu0  ;;  %v1846_v5 = vadd.f32 %v11304_v9, %v1824_v48  ;;  %v3094_v26 = vpack.c.bf16 %v3081_v4, %v3080_v38 }
 0x21b   : > { %v8980_v43 = vpop.f32.mrb[155].mxu1 }
 0x21c   : > { %9168 = vmatmul.mubr.msk.bf16.gmra.mrb[4].mxu0 %vm292_vm2, %v3091_v29  ;;  %v1864_v20 = vmax.f32 %v1846_v5, 0.0  ;;  %v1847_v53 = vadd.f32 %v11304_v9, %v1825_v41  ;;  %v1929_v29 = vpop.permute.xlu0 %1928  ;;  %v1944_v5 = vpop.permute.xlu1 %1943 }
 0x21d   : > { %9206 = vmatmul.mubr.msk.bf16.gmra.mrb[4].mxu1 %vm292_vm2, %v3092_v10  ;;  %9171 = vmatprep.mubr.msk.bf16.mxu0 %vm10199_vm1, %v10198_v2 }
 0x21e   : > { %v1990_v27 = vmul.f32 %v1919_v16, %v1864_v20  ;;  %v1865_v55 = vmax.f32 %v1847_v53, 0.0  ;;  %9209 = vmatprep.mubr.msk.bf16.mxu1 %vm10199_vm1, %v10198_v2  ;;  %v3083_v16 = vld [vmem:[%s10267_s6 + $0x10c] sm:$0xff] }
 0x21f   : > { %v1773_v14 = vpop.f32.mrb[156].mxu0 }
 0x220   : > { %2008 = vst.msk [vmem:[#allocation2 + $0x38] sm:$0xff] %vm228_vm3, %v1990_v27  ;;  %v1991_v60 = vmul.f32 %v1924_v31, %v1865_v55  ;;  %v1826_v15 = vadd.f32 %v1773_v14, %v11209_v40  ;;  %v11370_v52 = vpop.f32.mrb[156].mxu1  ;;  %v8945_v11 = vpop.f32.mrb[157].mxu0 }
 0x221   : > { %v8983_v59 = vpop.f32.mrb[157].mxu1  ;;  %v1776_v33 = vpop.f32.mrb[158].mxu0 }
 0x222   : > { %2009 = vst.msk [vmem:[#allocation2 + $0x40] sm:$0xff] %vm228_vm3, %v1991_v60  ;;  %v1827_v0 = vadd.f32 %v1776_v33, %v11212_v54  ;;  %v11374_v1 = vpop.f32.mrb[158].mxu1  ;;  %v8946_v21 = vpop.f32.mrb[159].mxu0  ;;  %v1848_v35 = vadd.f32 %v11304_v9, %v1826_v15 }
 0x223   : > { %v8984_v36 = vpop.f32.mrb[159].mxu1  ;;  %v1939_v41 = vpop.permute.xlu0 %1938 }
 0x224   : > { %9172 = vmatmul.mubr.msk.bf16.gmra.mrb[8].mxu0 %vm292_vm2, %v3092_v10  ;;  %v1866_v40 = vmax.f32 %v1848_v35, 0.0  ;;  %v1849_v22 = vadd.f32 %v11304_v9, %v1827_v0  ;;  %v1954_v35 = vpop.permute.xlu1 %1953 }
 0x225   : > { %9210 = vmatmul.mubr.msk.bf16.gmra.mrb[8].mxu1 %vm292_vm2, %v3093_v8  ;;  %9175 = vmatprep.mubr.msk.bf16.mxu0 %vm10199_vm1, %v10198_v2 }
 0x226   : > { %v1992_v54 = vmul.f32 %v1929_v29, %v1866_v40  ;;  %v1867_v23 = vmax.f32 %v1849_v22, 0.0  ;;  %9213 = vmatprep.mubr.msk.bf16.mxu1 %vm10199_vm1, %v10198_v2  ;;  %v3084_v29 = vld [vmem:[%s10267_s6 + $0x114] sm:$0xff]  ;;  %v3085_v40 = vld [vmem:[%s10267_s6 + $0x11c] sm:$0xff] }
 0x227   : > { %v1781_v62 = vpop.f32.mrb[160].mxu0 }
 0x228   : > { %2010 = vst.msk [vmem:[#allocation2 + $0x48] sm:$0xff] %vm228_vm3, %v1992_v54  ;;  %v1993_v19 = vmul.f32 %v1934_v7, %v1867_v23  ;;  %v11387_v24 = vpop.f32.mrb[160].mxu1  ;;  %v8949_v13 = vpop.f32.mrb[161].mxu0  ;;  %v1828_v30 = vadd.f32 %v1781_v62, %v11224_v57 }
 0x229   : > { %v8987_v44 = vpop.f32.mrb[161].mxu1  ;;  %v1784_v63 = vpop.f32.mrb[162].mxu0 }
 0x22a   : > { %2011 = vst.msk [vmem:[#allocation2 + $0x50] sm:$0xff] %vm228_vm3, %v1993_v19  ;;  %v1829_v48 = vadd.f32 %v1784_v63, %v11227_v3  ;;  %v11392_v51 = vpop.f32.mrb[162].mxu1  ;;  %v8950_v37 = vpop.f32.mrb[163].mxu0  ;;  %v1850_v10 = vadd.f32 %v11304_v9, %v1828_v30  ;;  %v3082_v3 = vld [vmem:[%s10267_s6 + $0x104] sm:$0xff]  ;;  %v3096_v19 = vpack.c.bf16 %v3085_v40, %v3084_v29 }
 0x22b   : > { %v8988_v18 = vpop.f32.mrb[163].mxu1  ;;  %v3095_v60 = vpack.c.bf16 %v3083_v16, %v3082_v3 }
 0x22c   : > { %9176 = vmatmul.mubr.msk.bf16.gmra.mrb[12].mxu0 %vm292_vm2, %v3093_v8  ;;  %v1851_v57 = vadd.f32 %v11304_v9, %v1829_v48  ;;  %v1868_v6 = vmax.f32 %v1850_v10, 0.0  ;;  %v1949_v8 = vpop.permute.xlu0 %1948  ;;  %v1964_v18 = vpop.permute.xlu1 %1963 }
 0x22d   : > { %9214 = vmatmul.mubr.msk.bf16.gmra.mrb[12].mxu1 %vm292_vm2, %v3094_v26  ;;  %9179 = vmatprep.mubr.msk.bf16.mxu0 %vm10199_vm1, %v10198_v2 }
 0x22e   : > { %v1869_v43 = vmax.f32 %v1851_v57, 0.0  ;;  %9217 = vmatprep.mubr.msk.bf16.mxu1 %vm10199_vm1, %v10198_v2  ;;  %v1994_v20 = vmul.f32 %v1939_v41, %v1868_v6  ;;  %v3086_v41 = vld [vmem:[%s10267_s6 + $0x124] sm:$0xff]  ;;  %v3087_v57 = vld [vmem:[%s10267_s6 + $0x12c] sm:$0xff] }
 0x22f   : > { %v1789_v53 = vpop.f32.mrb[164].mxu0 }
 0x230   : > { %v1995_v31 = vmul.f32 %v1944_v5, %v1869_v43  ;;  %v1830_v27 = vadd.f32 %v1789_v53, %v11239_v17  ;;  %v11405_v55 = vpop.f32.mrb[164].mxu1  ;;  %v8953_v47 = vpop.f32.mrb[165].mxu0  ;;  %2012 = vst.msk [vmem:[#allocation2 + $0x58] sm:$0xff] %vm228_vm3, %v1994_v20 }
 0x231   : > { %v8991_v50 = vpop.f32.mrb[165].mxu1  ;;  %v1792_v14 = vpop.f32.mrb[166].mxu0 }
 0x232   : > { %2013 = vst.msk [vmem:[#allocation2 + $0x60] sm:$0xff] %vm228_vm3, %v1995_v31  ;;  %v1831_v15 = vadd.f32 %v1792_v14, %v11242_v56  ;;  %v11410_v11 = vpop.f32.mrb[166].mxu1  ;;  %v8954_v59 = vpop.f32.mrb[167].mxu0  ;;  %v1852_v33 = vadd.f32 %v11304_v9, %v1830_v27  ;;  %v3097_v31 = vpack.c.bf16 %v3087_v57, %v3086_v41 }
 0x233   : > { %v8992_v17 = vpop.f32.mrb[167].mxu1  ;;  %v1959_v48 = vpop.permute.xlu0 %1958 }
 0x234   : > { %9180 = vmatmul.mubr.msk.bf16.gmra.mrb[16].mxu0 %vm292_vm2, %v3094_v26  ;;  %v1870_v0 = vmax.f32 %v1852_v33, 0.0  ;;  %v1853_v21 = vadd.f32 %v11304_v9, %v1831_v15  ;;  %v1974_v33 = vpop.permute.xlu1 %1973 }
 0x235   : > { %9218 = vmatmul.mubr.msk.bf16.gmra.mrb[16].mxu1 %vm292_vm2, %v3095_v60  ;;  %9183 = vmatprep.mubr.msk.bf16.mxu0 %vm10199_vm1, %v10198_v2 }
 0x236   : > { %v1996_v56 = vmul.f32 %v1949_v8, %v1870_v0  ;;  %v1871_v36 = vmax.f32 %v1853_v21, 0.0  ;;  %9221 = vmatprep.mubr.msk.bf16.mxu1 %vm10199_vm1, %v10198_v2  ;;  %v3088_v8 = vld [vmem:[%s10267_s6 + $0x134] sm:$0xff]  ;;  %v3089_v0 = vld [vmem:[%s10267_s6 + $0x13c] sm:$0xff] }
 0x237   : > { %v1797_v22 = vpop.f32.mrb[168].mxu0  ;;  %v1969_v15 = vpop.permute.xlu0 %1968 }
 0x238   : > { %2014 = vst.msk [vmem:[#allocation2 + $0x68] sm:$0xff] %vm228_vm3, %v1996_v56  ;;  %v1997_v7 = vmul.f32 %v1954_v35, %v1871_v36  ;;  %v1832_v54 = vadd.f32 %v1797_v22, %v11254_v34  ;;  %v11424_v23 = vpop.f32.mrb[168].mxu1  ;;  %v8957_v38 = vpop.f32.mrb[169].mxu0 }
 0x239   : > { %v8995_v4 = vpop.f32.mrb[169].mxu1  ;;  %v1800_v62 = vpop.f32.mrb[170].mxu0 }
 0x23a   : > { %2015 = vst.msk [vmem:[#allocation2 + $0x70] sm:$0xff] %vm228_vm3, %v1997_v7  ;;  %v1833_v13 = vadd.f32 %v1800_v62, %v11257_v45  ;;  %v11428_v30 = vpop.f32.mrb[170].mxu1  ;;  %v8958_v44 = vpop.f32.mrb[171].mxu0  ;;  %v1854_v63 = vadd.f32 %v11304_v9, %v1832_v54  ;;  %v3098_v7 = vpack.c.bf16 %v3089_v0, %v3088_v8 }
 0x23b   : > { %v8996_v26 = vpop.f32.mrb[171].mxu1 }
 0x23c   : > { %9184 = vmatmul.mubr.msk.bf16.gmra.mrb[20].mxu0 %vm292_vm2, %v3095_v60  ;;  %v1872_v34 = vmax.f32 %v1854_v63, 0.0  ;;  %v1855_v37 = vadd.f32 %v11304_v9, %v1833_v13  ;;  %v1984_v63 = vpop.permute.xlu1 %1983  ;;  %v3254_v26 = vld [vmem:[%s10267_s6 + $0xbd] sm:$0xff] }
 0x23d   : > { %9222 = vmatmul.mubr.msk.bf16.gmra.mrb[20].mxu1 %vm292_vm2, %v3096_v19  ;;  %9187 = vmatprep.mubr.msk.bf16.mxu0 %vm10199_vm1, %v10198_v2 }
 0x23e   : > { %v1998_v45 = vmul.f32 %v1959_v48, %v1872_v34  ;;  %v1873_v10 = vmax.f32 %v1855_v37, 0.0  ;;  %9225 = vmatprep.mubr.msk.bf16.mxu1 %vm10199_vm1, %v10198_v2  ;;  %v3434_v37 = vld [vmem:[%s10267_s6 + $0xb6] sm:$0xff] }
 0x23f   : > { %v1805_v6 = vpop.f32.mrb[172].mxu0 }
 0x240   : > { %2016 = vst.msk [vmem:[#allocation2 + $0x78] sm:$0xff] %vm228_vm3, %v1998_v45  ;;  %v1999_v5 = vmul.f32 %v1964_v18, %v1873_v10  ;;  %v1834_v43 = vadd.f32 %v1805_v6, %v11269_v58  ;;  %v11442_v3 = vpop.f32.mrb[172].mxu1  ;;  %v8961_v16 = vpop.f32.mrb[173].mxu0  ;;  %v3435_v18 = vld [vmem:[%s10267_s6 + $0xbe] sm:$0xff] }
 0x241   : > { %v8999_v20 = vpop.f32.mrb[173].mxu1  ;;  %v1808_v53 = vpop.f32.mrb[174].mxu0  ;;  %v3452_v16 = vpack.c.bf16 %v3435_v18, %v3434_v37 }
 0x242   : > { %2017 = vst.msk [vmem:[#allocation2 + $0x80] sm:$0xff] %vm228_vm3, %v1999_v5  ;;  %v1835_v27 = vadd.f32 %v1808_v53, %v11272_v61  ;;  %v11446_v47 = vpop.f32.mrb[174].mxu1  ;;  %v8962_v50 = vpop.f32.mrb[175].mxu0  ;;  %v1856_v14 = vadd.f32 %v11304_v9, %v1834_v43  ;;  %v10116_v20 = vld [vmem:[%s13176_s2 + $0x20] sm:$0xff]  }
 0x243   : > { %v9000_v60 = vpop.f32.mrb[175].mxu1  ;;  %v10117_v50 = vld [vmem:[%s13176_s2] sm:$0xff]  }
 0x244   : > { %9188 = vmatmul.mubr.msk.bf16.gmra.mrb[24].mxu0 %vm292_vm2, %v3096_v19  ;;  %v1874_v58 = vmax.f32 %v1856_v14, 0.0  ;;  %v1857_v59 = vadd.f32 %v11304_v9, %v1835_v27  ;;  %v1979_v19 = vpop.permute.xlu0 %1978 }
 0x245   : > { %9226 = vmatmul.mubr.msk.bf16.gmra.mrb[24].mxu1 %vm292_vm2, %v3097_v31  ;;  %9191 = vmatprep.mubr.msk.bf16.mxu0 %vm10199_vm1, %v10198_v2 }
 0x246   : > { %v2000_v61 = vmul.f32 %v1969_v15, %v1874_v58  ;;  %v1875_v17 = vmax.f32 %v1857_v59, 0.0  ;;  %9229 = vmatprep.mubr.msk.bf16.mxu1 %vm10199_vm1, %v10198_v2  ;;  %v3255_v15 = vld [vmem:[%s10267_s6 + $0xc5] sm:$0xff]  ;;  %v3256_v58 = vld [vmem:[%s10267_s6 + $0xcd] sm:$0xff] }
 0x247   : > { %v1813_v21 = vpop.f32.mrb[176].mxu0  ;;  %v3436_v59 = vld [vmem:[%s10267_s6 + $0xc6] sm:$0xff] }
 0x248   : > { %2018 = vst.msk [vmem:[#allocation2 + $0x88] sm:$0xff] %vm228_vm3, %v2000_v61  ;;  %v2001_v35 = vmul.f32 %v1974_v33, %v1875_v17  ;;  %v1836_v56 = vadd.f32 %v1813_v21, %v11286_v28  ;;  %v11460_v36 = vpop.f32.mrb[176].mxu1  ;;  %v8965_v29 = vpop.f32.mrb[177].mxu0  ;;  %v3437_v33 = vld [vmem:[%s10267_s6 + $0xce] sm:$0xff] }
 0x249   : > { %v9003_v40 = vpop.f32.mrb[177].mxu1  ;;  %v1816_v22 = vpop.f32.mrb[178].mxu0  ;;  %v10119_v61 = vld [vmem:[%s13176_s2 + $0x8] sm:$0xff]  }
 0x24a   : > { %2019 = vst.msk [vmem:[#allocation2 + $0x90] sm:$0xff] %vm228_vm3, %v2001_v35  ;;  %v1837_v54 = vadd.f32 %v1816_v22, %v11289_v25  ;;  %v11464_v38 = vpop.f32.mrb[178].mxu1  ;;  %v8966_v4 = vpop.f32.mrb[179].mxu0  ;;  %v1858_v62 = vadd.f32 %v11304_v9, %v1836_v56  ;;  %v3253_v25 = vld [vmem:[%s10267_s6 + $0xb5] sm:$0xff]  ;;  %v3272_v35 = vpack.c.bf16 %v3256_v58, %v3255_v15  ;;  %v3453_v40 = vpack.c.bf16 %v3437_v33, %v3436_v59 }
 0x24b   : > { %v9004_v28 = vpop.f32.mrb[179].mxu1  ;;  %v3271_v6 = vpack.c.bf16 %v3254_v26, %v3253_v25  ;;  %v10122_v25 = vld [vmem:[%s13176_s2 + $0x38] sm:$0xff]  }
 0x24c   : > { %9192 = vmatmul.mubr.msk.bf16.gmra.mrb[28].mxu0 %vm292_vm2, %v3097_v31  ;;  %v1876_v13 = vmax.f32 %v1858_v62, 0.0  ;;  %v1859_v44 = vadd.f32 %v11304_v9, %v1837_v54  ;;  %v10121_v28 = vld [vmem:[%s13176_s2 + $0x10] sm:$0xff]  }
 0x24d   : > { %9230 = vmatmul.mubr.msk.bf16.gmra.mrb[28].mxu1 %vm292_vm2, %v3098_v7  ;;  %9235 = vmatprep.mubr.msk.bf16.mxu0 %vm10199_vm1, %v10198_v2 }
 0x24e   : > { %v2002_v48 = vmul.f32 %v1979_v19, %v1876_v13  ;;  %v1877_v34 = vmax.f32 %v1859_v44, 0.0  ;;  %9273 = vmatprep.mubr.msk.bf16.mxu1 %vm10199_vm1, %v10198_v2  ;;  %v3257_v13 = vld [vmem:[%s10267_s6 + $0xd5] sm:$0xff] }
 0x24f   : > { %v2277_v45 = vpop.f32.mrb[180].mxu0  ;;  %v3438_v44 = vld [vmem:[%s10267_s6 + $0xd6] sm:$0xff] }
 0x250   : > { %2020 = vst.msk [vmem:[#allocation2 + $0x98] sm:$0xff] %vm228_vm3, %v2002_v48  ;;  %v2003_v10 = vmul.f32 %v1984_v63, %v1877_v34  ;;  %v2278_v9 = vadd.f32 %v2277_v45, %v11310_v12  ;;  %v2440_v41 = vpop.f32.mrb[180].mxu1  ;;  %v9009_v57 = vpop.f32.mrb[181].mxu0  ;;  %v3439_v63 = vld [vmem:[%s10267_s6 + $0xde] sm:$0xff] }
 0x251   : > { %v9047_v5 = vpop.f32.mrb[181].mxu1  ;;  %v2280_v43 = vpop.f32.mrb[182].mxu0  ;;  %v10123_v48 = vld [vmem:[%s13176_s2 + $0x18] sm:$0xff]  }
 0x252   : > { %2021 = vst.msk [vmem:[#allocation2 + $0xa0] sm:$0xff] %vm228_vm3, %v2003_v10  ;;  %v11484_v53 = vadd.f32 %v2440_v41, %v2278_v9  ;;  %v2281_v12 = vadd.f32 %v2280_v43, %v11316_v46  ;;  %v2443_v31 = vpop.f32.mrb[182].mxu1  ;;  %v9010_v27 = vpop.f32.mrb[183].mxu0  ;;  %v10118_v46 = vld [vmem:[%s13176_s2 + $0x28] sm:$0xff]   ;;  %v3454_v41 = vpack.c.bf16 %v3439_v63, %v3438_v44 }
 0x253   : > { %v9048_v14 = vpop.f32.mrb[183].mxu1 }
 0x254   : > { %v11490_v60 = vadd.f32 %v2443_v31, %v2281_v12  ;;  %9236 = vmatmul.mubr.msk.bf16.vlgmr.msra.gmra.mrb[32].mxu0 %vm292_vm2, %v3271_v6  ;;  %v3440_v12 = vld [vmem:[%s10267_s6 + $0xe6] sm:$0xff]  ;;  %v3441_v31 = vld [vmem:[%s10267_s6 + $0xee] sm:$0xff] }
 0x255   : > { %9274 = vmatmul.mubr.msk.bf16.vlgmr.msra.gmra.mrb[32].mxu1 %vm292_vm2, %v3452_v16  ;;  %9310 = vmatpush3.bf16.msra.mxu0 %v10116_v20  ;;  %v3260_v20 = vld [vmem:[%s10267_s6 + $0xed] sm:$0xff]  ;;  %v3455_v33 = vpack.c.bf16 %v3441_v31, %v3440_v12 }
 0x256   : > { %9354 = vmatpush3.bf16.msra.mxu1 %v10117_v50  ;;  %9239 = vmatprep.mubr.msk.bf16.mxu0 %vm10199_vm1, %v10198_v2 }
 0x257   : > { %v2285_v17 = vpop.f32.mrb[184].mxu0  ;;  %9277 = vmatprep.mubr.msk.bf16.mxu1 %vm10199_vm1, %v10198_v2  ;;  %9311 = vmatprep.subr.bf16.mxu0 %v10198_v2 }
 0x258   : > { %v2286_v8 = vadd.f32 %v2285_v17, %v11333_v32  ;;  %v2448_v0 = vpop.f32.mrb[184].mxu1  ;;  %v9013_v21 = vpop.f32.mrb[185].mxu0  ;;  %9355 = vmatprep.subr.bf16.mxu1 %v10198_v2  ;;  %v10120_v32 = vld [vmem:[%s13176_s2 + $0x30] sm:$0xff]  }
 0x259   : > { %v9051_v56 = vpop.f32.mrb[185].mxu1  ;;  %v2288_v29 = vpop.f32.mrb[186].mxu0  ;;  %9312 = vmatpush3.bf16.msra.mxu0 %v10118_v46 }
 0x25a   : > { %v11511_v22 = vadd.f32 %v2448_v0, %v2286_v8  ;;  %v2451_v7 = vpop.f32.mrb[186].mxu1  ;;  %v9014_v54 = vpop.f32.mrb[187].mxu0  ;;  %9356 = vmatpush3.bf16.msra.mxu1 %v10119_v61  ;;  %v2289_v4 = vadd.f32 %v2288_v29, %v11338_v42  ;;  %9313 = vmatprep.subr.bf16.mxu0 %v10198_v2  ;;  %v3258_v42 = vld [vmem:[%s10267_s6 + $0xdd] sm:$0xff] }
 0x25b   : > { %v9052_v62 = vpop.f32.mrb[187].mxu1  ;;  %9357 = vmatprep.subr.bf16.mxu1 %v10198_v2  ;;  %v3273_v45 = vpack.c.bf16 %v3258_v42, %v3257_v13  ;;  %v3262_v56 = vld [vmem:[%s10267_s6 + $0xfd] sm:$0xff] }
 0x25c   : > { %9240 = vmatmul.mubr.msk.bf16.gmra.mrb[36].mxu0 %vm292_vm2, %v3272_v35  ;;  %v11523_v19 = vadd.f32 %v2451_v7, %v2289_v4  ;;  %v3442_v29 = vld [vmem:[%s10267_s6 + $0xf6] sm:$0xff] }
 0x25d   : > { %9278 = vmatmul.mubr.msk.bf16.gmra.mrb[36].mxu1 %vm292_vm2, %v3453_v40  ;;  %9243 = vmatprep.mubr.msk.bf16.mxu0 %vm10199_vm1, %v10198_v2  ;;  %v3443_v40 = vld [vmem:[%s10267_s6 + $0xfe] sm:$0xff] }
 0x25e   : > { %9281 = vmatprep.mubr.msk.bf16.mxu1 %vm10199_vm1, %v10198_v2  ;;  %9314 = vmatpush3.bf16.msra.mxu0 %v10120_v32  ;;  %v3456_v13 = vpack.c.bf16 %v3443_v40, %v3442_v29 }
 0x25f   : > { %v2293_v26 = vpop.f32.mrb[188].mxu0  ;;  %9358 = vmatpush3.bf16.msra.mxu1 %v10121_v28  ;;  %9315 = vmatprep.subr.bf16.mxu0 %v10198_v2 }
 0x260   : > { %v2294_v34 = vadd.f32 %v2293_v26, %v11352_v49  ;;  %v2456_v37 = vpop.f32.mrb[188].mxu1  ;;  %v9017_v18 = vpop.f32.mrb[189].mxu0  ;;  %9359 = vmatprep.subr.bf16.mxu1 %v10198_v2 }
 0x261   : > { %v9055_v10 = vpop.f32.mrb[189].mxu1  ;;  %v2296_v9 = vpop.f32.mrb[190].mxu0  ;;  %v3445_v18 = vld [vmem:[%s10267_s6 + $0x10e] sm:$0xff] }
 0x262   : > { %v11543_v57 = vadd.f32 %v2456_v37, %v2294_v34  ;;  %v2297_v6 = vadd.f32 %v2296_v9, %v11356_v39  ;;  %v2459_v5 = vpop.f32.mrb[190].mxu1  ;;  %v9018_v43 = vpop.f32.mrb[191].mxu0  ;;  %9316 = vmatpush3.bf16.msra.mxu0 %v10122_v25  ;;  %v3259_v39 = vld [vmem:[%s10267_s6 + $0xe5] sm:$0xff]  ;;  %v3264_v34 = vld [vmem:[%s10267_s6 + $0x10d] sm:$0xff] }
 0x263   : > { %v9056_v49 = vpop.f32.mrb[191].mxu1  ;;  %9360 = vmatpush3.bf16.msra.mxu1 %v10123_v48  ;;  %9397 = vmatprep.subr.bf16.mxu0 %v10198_v2  ;;  %v3274_v58 = vpack.c.bf16 %v3260_v20, %v3259_v39  ;;  %v3444_v37 = vld [vmem:[%s10267_s6 + $0x106] sm:$0xff] }
 0x264   : > { %v11547_v16 = vadd.f32 %v2459_v5, %v2297_v6  ;;  %9244 = vmatmul.mubr.msk.bf16.gmra.mrb[40].mxu0 %vm292_vm2, %v3273_v45  ;;  %9441 = vmatprep.subr.bf16.mxu1 %v10198_v2  ;;  %v3457_v43 = vpack.c.bf16 %v3445_v18, %v3444_v37 }
 0x265   : > { %9282 = vmatmul.mubr.msk.bf16.gmra.mrb[40].mxu1 %vm292_vm2, %v3454_v41  ;;  %9247 = vmatprep.mubr.msk.bf16.mxu0 %vm10199_vm1, %v10198_v2 }
 0x266   : > { %9285 = vmatprep.mubr.msk.bf16.mxu1 %vm10199_vm1, %v10198_v2 }
 0x267   : > { %v2301_v27 = vpop.f32.mrb[192].mxu0 }
 0x268   : > { %v2302_v50 = vadd.f32 %v2301_v27, %v11370_v52  ;;  %v2464_v14 = vpop.f32.mrb[192].mxu1  ;;  %v9021_v15 = vpop.f32.mrb[193].mxu0  ;;  %v3261_v52 = vld [vmem:[%s10267_s6 + $0xf5] sm:$0xff] }
 0x269   : > { %v9059_v46 = vpop.f32.mrb[193].mxu1  ;;  %v2304_v59 = vpop.f32.mrb[194].mxu0  ;;  %v3275_v4 = vpack.c.bf16 %v3262_v56, %v3261_v52  ;;  %v3447_v15 = vld [vmem:[%s10267_s6 + $0x11e] sm:$0xff] }
 0x26a   : > { %v11561_v61 = vadd.f32 %v2464_v14, %v2302_v50  ;;  %v2305_v17 = vadd.f32 %v2304_v59, %v11374_v1  ;;  %v2467_v8 = vpop.f32.mrb[194].mxu1  ;;  %v9022_v0 = vpop.f32.mrb[195].mxu0  ;;  %v3266_v50 = vld [vmem:[%s10267_s6 + $0x11d] sm:$0xff] }
 0x26b   : > { %v9060_v21 = vpop.f32.mrb[195].mxu1  ;;  %v3446_v14 = vld [vmem:[%s10267_s6 + $0x116] sm:$0xff] }
 0x26c   : > { %v11564_v35 = vadd.f32 %v2467_v8, %v2305_v17  ;;  %9248 = vmatmul.mubr.msk.bf16.gmra.mrb[44].mxu0 %vm292_vm2, %v3274_v58  ;;  %v3458_v0 = vpack.c.bf16 %v3447_v15, %v3446_v14 }
 0x26d   : > { %9286 = vmatmul.mubr.msk.bf16.gmra.mrb[44].mxu1 %vm292_vm2, %v3455_v33  ;;  %9251 = vmatprep.mubr.msk.bf16.mxu0 %vm10199_vm1, %v10198_v2 }
 0x26e   : > { %9289 = vmatprep.mubr.msk.bf16.mxu1 %vm10199_vm1, %v10198_v2 }
 0x26f   : > { %v2309_v1 = vpop.f32.mrb[196].mxu0 }
 0x270   : > { %v2310_v7 = vadd.f32 %v2309_v1, %v11387_v24  ;;  %v2472_v54 = vpop.f32.mrb[196].mxu1  ;;  %v9025_v32 = vpop.f32.mrb[197].mxu0  ;;  %v3263_v24 = vld [vmem:[%s10267_s6 + $0x105] sm:$0xff] }
 0x271   : > { %v9063_v62 = vpop.f32.mrb[197].mxu1  ;;  %v2312_v28 = vpop.f32.mrb[198].mxu0  ;;  %v3276_v41 = vpack.c.bf16 %v3264_v34, %v3263_v24  ;;  %v3449_v32 = vld [vmem:[%s10267_s6 + $0x12e] sm:$0xff] }
 0x272   : > { %v11577_v42 = vadd.f32 %v2472_v54, %v2310_v7  ;;  %v2313_v44 = vadd.f32 %v2312_v28, %v11392_v51  ;;  %v2475_v63 = vpop.f32.mrb[198].mxu1  ;;  %v9026_v25 = vpop.f32.mrb[199].mxu0  ;;  %v3268_v7 = vld [vmem:[%s10267_s6 + $0x12d] sm:$0xff] }
 0x273   : > { %v9064_v26 = vpop.f32.mrb[199].mxu1  ;;  %v3448_v54 = vld [vmem:[%s10267_s6 + $0x126] sm:$0xff] }
 0x274   : > { %v11580_v48 = vadd.f32 %v2475_v63, %v2313_v44  ;;  %9252 = vmatmul.mubr.msk.bf16.gmra.mrb[48].mxu0 %vm292_vm2, %v3275_v4  ;;  %v3459_v25 = vpack.c.bf16 %v3449_v32, %v3448_v54 }
 0x275   : > { %9290 = vmatmul.mubr.msk.bf16.gmra.mrb[48].mxu1 %vm292_vm2, %v3456_v13  ;;  %9255 = vmatprep.mubr.msk.bf16.mxu0 %vm10199_vm1, %v10198_v2 }
 0x276   : > { %9293 = vmatprep.mubr.msk.bf16.mxu1 %vm10199_vm1, %v10198_v2 }
 0x277   : > { %v2317_v51 = vpop.f32.mrb[200].mxu0 }
 0x278   : > { %v2318_v45 = vadd.f32 %v2317_v51, %v11405_v55  ;;  %v2480_v10 = vpop.f32.mrb[200].mxu1  ;;  %v9029_v9 = vpop.f32.mrb[201].mxu0  ;;  %v3265_v55 = vld [vmem:[%s10267_s6 + $0x115] sm:$0xff] }
 0x279   : > { %v9067_v6 = vpop.f32.mrb[201].mxu1  ;;  %v2320_v5 = vpop.f32.mrb[202].mxu0  ;;  %v3277_v33 = vpack.c.bf16 %v3266_v50, %v3265_v55  ;;  %v3451_v9 = vld [vmem:[%s10267_s6 + $0x13e] sm:$0xff] }
 0x27a   : > { %v11593_v49 = vadd.f32 %v2480_v10, %v2318_v45  ;;  %v2321_v39 = vadd.f32 %v2320_v5, %v11410_v11  ;;  %v2483_v20 = vpop.f32.mrb[202].mxu1  ;;  %v9030_v12 = vpop.f32.mrb[203].mxu0  ;;  %v3270_v45 = vld [vmem:[%s10267_s6 + $0x13d] sm:$0xff] }
 0x27b   : > { %v9068_v31 = vpop.f32.mrb[203].mxu1  ;;  %v3450_v10 = vld [vmem:[%s10267_s6 + $0x136] sm:$0xff] }
 0x27c   : > { %v11596_v27 = vadd.f32 %v2483_v20, %v2321_v39  ;;  %9256 = vmatmul.mubr.msk.bf16.gmra.mrb[52].mxu0 %vm292_vm2, %v3276_v41  ;;  %v3460_v12 = vpack.c.bf16 %v3451_v9, %v3450_v10 }
 0x27d   : > { %9294 = vmatmul.mubr.msk.bf16.gmra.mrb[52].mxu1 %vm292_vm2, %v3457_v43  ;;  %9259 = vmatprep.mubr.msk.bf16.mxu0 %vm10199_vm1, %v10198_v2 }
 0x27e   : > { %9297 = vmatprep.mubr.msk.bf16.mxu1 %vm10199_vm1, %v10198_v2 }
 0x27f   : > { %v2325_v11 = vpop.f32.mrb[204].mxu0 }
 0x280   : > { %v2326_v58 = vadd.f32 %v2325_v11, %v11424_v23  ;;  %v2488_v46 = vpop.f32.mrb[204].mxu1  ;;  %v9033_v59 = vpop.f32.mrb[205].mxu0  ;;  %v3267_v23 = vld [vmem:[%s10267_s6 + $0x125] sm:$0xff] }
 0x281   : > { %v9071_v17 = vpop.f32.mrb[205].mxu1  ;;  %v2328_v8 = vpop.f32.mrb[206].mxu0  ;;  %v3278_v13 = vpack.c.bf16 %v3268_v7, %v3267_v23  ;;  %v3796_v59 = vld [vmem:[#allocation2 + $0xd] sm:$0xff] }
 0x282   : > { %v11609_v21 = vadd.f32 %v2488_v46, %v2326_v58  ;;  %v2329_v52 = vadd.f32 %v2328_v8, %v11428_v30  ;;  %v2491_v56 = vpop.f32.mrb[206].mxu1  ;;  %v9034_v29 = vpop.f32.mrb[207].mxu0  ;;  %v3831_v58 = vld [vmem:[#allocation2 + $0xe] sm:$0xff]  ;;  %v3795_v46 = vld [vmem:[#allocation2 + $0x5] sm:$0xff] }
 0x283   : > { %v9072_v40 = vpop.f32.mrb[207].mxu1  ;;  %v3813_v29 = vpack.c.bf16 %v3796_v59, %v3795_v46  ;;  %v3834_v59 = vld [vmem:[#allocation2 + $0x26] sm:$0xff] }
 0x284   : > { %v11612_v1 = vadd.f32 %v2491_v56, %v2329_v52  ;;  %9260 = vmatmul.mubr.msk.bf16.gmra.mrb[56].mxu0 %vm292_vm2, %v3277_v33  ;;  %v10124_v40 = vld [vmem:[%s13176_s2 + $0x40] sm:$0xff]  }
 0x285   : > { %9298 = vmatmul.mubr.msk.bf16.gmra.mrb[56].mxu1 %vm292_vm2, %v3458_v0  ;;  %9263 = vmatprep.mubr.msk.bf16.mxu0 %vm10199_vm1, %v10198_v2 }
 0x286   : > { %9301 = vmatprep.mubr.msk.bf16.mxu1 %vm10199_vm1, %v10198_v2 }
 0x287   : > { %v2333_v30 = vpop.f32.mrb[208].mxu0 }
 0x288   : > { %v2334_v4 = vadd.f32 %v2333_v30, %v11442_v3  ;;  %v2496_v62 = vpop.f32.mrb[208].mxu1  ;;  %v9037_v28 = vpop.f32.mrb[209].mxu0  ;;  %v3269_v3 = vld [vmem:[%s10267_s6 + $0x135] sm:$0xff] }
 0x289   : > { %v9075_v44 = vpop.f32.mrb[209].mxu1  ;;  %v2336_v63 = vpop.f32.mrb[210].mxu0  ;;  %v3279_v43 = vpack.c.bf16 %v3270_v45, %v3269_v3 }
 0x28a   : > { %v11625_v26 = vadd.f32 %v2496_v62, %v2334_v4  ;;  %v2337_v24 = vadd.f32 %v2336_v63, %v11446_v47  ;;  %v2499_v34 = vpop.f32.mrb[210].mxu1  ;;  %v9038_v37 = vpop.f32.mrb[211].mxu0  ;;  %v10126_v62 = vld [vmem:[%s13176_s2 + $0x48] sm:$0xff]  }
 0x28b   : > { %v9076_v18 = vpop.f32.mrb[211].mxu1 }
 0x28c   : > { %v11628_v51 = vadd.f32 %v2499_v34, %v2337_v24  ;;  %9264 = vmatmul.mubr.msk.bf16.gmra.mrb[60].mxu0 %vm292_vm2, %v3278_v13  ;;  %v3833_v13 = vld [vmem:[#allocation2 + $0x1e] sm:$0xff]  ;;  %v3832_v18 = vld [vmem:[#allocation2 + $0x16] sm:$0xff] }
 0x28d   : > { %9302 = vmatmul.mubr.msk.bf16.gmra.mrb[60].mxu1 %vm292_vm2, %v3459_v25  ;;  %9267 = vmatprep.mubr.msk.bf16.mxu0 %vm10199_vm1, %v10198_v2  ;;  %v3798_v24 = vld [vmem:[#allocation2 + $0x1d] sm:$0xff] }
 0x28e   : > { %9305 = vmatprep.mubr.msk.bf16.mxu1 %vm10199_vm1, %v10198_v2 }
 0x28f   : > { %v2341_v47 = vpop.f32.mrb[212].mxu0 }
 0x290   : > { %v2342_v41 = vadd.f32 %v2341_v47, %v11460_v36  ;;  %v2504_v6 = vpop.f32.mrb[212].mxu1  ;;  %v9041_v5 = vpop.f32.mrb[213].mxu0  ;;  %v3830_v36 = vld [vmem:[#allocation2 + $0x6] sm:$0xff]  ;;  %v3849_v47 = vpack.c.bf16 %v3833_v13, %v3832_v18 }
 0x291   : > { %v9079_v39 = vpop.f32.mrb[213].mxu1  ;;  %v2344_v20 = vpop.f32.mrb[214].mxu0  ;;  %v3848_v0 = vpack.c.bf16 %v3831_v58, %v3830_v36  ;;  %v3800_v36 = vld [vmem:[#allocation2 + $0x2d] sm:$0xff] }
 0x292   : > { %v11641_v31 = vadd.f32 %v2504_v6, %v2342_v41  ;;  %v2345_v55 = vadd.f32 %v2344_v20, %v11464_v38  ;;  %v2507_v50 = vpop.f32.mrb[214].mxu1  ;;  %v9042_v14 = vpop.f32.mrb[215].mxu0  ;;  %v3797_v41 = vld [vmem:[#allocation2 + $0x15] sm:$0xff] }
 0x293   : > { %v9080_v15 = vpop.f32.mrb[215].mxu1  ;;  %v3814_v5 = vpack.c.bf16 %v3798_v24, %v3797_v41  ;;  %v10130_v39 = vld [vmem:[%s13176_s2 + $0x58] sm:$0xff]  }
 0x294   : > { %v11644_v11 = vadd.f32 %v2507_v50, %v2345_v55  ;;  %9268 = vmatmul.mubr.msk.bf16.gmra.mrb[64].mxu0 %vm292_vm2, %v3279_v43  ;;  %v10129_v43 = vld [vmem:[%s13176_s2 + $0x70] sm:$0xff]   ;;  %v10131_v55 = vld [vmem:[%s13176_s2 + $0x78] sm:$0xff]  }
 0x295   : > { %9306 = vmatmul.mubr.msk.bf16.gmra.mrb[64].mxu1 %vm292_vm2, %v3460_v12  ;;  %9317 = vmatprep.mubr.msk.bf16.mxu0 %vm10199_vm1, %v10198_v2  ;;  %v3835_v12 = vld [vmem:[#allocation2 + $0x2e] sm:$0xff] }
 0x296   : > { %9361 = vmatprep.mubr.msk.bf16.mxu1 %vm10199_vm1, %v10198_v2  ;;  %v3801_v24 = vld [vmem:[#allocation2 + $0x35] sm:$0xff] }
 0x297   : > { %v2621_v38 = vpop.f32.mrb[216].mxu0 }
 0x298   : > { %v2692_v33 = vadd.f32 %v2621_v38, %v11484_v53  ;;  %v2802_v17 = vpop.f32.mrb[216].mxu1  ;;  %v9085_v8 = vpop.f32.mrb[217].mxu0  ;;  %v10125_v53 = vld [vmem:[%s13176_s2 + $0x60] sm:$0xff]  }
 0x299   : > { %v9123_v52 = vpop.f32.mrb[217].mxu1  ;;  %v2624_v56 = vpop.f32.mrb[218].mxu0 }
 0x29a   : > { %v11656_v23 = vadd.f32 %v2802_v17, %v2692_v33  ;;  %v2693_v7 = vadd.f32 %v2624_v56, %v11490_v60  ;;  %v2805_v54 = vpop.f32.mrb[218].mxu1  ;;  %v9086_v32 = vpop.f32.mrb[219].mxu0  ;;  %v10127_v60 = vld [vmem:[%s13176_s2 + $0x68] sm:$0xff]  }
 0x29b   : > { %v9124_v30 = vpop.f32.mrb[219].mxu1  ;;  %v3799_v52 = vld [vmem:[#allocation2 + $0x25] sm:$0xff] }
 0x29c   : > { %v11662_v4 = vadd.f32 %v2805_v54, %v2693_v7  ;;  %9318 = vmatmul.mubr.msk.bf16.vlgmr.msra.gmra.mrb[68].mxu0 %vm228_vm3, %v3848_v0  ;;  %v3850_v0 = vpack.c.bf16 %v3835_v12, %v3834_v59  ;;  %v3806_v59 = vld [vmem:[#allocation2 + $0x5d] sm:$0xff] }
 0x29d   : > { %9362 = vmatmul.mubr.msk.bf16.vlgmr.msra.gmra.mrb[68].mxu1 %vm228_vm3, %v3813_v29  ;;  %9398 = vmatpush3.bf16.msra.mxu0 %v10124_v40  ;;  %v3815_v29 = vpack.c.bf16 %v3800_v36, %v3799_v52  ;;  %v3837_v40 = vld [vmem:[#allocation2 + $0x3e] sm:$0xff] }
 0x29e   : > { %9442 = vmatpush3.bf16.msra.mxu1 %v10125_v53  ;;  %9321 = vmatprep.mubr.msk.bf16.mxu0 %vm10199_vm1, %v10198_v2  ;;  %v3802_v53 = vld [vmem:[#allocation2 + $0x3d] sm:$0xff] }
 0x29f   : > { %v2629_v28 = vpop.f32.mrb[220].mxu0  ;;  %9365 = vmatprep.mubr.msk.bf16.mxu1 %vm10199_vm1, %v10198_v2  ;;  %9399 = vmatprep.subr.bf16.mxu0 %v10198_v2 }
 0x2a0   : > { %v2694_v44 = vadd.f32 %v2629_v28, %v11511_v22  ;;  %v2810_v63 = vpop.f32.mrb[220].mxu1  ;;  %v9089_v25 = vpop.f32.mrb[221].mxu0  ;;  %9443 = vmatprep.subr.bf16.mxu1 %v10198_v2  ;;  %v10128_v22 = vld [vmem:[%s13176_s2 + $0x50] sm:$0xff]  }
 0x2a1   : > { %v9127_v34 = vpop.f32.mrb[221].mxu1  ;;  %v2632_v37 = vpop.f32.mrb[222].mxu0  ;;  %9400 = vmatpush3.bf16.msra.mxu0 %v10126_v62 }
 0x2a2   : > { %v11679_v3 = vadd.f32 %v2810_v63, %v2694_v44  ;;  %v2695_v45 = vadd.f32 %v2632_v37, %v11523_v19  ;;  %v2813_v10 = vpop.f32.mrb[222].mxu1  ;;  %v9090_v9 = vpop.f32.mrb[223].mxu0  ;;  %9444 = vmatpush3.bf16.msra.mxu1 %v10127_v60  ;;  %9401 = vmatprep.subr.bf16.mxu0 %v10198_v2  ;;  %v3836_v60 = vld [vmem:[#allocation2 + $0x36] sm:$0xff]  ;;  %v3816_v37 = vpack.c.bf16 %v3802_v53, %v3801_v24 }
 0x2a3   : > { %v9128_v6 = vpop.f32.mrb[223].mxu1  ;;  %9445 = vmatprep.subr.bf16.mxu1 %v10198_v2  ;;  %v3851_v25 = vpack.c.bf16 %v3837_v40, %v3836_v60  ;;  %v3805_v40 = vld [vmem:[#allocation2 + $0x55] sm:$0xff]  ;;  %v3808_v60 = vld [vmem:[#allocation2 + $0x6d] sm:$0xff] }
 0x2a4   : > { %v11690_v19 = vadd.f32 %v2813_v10, %v2695_v45  ;;  %9322 = vmatmul.mubr.msk.bf16.gmra.mrb[72].mxu0 %vm228_vm3, %v3849_v47  ;;  %v3804_v47 = vld [vmem:[#allocation2 + $0x4d] sm:$0xff] }
 0x2a5   : > { %9366 = vmatmul.mubr.msk.bf16.gmra.mrb[72].mxu1 %vm228_vm3, %v3814_v5  ;;  %9325 = vmatprep.mubr.msk.bf16.mxu0 %vm10199_vm1, %v10198_v2  ;;  %v3838_v6 = vld [vmem:[#allocation2 + $0x46] sm:$0xff] }
 0x2a6   : > { %9369 = vmatprep.mubr.msk.bf16.mxu1 %vm10199_vm1, %v10198_v2  ;;  %9402 = vmatpush3.bf16.msra.mxu0 %v10128_v22 }
 0x2a7   : > { %v2637_v20 = vpop.f32.mrb[224].mxu0  ;;  %9446 = vmatpush3.bf16.msra.mxu1 %v10129_v43  ;;  %9403 = vmatprep.subr.bf16.mxu0 %v10198_v2 }
 0x2a8   : > { %v2696_v50 = vadd.f32 %v2637_v20, %v11543_v57  ;;  %v2818_v14 = vpop.f32.mrb[224].mxu1  ;;  %v9093_v15 = vpop.f32.mrb[225].mxu0  ;;  %9447 = vmatprep.subr.bf16.mxu1 %v10198_v2 }
 0x2a9   : > { %v9131_v58 = vpop.f32.mrb[225].mxu1  ;;  %v2640_v46 = vpop.f32.mrb[226].mxu0 }
 0x2aa   : > { %v11707_v38 = vadd.f32 %v2818_v14, %v2696_v50  ;;  %v2697_v33 = vadd.f32 %v2640_v46, %v11547_v16  ;;  %v2821_v17 = vpop.f32.mrb[226].mxu1  ;;  %v9094_v8 = vpop.f32.mrb[227].mxu0  ;;  %9404 = vmatpush3.bf16.msra.mxu0 %v10130_v39 }
 0x2ab   : > { %v9132_v56 = vpop.f32.mrb[227].mxu1  ;;  %9448 = vmatpush3.bf16.msra.mxu1 %v10131_v55  ;;  %9485 = vmatprep.subr.bf16.mxu0 %v10198_v2  ;;  %v3803_v55 = vld [vmem:[#allocation2 + $0x45] sm:$0xff]  ;;  %v3840_v8 = vld [vmem:[#allocation2 + $0x56] sm:$0xff] }
 0x2ac   : > { %v11711_v57 = vadd.f32 %v2821_v17, %v2697_v33  ;;  %9326 = vmatmul.mubr.msk.bf16.gmra.mrb[76].mxu0 %vm228_vm3, %v3850_v0  ;;  %9529 = vmatprep.subr.bf16.mxu1 %v10198_v2  ;;  %v3817_v14 = vpack.c.bf16 %v3804_v47, %v3803_v55 }
 0x2ad   : > { %9370 = vmatmul.mubr.msk.bf16.gmra.mrb[76].mxu1 %vm228_vm3, %v3815_v29  ;;  %9329 = vmatprep.mubr.msk.bf16.mxu0 %vm10199_vm1, %v10198_v2 }
 0x2ae   : > { %9373 = vmatprep.mubr.msk.bf16.mxu1 %vm10199_vm1, %v10198_v2 }
 0x2af   : > { %v2645_v16 = vpop.f32.mrb[228].mxu0 }
 0x2b0   : > { %v2698_v7 = vadd.f32 %v2645_v16, %v11561_v61  ;;  %v2826_v54 = vpop.f32.mrb[228].mxu1  ;;  %v9097_v32 = vpop.f32.mrb[229].mxu0 }
 0x2b1   : > { %v9135_v30 = vpop.f32.mrb[229].mxu1  ;;  %v2648_v62 = vpop.f32.mrb[230].mxu0 }
 0x2b2   : > { %v11721_v28 = vadd.f32 %v2826_v54, %v2698_v7  ;;  %v2699_v13 = vadd.f32 %v2648_v62, %v11564_v35  ;;  %v2829_v44 = vpop.f32.mrb[230].mxu1  ;;  %v9098_v63 = vpop.f32.mrb[231].mxu0  ;;  %v3839_v35 = vld [vmem:[#allocation2 + $0x4e] sm:$0xff]  ;;  %v3818_v54 = vpack.c.bf16 %v3806_v59, %v3805_v40 }
 0x2b3   : > { %v9136_v34 = vpop.f32.mrb[231].mxu1  ;;  %v3852_v12 = vpack.c.bf16 %v3839_v35, %v3838_v6  ;;  %v3842_v63 = vld [vmem:[#allocation2 + $0x66] sm:$0xff]  ;;  %v3810_v6 = vld [vmem:[#allocation2 + $0x7d] sm:$0xff] }
 0x2b4   : > { %v11724_v18 = vadd.f32 %v2829_v44, %v2699_v13  ;;  %9330 = vmatmul.mubr.msk.bf16.gmra.mrb[80].mxu0 %vm228_vm3, %v3851_v25  ;;  %v3807_v35 = vld [vmem:[#allocation2 + $0x65] sm:$0xff] }
 0x2b5   : > { %9374 = vmatmul.mubr.msk.bf16.gmra.mrb[80].mxu1 %vm228_vm3, %v3816_v37  ;;  %9333 = vmatprep.mubr.msk.bf16.mxu0 %vm10199_vm1, %v10198_v2 }
 0x2b6   : > { %9377 = vmatprep.mubr.msk.bf16.mxu1 %vm10199_vm1, %v10198_v2 }
 0x2b7   : > { %v2653_v61 = vpop.f32.mrb[232].mxu0 }
 0x2b8   : > { %v2700_v45 = vadd.f32 %v2653_v61, %v11577_v42  ;;  %v2834_v10 = vpop.f32.mrb[232].mxu1  ;;  %v9101_v9 = vpop.f32.mrb[233].mxu0 }
 0x2b9   : > { %v9139_v41 = vpop.f32.mrb[233].mxu1  ;;  %v2656_v22 = vpop.f32.mrb[234].mxu0 }
 0x2ba   : > { %v11733_v5 = vadd.f32 %v2834_v10, %v2700_v45  ;;  %v2701_v43 = vadd.f32 %v2656_v22, %v11580_v48  ;;  %v2837_v39 = vpop.f32.mrb[234].mxu1  ;;  %v9102_v20 = vpop.f32.mrb[235].mxu0  ;;  %v3841_v48 = vld [vmem:[#allocation2 + $0x5e] sm:$0xff]  ;;  %v3819_v10 = vpack.c.bf16 %v3808_v60, %v3807_v35  ;;  %v4179_v60 = vld [vmem:[#allocation2 + $0xf] sm:$0xff] }
 0x2bb   : > { %v9140_v50 = vpop.f32.mrb[235].mxu1  ;;  %v3853_v16 = vpack.c.bf16 %v3841_v48, %v3840_v8  ;;  %v3844_v20 = vld [vmem:[#allocation2 + $0x76] sm:$0xff]  ;;  %v3812_v8 = vld [vmem:[#allocation2 + $0x8d] sm:$0xff]  ;;  %v10132_v35 = vld [vmem:[%s13176_s2 + $0x80] sm:$0xff]  }
 0x2bc   : > { %v11736_v15 = vadd.f32 %v2837_v39, %v2701_v43  ;;  %9334 = vmatmul.mubr.msk.bf16.gmra.mrb[84].mxu0 %vm228_vm3, %v3852_v12  ;;  %v3809_v48 = vld [vmem:[#allocation2 + $0x75] sm:$0xff] }
 0x2bd   : > { %9378 = vmatmul.mubr.msk.bf16.gmra.mrb[84].mxu1 %vm228_vm3, %v3817_v14  ;;  %9337 = vmatprep.mubr.msk.bf16.mxu0 %vm10199_vm1, %v10198_v2 }
 0x2be   : > { %9381 = vmatprep.mubr.msk.bf16.mxu1 %vm10199_vm1, %v10198_v2 }
 0x2bf   : > { %v2661_v42 = vpop.f32.mrb[236].mxu0 }
 0x2c0   : > { %v2702_v36 = vadd.f32 %v2661_v42, %v11593_v49  ;;  %v2842_v58 = vpop.f32.mrb[236].mxu1  ;;  %v9105_v46 = vpop.f32.mrb[237].mxu0 }
 0x2c1   : > { %v9143_v33 = vpop.f32.mrb[237].mxu1  ;;  %v2664_v17 = vpop.f32.mrb[238].mxu0 }
 0x2c2   : > { %v11745_v0 = vadd.f32 %v2842_v58, %v2702_v36  ;;  %v2703_v52 = vadd.f32 %v2664_v17, %v11596_v27  ;;  %v2845_v56 = vpop.f32.mrb[238].mxu1  ;;  %v9106_v29 = vpop.f32.mrb[239].mxu0  ;;  %v3843_v27 = vld [vmem:[#allocation2 + $0x6e] sm:$0xff]  ;;  %v3820_v58 = vpack.c.bf16 %v3810_v6, %v3809_v48 }
 0x2c3   : > { %v9144_v7 = vpop.f32.mrb[239].mxu1  ;;  %v3854_v61 = vpack.c.bf16 %v3843_v27, %v3842_v63  ;;  %v3846_v29 = vld [vmem:[#allocation2 + $0x86] sm:$0xff] }
 0x2c4   : > { %v11748_v32 = vadd.f32 %v2845_v56, %v2703_v52  ;;  %9338 = vmatmul.mubr.msk.bf16.gmra.mrb[88].mxu0 %vm228_vm3, %v3853_v16  ;;  %v3811_v27 = vld [vmem:[#allocation2 + $0x85] sm:$0xff] }
 0x2c5   : > { %9382 = vmatmul.mubr.msk.bf16.gmra.mrb[88].mxu1 %vm228_vm3, %v3818_v54  ;;  %9341 = vmatprep.mubr.msk.bf16.mxu0 %vm10199_vm1, %v10198_v2 }
 0x2c6   : > { %9385 = vmatprep.mubr.msk.bf16.mxu1 %vm10199_vm1, %v10198_v2 }
 0x2c7   : > { %v2669_v49 = vpop.f32.mrb[240].mxu0 }
 0x2c8   : > { %v2704_v53 = vadd.f32 %v2669_v49, %v11609_v21  ;;  %v2850_v30 = vpop.f32.mrb[240].mxu1  ;;  %v9109_v62 = vpop.f32.mrb[241].mxu0 }
 0x2c9   : > { %v9147_v13 = vpop.f32.mrb[241].mxu1  ;;  %v2672_v44 = vpop.f32.mrb[242].mxu0 }
 0x2ca   : > { %v11757_v25 = vadd.f32 %v2850_v30, %v2704_v53  ;;  %v2705_v24 = vadd.f32 %v2672_v44, %v11612_v1  ;;  %v2853_v34 = vpop.f32.mrb[242].mxu1  ;;  %v9110_v37 = vpop.f32.mrb[243].mxu0  ;;  %v3845_v1 = vld [vmem:[#allocation2 + $0x7e] sm:$0xff]  ;;  %v3821_v30 = vpack.c.bf16 %v3812_v8, %v3811_v27  ;;  %v4390_v8 = vld [vmem:[#allocation2 + $0x27] sm:$0xff] }
 0x2cb   : > { %v9148_v45 = vpop.f32.mrb[243].mxu1  ;;  %v3855_v42 = vpack.c.bf16 %v3845_v1, %v3844_v20  ;;  %v4389_v13 = vld [vmem:[#allocation2 + $0x1f] sm:$0xff] }
 0x2cc   : > { %v11760_v9 = vadd.f32 %v2853_v34, %v2705_v24  ;;  %9342 = vmatmul.mubr.msk.bf16.gmra.mrb[92].mxu0 %vm228_vm3, %v3854_v61  ;;  %v4388_v45 = vld [vmem:[#allocation2 + $0x17] sm:$0xff]  ;;  %v4181_v20 = vld [vmem:[#allocation2 + $0x1f] sm:$0xff] }
 0x2cd   : > { %9386 = vmatmul.mubr.msk.bf16.gmra.mrb[92].mxu1 %vm228_vm3, %v3819_v10  ;;  %9345 = vmatprep.mubr.msk.bf16.mxu0 %vm10199_vm1, %v10198_v2 }
 0x2ce   : > { %9389 = vmatprep.mubr.msk.bf16.mxu1 %vm10199_vm1, %v10198_v2 }
 0x2cf   : > { %v2677_v21 = vpop.f32.mrb[244].mxu0 }
 0x2d0   : > { %v2706_v47 = vadd.f32 %v2677_v21, %v11625_v26  ;;  %v2858_v41 = vpop.f32.mrb[244].mxu1  ;;  %v9113_v22 = vpop.f32.mrb[245].mxu0 }
 0x2d1   : > { %v9151_v43 = vpop.f32.mrb[245].mxu1  ;;  %v2680_v39 = vpop.f32.mrb[246].mxu0 }
 0x2d2   : > { %v11769_v12 = vadd.f32 %v2858_v41, %v2706_v47  ;;  %v2707_v55 = vadd.f32 %v2680_v39, %v11628_v51  ;;  %v2861_v50 = vpop.f32.mrb[246].mxu1  ;;  %v9114_v14 = vpop.f32.mrb[247].mxu0  ;;  %v3847_v51 = vld [vmem:[#allocation2 + $0x8e] sm:$0xff]  ;;  %v4406_v41 = vpack.c.bf16 %v4389_v13, %v4388_v45 }
 0x2d3   : > { %v9152_v36 = vpop.f32.mrb[247].mxu1  ;;  %v3856_v49 = vpack.c.bf16 %v3847_v51, %v3846_v29  ;;  %v10134_v43 = vld [vmem:[%s13176_s2 + $0x88] sm:$0xff]   ;;  %v10137_v29 = vld [vmem:[%s13176_s2 + $0xb0] sm:$0xff]  }
 0x2d4   : > { %v11772_v46 = vadd.f32 %v2861_v50, %v2707_v55  ;;  %9346 = vmatmul.mubr.msk.bf16.gmra.mrb[96].mxu0 %vm228_vm3, %v3855_v42  ;;  %v4391_v42 = vld [vmem:[#allocation2 + $0x2f] sm:$0xff] }
 0x2d5   : > { %9390 = vmatmul.mubr.msk.bf16.gmra.mrb[96].mxu1 %vm228_vm3, %v3820_v58  ;;  %9349 = vmatprep.mubr.msk.bf16.mxu0 %vm10199_vm1, %v10198_v2  ;;  %v4180_v58 = vld [vmem:[#allocation2 + $0x17] sm:$0xff] }
 0x2d6   : > { %9393 = vmatprep.mubr.msk.bf16.mxu1 %vm10199_vm1, %v10198_v2 }
 0x2d7   : > { %v2685_v26 = vpop.f32.mrb[248].mxu0 }
 0x2d8   : > { %v2708_v59 = vadd.f32 %v2685_v26, %v11641_v31  ;;  %v2866_v33 = vpop.f32.mrb[248].mxu1  ;;  %v9117_v17 = vpop.f32.mrb[249].mxu0  ;;  %v4178_v31 = vld [vmem:[#allocation2 + $0x7] sm:$0xff] }
 0x2d9   : > { %v9155_v52 = vpop.f32.mrb[249].mxu1  ;;  %v2688_v56 = vpop.f32.mrb[250].mxu0  ;;  %v4196_v34 = vpack.c.bf16 %v4179_v60, %v4178_v31  ;;  %v4197_v17 = vpack.c.bf16 %v4181_v20, %v4180_v58 }
 0x2da   : > { %v11781_v16 = vadd.f32 %v2866_v33, %v2708_v59  ;;  %v2709_v40 = vadd.f32 %v2688_v56, %v11644_v11  ;;  %v2869_v7 = vpop.f32.mrb[250].mxu1  ;;  %v9118_v54 = vpop.f32.mrb[251].mxu0  ;;  %v4407_v56 = vpack.c.bf16 %v4391_v42, %v4390_v8  ;;  %v4397_v42 = vld [vmem:[#allocation2 + $0x5f] sm:$0xff] }
 0x2db   : > { %v9156_v53 = vpop.f32.mrb[251].mxu1  ;;  %v10139_v54 = vld [vmem:[%s13176_s2 + $0xb8] sm:$0xff]  }
 0x2dc   : > { %v11784_v62 = vadd.f32 %v2869_v7, %v2709_v40  ;;  %9350 = vmatmul.mubr.msk.bf16.gmra.mrb[100].mxu0 %vm228_vm3, %v3856_v49  ;;  %v10138_v40 = vld [vmem:[%s13176_s2 + $0x98] sm:$0xff]  }
 0x2dd   : > { %9394 = vmatmul.mubr.msk.bf16.gmra.mrb[100].mxu1 %vm228_vm3, %v3821_v30  ;;  %9405 = vmatprep.mubr.msk.bf16.mxu0 %vm10199_vm1, %v10198_v2  ;;  %v4393_v30 = vld [vmem:[#allocation2 + $0x3f] sm:$0xff] }
 0x2de   : > { %9449 = vmatprep.mubr.msk.bf16.mxu1 %vm10199_vm1, %v10198_v2 }
 0x2df   : > { %v2983_v11 = vpop.f32.mrb[252].mxu0 }
 0x2e0   : > { %v3054_v44 = vadd.f32 %v2983_v11, %v11656_v23  ;;  %v3164_v63 = vpop.f32.mrb[252].mxu1  ;;  %v9161_v24 = vpop.f32.mrb[253].mxu0  ;;  %v10133_v23 = vld [vmem:[%s13176_s2 + $0xa0] sm:$0xff]  }
 0x2e1   : > { %v9199_v37 = vpop.f32.mrb[253].mxu1  ;;  %v2986_v61 = vpop.f32.mrb[254].mxu0  ;;  %v4392_v24 = vld [vmem:[#allocation2 + $0x37] sm:$0xff] }
 0x2e2   : > { %v11796_v10 = vadd.f32 %v3164_v63, %v3054_v44  ;;  %v3055_v21 = vadd.f32 %v2986_v61, %v11662_v4  ;;  %v3167_v1 = vpop.f32.mrb[254].mxu1  ;;  %v9162_v47 = vpop.f32.mrb[255].mxu0  ;;  %v10135_v4 = vld [vmem:[%s13176_s2 + $0xa8] sm:$0xff]   ;;  %v4408_v37 = vpack.c.bf16 %v4393_v30, %v4392_v24 }
 0x2e3   : > { %v9200_v22 = vpop.f32.mrb[255].mxu1 }
 0x2e4   : > { %v11802_v6 = vadd.f32 %v3167_v1, %v3055_v21  ;;  %9406 = vmatmul.mubr.msk.bf16.vlgmr.msra.gmra.mrb[104].mxu0 %vm228_vm3, %v4196_v34  ;;  %v4395_v21 = vld [vmem:[#allocation2 + $0x4f] sm:$0xff] }
 0x2e5   : > { %9450 = vmatmul.mubr.msk.bf16.vlgmr.msra.gmra.mrb[104].mxu1 %vm228_vm3, %v4406_v41  ;;  %9486 = vmatpush3.bf16.msra.mxu0 %v10132_v35 }
 0x2e6   : > { %9530 = vmatpush3.bf16.msra.mxu1 %v10133_v23  ;;  %9409 = vmatprep.mubr.msk.bf16.mxu0 %vm10199_vm1, %v10198_v2 }
 0x2e7   : > { %v2991_v39 = vpop.f32.mrb[0].mxu0  ;;  %9453 = vmatprep.mubr.msk.bf16.mxu1 %vm10199_vm1, %v10198_v2  ;;  %9487 = vmatprep.subr.bf16.mxu0 %v10198_v2 }
 0x2e8   : > { %v3056_v55 = vadd.f32 %v2991_v39, %v11679_v3  ;;  %v3172_v50 = vpop.f32.mrb[0].mxu1  ;;  %v9165_v14 = vpop.f32.mrb[1].mxu0  ;;  %9531 = vmatprep.subr.bf16.mxu1 %v10198_v2  ;;  %v10136_v3 = vld [vmem:[%s13176_s2 + $0x90] sm:$0xff]  }
 0x2e9   : > { %v9203_v48 = vpop.f32.mrb[1].mxu1  ;;  %v2994_v36 = vpop.f32.mrb[2].mxu0  ;;  %9488 = vmatpush3.bf16.msra.mxu0 %v10134_v43 }
 0x2ea   : > { %v11819_v26 = vadd.f32 %v3172_v50, %v3056_v55  ;;  %v3057_v51 = vadd.f32 %v2994_v36, %v11690_v19  ;;  %v3175_v59 = vpop.f32.mrb[2].mxu1  ;;  %v9166_v33 = vpop.f32.mrb[3].mxu0  ;;  %9532 = vmatpush3.bf16.msra.mxu1 %v10135_v4  ;;  %9489 = vmatprep.subr.bf16.mxu0 %v10198_v2  ;;  %v4394_v4 = vld [vmem:[#allocation2 + $0x47] sm:$0xff] }
 0x2eb   : > { %v9204_v52 = vpop.f32.mrb[3].mxu1  ;;  %9533 = vmatprep.subr.bf16.mxu1 %v10198_v2  ;;  %v4409_v20 = vpack.c.bf16 %v4395_v21, %v4394_v4 }
 0x2ec   : > { %v11830_v19 = vadd.f32 %v3175_v59, %v3057_v51  ;;  %9410 = vmatmul.mubr.msk.bf16.gmra.mrb[108].mxu0 %vm228_vm3, %v4197_v17  ;;  %v4396_v17 = vld [vmem:[#allocation2 + $0x57] sm:$0xff] }
 0x2ed   : > { %9454 = vmatmul.mubr.msk.bf16.gmra.mrb[108].mxu1 %vm228_vm3, %v4407_v56  ;;  %9413 = vmatprep.mubr.msk.bf16.mxu0 %vm10199_vm1, %v10198_v2 }
 0x2ee   : > { %9457 = vmatprep.mubr.msk.bf16.mxu1 %vm10199_vm1, %v10198_v2  ;;  %9490 = vmatpush3.bf16.msra.mxu0 %v10136_v3  ;;  %v4410_v3 = vpack.c.bf16 %v4397_v42, %v4396_v17 }
 0x2ef   : > { %v2999_v7 = vpop.f32.mrb[4].mxu0  ;;  %9534 = vmatpush3.bf16.msra.mxu1 %v10137_v29  ;;  %9491 = vmatprep.subr.bf16.mxu0 %v10198_v2 }
 0x2f0   : > { %v3058_v49 = vadd.f32 %v2999_v7, %v11707_v38  ;;  %v3180_v27 = vpop.f32.mrb[4].mxu1  ;;  %v9169_v53 = vpop.f32.mrb[5].mxu0  ;;  %9535 = vmatprep.subr.bf16.mxu1 %v10198_v2 }
 0x2f1   : > { %v9207_v31 = vpop.f32.mrb[5].mxu1  ;;  %v3002_v60 = vpop.f32.mrb[6].mxu0 }
 0x2f2   : > { %v11847_v11 = vadd.f32 %v3180_v27, %v3058_v49  ;;  %v3059_v13 = vadd.f32 %v3002_v60, %v11711_v57  ;;  %v3183_v44 = vpop.f32.mrb[6].mxu1  ;;  %v9170_v63 = vpop.f32.mrb[7].mxu0  ;;  %9492 = vmatpush3.bf16.msra.mxu0 %v10138_v40  ;;  %v4399_v40 = vld [vmem:[#allocation2 + $0x6f] sm:$0xff]  ;;  %v4398_v31 = vld [vmem:[#allocation2 + $0x67] sm:$0xff] }
 0x2f3   : > { %v9208_v34 = vpop.f32.mrb[7].mxu1  ;;  %9536 = vmatpush3.bf16.msra.mxu1 %v10139_v54  ;;  %9573 = vmatprep.subr.bf16.mxu0 %v10198_v2 }
 0x2f4   : > { %v11851_v38 = vadd.f32 %v3183_v44, %v3059_v13  ;;  %9414 = vmatmul.mubr.msk.bf16.gmra.mrb[112].mxu0 %vm228_vm3, %v4407_v56  ;;  %9617 = vmatprep.subr.bf16.mxu1 %v10198_v2  ;;  %v4411_v13 = vpack.c.bf16 %v4399_v40, %v4398_v31  ;;  %v4401_v34 = vld [vmem:[#allocation2 + $0x7f] sm:$0xff] }
 0x2f5   : > { %9458 = vmatmul.mubr.msk.bf16.gmra.mrb[112].mxu1 %vm228_vm3, %v4408_v37  ;;  %9417 = vmatprep.mubr.msk.bf16.mxu0 %vm10199_vm1, %v10198_v2 }
 0x2f6   : > { %9461 = vmatprep.mubr.msk.bf16.mxu1 %vm10199_vm1, %v10198_v2 }
 0x2f7   : > { %v3007_v57 = vpop.f32.mrb[8].mxu0 }
 0x2f8   : > { %v3060_v61 = vadd.f32 %v3007_v57, %v11721_v28  ;;  %v3188_v35 = vpop.f32.mrb[8].mxu1  ;;  %v9173_v45 = vpop.f32.mrb[9].mxu0 }
 0x2f9   : > { %v9211_v1 = vpop.f32.mrb[9].mxu1  ;;  %v3010_v47 = vpop.f32.mrb[10].mxu0 }
 0x2fa   : > { %v11861_v23 = vadd.f32 %v3188_v35, %v3060_v61  ;;  %v3061_v41 = vadd.f32 %v3010_v47, %v11724_v18  ;;  %v3191_v22 = vpop.f32.mrb[10].mxu1  ;;  %v9174_v43 = vpop.f32.mrb[11].mxu0  ;;  %v4400_v1 = vld [vmem:[#allocation2 + $0x77] sm:$0xff] }
 0x2fb   : > { %v9212_v39 = vpop.f32.mrb[11].mxu1 }
 0x2fc   : > { %v11864_v55 = vadd.f32 %v3191_v22, %v3061_v41  ;;  %9418 = vmatmul.mubr.msk.bf16.gmra.mrb[116].mxu0 %vm228_vm3, %v4408_v37  ;;  %v4412_v41 = vpack.c.bf16 %v4401_v34, %v4400_v1  ;;  %v4403_v39 = vld [vmem:[#allocation2 + $0x8f] sm:$0xff] }
 0x2fd   : > { %9462 = vmatmul.mubr.msk.bf16.gmra.mrb[116].mxu1 %vm228_vm3, %v4409_v20  ;;  %9421 = vmatprep.mubr.msk.bf16.mxu0 %vm10199_vm1, %v10198_v2 }
 0x2fe   : > { %9465 = vmatprep.mubr.msk.bf16.mxu1 %vm10199_vm1, %v10198_v2 }
 0x2ff   : > { %v3015_v28 = vpop.f32.mrb[12].mxu0 }
 0x300   : > { %v3062_v18 = vadd.f32 %v3015_v28, %v11733_v5  ;;  %v3196_v50 = vpop.f32.mrb[12].mxu1  ;;  %v9177_v14 = vpop.f32.mrb[13].mxu0 }
 0x301   : > { %v9215_v48 = vpop.f32.mrb[13].mxu1  ;;  %v3018_v36 = vpop.f32.mrb[14].mxu0 }
 0x302   : > { %v11873_v58 = vadd.f32 %v3196_v50, %v3062_v18  ;;  %v3063_v51 = vadd.f32 %v3018_v36, %v11736_v15  ;;  %v3199_v59 = vpop.f32.mrb[14].mxu1  ;;  %v9178_v33 = vpop.f32.mrb[15].mxu0  ;;  %v4402_v48 = vld [vmem:[#allocation2 + $0x87] sm:$0xff] }
 0x303   : > { %v9216_v8 = vpop.f32.mrb[15].mxu1 }
 0x304   : > { %v11876_v52 = vadd.f32 %v3199_v59, %v3063_v51  ;;  %9422 = vmatmul.mubr.msk.bf16.gmra.mrb[120].mxu0 %vm228_vm3, %v4409_v20  ;;  %v4413_v51 = vpack.c.bf16 %v4403_v39, %v4402_v48  ;;  %v4405_v8 = vld [vmem:[#allocation2 + $0x9f] sm:$0xff] }
 0x305   : > { %9466 = vmatmul.mubr.msk.bf16.gmra.mrb[120].mxu1 %vm228_vm3, %v4410_v3  ;;  %9425 = vmatprep.mubr.msk.bf16.mxu0 %vm10199_vm1, %v10198_v2 }
 0x306   : > { %9469 = vmatprep.mubr.msk.bf16.mxu1 %vm10199_vm1, %v10198_v2 }
 0x307   : > { %v3023_v5 = vpop.f32.mrb[16].mxu0 }
 0x308   : > { %v3064_v15 = vadd.f32 %v3023_v5, %v11745_v0  ;;  %v3204_v56 = vpop.f32.mrb[16].mxu1  ;;  %v9181_v29 = vpop.f32.mrb[17].mxu0 }
 0x309   : > { %v9219_v7 = vpop.f32.mrb[17].mxu1  ;;  %v3026_v54 = vpop.f32.mrb[18].mxu0 }
 0x30a   : > { %v11885_v49 = vadd.f32 %v3204_v56, %v3064_v15  ;;  %v3065_v27 = vadd.f32 %v3026_v54, %v11748_v32  ;;  %v3207_v53 = vpop.f32.mrb[18].mxu1  ;;  %v9182_v30 = vpop.f32.mrb[19].mxu0  ;;  %v4404_v7 = vld [vmem:[#allocation2 + $0x97] sm:$0xff] }
 0x30b   : > { %v9220_v60 = vpop.f32.mrb[19].mxu1 }
 0x30c   : > { %v11888_v44 = vadd.f32 %v3207_v53, %v3065_v27  ;;  %9426 = vmatmul.mubr.msk.bf16.gmra.mrb[124].mxu0 %vm228_vm3, %v4410_v3  ;;  %v4414_v27 = vpack.c.bf16 %v4405_v8, %v4404_v7 }
 0x30d   : > { %9470 = vmatmul.mubr.msk.bf16.gmra.mrb[124].mxu1 %vm228_vm3, %v4411_v13  ;;  %9429 = vmatprep.mubr.msk.bf16.mxu0 %vm10199_vm1, %v10198_v2 }
 0x30e   : > { %9473 = vmatprep.mubr.msk.bf16.mxu1 %vm10199_vm1, %v10198_v2 }
 0x30f   : > { %v3031_v0 = vpop.f32.mrb[20].mxu0 }
 0x310   : > { %v3066_v32 = vadd.f32 %v3031_v0, %v11757_v25  ;;  %v3212_v63 = vpop.f32.mrb[20].mxu1  ;;  %v9185_v24 = vpop.f32.mrb[21].mxu0  ;;  %v4598_v0 = vld [vmem:[#allocation2 + $0x18] sm:$0xff] }
 0x311   : > { %v9223_v37 = vpop.f32.mrb[21].mxu1  ;;  %v3034_v57 = vpop.f32.mrb[22].mxu0  ;;  %v10140_v24 = vld [vmem:[%s13176_s2 + $0xc0] sm:$0xff]  }
 0x312   : > { %v11897_v61 = vadd.f32 %v3212_v63, %v3066_v32  ;;  %v3067_v35 = vadd.f32 %v3034_v57, %v11760_v9  ;;  %v3215_v45 = vpop.f32.mrb[22].mxu1  ;;  %v9186_v21 = vpop.f32.mrb[23].mxu0  ;;  %v4808_v37 = vld [vmem:[#allocation2 + $0x19] sm:$0xff] }
 0x313   : > { %v9224_v47 = vpop.f32.mrb[23].mxu1 }
 0x314   : > { %v11900_v22 = vadd.f32 %v3215_v45, %v3067_v35  ;;  %9430 = vmatmul.mubr.msk.bf16.gmra.mrb[128].mxu0 %vm228_vm3, %v4411_v13 }
 0x315   : > { %9474 = vmatmul.mubr.msk.bf16.gmra.mrb[128].mxu1 %vm228_vm3, %v4412_v41  ;;  %9433 = vmatprep.mubr.msk.bf16.mxu0 %vm10199_vm1, %v10198_v2 }
 0x316   : > { %9477 = vmatprep.mubr.msk.bf16.mxu1 %vm10199_vm1, %v10198_v2 }
 0x317   : > { %v3039_v25 = vpop.f32.mrb[24].mxu0 }
 0x318   : > { %v3068_v9 = vadd.f32 %v3039_v25, %v11769_v12  ;;  %v3220_v43 = vpop.f32.mrb[24].mxu1  ;;  %v9189_v4 = vpop.f32.mrb[25].mxu0 }
 0x319   : > { %v9227_v20 = vpop.f32.mrb[25].mxu1  ;;  %v3042_v28 = vpop.f32.mrb[26].mxu0 }
 0x31a   : > { %v11909_v18 = vadd.f32 %v3220_v43, %v3068_v9  ;;  %v3069_v50 = vadd.f32 %v3042_v28, %v11772_v46  ;;  %v3223_v14 = vpop.f32.mrb[26].mxu1  ;;  %v9190_v42 = vpop.f32.mrb[27].mxu0  ;;  %v4601_v20 = vld [vmem:[#allocation2 + $0x30] sm:$0xff]  ;;  %v10143_v28 = vld [vmem:[%s13176_s2 + $0xe8] sm:$0xff]  }
 0x31b   : > { %v9228_v36 = vpop.f32.mrb[27].mxu1  ;;  %v3672_v43 = vpop.permute.xlu0 %3671 }
 0x31c   : > { %v11912_v59 = vadd.f32 %v3223_v14, %v3069_v50  ;;  %9434 = vmatmul.mubr.msk.bf16.gmra.mrb[132].mxu0 %vm228_vm3, %v4412_v41  ;;  %v11943_v41 = vld [vmem:[%s13177_s3] ss:$0 sm:$0xff]  ;;  %v3677_v50 = vpop.permute.xlu1 %3676 }
 0x31d   : > { %9478 = vmatmul.mubr.msk.bf16.gmra.mrb[132].mxu1 %vm228_vm3, %v4413_v51  ;;  %9437 = vmatprep.mubr.msk.bf16.mxu0 %vm10199_vm1, %v10198_v2 }
 0x31e   : > { %9481 = vmatprep.mubr.msk.bf16.mxu1 %vm10199_vm1, %v10198_v2 }
 0x31f   : > { %v3047_v12 = vpop.f32.mrb[28].mxu0 }
 0x320   : > { %v3070_v46 = vadd.f32 %v3047_v12, %v11781_v16  ;;  %v3228_v33 = vpop.f32.mrb[28].mxu1  ;;  %v9193_v17 = vpop.f32.mrb[29].mxu0  ;;  %v4599_v16 = vld [vmem:[#allocation2 + $0x20] sm:$0xff] }
 0x321   : > { %v9231_v3 = vpop.f32.mrb[29].mxu1  ;;  %v3050_v5 = vpop.f32.mrb[30].mxu0  ;;  %v4616_v34 = vpack.c.bf16 %v4599_v16, %v4598_v0  ;;  %v10146_v0 = vld [vmem:[%s13176_s2 + $0xd8] sm:$0xff]  }
 0x322   : > { %v11921_v15 = vadd.f32 %v3228_v33, %v3070_v46  ;;  %v3071_v56 = vadd.f32 %v3050_v5, %v11784_v62  ;;  %v3231_v29 = vpop.f32.mrb[30].mxu1  ;;  %v9194_v40 = vpop.f32.mrb[31].mxu0  ;;  %v4809_v62 = vld [vmem:[#allocation2 + $0x21] sm:$0xff]  ;;  %v4811_v33 = vld [vmem:[#allocation2 + $0x31] sm:$0xff] }
 0x323   : > { %v9232_v54 = vpop.f32.mrb[31].mxu1  ;;  %v4826_v1 = vpack.c.bf16 %v4809_v62, %v4808_v37  ;;  %v4600_v46 = vld [vmem:[#allocation2 + $0x28] sm:$0xff] }
 0x324   : > { %v11924_v53 = vadd.f32 %v3231_v29, %v3071_v56  ;;  %9438 = vmatmul.mubr.msk.bf16.gmra.mrb[136].mxu0 %vm228_vm3, %v4413_v51  ;;  %v4617_v3 = vpack.c.bf16 %v4601_v20, %v4600_v46  ;;  %v4810_v54 = vld [vmem:[#allocation2 + $0x29] sm:$0xff] }
 0x325   : > { %9482 = vmatmul.mubr.msk.bf16.gmra.mrb[136].mxu1 %vm228_vm3, %v4414_v27  ;;  %9493 = vmatprep.mubr.msk.bf16.mxu0 %vm10199_vm1, %v10198_v2  ;;  %v4827_v16 = vpack.c.bf16 %v4811_v33, %v4810_v54  ;;  %v4605_v46 = vld [vmem:[#allocation2 + $0x50] sm:$0xff] }
 0x326   : > { %9537 = vmatprep.mubr.msk.bf16.mxu1 %vm10199_vm1, %v10198_v2 }
 0x327   : > { %v3345_v30 = vpop.f32.mrb[32].mxu0 }
 0x328   : > { %v3416_v31 = vadd.f32 %v3345_v30, %v11796_v10  ;;  %v3526_v60 = vpop.f32.mrb[32].mxu1  ;;  %v9237_v13 = vpop.f32.mrb[33].mxu0  ;;  %v10141_v10 = vld [vmem:[%s13176_s2 + $0xe0] sm:$0xff]   ;;  %v10145_v30 = vld [vmem:[%s13176_s2 + $0xf0] sm:$0xff]  }
 0x329   : > { %v9275_v32 = vpop.f32.mrb[33].mxu1  ;;  %v3348_v63 = vpop.f32.mrb[34].mxu0 }
 0x32a   : > { %v3597_v57 = vadd.f32 %v3526_v60, %v3416_v31  ;;  %v3417_v35 = vadd.f32 %v3348_v63, %v11802_v6  ;;  %v3529_v45 = vpop.f32.mrb[34].mxu1  ;;  %v9238_v21 = vpop.f32.mrb[35].mxu0  ;;  %v10142_v6 = vld [vmem:[%s13176_s2 + $0xc8] sm:$0xff]  }
 0x32b   : > { %v9276_v47 = vpop.f32.mrb[35].mxu1  ;;  %v3682_v31 = vpop.permute.xlu0 %3681 }
 0x32c   : > { %v3615_v25 = vadd.f32 %v11943_v41, %v3597_v57  ;;  %v3598_v9 = vadd.f32 %v3529_v45, %v3417_v35  ;;  %9494 = vmatmul.mubr.msk.bf16.vlgmr.msra.gmra.mrb[140].mxu0 %vm228_vm3, %v4616_v34  ;;  %v3687_v32 = vpop.permute.xlu1 %3686  ;;  %v10147_v34 = vld [vmem:[%s13176_s2 + $0xf8] sm:$0xff]  }
 0x32d   : > { %9538 = vmatmul.mubr.msk.bf16.vlgmr.msra.gmra.mrb[140].mxu1 %vm228_vm3, %v4826_v1  ;;  %9574 = vmatpush3.bf16.msra.mxu0 %v10140_v24  ;;  %v4603_v24 = vld [vmem:[#allocation2 + $0x40] sm:$0xff] }
 0x32e   : > { %v3633_v4 = vmax.f32 %v3615_v25, 0.0  ;;  %v3616_v39 = vadd.f32 %v11943_v41, %v3598_v9  ;;  %9618 = vmatpush3.bf16.msra.mxu1 %v10141_v10  ;;  %9497 = vmatprep.mubr.msk.bf16.mxu0 %vm10199_vm1, %v10198_v2  ;;  %v4813_v10 = vld [vmem:[#allocation2 + $0x41] sm:$0xff]  ;;  %v4602_v25 = vld [vmem:[#allocation2 + $0x38] sm:$0xff] }
 0x32f   : > { %v3353_v14 = vpop.f32.mrb[36].mxu0  ;;  %9541 = vmatprep.mubr.msk.bf16.mxu1 %vm10199_vm1, %v10198_v2  ;;  %9575 = vmatprep.subr.bf16.mxu0 %v10198_v2  ;;  %v4618_v20 = vpack.c.bf16 %v4603_v24, %v4602_v25  ;;  %v4606_v25 = vld [vmem:[#allocation2 + $0x58] sm:$0xff] }
 0x330   : > { %v3759_v42 = vmul.f32 %v3672_v43, %v3633_v4  ;;  %v3634_v48 = vmax.f32 %v3616_v39, 0.0  ;;  %v3418_v36 = vadd.f32 %v3353_v14, %v11819_v26  ;;  %v3534_v51 = vpop.f32.mrb[36].mxu1  ;;  %v9241_v12 = vpop.f32.mrb[37].mxu0  ;;  %9619 = vmatprep.subr.bf16.mxu1 %v10198_v2  ;;  %v10144_v26 = vld [vmem:[%s13176_s2 + $0xd0] sm:$0xff]  }
 0x331   : > { %v9279_v17 = vpop.f32.mrb[37].mxu1  ;;  %v3356_v8 = vpop.f32.mrb[38].mxu0  ;;  %9576 = vmatpush3.bf16.msra.mxu0 %v10142_v6 }
 0x332   : > { %3777 = vst.msk [vmem:[#allocation2 + $0xa8] sm:$0xff] %vm228_vm3, %v3759_v42  ;;  %v3760_v5 = vmul.f32 %v3677_v50, %v3634_v48  ;;  %v3599_v56 = vadd.f32 %v3534_v51, %v3418_v36  ;;  %v3419_v29 = vadd.f32 %v3356_v8, %v11830_v19  ;;  %v3537_v40 = vpop.f32.mrb[38].mxu1  ;;  %v9242_v7 = vpop.f32.mrb[39].mxu0  ;;  %9620 = vmatpush3.bf16.msra.mxu1 %v10143_v28  ;;  %v4812_v28 = vld [vmem:[#allocation2 + $0x39] sm:$0xff] }
 0x333   : > { %9577 = vmatprep.subr.bf16.mxu0 %v10198_v2  ;;  %v9280_v27 = vpop.f32.mrb[39].mxu1  ;;  %9621 = vmatprep.subr.bf16.mxu1 %v10198_v2  ;;  %v11992_v50 = vpack.c.bf16 %v4813_v10, %v4812_v28  ;;  %v3697_v51 = vpop.permute.xlu1 %3696  ;;  %v4604_v7 = vld [vmem:[#allocation2 + $0x48] sm:$0xff] }
 0x334   : > { %3778 = vst.msk [vmem:[#allocation2 + $0xb0] sm:$0xff] %vm228_vm3, %v3760_v5  ;;  %v3617_v19 = vadd.f32 %v11943_v41, %v3599_v56  ;;  %v3600_v62 = vadd.f32 %v3537_v40, %v3419_v29  ;;  %9498 = vmatmul.mubr.msk.bf16.gmra.mrb[144].mxu0 %vm228_vm3, %v4617_v3  ;;  %v4815_v56 = vld [vmem:[#allocation2 + $0x51] sm:$0xff]  ;;  %v4817_v10 = vld [vmem:[#allocation2 + $0x61] sm:$0xff] }
 0x335   : > { %9542 = vmatmul.mubr.msk.bf16.gmra.mrb[144].mxu1 %vm228_vm3, %v4827_v16  ;;  %9501 = vmatprep.mubr.msk.bf16.mxu0 %vm10199_vm1, %v10198_v2 }
 0x336   : > { %v3635_v60 = vmax.f32 %v3617_v19, 0.0  ;;  %v3618_v13 = vadd.f32 %v11943_v41, %v3600_v62  ;;  %9545 = vmatprep.mubr.msk.bf16.mxu1 %vm10199_vm1, %v10198_v2  ;;  %9578 = vmatpush3.bf16.msra.mxu0 %v10144_v26  ;;  %v4619_v19 = vpack.c.bf16 %v4605_v46, %v4604_v7  ;;  %v4814_v62 = vld [vmem:[#allocation2 + $0x49] sm:$0xff] }
 0x337   : > { %v3361_v63 = vpop.f32.mrb[40].mxu0  ;;  %9622 = vmatpush3.bf16.msra.mxu1 %v10145_v30  ;;  %9579 = vmatprep.subr.bf16.mxu0 %v10198_v2 }
 0x338   : > { %v3761_v37 = vmul.f32 %v3682_v31, %v3635_v60  ;;  %v3636_v57 = vmax.f32 %v3618_v13, 0.0  ;;  %v3420_v35 = vadd.f32 %v3361_v63, %v11847_v11  ;;  %v3542_v45 = vpop.f32.mrb[40].mxu1  ;;  %v9245_v21 = vpop.f32.mrb[41].mxu0  ;;  %9623 = vmatprep.subr.bf16.mxu1 %v10198_v2  ;;  %v12009_v60 = vpack.c.bf16 %v4815_v56, %v4814_v62 }
 0x339   : > { %v9283_v1 = vpop.f32.mrb[41].mxu1  ;;  %v3364_v47 = vpop.f32.mrb[42].mxu0 }
 0x33a   : > { %3779 = vst.msk [vmem:[#allocation2 + $0xb8] sm:$0xff] %vm228_vm3, %v3761_v37  ;;  %v3762_v9 = vmul.f32 %v3687_v32, %v3636_v57  ;;  %v3601_v6 = vadd.f32 %v3542_v45, %v3420_v35  ;;  %v3421_v43 = vadd.f32 %v3364_v47, %v11851_v38  ;;  %v3545_v4 = vpop.f32.mrb[42].mxu1  ;;  %v9246_v39 = vpop.f32.mrb[43].mxu0  ;;  %9580 = vmatpush3.bf16.msra.mxu0 %v10146_v0 }
 0x33b   : > { %v9284_v11 = vpop.f32.mrb[43].mxu1  ;;  %9624 = vmatpush3.bf16.msra.mxu1 %v10147_v34  ;;  %9661 = vmatprep.subr.bf16.mxu0 %v10198_v2  ;;  %v3692_v38 = vpop.permute.xlu0 %3691  ;;  %v4607_v34 = vld [vmem:[#allocation2 + $0x60] sm:$0xff] }
 0x33c   : > { %3780 = vst.msk [vmem:[#allocation2 + $0xc0] sm:$0xff] %vm228_vm3, %v3762_v9  ;;  %v3619_v14 = vadd.f32 %v11943_v41, %v3601_v6  ;;  %v3602_v42 = vadd.f32 %v3545_v4, %v3421_v43  ;;  %9502 = vmatmul.mubr.msk.bf16.gmra.mrb[148].mxu0 %vm228_vm3, %v4618_v20  ;;  %9705 = vmatprep.subr.bf16.mxu1 %v10198_v2  ;;  %v3707_v63 = vpop.permute.xlu1 %3706  ;;  %v4816_v39 = vld [vmem:[#allocation2 + $0x59] sm:$0xff] }
 0x33d   : > { %9546 = vmatmul.mubr.msk.bf16.gmra.mrb[148].mxu1 %vm228_vm3, %v11992_v50  ;;  %9505 = vmatprep.mubr.msk.bf16.mxu0 %vm10199_vm1, %v10198_v2  ;;  %v4620_v4 = vpack.c.bf16 %v4607_v34, %v4606_v25 }
 0x33e   : > { %v3637_v48 = vmax.f32 %v3619_v14, 0.0  ;;  %v3620_v36 = vadd.f32 %v11943_v41, %v3602_v42  ;;  %9549 = vmatprep.mubr.msk.bf16.mxu1 %vm10199_vm1, %v10198_v2  ;;  %v12024_v14 = vpack.c.bf16 %v4817_v10, %v4816_v39  ;;  %v4820_v39 = vld [vmem:[#allocation2 + $0x79] sm:$0xff] }
 0x33f   : > { %v3369_v12 = vpop.f32.mrb[44].mxu0 }
 0x340   : > { %v3763_v33 = vmul.f32 %v3692_v38, %v3637_v48  ;;  %v3638_v17 = vmax.f32 %v3620_v36, 0.0  ;;  %v3422_v8 = vadd.f32 %v3369_v12, %v11861_v23  ;;  %v3550_v3 = vpop.f32.mrb[44].mxu1  ;;  %v9249_v5 = vpop.f32.mrb[45].mxu0  ;;  %v4609_v12 = vld [vmem:[#allocation2 + $0x70] sm:$0xff] }
 0x341   : > { %v9287_v29 = vpop.f32.mrb[45].mxu1  ;;  %v3372_v40 = vpop.f32.mrb[46].mxu0 }
 0x342   : > { %3781 = vst.msk [vmem:[#allocation2 + $0xc8] sm:$0xff] %vm228_vm3, %v3763_v33  ;;  %v3764_v54 = vmul.f32 %v3697_v51, %v3638_v17  ;;  %v3603_v26 = vadd.f32 %v3550_v3, %v3422_v8  ;;  %v3423_v27 = vadd.f32 %v3372_v40, %v11864_v55  ;;  %v3553_v16 = vpop.f32.mrb[46].mxu1  ;;  %v9250_v30 = vpop.f32.mrb[47].mxu0  ;;  %v4819_v8 = vld [vmem:[#allocation2 + $0x71] sm:$0xff]  ;;  %v4608_v40 = vld [vmem:[#allocation2 + $0x68] sm:$0xff] }
 0x343   : > { %v9288_v31 = vpop.f32.mrb[47].mxu1  ;;  %v3702_v55 = vpop.permute.xlu0 %3701  ;;  %v4818_v30 = vld [vmem:[#allocation2 + $0x69] sm:$0xff] }
 0x344   : > { %3782 = vst.msk [vmem:[#allocation2 + $0xd0] sm:$0xff] %vm228_vm3, %v3764_v54  ;;  %v3621_v23 = vadd.f32 %v11943_v41, %v3603_v26  ;;  %v3604_v13 = vadd.f32 %v3553_v16, %v3423_v27  ;;  %9506 = vmatmul.mubr.msk.bf16.gmra.mrb[152].mxu0 %vm228_vm3, %v4619_v19  ;;  %v4621_v16 = vpack.c.bf16 %v4609_v12, %v4608_v40 }
 0x345   : > { %9550 = vmatmul.mubr.msk.bf16.gmra.mrb[152].mxu1 %vm228_vm3, %v12009_v60  ;;  %9509 = vmatprep.mubr.msk.bf16.mxu0 %vm10199_vm1, %v10198_v2 }
 0x346   : > { %v3639_v0 = vmax.f32 %v3621_v23, 0.0  ;;  %v3622_v32 = vadd.f32 %v11943_v41, %v3604_v13  ;;  %9553 = vmatprep.mubr.msk.bf16.mxu1 %vm10199_vm1, %v10198_v2 }
 0x347   : > { %v3377_v24 = vpop.f32.mrb[48].mxu0  ;;  %v3712_v38 = vpop.permute.xlu0 %3711 }
 0x348   : > { %v3765_v37 = vmul.f32 %v3702_v55, %v3639_v0  ;;  %v3640_v57 = vmax.f32 %v3622_v32, 0.0  ;;  %v3424_v35 = vadd.f32 %v3377_v24, %v11873_v58  ;;  %v3558_v45 = vpop.f32.mrb[48].mxu1  ;;  %v9253_v21 = vpop.f32.mrb[49].mxu0 }
 0x349   : > { %v9291_v1 = vpop.f32.mrb[49].mxu1  ;;  %v3380_v47 = vpop.f32.mrb[50].mxu0 }
 0x34a   : > { %3783 = vst.msk [vmem:[#allocation2 + $0xd8] sm:$0xff] %vm228_vm3, %v3765_v37  ;;  %v3766_v9 = vmul.f32 %v3707_v63, %v3640_v57  ;;  %v3561_v6 = vpop.f32.mrb[50].mxu1  ;;  %v9254_v43 = vpop.f32.mrb[51].mxu0  ;;  %v3605_v20 = vadd.f32 %v3558_v45, %v3424_v35  ;;  %v3425_v28 = vadd.f32 %v3380_v47, %v11876_v52  ;;  %v4611_v63 = vld [vmem:[#allocation2 + $0x80] sm:$0xff]  ;;  %v4610_v1 = vld [vmem:[#allocation2 + $0x78] sm:$0xff] }
 0x34b   : > { %v9292_v11 = vpop.f32.mrb[51].mxu1  ;;  %v3717_v52 = vpop.permute.xlu1 %3716  ;;  %v4821_v45 = vld [vmem:[#allocation2 + $0x81] sm:$0xff] }
 0x34c   : > { %3784 = vst.msk [vmem:[#allocation2 + $0xe0] sm:$0xff] %vm228_vm3, %v3766_v9  ;;  %9510 = vmatmul.mubr.msk.bf16.gmra.mrb[156].mxu0 %vm228_vm3, %v4620_v4  ;;  %v3623_v58 = vadd.f32 %v11943_v41, %v3605_v20  ;;  %v3606_v42 = vadd.f32 %v3561_v6, %v3425_v28  ;;  %v4622_v4 = vpack.c.bf16 %v4611_v63, %v4610_v1 }
 0x34d   : > { %9554 = vmatmul.mubr.msk.bf16.gmra.mrb[156].mxu1 %vm228_vm3, %v12024_v14  ;;  %9513 = vmatprep.mubr.msk.bf16.mxu0 %vm10199_vm1, %v10198_v2  ;;  %v12054_v28 = vpack.c.bf16 %v4821_v45, %v4820_v39 }
 0x34e   : > { %9557 = vmatprep.mubr.msk.bf16.mxu1 %vm10199_vm1, %v10198_v2  ;;  %v3641_v48 = vmax.f32 %v3623_v58, 0.0  ;;  %v3624_v36 = vadd.f32 %v11943_v41, %v3606_v42 }
 0x34f   : > { %v3385_v51 = vpop.f32.mrb[52].mxu0  ;;  %v3727_v0 = vpop.permute.xlu1 %3726 }
 0x350   : > { %v3426_v46 = vadd.f32 %v3385_v51, %v11885_v49  ;;  %v3566_v33 = vpop.f32.mrb[52].mxu1  ;;  %v9257_v17 = vpop.f32.mrb[53].mxu0  ;;  %v3767_v3 = vmul.f32 %v3712_v38, %v3641_v48  ;;  %v3642_v5 = vmax.f32 %v3624_v36, 0.0  ;;  %v12039_v49 = vpack.c.bf16 %v4819_v8, %v4818_v30  ;;  %v4613_v48 = vld [vmem:[#allocation2 + $0x90] sm:$0xff] }
 0x351   : > { %v9295_v56 = vpop.f32.mrb[53].mxu1  ;;  %v3388_v29 = vpop.f32.mrb[54].mxu0  ;;  %v4823_v17 = vld [vmem:[#allocation2 + $0x91] sm:$0xff] }
 0x352   : > { %v3607_v7 = vadd.f32 %v3566_v33, %v3426_v46  ;;  %v3427_v54 = vadd.f32 %v3388_v29, %v11888_v44  ;;  %v3569_v26 = vpop.f32.mrb[54].mxu1  ;;  %v9258_v27 = vpop.f32.mrb[55].mxu0  ;;  %3785 = vst.msk [vmem:[#allocation2 + $0xe8] sm:$0xff] %vm228_vm3, %v3767_v3  ;;  %v3768_v19 = vmul.f32 %v3717_v52, %v3642_v5  ;;  %v4612_v5 = vld [vmem:[#allocation2 + $0x88] sm:$0xff] }
 0x353   : > { %v9296_v62 = vpop.f32.mrb[55].mxu1  ;;  %v3722_v44 = vpop.permute.xlu0 %3721  ;;  %v4822_v27 = vld [vmem:[#allocation2 + $0x89] sm:$0xff] }
 0x354   : > { %v3625_v31 = vadd.f32 %v11943_v41, %v3607_v7  ;;  %v3608_v23 = vadd.f32 %v3569_v26, %v3427_v54  ;;  %9514 = vmatmul.mubr.msk.bf16.gmra.mrb[160].mxu0 %vm228_vm3, %v4621_v16  ;;  %3786 = vst.msk [vmem:[#allocation2 + $0xf0] sm:$0xff] %vm228_vm3, %v3768_v19  ;;  %v3737_v38 = vpop.permute.xlu1 %3736  ;;  %v4623_v26 = vpack.c.bf16 %v4613_v48, %v4612_v5 }
 0x355   : > { %9558 = vmatmul.mubr.msk.bf16.gmra.mrb[160].mxu1 %vm228_vm3, %v12039_v49  ;;  %9517 = vmatprep.mubr.msk.bf16.mxu0 %vm10199_vm1, %v10198_v2  ;;  %v12069_v30 = vpack.c.bf16 %v4823_v17, %v4822_v27 }
 0x356   : > { %v3643_v13 = vmax.f32 %v3625_v31, 0.0  ;;  %v3626_v55 = vadd.f32 %v11943_v41, %v3608_v23  ;;  %9561 = vmatprep.mubr.msk.bf16.mxu1 %vm10199_vm1, %v10198_v2 }
 0x357   : > { %v3393_v32 = vpop.f32.mrb[56].mxu0 }
 0x358   : > { %v3769_v24 = vmul.f32 %v3722_v44, %v3643_v13  ;;  %v3644_v34 = vmax.f32 %v3626_v55, 0.0  ;;  %v3428_v37 = vadd.f32 %v3393_v32, %v11897_v61  ;;  %v3574_v57 = vpop.f32.mrb[56].mxu1  ;;  %v9261_v35 = vpop.f32.mrb[57].mxu0  ;;  %v4615_v13 = vld [vmem:[#allocation2 + $0xa0] sm:$0xff] }
 0x359   : > { %v9299_v21 = vpop.f32.mrb[57].mxu1  ;;  %v3396_v10 = vpop.f32.mrb[58].mxu0  ;;  %v4614_v35 = vld [vmem:[#allocation2 + $0x98] sm:$0xff] }
 0x35a   : > { %3787 = vst.msk [vmem:[#allocation2 + $0xf8] sm:$0xff] %vm228_vm3, %v3769_v24  ;;  %v3770_v47 = vmul.f32 %v3727_v0, %v3644_v34  ;;  %v3609_v25 = vadd.f32 %v3574_v57, %v3428_v37  ;;  %v3429_v9 = vadd.f32 %v3396_v10, %v11900_v22  ;;  %v3577_v6 = vpop.f32.mrb[58].mxu1  ;;  %v9262_v43 = vpop.f32.mrb[59].mxu0  ;;  %v4825_v34 = vld [vmem:[#allocation2 + $0xa1] sm:$0xff] }
 0x35b   : > { %v9300_v20 = vpop.f32.mrb[59].mxu1  ;;  %v3732_v22 = vpop.permute.xlu0 %3731 }
 0x35c   : > { %3788 = vst.msk [vmem:[#allocation2 + $0x100] sm:$0xff] %vm228_vm3, %v3770_v47  ;;  %v3627_v61 = vadd.f32 %v11943_v41, %v3609_v25  ;;  %v3610_v11 = vadd.f32 %v3577_v6, %v3429_v9  ;;  %9518 = vmatmul.mubr.msk.bf16.gmra.mrb[164].mxu0 %vm228_vm3, %v4622_v4  ;;  %v3747_v23 = vpop.permute.xlu1 %3746  ;;  %v4624_v25 = vpack.c.bf16 %v4615_v13, %v4614_v35  ;;  %v4824_v9 = vld [vmem:[#allocation2 + $0x99] sm:$0xff] }
 0x35d   : > { %9562 = vmatmul.mubr.msk.bf16.gmra.mrb[164].mxu1 %vm228_vm3, %v12054_v28  ;;  %9521 = vmatprep.mubr.msk.bf16.mxu0 %vm10199_vm1, %v10198_v2  ;;  %v12084_v43 = vpack.c.bf16 %v4825_v34, %v4824_v9  ;;  %v5230_v13 = vld [vmem:[#allocation2 + $0x3a] sm:$0xff]  ;;  %v5232_v9 = vld [vmem:[#allocation2 + $0x4a] sm:$0xff] }
 0x35e   : > { %v3645_v58 = vmax.f32 %v3627_v61, 0.0  ;;  %v3628_v42 = vadd.f32 %v11943_v41, %v3610_v11  ;;  %9565 = vmatprep.mubr.msk.bf16.mxu1 %vm10199_vm1, %v10198_v2  ;;  %v5019_v61 = vld [vmem:[#allocation2 + $0x31] sm:$0xff] }
 0x35f   : > { %v3401_v52 = vpop.f32.mrb[60].mxu0  ;;  %v10154_v34 = vld [vmem:[%s13176_s2 + $0x118] sm:$0xff]  }
 0x360   : > { %v3771_v36 = vmul.f32 %v3732_v22, %v3645_v58  ;;  %v3646_v51 = vmax.f32 %v3628_v42, 0.0  ;;  %v3430_v12 = vadd.f32 %v3401_v52, %v11909_v18  ;;  %v3582_v46 = vpop.f32.mrb[60].mxu1  ;;  %v9265_v33 = vpop.f32.mrb[61].mxu0  ;;  %v5229_v58 = vld [vmem:[#allocation2 + $0x32] sm:$0xff] }
 0x361   : > { %v9303_v8 = vpop.f32.mrb[61].mxu1  ;;  %v3404_v3 = vpop.f32.mrb[62].mxu0  ;;  %v5228_v33 = vld [vmem:[#allocation2 + $0x2a] sm:$0xff] }
 0x362   : > { %3789 = vst.msk [vmem:[#allocation2 + $0x108] sm:$0xff] %vm228_vm3, %v3771_v36  ;;  %v3772_v56 = vmul.f32 %v3737_v38, %v3646_v51  ;;  %v3611_v29 = vadd.f32 %v3582_v46, %v3430_v12  ;;  %v3431_v40 = vadd.f32 %v3404_v3, %v11912_v59  ;;  %v3585_v7 = vpop.f32.mrb[62].mxu1  ;;  %v9266_v54 = vpop.f32.mrb[63].mxu0  ;;  %v5018_v36 = vld [vmem:[#allocation2 + $0x29] sm:$0xff] }
 0x363   : > { %v9304_v16 = vpop.f32.mrb[63].mxu1  ;;  %v3742_v59 = vpop.permute.xlu0 %3741  ;;  %v5036_v17 = vpack.c.bf16 %v5019_v61, %v5018_v36  ;;  %v10150_v54 = vld [vmem:[%s13176_s2 + $0x108] sm:$0xff]  }
 0x364   : > { %3790 = vst.msk [vmem:[#allocation2 + $0x110] sm:$0xff] %vm228_vm3, %v3772_v56  ;;  %v3629_v18 = vadd.f32 %v11943_v41, %v3611_v29  ;;  %v3612_v19 = vadd.f32 %v3585_v7, %v3431_v40  ;;  %9522 = vmatmul.mubr.msk.bf16.gmra.mrb[168].mxu0 %vm228_vm3, %v4623_v26  ;;  %v3757_v11 = vpop.permute.xlu1 %3756  ;;  %v10149_v56 = vld [vmem:[%s13176_s2 + $0x20] sm:$0xff]   ;;  %v5246_v29 = vpack.c.bf16 %v5229_v58, %v5228_v33  ;;  %v10151_v26 = vld [vmem:[%s13176_s2 + $0x28] sm:$0xff]   ;;  %v5237_v33 = vld [vmem:[#allocation2 + $0x72] sm:$0xff] }
 0x365   : > { %9566 = vmatmul.mubr.msk.bf16.gmra.mrb[168].mxu1 %vm228_vm3, %v12069_v30  ;;  %9525 = vmatprep.mubr.msk.bf16.mxu0 %vm10199_vm1, %v10198_v2  ;;  %v5235_v61 = vld [vmem:[#allocation2 + $0x62] sm:$0xff] }
 0x366   : > { %v3647_v62 = vmax.f32 %v3629_v18, 0.0  ;;  %v3630_v31 = vadd.f32 %v11943_v41, %v3612_v19  ;;  %9569 = vmatprep.mubr.msk.bf16.mxu1 %vm10199_vm1, %v10198_v2  ;;  %v5231_v19 = vld [vmem:[#allocation2 + $0x42] sm:$0xff] }
 0x367   : > { %v3409_v44 = vpop.f32.mrb[64].mxu0 }
 0x368   : > { %v3773_v55 = vmul.f32 %v3742_v59, %v3647_v62  ;;  %v3648_v0 = vmax.f32 %v3630_v31, 0.0  ;;  %v3432_v32 = vadd.f32 %v3409_v44, %v11921_v15  ;;  %v3590_v63 = vpop.f32.mrb[64].mxu1  ;;  %v9269_v24 = vpop.f32.mrb[65].mxu0 }
 0x369   : > { %v9307_v37 = vpop.f32.mrb[65].mxu1  ;;  %v3412_v57 = vpop.f32.mrb[66].mxu0  ;;  %v10153_v24 = vld [vmem:[%s13176_s2 + $0x30] sm:$0xff]  }
 0x36a   : > { %3791 = vst.msk [vmem:[#allocation2 + $0x118] sm:$0xff] %vm228_vm3, %v3773_v55  ;;  %v3774_v45 = vmul.f32 %v3747_v23, %v3648_v0  ;;  %v3613_v21 = vadd.f32 %v3590_v63, %v3432_v32  ;;  %v3433_v10 = vadd.f32 %v3412_v57, %v11924_v53  ;;  %v3593_v1 = vpop.f32.mrb[66].mxu1  ;;  %v9270_v47 = vpop.f32.mrb[67].mxu0  ;;  %v10152_v55 = vld [vmem:[%s13176_s2 + $0x110] sm:$0xff]   ;;  %v5247_v63 = vpack.c.bf16 %v5231_v19, %v5230_v13  ;;  %v5238_v13 = vld [vmem:[#allocation2 + $0x7a] sm:$0xff] }
 0x36b   : > { %v9308_v6 = vpop.f32.mrb[67].mxu1  ;;  %v3752_v53 = vpop.permute.xlu0 %3751 }
 0x36c   : > { %3792 = vst.msk [vmem:[#allocation2 + $0x120] sm:$0xff] %vm228_vm3, %v3774_v45  ;;  %v3631_v15 = vadd.f32 %v11943_v41, %v3613_v21  ;;  %v3614_v4 = vadd.f32 %v3593_v1, %v3433_v10  ;;  %9526 = vmatmul.mubr.msk.bf16.gmra.mrb[172].mxu0 %vm228_vm3, %v4624_v25  ;;  %v5233_v45 = vld [vmem:[#allocation2 + $0x52] sm:$0xff] }
 0x36d   : > { %9570 = vmatmul.mubr.msk.bf16.gmra.mrb[172].mxu1 %vm228_vm3, %v12084_v43  ;;  %9581 = vmatprep.mubr.msk.bf16.mxu0 %vm10199_vm1, %v10198_v2 }
 0x36e   : > { %v3649_v39 = vmax.f32 %v3631_v15, 0.0  ;;  %v3632_v20 = vadd.f32 %v11943_v41, %v3614_v4  ;;  %9625 = vmatprep.mubr.msk.bf16.mxu1 %vm10199_vm1, %v10198_v2  ;;  %v10148_v41 = vld [vmem:[%s13176_s2 + $0x100] sm:$0xff]   ;;  %v5248_v4 = vpack.c.bf16 %v5233_v45, %v5232_v9 }
 0x36f   : > { %v3951_v22 = vpop.f32.mrb[68].mxu0 }
 0x370   : > { %v3775_v42 = vmul.f32 %v3752_v53, %v3649_v39  ;;  %v3650_v38 = vmax.f32 %v3632_v20, 0.0  ;;  %v4107_v52 = vpop.f32.mrb[68].mxu1  ;;  %v9319_v48 = vpop.f32.mrb[69].mxu0 }
 0x371   : > { %v12096_v51 = vadd.f32 %v4107_v52, %v3951_v22  ;;  %v9363_v12 = vpop.f32.mrb[69].mxu1  ;;  %v3954_v46 = vpop.f32.mrb[70].mxu0 }
 0x372   : > { %3793 = vst.msk [vmem:[#allocation2 + $0x128] sm:$0xff] %vm228_vm3, %v3775_v42  ;;  %v3776_v8 = vmul.f32 %v3757_v11, %v3650_v38  ;;  %v4110_v3 = vpop.f32.mrb[70].mxu1  ;;  %v9320_v5 = vpop.f32.mrb[71].mxu0  ;;  %v5234_v38 = vld [vmem:[#allocation2 + $0x5a] sm:$0xff] }
 0x373   : > { %v12105_v40 = vadd.f32 %v4110_v3, %v3954_v46  ;;  %v9364_v7 = vpop.f32.mrb[71].mxu1  ;;  %v5249_v36 = vpack.c.bf16 %v5235_v61, %v5234_v38 }
 0x374   : > { %3794 = vst.msk [vmem:[#allocation2 + $0x130] sm:$0xff] %vm228_vm3, %v3776_v8  ;;  %9582 = vmatmul.mubr.msk.bf16.vlgmr.msra.gmra.mrb[176].mxu0 %vm228_vm3, %v5036_v17 }
 0x375   : > { %9626 = vmatmul.mubr.msk.bf16.vlgmr.msra.gmra.mrb[176].mxu1 %vm228_vm3, %v5246_v29  ;;  %9662 = vmatpush3.bf16.msra.mxu0 %v10148_v41  ;;  %v5236_v29 = vld [vmem:[#allocation2 + $0x6a] sm:$0xff] }
 0x376   : > { %9706 = vmatpush3.bf16.msra.mxu1 %v10149_v56  ;;  %9585 = vmatprep.mubr.msk.bf16.mxu0 %vm10199_vm1, %v10198_v2 }
 0x377   : > { %v3959_v27 = vpop.f32.mrb[72].mxu0  ;;  %9629 = vmatprep.mubr.msk.bf16.mxu1 %vm10199_vm1, %v10198_v2  ;;  %9663 = vmatprep.subr.bf16.mxu0 %v10198_v2 }
 0x378   : > { %v4115_v16 = vpop.f32.mrb[72].mxu1  ;;  %v9323_v18 = vpop.f32.mrb[73].mxu0  ;;  %9707 = vmatprep.subr.bf16.mxu1 %v10198_v2 }
 0x379   : > { %v12122_v59 = vadd.f32 %v4115_v16, %v3959_v27  ;;  %v9367_v62 = vpop.f32.mrb[73].mxu1  ;;  %v3962_v31 = vpop.f32.mrb[74].mxu0  ;;  %9664 = vmatpush3.bf16.msra.mxu0 %v10150_v54  ;;  %v5250_v54 = vpack.c.bf16 %v5237_v33, %v5236_v29  ;;  %v5239_v18 = vld [vmem:[#allocation2 + $0x82] sm:$0xff] }
 0x37a   : > { %v4118_v23 = vpop.f32.mrb[74].mxu1  ;;  %v9324_v44 = vpop.f32.mrb[75].mxu0  ;;  %9708 = vmatpush3.bf16.msra.mxu1 %v10151_v26  ;;  %9665 = vmatprep.subr.bf16.mxu0 %v10198_v2  ;;  %v6715_v33 = vld [vmem:[#allocation2 + $0xa9] sm:$0xff] }
 0x37b   : > { %v12128_v0 = vadd.f32 %v4118_v23, %v3962_v31  ;;  %v9368_v32 = vpop.f32.mrb[75].mxu1  ;;  %9709 = vmatprep.subr.bf16.mxu1 %v10198_v2 }
 0x37c   : > { %9586 = vmatmul.mubr.msk.bf16.gmra.mrb[180].mxu0 %vm228_vm3, %v11992_v50  ;;  %v10155_v50 = vld [vmem:[%s13176_s2 + $0x38] sm:$0xff]   ;;  %v5251_v32 = vpack.c.bf16 %v5239_v18, %v5238_v13  ;;  %v5438_v13 = vld [vmem:[#allocation2 + $0x2b] sm:$0xff] }
 0x37d   : > { %9630 = vmatmul.mubr.msk.bf16.gmra.mrb[180].mxu1 %vm228_vm3, %v5247_v63  ;;  %9589 = vmatprep.mubr.msk.bf16.mxu0 %vm10199_vm1, %v10198_v2 }
 0x37e   : > { %9633 = vmatprep.mubr.msk.bf16.mxu1 %vm10199_vm1, %v10198_v2  ;;  %9666 = vmatpush3.bf16.msra.mxu0 %v10152_v55 }
 0x37f   : > { %v3967_v37 = vpop.f32.mrb[76].mxu0  ;;  %9710 = vmatpush3.bf16.msra.mxu1 %v10153_v24  ;;  %9667 = vmatprep.subr.bf16.mxu0 %v10198_v2 }
 0x380   : > { %v4123_v57 = vpop.f32.mrb[76].mxu1  ;;  %v9327_v35 = vpop.f32.mrb[77].mxu0  ;;  %9711 = vmatprep.subr.bf16.mxu1 %v10198_v2 }
 0x381   : > { %v12149_v21 = vadd.f32 %v4123_v57, %v3967_v37  ;;  %v9371_v10 = vpop.f32.mrb[77].mxu1  ;;  %v3970_v1 = vpop.f32.mrb[78].mxu0  ;;  %v5241_v37 = vld [vmem:[#allocation2 + $0x92] sm:$0xff] }
 0x382   : > { %v4126_v47 = vpop.f32.mrb[78].mxu1  ;;  %v9328_v25 = vpop.f32.mrb[79].mxu0  ;;  %9668 = vmatpush3.bf16.msra.mxu0 %v10154_v34 }
 0x383   : > { %v12151_v6 = vadd.f32 %v4126_v47, %v3970_v1  ;;  %v9372_v15 = vpop.f32.mrb[79].mxu1  ;;  %9712 = vmatpush3.bf16.msra.mxu1 %v10155_v50  ;;  %9749 = vmatprep.subr.bf16.mxu0 %v10198_v2  ;;  %v5240_v1 = vld [vmem:[#allocation2 + $0x8a] sm:$0xff] }
 0x384   : > { %9590 = vmatmul.mubr.msk.bf16.gmra.mrb[184].mxu0 %vm228_vm3, %v12009_v60  ;;  %9793 = vmatprep.subr.bf16.mxu1 %v10198_v2  ;;  %v5252_v25 = vpack.c.bf16 %v5241_v37, %v5240_v1 }
 0x385   : > { %9634 = vmatmul.mubr.msk.bf16.gmra.mrb[184].mxu1 %vm228_vm3, %v5248_v4  ;;  %9593 = vmatprep.mubr.msk.bf16.mxu0 %vm10199_vm1, %v10198_v2 }
 0x386   : > { %9637 = vmatprep.mubr.msk.bf16.mxu1 %vm10199_vm1, %v10198_v2 }
 0x387   : > { %v3975_v53 = vpop.f32.mrb[80].mxu0 }
 0x388   : > { %v4131_v39 = vpop.f32.mrb[80].mxu1  ;;  %v9331_v20 = vpop.f32.mrb[81].mxu0 }
 0x389   : > { %v12162_v11 = vadd.f32 %v4131_v39, %v3975_v53  ;;  %v9375_v22 = vpop.f32.mrb[81].mxu1  ;;  %v3978_v58 = vpop.f32.mrb[82].mxu0  ;;  %v5243_v53 = vld [vmem:[#allocation2 + $0xa2] sm:$0xff] }
 0x38a   : > { %v4134_v42 = vpop.f32.mrb[82].mxu1  ;;  %v9332_v60 = vpop.f32.mrb[83].mxu0 }
 0x38b   : > { %v12164_v52 = vadd.f32 %v4134_v42, %v3978_v58  ;;  %v9376_v48 = vpop.f32.mrb[83].mxu1  ;;  %v5242_v42 = vld [vmem:[#allocation2 + $0x9a] sm:$0xff] }
 0x38c   : > { %9594 = vmatmul.mubr.msk.bf16.gmra.mrb[188].mxu0 %vm228_vm3, %v12024_v14  ;;  %v5253_v38 = vpack.c.bf16 %v5243_v53, %v5242_v42  ;;  %v6716_v48 = vld [vmem:[#allocation2 + $0xb1] sm:$0xff]  ;;  %v5440_v42 = vld [vmem:[#allocation2 + $0x3b] sm:$0xff] }
 0x38d   : > { %9638 = vmatmul.mubr.msk.bf16.gmra.mrb[188].mxu1 %vm228_vm3, %v5249_v36  ;;  %9597 = vmatprep.mubr.msk.bf16.mxu0 %vm10199_vm1, %v10198_v2 }
 0x38e   : > { %9641 = vmatprep.mubr.msk.bf16.mxu1 %vm10199_vm1, %v10198_v2 }
 0x38f   : > { %v3983_v12 = vpop.f32.mrb[84].mxu0 }
 0x390   : > { %v4139_v46 = vpop.f32.mrb[84].mxu1  ;;  %v9335_v41 = vpop.f32.mrb[85].mxu0 }
 0x391   : > { %v12173_v17 = vadd.f32 %v4139_v46, %v3983_v12  ;;  %v9379_v8 = vpop.f32.mrb[85].mxu1  ;;  %v3986_v3 = vpop.f32.mrb[86].mxu0  ;;  %v5245_v41 = vld [vmem:[#allocation2 + $0xb2] sm:$0xff] }
 0x392   : > { %v4142_v5 = vpop.f32.mrb[86].mxu1  ;;  %v9336_v56 = vpop.f32.mrb[87].mxu0 }
 0x393   : > { %v12175_v14 = vadd.f32 %v4142_v5, %v3986_v3  ;;  %v9380_v7 = vpop.f32.mrb[87].mxu1  ;;  %v12219_v56 = vpack.c.bf16 %v6716_v48, %v6715_v33 }
 0x394   : > { %9598 = vmatmul.mubr.msk.bf16.gmra.mrb[192].mxu0 %vm228_vm3, %v12039_v49  ;;  %v5244_v7 = vld [vmem:[#allocation2 + $0xaa] sm:$0xff] }
 0x395   : > { %9642 = vmatmul.mubr.msk.bf16.gmra.mrb[192].mxu1 %vm228_vm3, %v5250_v54  ;;  %9601 = vmatprep.mubr.msk.bf16.mxu0 %vm10199_vm1, %v10198_v2 }
 0x396   : > { %9645 = vmatprep.mubr.msk.bf16.mxu1 %vm10199_vm1, %v10198_v2 }
 0x397   : > { %v3991_v26 = vpop.f32.mrb[88].mxu0 }
 0x398   : > { %v4147_v27 = vpop.f32.mrb[88].mxu1  ;;  %v9339_v16 = vpop.f32.mrb[89].mxu0 }
 0x399   : > { %v12184_v19 = vadd.f32 %v4147_v27, %v3991_v26  ;;  %v9383_v62 = vpop.f32.mrb[89].mxu1  ;;  %v3994_v31 = vpop.f32.mrb[90].mxu0  ;;  %v5254_v26 = vpack.c.bf16 %v5245_v41, %v5244_v7  ;;  %v5439_v16 = vld [vmem:[#allocation2 + $0x33] sm:$0xff] }
 0x39a   : > { %v4150_v23 = vpop.f32.mrb[90].mxu1  ;;  %v9340_v44 = vpop.f32.mrb[91].mxu0  ;;  %v5742_v62 = vld [vmem:[#allocation2 + $0x9e] sm:$0xff] }
 0x39b   : > { %v12186_v49 = vadd.f32 %v4150_v23, %v3994_v31  ;;  %v9384_v55 = vpop.f32.mrb[91].mxu1  ;;  %v10163_v7 = vld [vmem:[%s13176_s2 + $0x58] sm:$0xff]  }
 0x39c   : > { %9602 = vmatmul.mubr.msk.bf16.gmra.mrb[196].mxu0 %vm228_vm3, %v12054_v28 }
 0x39d   : > { %9646 = vmatmul.mubr.msk.bf16.gmra.mrb[196].mxu1 %vm228_vm3, %v5251_v32  ;;  %9605 = vmatprep.mubr.msk.bf16.mxu0 %vm10199_vm1, %v10198_v2 }
 0x39e   : > { %9649 = vmatprep.mubr.msk.bf16.mxu1 %vm10199_vm1, %v10198_v2 }
 0x39f   : > { %v3999_v63 = vpop.f32.mrb[92].mxu0 }
 0x3a0   : > { %v4155_v24 = vpop.f32.mrb[92].mxu1  ;;  %v9343_v34 = vpop.f32.mrb[93].mxu0 }
 0x3a1   : > { %v12195_v50 = vadd.f32 %v4155_v24, %v3999_v63  ;;  %v9387_v57 = vpop.f32.mrb[93].mxu1  ;;  %v4002_v35 = vpop.f32.mrb[94].mxu0  ;;  %v10156_v63 = vld [vmem:[%s13176_s2] sm:$0xff]   ;;  %v5456_v24 = vpack.c.bf16 %v5439_v16, %v5438_v13  ;;  %v5741_v34 = vld [vmem:[#allocation2 + $0x96] sm:$0xff] }
 0x3a2   : > { %v4158_v45 = vpop.f32.mrb[94].mxu1  ;;  %v9344_v10 = vpop.f32.mrb[95].mxu0 }
 0x3a3   : > { %v12197_v28 = vadd.f32 %v4158_v45, %v4002_v35  ;;  %v9388_v47 = vpop.f32.mrb[95].mxu1  ;;  %v10157_v45 = vld [vmem:[%s13176_s2 + $0x40] sm:$0xff]   ;;  %v5759_v10 = vpack.c.bf16 %v5742_v62, %v5741_v34 }
 0x3a4   : > { %9606 = vmatmul.mubr.msk.bf16.gmra.mrb[200].mxu0 %vm228_vm3, %v12069_v30 }
 0x3a5   : > { %9650 = vmatmul.mubr.msk.bf16.gmra.mrb[200].mxu1 %vm228_vm3, %v5252_v25  ;;  %9609 = vmatprep.mubr.msk.bf16.mxu0 %vm10199_vm1, %v10198_v2  ;;  %v10159_v25 = vld [vmem:[%s13176_s2 + $0x48] sm:$0xff]  }
 0x3a6   : > { %9653 = vmatprep.mubr.msk.bf16.mxu1 %vm10199_vm1, %v10198_v2 }
 0x3a7   : > { %v4007_v9 = vpop.f32.mrb[96].mxu0 }
 0x3a8   : > { %v4163_v15 = vpop.f32.mrb[96].mxu1  ;;  %v9347_v4 = vpop.f32.mrb[97].mxu0 }
 0x3a9   : > { %v12206_v39 = vadd.f32 %v4163_v15, %v4007_v9  ;;  %v9391_v20 = vpop.f32.mrb[97].mxu1  ;;  %v4010_v61 = vpop.f32.mrb[98].mxu0  ;;  %v5441_v15 = vld [vmem:[#allocation2 + $0x43] sm:$0xff] }
 0x3aa   : > { %v4166_v22 = vpop.f32.mrb[98].mxu1  ;;  %v9348_v58 = vpop.f32.mrb[99].mxu0 }
 0x3ab   : > { %v12208_v30 = vadd.f32 %v4166_v22, %v4010_v61  ;;  %v9392_v60 = vpop.f32.mrb[99].mxu1  ;;  %v5744_v61 = vld [vmem:[#allocation2 + $0xae] sm:$0xff] }
 0x3ac   : > { %9610 = vmatmul.mubr.msk.bf16.gmra.mrb[204].mxu0 %vm228_vm3, %v12084_v43 }
 0x3ad   : > { %9654 = vmatmul.mubr.msk.bf16.gmra.mrb[204].mxu1 %vm228_vm3, %v5253_v38  ;;  %9613 = vmatprep.mubr.msk.bf16.mxu0 %vm10199_vm1, %v10198_v2 }
 0x3ae   : > { %9657 = vmatprep.mubr.msk.bf16.mxu1 %vm10199_vm1, %v10198_v2 }
 0x3af   : > { %v4015_v36 = vpop.f32.mrb[100].mxu0 }
 0x3b0   : > { %v4171_v12 = vpop.f32.mrb[100].mxu1  ;;  %v9351_v46 = vpop.f32.mrb[101].mxu0 }
 0x3b1   : > { %v9395_v8 = vpop.f32.mrb[101].mxu1  ;;  %v4018_v3 = vpop.f32.mrb[102].mxu0  ;;  %v12217_v5 = vadd.f32 %v4171_v12, %v4015_v36  ;;  %v5457_v36 = vpack.c.bf16 %v5441_v15, %v5440_v42  ;;  %v5743_v12 = vld [vmem:[#allocation2 + $0xa6] sm:$0xff] }
 0x3b2   : > { %v4174_v43 = vpop.f32.mrb[102].mxu1  ;;  %v9352_v29 = vpop.f32.mrb[103].mxu0  ;;  %v5760_v33 = vpack.c.bf16 %v5744_v61, %v5743_v12  ;;  %v5747_v61 = vld [vmem:[#allocation2 + $0xc6] sm:$0xff]  ;;  %v5750_v12 = vld [vmem:[#allocation2 + $0xde] sm:$0xff] }
 0x3b3   : > { %v9396_v54 = vpop.f32.mrb[103].mxu1  ;;  %v12221_v27 = vadd.f32 %v4174_v43, %v4018_v3  ;;  %v10162_v3 = vld [vmem:[%s13176_s2 + $0x18] sm:$0xff]  }
 0x3b4   : > { %9614 = vmatmul.mubr.msk.bf16.gmra.mrb[208].mxu0 %vm228_vm3, %v12219_v56  ;;  %v5443_v29 = vld [vmem:[#allocation2 + $0x53] sm:$0xff] }
 0x3b5   : > { %9658 = vmatmul.mubr.msk.bf16.gmra.mrb[208].mxu1 %vm228_vm3, %v5254_v26  ;;  %9669 = vmatprep.mubr.msk.bf16.mxu0 %vm10199_vm1, %v10198_v2 }
 0x3b6   : > { %9713 = vmatprep.mubr.msk.bf16.mxu1 %vm10199_vm1, %v10198_v2 }
 0x3b7   : > { %v4299_v18 = vpop.f32.mrb[104].mxu0 }
 0x3b8   : > { %v4370_v31 = vadd.f32 %v4299_v18, %v12096_v51  ;;  %v4509_v23 = vpop.f32.mrb[104].mxu1  ;;  %v9407_v44 = vpop.f32.mrb[105].mxu0  ;;  %v5746_v18 = vld [vmem:[#allocation2 + $0xbe] sm:$0xff] }
 0x3b9   : > { %v9451_v55 = vpop.f32.mrb[105].mxu1  ;;  %v4302_v32 = vpop.f32.mrb[106].mxu0 }
 0x3ba   : > { %v4371_v37 = vadd.f32 %v4302_v32, %v12105_v40  ;;  %v4512_v57 = vpop.f32.mrb[106].mxu1  ;;  %v9408_v35 = vpop.f32.mrb[107].mxu0  ;;  %v12238_v51 = vadd.f32 %v4509_v23, %v4370_v31  ;;  %v10158_v40 = vld [vmem:[%s13176_s2 + $0x8] sm:$0xff]  }
 0x3bb   : > { %v9452_v1 = vpop.f32.mrb[107].mxu1  ;;  %v5442_v23 = vld [vmem:[#allocation2 + $0x4b] sm:$0xff] }
 0x3bc   : > { %9670 = vmatmul.mubr.msk.bf16.vlgmr.msra.gmra.mrb[212].mxu0 %vm228_vm3, %v5456_v24  ;;  %v12241_v47 = vadd.f32 %v4512_v57, %v4371_v37  ;;  %v5458_v32 = vpack.c.bf16 %v5443_v29, %v5442_v23  ;;  %v5445_v57 = vld [vmem:[#allocation2 + $0x63] sm:$0xff]  ;;  %v5748_v1 = vld [vmem:[#allocation2 + $0xce] sm:$0xff] }
 0x3bd   : > { %9714 = vmatmul.mubr.msk.bf16.vlgmr.msra.gmra.mrb[212].mxu1 %vm228_vm3, %v5759_v10  ;;  %9750 = vmatpush3.bf16.msra.mxu0 %v10156_v63  ;;  %v5745_v63 = vld [vmem:[#allocation2 + $0xb6] sm:$0xff]  ;;  %v5762_v42 = vpack.c.bf16 %v5748_v1, %v5747_v61 }
 0x3be   : > { %9794 = vmatpush3.bf16.msra.mxu1 %v10157_v45  ;;  %9673 = vmatprep.mubr.msk.bf16.mxu0 %vm10199_vm1, %v10198_v2  ;;  %v5761_v37 = vpack.c.bf16 %v5746_v18, %v5745_v63 }
 0x3bf   : > { %v4307_v9 = vpop.f32.mrb[108].mxu0  ;;  %9717 = vmatprep.mubr.msk.bf16.mxu1 %vm10199_vm1, %v10198_v2  ;;  %9751 = vmatprep.subr.bf16.mxu0 %v10198_v2 }
 0x3c0   : > { %v4372_v4 = vadd.f32 %v4307_v9, %v12122_v59  ;;  %v4517_v53 = vpop.f32.mrb[108].mxu1  ;;  %v9411_v20 = vpop.f32.mrb[109].mxu0  ;;  %9795 = vmatprep.subr.bf16.mxu1 %v10198_v2  ;;  %v10160_v59 = vld [vmem:[%s13176_s2 + $0x10] sm:$0xff]   ;;  %v5444_v9 = vld [vmem:[#allocation2 + $0x5b] sm:$0xff] }
 0x3c1   : > { %v9455_v22 = vpop.f32.mrb[109].mxu1  ;;  %v4310_v58 = vpop.f32.mrb[110].mxu0  ;;  %9752 = vmatpush3.bf16.msra.mxu0 %v10158_v40  ;;  %v5459_v20 = vpack.c.bf16 %v5445_v57, %v5444_v9  ;;  %v5751_v57 = vld [vmem:[#allocation2 + $0xe6] sm:$0xff] }
 0x3c2   : > { %v4373_v60 = vadd.f32 %v4310_v58, %v12128_v0  ;;  %v4520_v38 = vpop.f32.mrb[110].mxu1  ;;  %v9412_v48 = vpop.f32.mrb[111].mxu0  ;;  %9796 = vmatpush3.bf16.msra.mxu1 %v10159_v25  ;;  %9753 = vmatprep.subr.bf16.mxu0 %v10198_v2  ;;  %v12262_v46 = vadd.f32 %v4517_v53, %v4372_v4  ;;  %v10161_v0 = vld [vmem:[%s13176_s2 + $0x50] sm:$0xff]  }
 0x3c3   : > { %v9456_v41 = vpop.f32.mrb[111].mxu1  ;;  %9797 = vmatprep.subr.bf16.mxu1 %v10198_v2 }
 0x3c4   : > { %9674 = vmatmul.mubr.msk.bf16.gmra.mrb[216].mxu0 %vm228_vm3, %v5457_v36  ;;  %v12269_v8 = vadd.f32 %v4520_v38, %v4373_v60 }
 0x3c5   : > { %9718 = vmatmul.mubr.msk.bf16.gmra.mrb[216].mxu1 %vm228_vm3, %v5760_v33  ;;  %9677 = vmatprep.mubr.msk.bf16.mxu0 %vm10199_vm1, %v10198_v2  ;;  %v5446_v33 = vld [vmem:[#allocation2 + $0x6b] sm:$0xff] }
 0x3c6   : > { %9721 = vmatprep.mubr.msk.bf16.mxu1 %vm10199_vm1, %v10198_v2  ;;  %9754 = vmatpush3.bf16.msra.mxu0 %v10160_v59 }
 0x3c7   : > { %v4315_v43 = vpop.f32.mrb[112].mxu0  ;;  %9798 = vmatpush3.bf16.msra.mxu1 %v10161_v0  ;;  %9755 = vmatprep.subr.bf16.mxu0 %v10198_v2 }
 0x3c8   : > { %v4374_v54 = vadd.f32 %v4315_v43, %v12149_v21  ;;  %v4525_v26 = vpop.f32.mrb[112].mxu1  ;;  %v9415_v16 = vpop.f32.mrb[113].mxu0  ;;  %9799 = vmatprep.subr.bf16.mxu1 %v10198_v2 }
 0x3c9   : > { %v9459_v62 = vpop.f32.mrb[113].mxu1  ;;  %v4318_v31 = vpop.f32.mrb[114].mxu0 }
 0x3ca   : > { %v4375_v44 = vadd.f32 %v4318_v31, %v12151_v6  ;;  %v4528_v13 = vpop.f32.mrb[114].mxu1  ;;  %v9416_v55 = vpop.f32.mrb[115].mxu0  ;;  %9756 = vmatpush3.bf16.msra.mxu0 %v10162_v3  ;;  %v12286_v24 = vadd.f32 %v4525_v26, %v4374_v54 }
 0x3cb   : > { %v9460_v34 = vpop.f32.mrb[115].mxu1  ;;  %9800 = vmatpush3.bf16.msra.mxu1 %v10163_v7  ;;  %9837 = vmatprep.subr.bf16.mxu0 %v10198_v2  ;;  %v5749_v7 = vld [vmem:[#allocation2 + $0xd6] sm:$0xff] }
 0x3cc   : > { %9678 = vmatmul.mubr.msk.bf16.gmra.mrb[220].mxu0 %vm228_vm3, %v5458_v32  ;;  %9881 = vmatprep.subr.bf16.mxu1 %v10198_v2  ;;  %v12291_v21 = vadd.f32 %v4528_v13, %v4375_v44  ;;  %v5763_v16 = vpack.c.bf16 %v5750_v12, %v5749_v7  ;;  %v5752_v44 = vld [vmem:[#allocation2 + $0xee] sm:$0xff]  ;;  %v5448_v32 = vld [vmem:[#allocation2 + $0x7b] sm:$0xff] }
 0x3cd   : > { %9722 = vmatmul.mubr.msk.bf16.gmra.mrb[220].mxu1 %vm228_vm3, %v5761_v37  ;;  %9681 = vmatprep.mubr.msk.bf16.mxu0 %vm10199_vm1, %v10198_v2 }
 0x3ce   : > { %9725 = vmatprep.mubr.msk.bf16.mxu1 %vm10199_vm1, %v10198_v2 }
 0x3cf   : > { %v4323_v6 = vpop.f32.mrb[116].mxu0 }
 0x3d0   : > { %v4376_v35 = vadd.f32 %v4323_v6, %v12162_v11  ;;  %v4533_v45 = vpop.f32.mrb[116].mxu1  ;;  %v9419_v10 = vpop.f32.mrb[117].mxu0 }
 0x3d1   : > { %v9463_v40 = vpop.f32.mrb[117].mxu1  ;;  %v4326_v25 = vpop.f32.mrb[118].mxu0  ;;  %v5764_v10 = vpack.c.bf16 %v5752_v44, %v5751_v57 }
 0x3d2   : > { %v4377_v15 = vadd.f32 %v4326_v25, %v12164_v52  ;;  %v4536_v4 = vpop.f32.mrb[118].mxu1  ;;  %v9420_v53 = vpop.f32.mrb[119].mxu0  ;;  %v12300_v22 = vadd.f32 %v4533_v45, %v4376_v35  ;;  %v5447_v52 = vld [vmem:[#allocation2 + $0x73] sm:$0xff] }
 0x3d3   : > { %v9464_v58 = vpop.f32.mrb[119].mxu1  ;;  %v5460_v29 = vpack.c.bf16 %v5447_v52, %v5446_v33  ;;  %v5753_v52 = vld [vmem:[#allocation2 + $0xf6] sm:$0xff] }
 0x3d4   : > { %9682 = vmatmul.mubr.msk.bf16.gmra.mrb[224].mxu0 %vm228_vm3, %v5459_v20  ;;  %v12303_v60 = vadd.f32 %v4536_v4, %v4377_v15  ;;  %v5754_v15 = vld [vmem:[#allocation2 + $0xfe] sm:$0xff]  ;;  %v5450_v20 = vld [vmem:[#allocation2 + $0x8b] sm:$0xff] }
 0x3d5   : > { %9726 = vmatmul.mubr.msk.bf16.gmra.mrb[224].mxu1 %vm228_vm3, %v5762_v42  ;;  %9685 = vmatprep.mubr.msk.bf16.mxu0 %vm10199_vm1, %v10198_v2 }
 0x3d6   : > { %9729 = vmatprep.mubr.msk.bf16.mxu1 %vm10199_vm1, %v10198_v2 }
 0x3d7   : > { %v4331_v11 = vpop.f32.mrb[120].mxu0 }
 0x3d8   : > { %v4378_v38 = vadd.f32 %v4331_v11, %v12173_v17  ;;  %v4541_v48 = vpop.f32.mrb[120].mxu1  ;;  %v9423_v36 = vpop.f32.mrb[121].mxu0 }
 0x3d9   : > { %v9467_v59 = vpop.f32.mrb[121].mxu1  ;;  %v4334_v41 = vpop.f32.mrb[122].mxu0  ;;  %v5765_v36 = vpack.c.bf16 %v5754_v15, %v5753_v52  ;;  %v10164_v52 = vld [vmem:[%s13176_s2 + $0x60] sm:$0xff]  }
 0x3da   : > { %v4379_v0 = vadd.f32 %v4334_v41, %v12175_v14  ;;  %v4544_v3 = vpop.f32.mrb[122].mxu1  ;;  %v9424_v43 = vpop.f32.mrb[123].mxu0  ;;  %v12312_v54 = vadd.f32 %v4541_v48, %v4378_v38  ;;  %v5449_v14 = vld [vmem:[#allocation2 + $0x83] sm:$0xff] }
 0x3db   : > { %v9468_v26 = vpop.f32.mrb[123].mxu1  ;;  %v5461_v6 = vpack.c.bf16 %v5449_v14, %v5448_v32  ;;  %v5755_v14 = vld [vmem:[#allocation2 + $0x106] sm:$0xff] }
 0x3dc   : > { %9686 = vmatmul.mubr.msk.bf16.gmra.mrb[228].mxu0 %vm228_vm3, %v5460_v29  ;;  %v12315_v18 = vadd.f32 %v4544_v3, %v4379_v0  ;;  %v5756_v0 = vld [vmem:[#allocation2 + $0x10e] sm:$0xff]  ;;  %v5452_v29 = vld [vmem:[#allocation2 + $0x9b] sm:$0xff] }
 0x3dd   : > { %9730 = vmatmul.mubr.msk.bf16.gmra.mrb[228].mxu1 %vm228_vm3, %v5763_v16  ;;  %9689 = vmatprep.mubr.msk.bf16.mxu0 %vm10199_vm1, %v10198_v2 }
 0x3de   : > { %9733 = vmatprep.mubr.msk.bf16.mxu1 %vm10199_vm1, %v10198_v2 }
 0x3df   : > { %v4339_v17 = vpop.f32.mrb[124].mxu0 }
 0x3e0   : > { %v4380_v62 = vadd.f32 %v4339_v17, %v12184_v19  ;;  %v4549_v31 = vpop.f32.mrb[124].mxu1  ;;  %v9427_v23 = vpop.f32.mrb[125].mxu0 }
 0x3e1   : > { %v9471_v13 = vpop.f32.mrb[125].mxu1  ;;  %v4342_v55 = vpop.f32.mrb[126].mxu0  ;;  %v5766_v23 = vpack.c.bf16 %v5756_v0, %v5755_v14  ;;  %v6091_v14 = vld [vmem:[#allocation2 + $0xaf] sm:$0xff] }
 0x3e2   : > { %v4381_v63 = vadd.f32 %v4342_v55, %v12186_v49  ;;  %v4552_v34 = vpop.f32.mrb[126].mxu1  ;;  %v9428_v37 = vpop.f32.mrb[127].mxu0  ;;  %v12324_v35 = vadd.f32 %v4549_v31, %v4380_v62  ;;  %v5451_v49 = vld [vmem:[#allocation2 + $0x93] sm:$0xff] }
 0x3e3   : > { %v9472_v45 = vpop.f32.mrb[127].mxu1  ;;  %v5462_v11 = vpack.c.bf16 %v5451_v49, %v5450_v20 }
 0x3e4   : > { %9690 = vmatmul.mubr.msk.bf16.gmra.mrb[232].mxu0 %vm228_vm3, %v5461_v6  ;;  %v12327_v1 = vadd.f32 %v4552_v34, %v4381_v63  ;;  %v5758_v63 = vld [vmem:[#allocation2 + $0x11e] sm:$0xff]  ;;  %v5454_v6 = vld [vmem:[#allocation2 + $0xab] sm:$0xff] }
 0x3e5   : > { %9734 = vmatmul.mubr.msk.bf16.gmra.mrb[232].mxu1 %vm228_vm3, %v5764_v10  ;;  %9693 = vmatprep.mubr.msk.bf16.mxu0 %vm10199_vm1, %v10198_v2 }
 0x3e6   : > { %9737 = vmatprep.mubr.msk.bf16.mxu1 %vm10199_vm1, %v10198_v2 }
 0x3e7   : > { %v4347_v19 = vpop.f32.mrb[128].mxu0 }
 0x3e8   : > { %v4382_v40 = vadd.f32 %v4347_v19, %v12195_v50  ;;  %v4557_v25 = vpop.f32.mrb[128].mxu1  ;;  %v9431_v9 = vpop.f32.mrb[129].mxu0 }
 0x3e9   : > { %v9475_v4 = vpop.f32.mrb[129].mxu1  ;;  %v4350_v53 = vpop.f32.mrb[130].mxu0 }
 0x3ea   : > { %v4383_v61 = vadd.f32 %v4350_v53, %v12197_v28  ;;  %v4560_v58 = vpop.f32.mrb[130].mxu1  ;;  %v9432_v42 = vpop.f32.mrb[131].mxu0  ;;  %v12336_v38 = vadd.f32 %v4557_v25, %v4382_v40  ;;  %v5453_v28 = vld [vmem:[#allocation2 + $0xa3] sm:$0xff]  ;;  %v5757_v40 = vld [vmem:[#allocation2 + $0x116] sm:$0xff] }
 0x3eb   : > { %v9476_v48 = vpop.f32.mrb[131].mxu1  ;;  %v5463_v17 = vpack.c.bf16 %v5453_v28, %v5452_v29  ;;  %v5767_v9 = vpack.c.bf16 %v5758_v63, %v5757_v40  ;;  %v6089_v4 = vld [vmem:[#allocation2 + $0x9f] sm:$0xff] }
 0x3ec   : > { %9694 = vmatmul.mubr.msk.bf16.gmra.mrb[236].mxu0 %vm228_vm3, %v5462_v11  ;;  %v12339_v12 = vadd.f32 %v4560_v58, %v4383_v61  ;;  %v5706_v58 = vld [vmem:[#allocation2 + $0x95] sm:$0xff] }
 0x3ed   : > { %9738 = vmatmul.mubr.msk.bf16.gmra.mrb[236].mxu1 %vm228_vm3, %v5765_v36  ;;  %9697 = vmatprep.mubr.msk.bf16.mxu0 %vm10199_vm1, %v10198_v2  ;;  %v6088_v48 = vld [vmem:[#allocation2 + $0x97] sm:$0xff] }
 0x3ee   : > { %9741 = vmatprep.mubr.msk.bf16.mxu1 %vm10199_vm1, %v10198_v2  ;;  %v10171_v40 = vld [vmem:[%s13176_s2 + $0x98] sm:$0xff]  }
 0x3ef   : > { %v4355_v50 = vpop.f32.mrb[132].mxu0 }
 0x3f0   : > { %v4384_v59 = vadd.f32 %v4355_v50, %v12206_v39  ;;  %v4565_v41 = vpop.f32.mrb[132].mxu1  ;;  %v9435_v33 = vpop.f32.mrb[133].mxu0 }
 0x3f1   : > { %v9479_v3 = vpop.f32.mrb[133].mxu1  ;;  %v4358_v43 = vpop.f32.mrb[134].mxu0  ;;  %v6106_v33 = vpack.c.bf16 %v6089_v4, %v6088_v48  ;;  %v6092_v48 = vld [vmem:[#allocation2 + $0xb7] sm:$0xff] }
 0x3f2   : > { %v4385_v7 = vadd.f32 %v4358_v43, %v12208_v30  ;;  %v4568_v26 = vpop.f32.mrb[134].mxu1  ;;  %v9436_v16 = vpop.f32.mrb[135].mxu0  ;;  %v12348_v62 = vadd.f32 %v4565_v41, %v4384_v59  ;;  %v5455_v30 = vld [vmem:[#allocation2 + $0xb3] sm:$0xff]  ;;  %v10166_v43 = vld [vmem:[%s13176_s2 + $0x68] sm:$0xff]  }
 0x3f3   : > { %v9480_v31 = vpop.f32.mrb[135].mxu1  ;;  %v5464_v49 = vpack.c.bf16 %v5455_v30, %v5454_v6 }
 0x3f4   : > { %9698 = vmatmul.mubr.msk.bf16.gmra.mrb[240].mxu0 %vm228_vm3, %v5463_v17  ;;  %v12351_v44 = vadd.f32 %v4568_v26, %v4385_v7  ;;  %v5709_v7 = vld [vmem:[#allocation2 + $0xad] sm:$0xff] }
 0x3f5   : > { %9742 = vmatmul.mubr.msk.bf16.gmra.mrb[240].mxu1 %vm228_vm3, %v5766_v23  ;;  %9701 = vmatprep.mubr.msk.bf16.mxu0 %vm10199_vm1, %v10198_v2 }
 0x3f6   : > { %9745 = vmatprep.mubr.msk.bf16.mxu1 %vm10199_vm1, %v10198_v2 }
 0x3f7   : > { %v4363_v39 = vpop.f32.mrb[136].mxu0 }
 0x3f8   : > { %v4386_v13 = vadd.f32 %v4363_v39, %v12217_v5  ;;  %v4573_v55 = vpop.f32.mrb[136].mxu1  ;;  %v9439_v32 = vpop.f32.mrb[137].mxu0  ;;  %v5707_v5 = vld [vmem:[#allocation2 + $0x9d] sm:$0xff]  ;;  %v5708_v39 = vld [vmem:[#allocation2 + $0xa5] sm:$0xff] }
 0x3f9   : > { %v9483_v34 = vpop.f32.mrb[137].mxu1  ;;  %v4366_v37 = vpop.f32.mrb[138].mxu0  ;;  %v5724_v36 = vpack.c.bf16 %v5707_v5, %v5706_v58  ;;  %v5725_v63 = vpack.c.bf16 %v5709_v7, %v5708_v39 }
 0x3fa   : > { %v12359_v57 = vadd.f32 %v4573_v55, %v4386_v13  ;;  %v4387_v45 = vadd.f32 %v4366_v37, %v12221_v27  ;;  %v4576_v10 = vpop.f32.mrb[138].mxu1  ;;  %v9440_v19 = vpop.f32.mrb[139].mxu0  ;;  %v6090_v34 = vld [vmem:[#allocation2 + $0xa7] sm:$0xff] }
 0x3fb   : > { %v9484_v25 = vpop.f32.mrb[139].mxu1  ;;  %v6107_v6 = vpack.c.bf16 %v6091_v14, %v6090_v34  ;;  %v6097_v34 = vld [vmem:[#allocation2 + $0xdf] sm:$0xff] }
 0x3fc   : > { %v12362_v15 = vadd.f32 %v4576_v10, %v4387_v45  ;;  %9702 = vmatmul.mubr.msk.bf16.gmra.mrb[244].mxu0 %vm228_vm3, %v5464_v49  ;;  %v10169_v45 = vld [vmem:[%s13176_s2 + $0x90] sm:$0xff]   ;;  %v10170_v10 = vld [vmem:[%s13176_s2 + $0x78] sm:$0xff]  }
 0x3fd   : > { %9746 = vmatmul.mubr.msk.bf16.gmra.mrb[244].mxu1 %vm228_vm3, %v5767_v9  ;;  %9757 = vmatprep.mubr.msk.bf16.mxu0 %vm10199_vm1, %v10198_v2  ;;  %v5711_v49 = vld [vmem:[#allocation2 + $0xbd] sm:$0xff] }
 0x3fe   : > { %9801 = vmatprep.mubr.msk.bf16.mxu1 %vm10199_vm1, %v10198_v2 }
 0x3ff   : > { %v4719_v27 = vpop.f32.mrb[140].mxu0 }
 0x400   : > { %v4790_v53 = vadd.f32 %v4719_v27, %v12238_v51  ;;  %v4929_v20 = vpop.f32.mrb[140].mxu1  ;;  %v9495_v61 = vpop.f32.mrb[141].mxu0  ;;  %v10165_v51 = vld [vmem:[%s13176_s2 + $0x80] sm:$0xff]  }
 0x401   : > { %v9539_v42 = vpop.f32.mrb[141].mxu1  ;;  %v4722_v11 = vpop.f32.mrb[142].mxu0  ;;  %v6093_v27 = vld [vmem:[#allocation2 + $0xbf] sm:$0xff] }
 0x402   : > { %v12374_v50 = vadd.f32 %v4929_v20, %v4790_v53  ;;  %v4791_v28 = vadd.f32 %v4722_v11, %v12241_v47  ;;  %v4932_v59 = vpop.f32.mrb[142].mxu1  ;;  %v9496_v41 = vpop.f32.mrb[143].mxu0  ;;  %v10167_v47 = vld [vmem:[%s13176_s2 + $0x88] sm:$0xff]   ;;  %v5710_v20 = vld [vmem:[#allocation2 + $0xb5] sm:$0xff] }
 0x403   : > { %v9540_v0 = vpop.f32.mrb[143].mxu1 }
 0x404   : > { %v12380_v3 = vadd.f32 %v4932_v59, %v4791_v28  ;;  %9758 = vmatmul.mubr.msk.bf16.vlgmr.msra.gmra.mrb[248].mxu0 %vm228_vm3, %v5724_v36  ;;  %v12428_v28 = vpack.c.bf16 %v6093_v27, %v6092_v48  ;;  %v5713_v59 = vld [vmem:[#allocation2 + $0xcd] sm:$0xff] }
 0x405   : > { %9802 = vmatmul.mubr.msk.bf16.vlgmr.msra.gmra.mrb[248].mxu1 %vm228_vm3, %v6106_v33  ;;  %9838 = vmatpush3.bf16.msra.mxu0 %v10164_v52  ;;  %v5726_v52 = vpack.c.bf16 %v5711_v49, %v5710_v20  ;;  %v6095_v0 = vld [vmem:[#allocation2 + $0xcf] sm:$0xff] }
 0x406   : > { %9882 = vmatpush3.bf16.msra.mxu1 %v10165_v51  ;;  %9761 = vmatprep.mubr.msk.bf16.mxu0 %vm10199_vm1, %v10198_v2 }
 0x407   : > { %v4727_v29 = vpop.f32.mrb[144].mxu0  ;;  %9805 = vmatprep.mubr.msk.bf16.mxu1 %vm10199_vm1, %v10198_v2  ;;  %9839 = vmatprep.subr.bf16.mxu0 %v10198_v2 }
 0x408   : > { %v4792_v26 = vadd.f32 %v4727_v29, %v12262_v46  ;;  %v4937_v16 = vpop.f32.mrb[144].mxu1  ;;  %v9499_v17 = vpop.f32.mrb[145].mxu0  ;;  %9883 = vmatprep.subr.bf16.mxu1 %v10198_v2  ;;  %v10168_v46 = vld [vmem:[%s13176_s2 + $0x70] sm:$0xff]   ;;  %v5712_v29 = vld [vmem:[#allocation2 + $0xc5] sm:$0xff] }
 0x409   : > { %v9543_v31 = vpop.f32.mrb[145].mxu1  ;;  %v4730_v23 = vpop.f32.mrb[146].mxu0  ;;  %9840 = vmatpush3.bf16.msra.mxu0 %v10166_v43  ;;  %v5727_v14 = vpack.c.bf16 %v5713_v59, %v5712_v29 }
 0x40a   : > { %v12397_v30 = vadd.f32 %v4937_v16, %v4792_v26  ;;  %v4793_v13 = vadd.f32 %v4730_v23, %v12269_v8  ;;  %v4940_v55 = vpop.f32.mrb[146].mxu1  ;;  %v9500_v32 = vpop.f32.mrb[147].mxu0  ;;  %9884 = vmatpush3.bf16.msra.mxu1 %v10167_v47  ;;  %9841 = vmatprep.subr.bf16.mxu0 %v10198_v2  ;;  %v6094_v31 = vld [vmem:[#allocation2 + $0xc7] sm:$0xff] }
 0x40b   : > { %v9544_v37 = vpop.f32.mrb[147].mxu1  ;;  %9885 = vmatprep.subr.bf16.mxu1 %v10198_v2  ;;  %v12445_v39 = vpack.c.bf16 %v6095_v0, %v6094_v31  ;;  %v5718_v31 = vld [vmem:[#allocation2 + $0xf5] sm:$0xff] }
 0x40c   : > { %v12408_v8 = vadd.f32 %v4940_v55, %v4793_v13  ;;  %9762 = vmatmul.mubr.msk.bf16.gmra.mrb[252].mxu0 %vm228_vm3, %v5725_v63 }
 0x40d   : > { %9806 = vmatmul.mubr.msk.bf16.gmra.mrb[252].mxu1 %vm228_vm3, %v6107_v6  ;;  %9765 = vmatprep.mubr.msk.bf16.mxu0 %vm10199_vm1, %v10198_v2  ;;  %v5714_v6 = vld [vmem:[#allocation2 + $0xd5] sm:$0xff] }
 0x40e   : > { %9809 = vmatprep.mubr.msk.bf16.mxu1 %vm10199_vm1, %v10198_v2  ;;  %9842 = vmatpush3.bf16.msra.mxu0 %v10168_v46 }
 0x40f   : > { %v4735_v19 = vpop.f32.mrb[148].mxu0  ;;  %9886 = vmatpush3.bf16.msra.mxu1 %v10169_v45  ;;  %9843 = vmatprep.subr.bf16.mxu0 %v10198_v2 }
 0x410   : > { %v4794_v25 = vadd.f32 %v4735_v19, %v12286_v24  ;;  %v4945_v9 = vpop.f32.mrb[148].mxu1  ;;  %v9503_v5 = vpop.f32.mrb[149].mxu0  ;;  %9887 = vmatprep.subr.bf16.mxu1 %v10198_v2 }
 0x411   : > { %v9547_v4 = vpop.f32.mrb[149].mxu1  ;;  %v4738_v53 = vpop.f32.mrb[150].mxu0 }
 0x412   : > { %v12425_v61 = vadd.f32 %v4945_v9, %v4794_v25  ;;  %v4795_v58 = vadd.f32 %v4738_v53, %v12291_v21  ;;  %v4948_v42 = vpop.f32.mrb[150].mxu1  ;;  %v9504_v11 = vpop.f32.mrb[151].mxu0  ;;  %9844 = vmatpush3.bf16.msra.mxu0 %v10170_v10  ;;  %v6096_v25 = vld [vmem:[#allocation2 + $0xd7] sm:$0xff] }
 0x413   : > { %v9548_v36 = vpop.f32.mrb[151].mxu1  ;;  %9888 = vmatpush3.bf16.msra.mxu1 %v10171_v40  ;;  %9925 = vmatprep.subr.bf16.mxu0 %v10198_v2  ;;  %v12460_v5 = vpack.c.bf16 %v6097_v34, %v6096_v25 }
 0x414   : > { %v12431_v24 = vadd.f32 %v4948_v42, %v4795_v58  ;;  %9766 = vmatmul.mubr.msk.bf16.gmra.mrb[0].mxu0 %vm228_vm3, %v5726_v52  ;;  %9969 = vmatprep.subr.bf16.mxu1 %v10198_v2  ;;  %v6099_v58 = vld [vmem:[#allocation2 + $0xef] sm:$0xff]  ;;  %v5716_v52 = vld [vmem:[#allocation2 + $0xe5] sm:$0xff] }
 0x415   : > { %9810 = vmatmul.mubr.msk.bf16.gmra.mrb[0].mxu1 %vm228_vm3, %v12428_v28  ;;  %9769 = vmatprep.mubr.msk.bf16.mxu0 %vm10199_vm1, %v10198_v2 }
 0x416   : > { %9813 = vmatprep.mubr.msk.bf16.mxu1 %vm10199_vm1, %v10198_v2 }
 0x417   : > { %v4743_v21 = vpop.f32.mrb[152].mxu0 }
 0x418   : > { %v4796_v41 = vadd.f32 %v4743_v21, %v12300_v22  ;;  %v4953_v51 = vpop.f32.mrb[152].mxu1  ;;  %v9507_v33 = vpop.f32.mrb[153].mxu0 }
 0x419   : > { %v9551_v43 = vpop.f32.mrb[153].mxu1  ;;  %v4746_v47 = vpop.f32.mrb[154].mxu0 }
 0x41a   : > { %v12442_v7 = vadd.f32 %v4953_v51, %v4796_v41  ;;  %v4797_v26 = vadd.f32 %v4746_v47, %v12303_v60  ;;  %v4956_v16 = vpop.f32.mrb[154].mxu1  ;;  %v9508_v17 = vpop.f32.mrb[155].mxu0  ;;  %v5715_v60 = vld [vmem:[#allocation2 + $0xdd] sm:$0xff]  ;;  %v6098_v51 = vld [vmem:[#allocation2 + $0xe7] sm:$0xff] }
 0x41b   : > { %v9552_v23 = vpop.f32.mrb[155].mxu1  ;;  %v5728_v40 = vpack.c.bf16 %v5715_v60, %v5714_v6  ;;  %v12475_v0 = vpack.c.bf16 %v6099_v58, %v6098_v51  ;;  %v6102_v58 = vld [vmem:[#allocation2 + $0x107] sm:$0xff] }
 0x41c   : > { %v12447_v13 = vadd.f32 %v4956_v16, %v4797_v26  ;;  %9770 = vmatmul.mubr.msk.bf16.gmra.mrb[4].mxu0 %vm228_vm3, %v5727_v14  ;;  %v6101_v16 = vld [vmem:[#allocation2 + $0xff] sm:$0xff] }
 0x41d   : > { %9814 = vmatmul.mubr.msk.bf16.gmra.mrb[4].mxu1 %vm228_vm3, %v12445_v39  ;;  %9773 = vmatprep.mubr.msk.bf16.mxu0 %vm10199_vm1, %v10198_v2 }
 0x41e   : > { %9817 = vmatprep.mubr.msk.bf16.mxu1 %vm10199_vm1, %v10198_v2 }
 0x41f   : > { %v4751_v22 = vpop.f32.mrb[156].mxu0 }
 0x420   : > { %v4798_v55 = vadd.f32 %v4751_v22, %v12312_v54  ;;  %v4961_v32 = vpop.f32.mrb[156].mxu1  ;;  %v9511_v63 = vpop.f32.mrb[157].mxu0 }
 0x421   : > { %v9555_v46 = vpop.f32.mrb[157].mxu1  ;;  %v4754_v37 = vpop.f32.mrb[158].mxu0  ;;  %v6100_v63 = vld [vmem:[#allocation2 + $0xf7] sm:$0xff] }
 0x422   : > { %v12457_v45 = vadd.f32 %v4961_v32, %v4798_v55  ;;  %v4799_v10 = vadd.f32 %v4754_v37, %v12315_v18  ;;  %v4964_v19 = vpop.f32.mrb[158].mxu1  ;;  %v9512_v49 = vpop.f32.mrb[159].mxu0  ;;  %v5717_v18 = vld [vmem:[#allocation2 + $0xed] sm:$0xff]  ;;  %v12490_v46 = vpack.c.bf16 %v6101_v16, %v6100_v63 }
 0x423   : > { %v9556_v9 = vpop.f32.mrb[159].mxu1  ;;  %v5729_v41 = vpack.c.bf16 %v5717_v18, %v5716_v52  ;;  %v6103_v49 = vld [vmem:[#allocation2 + $0x10f] sm:$0xff] }
 0x424   : > { %v12462_v27 = vadd.f32 %v4964_v19, %v4799_v10  ;;  %9774 = vmatmul.mubr.msk.bf16.gmra.mrb[8].mxu0 %vm228_vm3, %v5728_v40  ;;  %v5720_v9 = vld [vmem:[#allocation2 + $0x105] sm:$0xff] }
 0x425   : > { %9818 = vmatmul.mubr.msk.bf16.gmra.mrb[8].mxu1 %vm228_vm3, %v12460_v5  ;;  %9777 = vmatprep.mubr.msk.bf16.mxu0 %vm10199_vm1, %v10198_v2 }
 0x426   : > { %9821 = vmatprep.mubr.msk.bf16.mxu1 %vm10199_vm1, %v10198_v2 }
 0x427   : > { %v4759_v54 = vpop.f32.mrb[160].mxu0 }
 0x428   : > { %v4800_v4 = vadd.f32 %v4759_v54, %v12324_v35  ;;  %v4969_v53 = vpop.f32.mrb[160].mxu1  ;;  %v9515_v20 = vpop.f32.mrb[161].mxu0 }
 0x429   : > { %v9559_v42 = vpop.f32.mrb[161].mxu1  ;;  %v4762_v11 = vpop.f32.mrb[162].mxu0 }
 0x42a   : > { %v12472_v48 = vadd.f32 %v4969_v53, %v4800_v4  ;;  %v4801_v36 = vadd.f32 %v4762_v11, %v12327_v1  ;;  %v4972_v21 = vpop.f32.mrb[162].mxu1  ;;  %v9516_v59 = vpop.f32.mrb[163].mxu0  ;;  %v5719_v1 = vld [vmem:[#allocation2 + $0xfd] sm:$0xff]  ;;  %v12505_v11 = vpack.c.bf16 %v6103_v49, %v6102_v58 }
 0x42b   : > { %v9560_v33 = vpop.f32.mrb[163].mxu1  ;;  %v5730_v32 = vpack.c.bf16 %v5719_v1, %v5718_v31 }
 0x42c   : > { %v12477_v43 = vadd.f32 %v4972_v21, %v4801_v36  ;;  %9778 = vmatmul.mubr.msk.bf16.gmra.mrb[12].mxu0 %vm228_vm3, %v5729_v41  ;;  %v6105_v41 = vld [vmem:[#allocation2 + $0x11f] sm:$0xff] }
 0x42d   : > { %9822 = vmatmul.mubr.msk.bf16.gmra.mrb[12].mxu1 %vm228_vm3, %v12475_v0  ;;  %9781 = vmatprep.mubr.msk.bf16.mxu0 %vm10199_vm1, %v10198_v2 }
 0x42e   : > { %9825 = vmatprep.mubr.msk.bf16.mxu1 %vm10199_vm1, %v10198_v2 }
 0x42f   : > { %v4767_v35 = vpop.f32.mrb[164].mxu0 }
 0x430   : > { %v4802_v47 = vadd.f32 %v4767_v35, %v12336_v38  ;;  %v4977_v29 = vpop.f32.mrb[164].mxu1  ;;  %v9519_v26 = vpop.f32.mrb[165].mxu0  ;;  %v5722_v35 = vld [vmem:[#allocation2 + $0x115] sm:$0xff] }
 0x431   : > { %v9563_v17 = vpop.f32.mrb[165].mxu1  ;;  %v4770_v14 = vpop.f32.mrb[166].mxu0 }
 0x432   : > { %v12487_v23 = vadd.f32 %v4977_v29, %v4802_v47  ;;  %v4803_v22 = vadd.f32 %v4770_v14, %v12339_v12  ;;  %v4980_v60 = vpop.f32.mrb[166].mxu1  ;;  %v9520_v55 = vpop.f32.mrb[167].mxu0  ;;  %v5721_v12 = vld [vmem:[#allocation2 + $0x10d] sm:$0xff]  ;;  %v6104_v17 = vld [vmem:[#allocation2 + $0x117] sm:$0xff] }
 0x433   : > { %v9564_v34 = vpop.f32.mrb[167].mxu1  ;;  %v5731_v20 = vpack.c.bf16 %v5721_v12, %v5720_v9  ;;  %v12520_v31 = vpack.c.bf16 %v6105_v41, %v6104_v17 }
 0x434   : > { %v12492_v37 = vadd.f32 %v4980_v60, %v4803_v22  ;;  %9782 = vmatmul.mubr.msk.bf16.gmra.mrb[16].mxu0 %vm228_vm3, %v5730_v32  ;;  %v6507_v60 = vld [vmem:[#allocation2 + $0xb0] sm:$0xff]  ;;  %v6297_v34 = vld [vmem:[#allocation2 + $0xa7] sm:$0xff] }
 0x435   : > { %9826 = vmatmul.mubr.msk.bf16.gmra.mrb[16].mxu1 %vm228_vm3, %v12490_v46  ;;  %9785 = vmatprep.mubr.msk.bf16.mxu0 %vm10199_vm1, %v10198_v2 }
 0x436   : > { %9829 = vmatprep.mubr.msk.bf16.mxu1 %vm10199_vm1, %v10198_v2 }
 0x437   : > { %v4775_v38 = vpop.f32.mrb[168].mxu0 }
 0x438   : > { %v4804_v6 = vadd.f32 %v4775_v38, %v12348_v62  ;;  %v4985_v10 = vpop.f32.mrb[168].mxu1  ;;  %v9523_v19 = vpop.f32.mrb[169].mxu0 }
 0x439   : > { %v9567_v40 = vpop.f32.mrb[169].mxu1  ;;  %v4778_v25 = vpop.f32.mrb[170].mxu0 }
 0x43a   : > { %v12502_v54 = vadd.f32 %v4985_v10, %v4804_v6  ;;  %v4805_v18 = vadd.f32 %v4778_v25, %v12351_v44  ;;  %v4988_v4 = vpop.f32.mrb[170].mxu1  ;;  %v9524_v53 = vpop.f32.mrb[171].mxu0  ;;  %v5723_v44 = vld [vmem:[#allocation2 + $0x11d] sm:$0xff]  ;;  %v6506_v10 = vld [vmem:[#allocation2 + $0xa8] sm:$0xff] }
 0x43b   : > { %v9568_v42 = vpop.f32.mrb[171].mxu1  ;;  %v5732_v16 = vpack.c.bf16 %v5723_v44, %v5722_v35  ;;  %v10172_v6 = vld [vmem:[%s13176_s2 + $0xa0] sm:$0xff]  }
 0x43c   : > { %v12507_v52 = vadd.f32 %v4988_v4, %v4805_v18  ;;  %9786 = vmatmul.mubr.msk.bf16.gmra.mrb[20].mxu0 %vm228_vm3, %v5731_v20  ;;  %v6524_v18 = vpack.c.bf16 %v6507_v60, %v6506_v10  ;;  %v10174_v20 = vld [vmem:[%s13176_s2 + $0xa8] sm:$0xff]  }
 0x43d   : > { %9830 = vmatmul.mubr.msk.bf16.gmra.mrb[20].mxu1 %vm228_vm3, %v12505_v11  ;;  %9789 = vmatprep.mubr.msk.bf16.mxu0 %vm10199_vm1, %v10198_v2  ;;  %v6510_v10 = vld [vmem:[#allocation2 + $0xc8] sm:$0xff] }
 0x43e   : > { %9833 = vmatprep.mubr.msk.bf16.mxu1 %vm10199_vm1, %v10198_v2 }
 0x43f   : > { %v4783_v62 = vpop.f32.mrb[172].mxu0 }
 0x440   : > { %v4806_v36 = vadd.f32 %v4783_v62, %v12359_v57  ;;  %v4993_v21 = vpop.f32.mrb[172].mxu1  ;;  %v9527_v59 = vpop.f32.mrb[173].mxu0  ;;  %v6298_v57 = vld [vmem:[#allocation2 + $0xaf] sm:$0xff] }
 0x441   : > { %v9571_v51 = vpop.f32.mrb[173].mxu1  ;;  %v4786_v33 = vpop.f32.mrb[174].mxu0  ;;  %v6315_v19 = vpack.c.bf16 %v6298_v57, %v6297_v34 }
 0x442   : > { %v12517_v1 = vadd.f32 %v4993_v21, %v4806_v36  ;;  %v4807_v47 = vadd.f32 %v4786_v33, %v12362_v15  ;;  %v4996_v29 = vpop.f32.mrb[174].mxu1  ;;  %v9528_v26 = vpop.f32.mrb[175].mxu0  ;;  %v6509_v36 = vld [vmem:[#allocation2 + $0xc0] sm:$0xff] }
 0x443   : > { %v9572_v14 = vpop.f32.mrb[175].mxu1 }
 0x444   : > { %v12522_v22 = vadd.f32 %v4996_v29, %v4807_v47  ;;  %9790 = vmatmul.mubr.msk.bf16.gmra.mrb[24].mxu0 %vm228_vm3, %v5732_v16  ;;  %v6508_v47 = vld [vmem:[#allocation2 + $0xb8] sm:$0xff]  ;;  %v10177_v16 = vld [vmem:[%s13176_s2 + $0xd0] sm:$0xff]  }
 0x445   : > { %9834 = vmatmul.mubr.msk.bf16.gmra.mrb[24].mxu1 %vm228_vm3, %v12520_v31  ;;  %9845 = vmatprep.mubr.msk.bf16.mxu0 %vm10199_vm1, %v10198_v2  ;;  %v6525_v26 = vpack.c.bf16 %v6509_v36, %v6508_v47 }
 0x446   : > { %9889 = vmatprep.mubr.msk.bf16.mxu1 %vm10199_vm1, %v10198_v2 }
 0x447   : > { %v5139_v15 = vpop.f32.mrb[176].mxu0 }
 0x448   : > { %v5210_v55 = vadd.f32 %v5139_v15, %v12374_v50  ;;  %v5349_v32 = vpop.f32.mrb[176].mxu1  ;;  %v9583_v63 = vpop.f32.mrb[177].mxu0  ;;  %v10173_v50 = vld [vmem:[%s13176_s2 + $0xc0] sm:$0xff]  }
 0x449   : > { %v9627_v38 = vpop.f32.mrb[177].mxu1  ;;  %v5142_v12 = vpop.f32.mrb[178].mxu0 }
 0x44a   : > { %v12535_v49 = vadd.f32 %v5349_v32, %v5210_v55  ;;  %v5211_v40 = vadd.f32 %v5142_v12, %v12380_v3  ;;  %v5352_v25 = vpop.f32.mrb[178].mxu1  ;;  %v9584_v9 = vpop.f32.mrb[179].mxu0  ;;  %v10175_v3 = vld [vmem:[%s13176_s2 + $0xc8] sm:$0xff]   ;;  %v6511_v55 = vld [vmem:[#allocation2 + $0xd0] sm:$0xff] }
 0x44b   : > { %v9628_v4 = vpop.f32.mrb[179].mxu1 }
 0x44c   : > { %v12541_v53 = vadd.f32 %v5352_v25, %v5211_v40  ;;  %9846 = vmatmul.mubr.msk.bf16.vlgmr.msra.gmra.mrb[28].mxu0 %vm228_vm3, %v6315_v19  ;;  %v6526_v40 = vpack.c.bf16 %v6511_v55, %v6510_v10 }
 0x44d   : > { %9890 = vmatmul.mubr.msk.bf16.vlgmr.msra.gmra.mrb[28].mxu1 %vm228_vm3, %v6524_v18  ;;  %9926 = vmatpush3.bf16.msra.mxu0 %v10172_v6  ;;  %v6513_v18 = vld [vmem:[#allocation2 + $0xe0] sm:$0xff] }
 0x44e   : > { %9970 = vmatpush3.bf16.msra.mxu1 %v10173_v50  ;;  %9849 = vmatprep.mubr.msk.bf16.mxu0 %vm10199_vm1, %v10198_v2 }
 0x44f   : > { %v5147_v58 = vpop.f32.mrb[180].mxu0  ;;  %9893 = vmatprep.mubr.msk.bf16.mxu1 %vm10199_vm1, %v10198_v2  ;;  %9927 = vmatprep.subr.bf16.mxu0 %v10198_v2 }
 0x450   : > { %v5212_v42 = vadd.f32 %v5147_v58, %v12397_v30  ;;  %v5357_v62 = vpop.f32.mrb[180].mxu1  ;;  %v9587_v44 = vpop.f32.mrb[181].mxu0  ;;  %9971 = vmatprep.subr.bf16.mxu1 %v10198_v2  ;;  %v10176_v30 = vld [vmem:[%s13176_s2 + $0xb0] sm:$0xff]  }
 0x451   : > { %v9631_v21 = vpop.f32.mrb[181].mxu1  ;;  %v5150_v59 = vpop.f32.mrb[182].mxu0  ;;  %9928 = vmatpush3.bf16.msra.mxu0 %v10174_v20 }
 0x452   : > { %v12558_v41 = vadd.f32 %v5357_v62, %v5212_v42  ;;  %v5213_v51 = vadd.f32 %v5150_v59, %v12408_v8  ;;  %v5360_v33 = vpop.f32.mrb[182].mxu1  ;;  %v9588_v35 = vpop.f32.mrb[183].mxu0  ;;  %9972 = vmatpush3.bf16.msra.mxu1 %v10175_v3  ;;  %9929 = vmatprep.subr.bf16.mxu0 %v10198_v2  ;;  %v10178_v8 = vld [vmem:[%s13176_s2 + $0xb8] sm:$0xff]  }
 0x453   : > { %v9632_v29 = vpop.f32.mrb[183].mxu1  ;;  %9973 = vmatprep.subr.bf16.mxu1 %v10198_v2  ;;  %v6512_v62 = vld [vmem:[#allocation2 + $0xd8] sm:$0xff] }
 0x454   : > { %v12569_v17 = vadd.f32 %v5360_v33, %v5213_v51  ;;  %9850 = vmatmul.mubr.msk.bf16.gmra.mrb[32].mxu0 %vm228_vm3, %v12428_v28  ;;  %v10179_v28 = vld [vmem:[%s13176_s2 + $0xd8] sm:$0xff]   ;;  %v6527_v36 = vpack.c.bf16 %v6513_v18, %v6512_v62  ;;  %v6515_v33 = vld [vmem:[#allocation2 + $0xf0] sm:$0xff] }
 0x455   : > { %9894 = vmatmul.mubr.msk.bf16.gmra.mrb[32].mxu1 %vm228_vm3, %v6525_v26  ;;  %9853 = vmatprep.mubr.msk.bf16.mxu0 %vm10199_vm1, %v10198_v2 }
 0x456   : > { %9897 = vmatprep.mubr.msk.bf16.mxu1 %vm10199_vm1, %v10198_v2  ;;  %9930 = vmatpush3.bf16.msra.mxu0 %v10176_v30 }
 0x457   : > { %v5155_v14 = vpop.f32.mrb[184].mxu0  ;;  %9974 = vmatpush3.bf16.msra.mxu1 %v10177_v16  ;;  %9931 = vmatprep.subr.bf16.mxu0 %v10198_v2  ;;  %v6514_v16 = vld [vmem:[#allocation2 + $0xe8] sm:$0xff] }
 0x458   : > { %v5214_v57 = vadd.f32 %v5155_v14, %v12425_v61  ;;  %v5365_v15 = vpop.f32.mrb[184].mxu1  ;;  %v9591_v60 = vpop.f32.mrb[185].mxu0  ;;  %9975 = vmatprep.subr.bf16.mxu1 %v10198_v2  ;;  %v6528_v14 = vpack.c.bf16 %v6515_v33, %v6514_v16 }
 0x459   : > { %v9635_v32 = vpop.f32.mrb[185].mxu1  ;;  %v5158_v63 = vpop.f32.mrb[186].mxu0  ;;  %v6517_v60 = vld [vmem:[#allocation2 + $0x100] sm:$0xff] }
 0x45a   : > { %v12587_v34 = vadd.f32 %v5365_v15, %v5214_v57  ;;  %v5215_v38 = vadd.f32 %v5158_v63, %v12431_v24  ;;  %v5368_v12 = vpop.f32.mrb[186].mxu1  ;;  %v9592_v6 = vpop.f32.mrb[187].mxu0  ;;  %9932 = vmatpush3.bf16.msra.mxu0 %v10178_v8 }
 0x45b   : > { %v9636_v19 = vpop.f32.mrb[187].mxu1  ;;  %9976 = vmatpush3.bf16.msra.mxu1 %v10179_v28  ;;  %10013 = vmatprep.subr.bf16.mxu0 %v10198_v2  ;;  %v6516_v6 = vld [vmem:[#allocation2 + $0xf8] sm:$0xff] }
 0x45c   : > { %v12591_v61 = vadd.f32 %v5368_v12, %v5215_v38  ;;  %9854 = vmatmul.mubr.msk.bf16.gmra.mrb[36].mxu0 %vm228_vm3, %v12445_v39  ;;  %10057 = vmatprep.subr.bf16.mxu1 %v10198_v2  ;;  %v6529_v19 = vpack.c.bf16 %v6517_v60, %v6516_v6  ;;  %v6313_v60 = vld [vmem:[#allocation2 + $0x127] sm:$0xff] }
 0x45d   : > { %9898 = vmatmul.mubr.msk.bf16.gmra.mrb[36].mxu1 %vm228_vm3, %v6526_v40  ;;  %9857 = vmatprep.mubr.msk.bf16.mxu0 %vm10199_vm1, %v10198_v2 }
 0x45e   : > { %9901 = vmatprep.mubr.msk.bf16.mxu1 %vm10199_vm1, %v10198_v2 }
 0x45f   : > { %v5163_v24 = vpop.f32.mrb[188].mxu0 }
 0x460   : > { %v5216_v25 = vadd.f32 %v5163_v24, %v12442_v7  ;;  %v5373_v9 = vpop.f32.mrb[188].mxu1  ;;  %v9595_v50 = vpop.f32.mrb[189].mxu0 }
 0x461   : > { %v9639_v4 = vpop.f32.mrb[189].mxu1  ;;  %v5166_v20 = vpop.f32.mrb[190].mxu0 }
 0x462   : > { %v12602_v3 = vadd.f32 %v5373_v9, %v5216_v25  ;;  %v5217_v39 = vadd.f32 %v5166_v20, %v12447_v13  ;;  %v5376_v58 = vpop.f32.mrb[190].mxu1  ;;  %v9596_v42 = vpop.f32.mrb[191].mxu0  ;;  %v6519_v9 = vld [vmem:[#allocation2 + $0x110] sm:$0xff] }
 0x463   : > { %v9640_v44 = vpop.f32.mrb[191].mxu1 }
 0x464   : > { %v12605_v21 = vadd.f32 %v5376_v58, %v5217_v39  ;;  %9858 = vmatmul.mubr.msk.bf16.gmra.mrb[40].mxu0 %vm228_vm3, %v12460_v5  ;;  %v6518_v58 = vld [vmem:[#allocation2 + $0x108] sm:$0xff] }
 0x465   : > { %9902 = vmatmul.mubr.msk.bf16.gmra.mrb[40].mxu1 %vm228_vm3, %v6527_v36  ;;  %9861 = vmatprep.mubr.msk.bf16.mxu0 %vm10199_vm1, %v10198_v2  ;;  %v6530_v62 = vpack.c.bf16 %v6519_v9, %v6518_v58 }
 0x466   : > { %9905 = vmatprep.mubr.msk.bf16.mxu1 %vm10199_vm1, %v10198_v2 }
 0x467   : > { %v5171_v7 = vpop.f32.mrb[192].mxu0 }
 0x468   : > { %v5218_v13 = vadd.f32 %v5171_v7, %v12457_v45  ;;  %v5381_v59 = vpop.f32.mrb[192].mxu1  ;;  %v9599_v51 = vpop.f32.mrb[193].mxu0 }
 0x469   : > { %v9643_v35 = vpop.f32.mrb[193].mxu1  ;;  %v5174_v47 = vpop.f32.mrb[194].mxu0 }
 0x46a   : > { %v12615_v30 = vadd.f32 %v5381_v59, %v5218_v13  ;;  %v5219_v5 = vadd.f32 %v5174_v47, %v12462_v27  ;;  %v5384_v29 = vpop.f32.mrb[194].mxu1  ;;  %v9600_v26 = vpop.f32.mrb[195].mxu0  ;;  %v6521_v13 = vld [vmem:[#allocation2 + $0x120] sm:$0xff] }
 0x46b   : > { %v9644_v8 = vpop.f32.mrb[195].mxu1 }
 0x46c   : > { %v12618_v28 = vadd.f32 %v5384_v29, %v5219_v5  ;;  %9862 = vmatmul.mubr.msk.bf16.gmra.mrb[44].mxu0 %vm228_vm3, %v12475_v0  ;;  %v6520_v5 = vld [vmem:[#allocation2 + $0x118] sm:$0xff] }
 0x46d   : > { %9906 = vmatmul.mubr.msk.bf16.gmra.mrb[44].mxu1 %vm228_vm3, %v6528_v14  ;;  %9865 = vmatprep.mubr.msk.bf16.mxu0 %vm10199_vm1, %v10198_v2  ;;  %v6531_v26 = vpack.c.bf16 %v6521_v13, %v6520_v5  ;;  %v10183_v13 = vld [vmem:[%s13176_s2 + $0x108] sm:$0xff]  }
 0x46e   : > { %9909 = vmatprep.mubr.msk.bf16.mxu1 %vm10199_vm1, %v10198_v2 }
 0x46f   : > { %v5179_v45 = vpop.f32.mrb[196].mxu0 }
 0x470   : > { %v5220_v27 = vadd.f32 %v5179_v45, %v12472_v48  ;;  %v5389_v57 = vpop.f32.mrb[196].mxu1  ;;  %v9603_v15 = vpop.f32.mrb[197].mxu0 }
 0x471   : > { %v9647_v55 = vpop.f32.mrb[197].mxu1  ;;  %v5182_v32 = vpop.f32.mrb[198].mxu0 }
 0x472   : > { %v12628_v63 = vadd.f32 %v5389_v57, %v5220_v27  ;;  %v5221_v0 = vadd.f32 %v5182_v32, %v12477_v43  ;;  %v5392_v38 = vpop.f32.mrb[198].mxu1  ;;  %v9604_v12 = vpop.f32.mrb[199].mxu0  ;;  %v6523_v27 = vld [vmem:[#allocation2 + $0x130] sm:$0xff] }
 0x473   : > { %v9648_v10 = vpop.f32.mrb[199].mxu1  ;;  %v6522_v12 = vld [vmem:[#allocation2 + $0x128] sm:$0xff] }
 0x474   : > { %v12631_v40 = vadd.f32 %v5392_v38, %v5221_v0  ;;  %9866 = vmatmul.mubr.msk.bf16.gmra.mrb[48].mxu0 %vm228_vm3, %v12490_v46  ;;  %v6532_v10 = vpack.c.bf16 %v6523_v27, %v6522_v12  ;;  %v10184_v27 = vld [vmem:[%s13176_s2 + $0xf0] sm:$0xff]   ;;  %v10187_v12 = vld [vmem:[%s13176_s2 + $0x118] sm:$0xff]  }
 0x475   : > { %9910 = vmatmul.mubr.msk.bf16.gmra.mrb[48].mxu1 %vm228_vm3, %v6529_v19  ;;  %9869 = vmatprep.mubr.msk.bf16.mxu0 %vm10199_vm1, %v10198_v2 }
 0x476   : > { %9913 = vmatprep.mubr.msk.bf16.mxu1 %vm10199_vm1, %v10198_v2 }
 0x477   : > { %v5187_v48 = vpop.f32.mrb[200].mxu0 }
 0x478   : > { %v5222_v43 = vadd.f32 %v5187_v48, %v12487_v23  ;;  %v5397_v24 = vpop.f32.mrb[200].mxu1  ;;  %v9607_v25 = vpop.f32.mrb[201].mxu0  ;;  %v6925_v48 = vld [vmem:[#allocation2 + $0xc1] sm:$0xff] }
 0x479   : > { %v9651_v50 = vpop.f32.mrb[201].mxu1  ;;  %v5190_v18 = vpop.f32.mrb[202].mxu0 }
 0x47a   : > { %v12641_v4 = vadd.f32 %v5397_v24, %v5222_v43  ;;  %v5223_v46 = vadd.f32 %v5190_v18, %v12492_v37  ;;  %v5400_v20 = vpop.f32.mrb[202].mxu1  ;;  %v9608_v39 = vpop.f32.mrb[203].mxu0  ;;  %v10180_v18 = vld [vmem:[%s13176_s2 + $0xe0] sm:$0xff]  }
 0x47b   : > { %v9652_v42 = vpop.f32.mrb[203].mxu1 }
 0x47c   : > { %v12644_v44 = vadd.f32 %v5400_v20, %v5223_v46  ;;  %9870 = vmatmul.mubr.msk.bf16.gmra.mrb[52].mxu0 %vm228_vm3, %v12505_v11  ;;  %v6924_v46 = vld [vmem:[#allocation2 + $0xb9] sm:$0xff] }
 0x47d   : > { %9914 = vmatmul.mubr.msk.bf16.gmra.mrb[52].mxu1 %vm228_vm3, %v6530_v62  ;;  %9873 = vmatprep.mubr.msk.bf16.mxu0 %vm10199_vm1, %v10198_v2  ;;  %v6942_v62 = vpack.c.bf16 %v6925_v48, %v6924_v46  ;;  %v6929_v48 = vld [vmem:[#allocation2 + $0xe1] sm:$0xff] }
 0x47e   : > { %9917 = vmatprep.mubr.msk.bf16.mxu1 %vm10199_vm1, %v10198_v2 }
 0x47f   : > { %v5195_v23 = vpop.f32.mrb[204].mxu0 }
 0x480   : > { %v5224_v37 = vadd.f32 %v5195_v23, %v12502_v54  ;;  %v5405_v36 = vpop.f32.mrb[204].mxu1  ;;  %v9611_v7 = vpop.f32.mrb[205].mxu0 }
 0x481   : > { %v9655_v59 = vpop.f32.mrb[205].mxu1  ;;  %v5198_v51 = vpop.f32.mrb[206].mxu0 }
 0x482   : > { %v12654_v33 = vadd.f32 %v5405_v36, %v5224_v37  ;;  %v5225_v11 = vadd.f32 %v5198_v51, %v12507_v52  ;;  %v5408_v35 = vpop.f32.mrb[206].mxu1  ;;  %v9612_v47 = vpop.f32.mrb[207].mxu0  ;;  %v6314_v52 = vld [vmem:[#allocation2 + $0x12f] sm:$0xff] }
 0x483   : > { %v9656_v29 = vpop.f32.mrb[207].mxu1  ;;  %v6323_v38 = vpack.c.bf16 %v6314_v52, %v6313_v60  ;;  %v6927_v47 = vld [vmem:[#allocation2 + $0xd1] sm:$0xff] }
 0x484   : > { %v12657_v16 = vadd.f32 %v5408_v35, %v5225_v11  ;;  %9874 = vmatmul.mubr.msk.bf16.gmra.mrb[56].mxu0 %vm228_vm3, %v12520_v31 }
 0x485   : > { %9918 = vmatmul.mubr.msk.bf16.gmra.mrb[56].mxu1 %vm228_vm3, %v6531_v26  ;;  %9877 = vmatprep.mubr.msk.bf16.mxu0 %vm10199_vm1, %v10198_v2  ;;  %v6717_v26 = vld [vmem:[#allocation2 + $0xb9] sm:$0xff] }
 0x486   : > { %9921 = vmatprep.mubr.msk.bf16.mxu1 %vm10199_vm1, %v10198_v2 }
 0x487   : > { %v5203_v54 = vpop.f32.mrb[208].mxu0 }
 0x488   : > { %v5226_v8 = vadd.f32 %v5203_v54, %v12517_v1  ;;  %v5413_v14 = vpop.f32.mrb[208].mxu1  ;;  %v9615_v45 = vpop.f32.mrb[209].mxu0  ;;  %v12682_v1 = vld [vmem:[%s13177_s3 + $0x1] ss:$0 sm:$0xff] }
 0x489   : > { %v9659_v57 = vpop.f32.mrb[209].mxu1  ;;  %v5206_v15 = vpop.f32.mrb[210].mxu0 }
 0x48a   : > { %v12667_v31 = vadd.f32 %v5413_v14, %v5226_v8  ;;  %v5227_v55 = vadd.f32 %v5206_v15, %v12522_v22  ;;  %v5416_v32 = vpop.f32.mrb[210].mxu1  ;;  %v9616_v0 = vpop.f32.mrb[211].mxu0 }
 0x48b   : > { %v9660_v6 = vpop.f32.mrb[211].mxu1  ;;  %v10186_v0 = vld [vmem:[%s13176_s2 + $0xf8] sm:$0xff]  }
 0x48c   : > { %v12670_v19 = vadd.f32 %v5416_v32, %v5227_v55  ;;  %9878 = vmatmul.mubr.msk.bf16.gmra.mrb[60].mxu0 %vm228_vm3, %v6323_v38 }
 0x48d   : > { %9922 = vmatmul.mubr.msk.bf16.gmra.mrb[60].mxu1 %vm228_vm3, %v6532_v10  ;;  %9933 = vmatprep.mubr.msk.bf16.mxu0 %vm10199_vm1, %v10198_v2 }
 0x48e   : > { %9977 = vmatprep.mubr.msk.bf16.mxu1 %vm10199_vm1, %v10198_v2 }
 0x48f   : > { %v5559_v22 = vpop.f32.mrb[212].mxu0 }
 0x490   : > { %v5630_v43 = vadd.f32 %v5559_v22, %v12535_v49  ;;  %v12685_v24 = vpop.f32.mrb[212].mxu1  ;;  %v9671_v25 = vpop.f32.mrb[213].mxu0  ;;  %v10181_v49 = vld [vmem:[%s13176_s2 + $0x100] sm:$0xff]  }
 0x491   : > { %v9715_v9 = vpop.f32.mrb[213].mxu1  ;;  %v5562_v50 = vpop.f32.mrb[214].mxu0 }
 0x492   : > { %v5652_v20 = vadd.f32 %v12682_v1, %v5630_v43  ;;  %v5631_v39 = vadd.f32 %v5562_v50, %v12541_v53  ;;  %v12692_v58 = vpop.f32.mrb[214].mxu1  ;;  %v9672_v42 = vpop.f32.mrb[215].mxu0  ;;  %v10182_v53 = vld [vmem:[%s13176_s2 + $0xe8] sm:$0xff]  }
 0x493   : > { %v9716_v23 = vpop.f32.mrb[215].mxu1 }
 0x494   : > { %v5670_v37 = vmax.f32 %v5652_v20, 0.0  ;;  %v5653_v36 = vadd.f32 %v12682_v1, %v5631_v39  ;;  %9934 = vmatmul.mubr.msk.bf16.vlgmr.msra.gmra.mrb[64].mxu0 %vm228_vm3, %v12219_v56  ;;  %v6718_v56 = vld [vmem:[#allocation2 + $0xc1] sm:$0xff]  ;;  %v6928_v20 = vld [vmem:[#allocation2 + $0xd9] sm:$0xff] }
 0x495   : > { %9978 = vmatmul.mubr.msk.bf16.vlgmr.msra.gmra.mrb[64].mxu1 %vm228_vm3, %v6942_v62  ;;  %10014 = vmatpush3.bf16.msra.mxu0 %v10180_v18  ;;  %v6734_v45 = vpack.c.bf16 %v6718_v56, %v6717_v26  ;;  %v6944_v39 = vpack.c.bf16 %v6929_v48, %v6928_v20 }
 0x496   : > { %5688 = vst.msk [vmem:[%s12700_s23] sm:$0xff] %vm228_vm3, %v5670_v37  ;;  %v5671_v7 = vmax.f32 %v5653_v36, 0.0  ;;  %10058 = vmatpush3.bf16.msra.mxu1 %v10181_v49  ;;  %9937 = vmatprep.mubr.msk.bf16.mxu0 %vm10199_vm1, %v10198_v2 }
 0x497   : > { %v5567_v59 = vpop.f32.mrb[216].mxu0  ;;  %9981 = vmatprep.mubr.msk.bf16.mxu1 %vm10199_vm1, %v10198_v2  ;;  %10015 = vmatprep.subr.bf16.mxu0 %v10198_v2 }
 0x498   : > { %5689 = vst.msk [vmem:[%s12700_s23 + $0x8] sm:$0xff] %vm228_vm3, %v5671_v7  ;;  %v5632_v51 = vadd.f32 %v5567_v59, %v12558_v41  ;;  %v12722_v11 = vpop.f32.mrb[216].mxu1  ;;  %v9675_v35 = vpop.f32.mrb[217].mxu0  ;;  %10059 = vmatprep.subr.bf16.mxu1 %v10198_v2  ;;  %v6926_v41 = vld [vmem:[#allocation2 + $0xc9] sm:$0xff] }
 0x499   : > { %v9719_v5 = vpop.f32.mrb[217].mxu1  ;;  %v5570_v29 = vpop.f32.mrb[218].mxu0  ;;  %10016 = vmatpush3.bf16.msra.mxu0 %v10182_v53  ;;  %v6943_v15 = vpack.c.bf16 %v6927_v47, %v6926_v41  ;;  %v6931_v53 = vld [vmem:[#allocation2 + $0xf1] sm:$0xff]  ;;  %v6930_v47 = vld [vmem:[#allocation2 + $0xe9] sm:$0xff]  ;;  %v6933_v41 = vld [vmem:[#allocation2 + $0x101] sm:$0xff] }
 0x49a   : > { %v5654_v54 = vadd.f32 %v12682_v1, %v5632_v51  ;;  %v5633_v52 = vadd.f32 %v5570_v29, %v12569_v17  ;;  %v12727_v8 = vpop.f32.mrb[218].mxu1  ;;  %v9676_v14 = vpop.f32.mrb[219].mxu0  ;;  %10060 = vmatpush3.bf16.msra.mxu1 %v10183_v13  ;;  %10017 = vmatprep.subr.bf16.mxu0 %v10198_v2  ;;  %v10185_v17 = vld [vmem:[%s13176_s2 + $0x110] sm:$0xff]   ;;  %v6945_v29 = vpack.c.bf16 %v6931_v53, %v6930_v47 }
 0x49b   : > { %v9720_v57 = vpop.f32.mrb[219].mxu1  ;;  %10061 = vmatprep.subr.bf16.mxu1 %v10198_v2 }
 0x49c   : > { %v5672_v60 = vmax.f32 %v5654_v54, 0.0  ;;  %v5655_v55 = vadd.f32 %v12682_v1, %v5633_v52  ;;  %9938 = vmatmul.mubr.msk.bf16.gmra.mrb[68].mxu0 %vm228_vm3, %v6734_v45 }
 0x49d   : > { %9982 = vmatmul.mubr.msk.bf16.gmra.mrb[68].mxu1 %vm228_vm3, %v6943_v15  ;;  %9941 = vmatprep.mubr.msk.bf16.mxu0 %vm10199_vm1, %v10198_v2 }
 0x49e   : > { %5690 = vst.msk [vmem:[%s12700_s23 + $0x10] sm:$0xff] %vm228_vm3, %v5672_v60  ;;  %v5673_v32 = vmax.f32 %v5655_v55, 0.0  ;;  %9985 = vmatprep.mubr.msk.bf16.mxu1 %vm10199_vm1, %v10198_v2  ;;  %10018 = vmatpush3.bf16.msra.mxu0 %v10184_v27 }
 0x49f   : > { %v5575_v38 = vpop.f32.mrb[220].mxu0  ;;  %10062 = vmatpush3.bf16.msra.mxu1 %v10185_v17  ;;  %10019 = vmatprep.subr.bf16.mxu0 %v10198_v2 }
 0x4a0   : > { %5691 = vst.msk [vmem:[%s12700_s23 + $0x18] sm:$0xff] %vm228_vm3, %v5673_v32  ;;  %v5634_v6 = vadd.f32 %v5575_v38, %v12587_v34  ;;  %v12756_v10 = vpop.f32.mrb[220].mxu1  ;;  %v9679_v22 = vpop.f32.mrb[221].mxu0  ;;  %10063 = vmatprep.subr.bf16.mxu1 %v10198_v2  ;;  %v6932_v32 = vld [vmem:[#allocation2 + $0xf9] sm:$0xff] }
 0x4a1   : > { %v9723_v43 = vpop.f32.mrb[221].mxu1  ;;  %v5578_v25 = vpop.f32.mrb[222].mxu0  ;;  %v6946_v38 = vpack.c.bf16 %v6933_v41, %v6932_v32 }
 0x4a2   : > { %v5656_v9 = vadd.f32 %v12682_v1, %v5634_v6  ;;  %v5635_v50 = vadd.f32 %v5578_v25, %v12591_v61  ;;  %v12761_v18 = vpop.f32.mrb[222].mxu1  ;;  %v9680_v46 = vpop.f32.mrb[223].mxu0  ;;  %10020 = vmatpush3.bf16.msra.mxu0 %v10186_v0  ;;  %v6935_v25 = vld [vmem:[#allocation2 + $0x111] sm:$0xff] }
 0x4a3   : > { %v9724_v34 = vpop.f32.mrb[223].mxu1  ;;  %10064 = vmatpush3.bf16.msra.mxu1 %v10187_v12 }
 0x4a4   : > { %v5674_v42 = vmax.f32 %v5656_v9, 0.0  ;;  %v5657_v49 = vadd.f32 %v12682_v1, %v5635_v50  ;;  %9942 = vmatmul.mubr.msk.bf16.gmra.mrb[72].mxu0 %vm228_vm3, %v6943_v15 }
 0x4a5   : > { %9986 = vmatmul.mubr.msk.bf16.gmra.mrb[72].mxu1 %vm228_vm3, %v6944_v39  ;;  %9945 = vmatprep.mubr.msk.bf16.mxu0 %vm10199_vm1, %v10198_v2 }
 0x4a6   : > { %5692 = vst.msk [vmem:[%s12700_s23 + $0x20] sm:$0xff] %vm228_vm3, %v5674_v42  ;;  %v5675_v61 = vmax.f32 %v5657_v49, 0.0  ;;  %9989 = vmatprep.mubr.msk.bf16.mxu1 %vm10199_vm1, %v10198_v2  ;;  %v6934_v42 = vld [vmem:[#allocation2 + $0x109] sm:$0xff] }
 0x4a7   : > { %v5583_v62 = vpop.f32.mrb[224].mxu0 }
 0x4a8   : > { %5693 = vst.msk [vmem:[%s12700_s23 + $0x28] sm:$0xff] %vm228_vm3, %v5675_v61  ;;  %v5636_v23 = vadd.f32 %v5583_v62, %v12602_v3  ;;  %v12775_v37 = vpop.f32.mrb[224].mxu1  ;;  %v9683_v36 = vpop.f32.mrb[225].mxu0  ;;  %v6947_v61 = vpack.c.bf16 %v6935_v25, %v6934_v42 }
 0x4a9   : > { %v9727_v7 = vpop.f32.mrb[225].mxu1  ;;  %v5586_v13 = vpop.f32.mrb[226].mxu0 }
 0x4aa   : > { %v5658_v59 = vadd.f32 %v12682_v1, %v5636_v23  ;;  %v5637_v56 = vadd.f32 %v5586_v13, %v12605_v21  ;;  %v12779_v51 = vpop.f32.mrb[226].mxu1  ;;  %v9684_v35 = vpop.f32.mrb[227].mxu0  ;;  %v6937_v13 = vld [vmem:[#allocation2 + $0x121] sm:$0xff] }
 0x4ab   : > { %v9728_v5 = vpop.f32.mrb[227].mxu1 }
 0x4ac   : > { %v5676_v26 = vmax.f32 %v5658_v59, 0.0  ;;  %v5659_v3 = vadd.f32 %v12682_v1, %v5637_v56  ;;  %9946 = vmatmul.mubr.msk.bf16.gmra.mrb[76].mxu0 %vm228_vm3, %v6944_v39 }
 0x4ad   : > { %9990 = vmatmul.mubr.msk.bf16.gmra.mrb[76].mxu1 %vm228_vm3, %v6945_v29  ;;  %9949 = vmatprep.mubr.msk.bf16.mxu0 %vm10199_vm1, %v10198_v2 }
 0x4ae   : > { %5694 = vst.msk [vmem:[%s12700_s23 + $0x30] sm:$0xff] %vm228_vm3, %v5676_v26  ;;  %v5677_v54 = vmax.f32 %v5659_v3, 0.0  ;;  %9993 = vmatprep.mubr.msk.bf16.mxu1 %vm10199_vm1, %v10198_v2  ;;  %v6936_v26 = vld [vmem:[#allocation2 + $0x119] sm:$0xff] }
 0x4af   : > { %v5591_v21 = vpop.f32.mrb[228].mxu0 }
 0x4b0   : > { %5695 = vst.msk [vmem:[%s12700_s23 + $0x38] sm:$0xff] %vm228_vm3, %v5677_v54  ;;  %v5638_v52 = vadd.f32 %v5591_v21, %v12615_v30  ;;  %v12793_v14 = vpop.f32.mrb[228].mxu1  ;;  %v9687_v45 = vpop.f32.mrb[229].mxu0  ;;  %v6948_v54 = vpack.c.bf16 %v6937_v13, %v6936_v26  ;;  %v7343_v13 = vld [vmem:[#allocation2 + $0xc3] sm:$0xff]  ;;  %v7342_v26 = vld [vmem:[#allocation2 + $0xbb] sm:$0xff] }
 0x4b1   : > { %v9731_v27 = vpop.f32.mrb[229].mxu1  ;;  %v5594_v57 = vpop.f32.mrb[230].mxu0 }
 0x4b2   : > { %v5660_v15 = vadd.f32 %v12682_v1, %v5638_v52  ;;  %v5639_v17 = vadd.f32 %v5594_v57, %v12618_v28  ;;  %v12797_v60 = vpop.f32.mrb[230].mxu1  ;;  %v9688_v55 = vpop.f32.mrb[231].mxu0  ;;  %v6938_v57 = vld [vmem:[#allocation2 + $0x129] sm:$0xff] }
 0x4b3   : > { %v9732_v0 = vpop.f32.mrb[231].mxu1 }
 0x4b4   : > { %v5678_v12 = vmax.f32 %v5660_v15, 0.0  ;;  %v5661_v30 = vadd.f32 %v12682_v1, %v5639_v17  ;;  %9950 = vmatmul.mubr.msk.bf16.gmra.mrb[80].mxu0 %vm228_vm3, %v6945_v29  ;;  %v6939_v15 = vld [vmem:[#allocation2 + $0x131] sm:$0xff] }
 0x4b5   : > { %9994 = vmatmul.mubr.msk.bf16.gmra.mrb[80].mxu1 %vm228_vm3, %v6946_v38  ;;  %9953 = vmatprep.mubr.msk.bf16.mxu0 %vm10199_vm1, %v10198_v2 }
 0x4b6   : > { %5696 = vst.msk [vmem:[%s12700_s23 + $0x40] sm:$0xff] %vm228_vm3, %v5678_v12  ;;  %v5679_v6 = vmax.f32 %v5661_v30, 0.0  ;;  %9997 = vmatprep.mubr.msk.bf16.mxu1 %vm10199_vm1, %v10198_v2 }
 0x4b7   : > { %v5599_v28 = vpop.f32.mrb[232].mxu0 }
 0x4b8   : > { %5697 = vst.msk [vmem:[%s12700_s23 + $0x48] sm:$0xff] %vm228_vm3, %v5679_v6  ;;  %v5640_v22 = vadd.f32 %v5599_v28, %v12628_v63  ;;  %v12811_v48 = vpop.f32.mrb[232].mxu1  ;;  %v9691_v43 = vpop.f32.mrb[233].mxu0  ;;  %v6949_v6 = vpack.c.bf16 %v6939_v15, %v6938_v57  ;;  %v7136_v57 = vld [vmem:[#allocation2 + $0xd2] sm:$0xff] }
 0x4b9   : > { %v9735_v9 = vpop.f32.mrb[233].mxu1  ;;  %v5602_v50 = vpop.f32.mrb[234].mxu0  ;;  %v6941_v43 = vld [vmem:[#allocation2 + $0x141] sm:$0xff] }
 0x4ba   : > { %v5662_v46 = vadd.f32 %v12682_v1, %v5640_v22  ;;  %v5641_v20 = vadd.f32 %v5602_v50, %v12631_v40  ;;  %v12815_v34 = vpop.f32.mrb[234].mxu1  ;;  %v9692_v39 = vpop.f32.mrb[235].mxu0 }
 0x4bb   : > { %v9736_v49 = vpop.f32.mrb[235].mxu1 }
 0x4bc   : > { %v5680_v62 = vmax.f32 %v5662_v46, 0.0  ;;  %v5663_v63 = vadd.f32 %v12682_v1, %v5641_v20  ;;  %9954 = vmatmul.mubr.msk.bf16.gmra.mrb[84].mxu0 %vm228_vm3, %v6946_v38 }
 0x4bd   : > { %9998 = vmatmul.mubr.msk.bf16.gmra.mrb[84].mxu1 %vm228_vm3, %v6947_v61  ;;  %9957 = vmatprep.mubr.msk.bf16.mxu0 %vm10199_vm1, %v10198_v2 }
 0x4be   : > { %5698 = vst.msk [vmem:[%s12700_s23 + $0x50] sm:$0xff] %vm228_vm3, %v5680_v62  ;;  %v5681_v23 = vmax.f32 %v5663_v63, 0.0  ;;  %10001 = vmatprep.mubr.msk.bf16.mxu1 %vm10199_vm1, %v10198_v2 }
 0x4bf   : > { %v5607_v40 = vpop.f32.mrb[236].mxu0 }
 0x4c0   : > { %5699 = vst.msk [vmem:[%s12700_s23 + $0x58] sm:$0xff] %vm228_vm3, %v5681_v23  ;;  %v5642_v36 = vadd.f32 %v5607_v40, %v12641_v4  ;;  %v12829_v53 = vpop.f32.mrb[236].mxu1  ;;  %v9695_v7 = vpop.f32.mrb[237].mxu0 }
 0x4c1   : > { %v9739_v59 = vpop.f32.mrb[237].mxu1  ;;  %v5610_v56 = vpop.f32.mrb[238].mxu0 }
 0x4c2   : > { %v5664_v35 = vadd.f32 %v12682_v1, %v5642_v36  ;;  %v5643_v47 = vadd.f32 %v5610_v56, %v12644_v44  ;;  %v12833_v5 = vpop.f32.mrb[238].mxu1  ;;  %v9696_v29 = vpop.f32.mrb[239].mxu0 }
 0x4c3   : > { %v9740_v3 = vpop.f32.mrb[239].mxu1 }
 0x4c4   : > { %v5682_v21 = vmax.f32 %v5664_v35, 0.0  ;;  %v5665_v4 = vadd.f32 %v12682_v1, %v5643_v47  ;;  %9958 = vmatmul.mubr.msk.bf16.gmra.mrb[88].mxu0 %vm228_vm3, %v6947_v61  ;;  %v7133_v35 = vld [vmem:[#allocation2 + $0xba] sm:$0xff] }
 0x4c5   : > { %10002 = vmatmul.mubr.msk.bf16.gmra.mrb[88].mxu1 %vm228_vm3, %v6948_v54  ;;  %9961 = vmatprep.mubr.msk.bf16.mxu0 %vm10199_vm1, %v10198_v2 }
 0x4c6   : > { %5700 = vst.msk [vmem:[%s12700_s23 + $0x60] sm:$0xff] %vm228_vm3, %v5682_v21  ;;  %v5683_v52 = vmax.f32 %v5665_v4, 0.0  ;;  %10005 = vmatprep.mubr.msk.bf16.mxu1 %vm10199_vm1, %v10198_v2 }
 0x4c7   : > { %v5615_v44 = vpop.f32.mrb[240].mxu0 }
 0x4c8   : > { %5701 = vst.msk [vmem:[%s12700_s23 + $0x68] sm:$0xff] %vm228_vm3, %v5683_v52  ;;  %v5644_v45 = vadd.f32 %v5615_v44, %v12654_v33  ;;  %v12847_v41 = vpop.f32.mrb[240].mxu1  ;;  %v9699_v27 = vpop.f32.mrb[241].mxu0  ;;  %v7360_v44 = vpack.c.bf16 %v7343_v13, %v7342_v26 }
 0x4c9   : > { %v9743_v17 = vpop.f32.mrb[241].mxu1  ;;  %v5618_v55 = vpop.f32.mrb[242].mxu0 }
 0x4ca   : > { %v5666_v32 = vadd.f32 %v12682_v1, %v5644_v45  ;;  %v5645_v0 = vadd.f32 %v5618_v55, %v12657_v16  ;;  %v12851_v38 = vpop.f32.mrb[242].mxu1  ;;  %v9700_v12 = vpop.f32.mrb[243].mxu0  ;;  %v6940_v16 = vld [vmem:[#allocation2 + $0x139] sm:$0xff] }
 0x4cb   : > { %v9744_v30 = vpop.f32.mrb[243].mxu1  ;;  %v6950_v42 = vpack.c.bf16 %v6941_v43, %v6940_v16  ;;  %v7345_v55 = vld [vmem:[#allocation2 + $0xd3] sm:$0xff]  ;;  %v7135_v12 = vld [vmem:[#allocation2 + $0xca] sm:$0xff] }
 0x4cc   : > { %v5684_v28 = vmax.f32 %v5666_v32, 0.0  ;;  %v5667_v33 = vadd.f32 %v12682_v1, %v5645_v0  ;;  %9962 = vmatmul.mubr.msk.bf16.gmra.mrb[92].mxu0 %vm228_vm3, %v6948_v54  ;;  %v7344_v16 = vld [vmem:[#allocation2 + $0xcb] sm:$0xff] }
 0x4cd   : > { %10006 = vmatmul.mubr.msk.bf16.gmra.mrb[92].mxu1 %vm228_vm3, %v6949_v6  ;;  %9965 = vmatprep.mubr.msk.bf16.mxu0 %vm10199_vm1, %v10198_v2 }
 0x4ce   : > { %5702 = vst.msk [vmem:[%s12700_s23 + $0x70] sm:$0xff] %vm228_vm3, %v5684_v28  ;;  %v5685_v22 = vmax.f32 %v5667_v33, 0.0  ;;  %10009 = vmatprep.mubr.msk.bf16.mxu1 %vm10199_vm1, %v10198_v2 }
 0x4cf   : > { %v5623_v25 = vpop.f32.mrb[244].mxu0 }
 0x4d0   : > { %5703 = vst.msk [vmem:[%s12700_s23 + $0x78] sm:$0xff] %vm228_vm3, %v5685_v22  ;;  %v5646_v9 = vadd.f32 %v5623_v25, %v12667_v31  ;;  %v12865_v50 = vpop.f32.mrb[244].mxu1  ;;  %v9703_v46 = vpop.f32.mrb[245].mxu0  ;;  %v7152_v22 = vpack.c.bf16 %v7136_v57, %v7135_v12  ;;  %v7361_v25 = vpack.c.bf16 %v7345_v55, %v7344_v16  ;;  %v7348_v57 = vld [vmem:[#allocation2 + $0xeb] sm:$0xff]  ;;  %v7351_v12 = vld [vmem:[#allocation2 + $0x103] sm:$0xff] }
 0x4d1   : > { %v9747_v20 = vpop.f32.mrb[245].mxu1  ;;  %v5626_v39 = vpop.f32.mrb[246].mxu0 }
 0x4d2   : > { %v5668_v49 = vadd.f32 %v12682_v1, %v5646_v9  ;;  %v5647_v61 = vadd.f32 %v5626_v39, %v12670_v19  ;;  %v12869_v62 = vpop.f32.mrb[246].mxu1  ;;  %v9704_v63 = vpop.f32.mrb[247].mxu0  ;;  %v7134_v19 = vld [vmem:[#allocation2 + $0xc2] sm:$0xff] }
 0x4d3   : > { %v9748_v23 = vpop.f32.mrb[247].mxu1  ;;  %v7151_v3 = vpack.c.bf16 %v7134_v19, %v7133_v35  ;;  %v7137_v63 = vld [vmem:[#allocation2 + $0xda] sm:$0xff] }
 0x4d4   : > { %v5686_v40 = vmax.f32 %v5668_v49, 0.0  ;;  %v5669_v36 = vadd.f32 %v12682_v1, %v5647_v61  ;;  %9966 = vmatmul.mubr.msk.bf16.gmra.mrb[96].mxu0 %vm228_vm3, %v6949_v6 }
 0x4d5   : > { %10010 = vmatmul.mubr.msk.bf16.gmra.mrb[96].mxu1 %vm228_vm3, %v6950_v42  ;;  %10021 = vmatprep.mubr.msk.bf16.mxu0 %vm10199_vm1, %v10198_v2  ;;  %v7347_v42 = vld [vmem:[#allocation2 + $0xe3] sm:$0xff] }
 0x4d6   : > { %5704 = vst.msk [vmem:[%s12700_s23 + $0x80] sm:$0xff] %vm228_vm3, %v5686_v40  ;;  %v5687_v31 = vmax.f32 %v5669_v36, 0.0  ;;  %10065 = vmatprep.mubr.msk.bf16.mxu1 %vm10199_vm1, %v10198_v2 }
 0x4d7   : > { %v6017_v7 = vpop.f32.mrb[248].mxu0 }
 0x4d8   : > { %5705 = vst.msk [vmem:[%s12700_s23 + $0x88] sm:$0xff] %vm228_vm3, %v5687_v31  ;;  %v6018_v1 = vadd.f32 %v6017_v7, %v12685_v24  ;;  %v6208_v59 = vpop.f32.mrb[248].mxu1  ;;  %v9759_v56 = vpop.f32.mrb[249].mxu0  ;;  %v7346_v7 = vld [vmem:[#allocation2 + $0xdb] sm:$0xff] }
 0x4d9   : > { %v9803_v47 = vpop.f32.mrb[249].mxu1  ;;  %v6020_v29 = vpop.f32.mrb[250].mxu0 }
 0x4da   : > { %v12883_v54 = vadd.f32 %v6208_v59, %v6018_v1  ;;  %v6021_v21 = vadd.f32 %v6020_v29, %v12692_v58  ;;  %v6211_v4 = vpop.f32.mrb[250].mxu1  ;;  %v9760_v52 = vpop.f32.mrb[251].mxu0  ;;  %v7362_v1 = vpack.c.bf16 %v7347_v42, %v7346_v7  ;;  %v7349_v29 = vld [vmem:[#allocation2 + $0xf3] sm:$0xff] }
 0x4db   : > { %v9804_v45 = vpop.f32.mrb[251].mxu1 }
 0x4dc   : > { %v12886_v27 = vadd.f32 %v6211_v4, %v6021_v21  ;;  %10022 = vmatmul.mubr.msk.bf16.vlgmr.msra.gmra.mrb[100].mxu0 %vm228_vm3, %v7151_v3  ;;  %v7139_v21 = vld [vmem:[#allocation2 + $0xea] sm:$0xff] }
 0x4dd   : > { %10066 = vmatmul.mubr.msk.bf16.vlgmr.msra.gmra.mrb[100].mxu1 %vm228_vm3, %v7360_v44  ;;  %10025 = vmatprep.mubr.msk.bf16.mxu0 %vm10199_vm1, %v10198_v2 }
 0x4de   : > { %10069 = vmatprep.mubr.msk.bf16.mxu1 %vm10199_vm1, %v10198_v2 }
 0x4df   : > { %v6025_v24 = vpop.f32.mrb[252].mxu0 }
 0x4e0   : > { %v6026_v58 = vadd.f32 %v6025_v24, %v12722_v11  ;;  %v6216_v15 = vpop.f32.mrb[252].mxu1  ;;  %v9763_v17 = vpop.f32.mrb[253].mxu0 }
 0x4e1   : > { %v9807_v32 = vpop.f32.mrb[253].mxu1  ;;  %v6028_v0 = vpop.f32.mrb[254].mxu0 }
 0x4e2   : > { %v12895_v30 = vadd.f32 %v6216_v15, %v6026_v58  ;;  %v6029_v6 = vadd.f32 %v6028_v0, %v12727_v8  ;;  %v6219_v28 = vpop.f32.mrb[254].mxu1  ;;  %v9764_v33 = vpop.f32.mrb[255].mxu0  ;;  %v7138_v8 = vld [vmem:[#allocation2 + $0xe2] sm:$0xff]  ;;  %v7363_v15 = vpack.c.bf16 %v7349_v29, %v7348_v57 }
 0x4e3   : > { %v9808_v43 = vpop.f32.mrb[255].mxu1  ;;  %v7153_v19 = vpack.c.bf16 %v7138_v8, %v7137_v63  ;;  %v7141_v33 = vld [vmem:[#allocation2 + $0xfa] sm:$0xff] }
 0x4e4   : > { %v12898_v9 = vadd.f32 %v6219_v28, %v6029_v6  ;;  %10026 = vmatmul.mubr.msk.bf16.gmra.mrb[104].mxu0 %vm228_vm3, %v7152_v22  ;;  %v7350_v8 = vld [vmem:[#allocation2 + $0xfb] sm:$0xff]  ;;  %v7353_v63 = vld [vmem:[#allocation2 + $0x113] sm:$0xff] }
 0x4e5   : > { %10070 = vmatmul.mubr.msk.bf16.gmra.mrb[104].mxu1 %vm228_vm3, %v7361_v25  ;;  %10029 = vmatprep.mubr.msk.bf16.mxu0 %vm10199_vm1, %v10198_v2 }
 0x4e6   : > { %10073 = vmatprep.mubr.msk.bf16.mxu1 %vm10199_vm1, %v10198_v2 }
 0x4e7   : > { %v6033_v11 = vpop.f32.mrb[0].mxu0 }
 0x4e8   : > { %v6034_v46 = vadd.f32 %v6033_v11, %v12756_v10  ;;  %v6224_v20 = vpop.f32.mrb[0].mxu1  ;;  %v9767_v39 = vpop.f32.mrb[1].mxu0 }
 0x4e9   : > { %v9811_v49 = vpop.f32.mrb[1].mxu1  ;;  %v6036_v61 = vpop.f32.mrb[2].mxu0 }
 0x4ea   : > { %v12907_v23 = vadd.f32 %v6224_v20, %v6034_v46  ;;  %v6037_v40 = vadd.f32 %v6036_v61, %v12761_v18  ;;  %v6227_v36 = vpop.f32.mrb[2].mxu1  ;;  %v9768_v31 = vpop.f32.mrb[3].mxu0  ;;  %v7140_v18 = vld [vmem:[#allocation2 + $0xf2] sm:$0xff]  ;;  %v7364_v20 = vpack.c.bf16 %v7351_v12, %v7350_v8 }
 0x4eb   : > { %v9812_v13 = vpop.f32.mrb[3].mxu1  ;;  %v7154_v24 = vpack.c.bf16 %v7140_v18, %v7139_v21  ;;  %v7143_v31 = vld [vmem:[#allocation2 + $0x10a] sm:$0xff]  ;;  %v7148_v12 = vld [vmem:[#allocation2 + $0x132] sm:$0xff] }
 0x4ec   : > { %v12910_v59 = vadd.f32 %v6227_v36, %v6037_v40  ;;  %10030 = vmatmul.mubr.msk.bf16.gmra.mrb[108].mxu0 %vm228_vm3, %v7153_v19  ;;  %v7352_v18 = vld [vmem:[#allocation2 + $0x10b] sm:$0xff]  ;;  %v7355_v21 = vld [vmem:[#allocation2 + $0x123] sm:$0xff] }
 0x4ed   : > { %10074 = vmatmul.mubr.msk.bf16.gmra.mrb[108].mxu1 %vm228_vm3, %v7362_v1  ;;  %10033 = vmatprep.mubr.msk.bf16.mxu0 %vm10199_vm1, %v10198_v2 }
 0x4ee   : > { %10077 = vmatprep.mubr.msk.bf16.mxu1 %vm10199_vm1, %v10198_v2 }
 0x4ef   : > { %v6041_v10 = vpop.f32.mrb[4].mxu0 }
 0x4f0   : > { %v6042_v56 = vadd.f32 %v6041_v10, %v12775_v37  ;;  %v6232_v35 = vpop.f32.mrb[4].mxu1  ;;  %v9771_v47 = vpop.f32.mrb[5].mxu0 }
 0x4f1   : > { %v9815_v26 = vpop.f32.mrb[5].mxu1  ;;  %v6044_v3 = vpop.f32.mrb[6].mxu0 }
 0x4f2   : > { %v12919_v4 = vadd.f32 %v6232_v35, %v6042_v56  ;;  %v6045_v52 = vadd.f32 %v6044_v3, %v12779_v51  ;;  %v6235_v44 = vpop.f32.mrb[6].mxu1  ;;  %v9772_v45 = vpop.f32.mrb[7].mxu0  ;;  %v7142_v51 = vld [vmem:[#allocation2 + $0x102] sm:$0xff]  ;;  %v7365_v35 = vpack.c.bf16 %v7353_v63, %v7352_v18 }
 0x4f3   : > { %v9816_v58 = vpop.f32.mrb[7].mxu1  ;;  %v7155_v11 = vpack.c.bf16 %v7142_v51, %v7141_v33  ;;  %v7145_v45 = vld [vmem:[#allocation2 + $0x11a] sm:$0xff]  ;;  %v7150_v63 = vld [vmem:[#allocation2 + $0x142] sm:$0xff] }
 0x4f4   : > { %v12922_v17 = vadd.f32 %v6235_v44, %v6045_v52  ;;  %10034 = vmatmul.mubr.msk.bf16.gmra.mrb[112].mxu0 %vm228_vm3, %v7154_v24  ;;  %v7354_v51 = vld [vmem:[#allocation2 + $0x11b] sm:$0xff] }
 0x4f5   : > { %10078 = vmatmul.mubr.msk.bf16.gmra.mrb[112].mxu1 %vm228_vm3, %v7363_v15  ;;  %10037 = vmatprep.mubr.msk.bf16.mxu0 %vm10199_vm1, %v10198_v2 }
 0x4f6   : > { %10081 = vmatprep.mubr.msk.bf16.mxu1 %vm10199_vm1, %v10198_v2 }
 0x4f7   : > { %v6049_v37 = vpop.f32.mrb[8].mxu0 }
 0x4f8   : > { %v6050_v55 = vadd.f32 %v6049_v37, %v12793_v14  ;;  %v6240_v32 = vpop.f32.mrb[8].mxu1  ;;  %v9775_v0 = vpop.f32.mrb[9].mxu0 }
 0x4f9   : > { %v9819_v6 = vpop.f32.mrb[9].mxu1  ;;  %v6052_v28 = vpop.f32.mrb[10].mxu0 }
 0x4fa   : > { %v12931_v22 = vadd.f32 %v6240_v32, %v6050_v55  ;;  %v6053_v16 = vadd.f32 %v6052_v28, %v12797_v60  ;;  %v6243_v43 = vpop.f32.mrb[10].mxu1  ;;  %v9776_v25 = vpop.f32.mrb[11].mxu0  ;;  %v7144_v60 = vld [vmem:[#allocation2 + $0x112] sm:$0xff]  ;;  %v7366_v32 = vpack.c.bf16 %v7355_v21, %v7354_v51 }
 0x4fb   : > { %v9820_v46 = vpop.f32.mrb[11].mxu1  ;;  %v7156_v10 = vpack.c.bf16 %v7144_v60, %v7143_v31 }
 0x4fc   : > { %v12934_v39 = vadd.f32 %v6243_v43, %v6053_v16  ;;  %10038 = vmatmul.mubr.msk.bf16.gmra.mrb[116].mxu0 %vm228_vm3, %v7155_v11  ;;  %v7356_v16 = vld [vmem:[#allocation2 + $0x12b] sm:$0xff]  ;;  %v7357_v43 = vld [vmem:[#allocation2 + $0x133] sm:$0xff] }
 0x4fd   : > { %10082 = vmatmul.mubr.msk.bf16.gmra.mrb[116].mxu1 %vm228_vm3, %v7364_v20  ;;  %10041 = vmatprep.mubr.msk.bf16.mxu0 %vm10199_vm1, %v10198_v2 }
 0x4fe   : > { %10085 = vmatprep.mubr.msk.bf16.mxu1 %vm10199_vm1, %v10198_v2 }
 0x4ff   : > { %v6057_v14 = vpop.f32.mrb[12].mxu0 }
 0x500   : > { %v6058_v42 = vadd.f32 %v6057_v14, %v12811_v48  ;;  %v6248_v49 = vpop.f32.mrb[12].mxu1  ;;  %v9779_v61 = vpop.f32.mrb[13].mxu0 }
 0x501   : > { %v9823_v40 = vpop.f32.mrb[13].mxu1  ;;  %v6060_v36 = vpop.f32.mrb[14].mxu0 }
 0x502   : > { %v12943_v19 = vadd.f32 %v6248_v49, %v6058_v42  ;;  %v6061_v7 = vadd.f32 %v6060_v36, %v12815_v34  ;;  %v6251_v13 = vpop.f32.mrb[14].mxu1  ;;  %v9780_v1 = vpop.f32.mrb[15].mxu0  ;;  %v7146_v34 = vld [vmem:[#allocation2 + $0x122] sm:$0xff]  ;;  %v7367_v49 = vpack.c.bf16 %v7357_v43, %v7356_v16 }
 0x503   : > { %v9824_v56 = vpop.f32.mrb[15].mxu1  ;;  %v7157_v37 = vpack.c.bf16 %v7146_v34, %v7145_v45  ;;  %v7359_v40 = vld [vmem:[#allocation2 + $0x143] sm:$0xff] }
 0x504   : > { %v12946_v47 = vadd.f32 %v6251_v13, %v6061_v7  ;;  %10042 = vmatmul.mubr.msk.bf16.gmra.mrb[120].mxu0 %vm228_vm3, %v7156_v10 }
 0x505   : > { %10086 = vmatmul.mubr.msk.bf16.gmra.mrb[120].mxu1 %vm228_vm3, %v7365_v35  ;;  %10045 = vmatprep.mubr.msk.bf16.mxu0 %vm10199_vm1, %v10198_v2 }
 0x506   : > { %10089 = vmatprep.mubr.msk.bf16.mxu1 %vm10199_vm1, %v10198_v2 }
 0x507   : > { %v6065_v48 = vpop.f32.mrb[16].mxu0 }
 0x508   : > { %v6066_v29 = vadd.f32 %v6065_v48, %v12829_v53  ;;  %v6256_v26 = vpop.f32.mrb[16].mxu1  ;;  %v9783_v3 = vpop.f32.mrb[17].mxu0 }
 0x509   : > { %v9827_v52 = vpop.f32.mrb[17].mxu1  ;;  %v6068_v44 = vpop.f32.mrb[18].mxu0 }
 0x50a   : > { %v12955_v24 = vadd.f32 %v6256_v26, %v6066_v29  ;;  %v6069_v57 = vadd.f32 %v6068_v44, %v12833_v5  ;;  %v6259_v58 = vpop.f32.mrb[18].mxu1  ;;  %v9784_v15 = vpop.f32.mrb[19].mxu0  ;;  %v7147_v5 = vld [vmem:[#allocation2 + $0x12a] sm:$0xff] }
 0x50b   : > { %v9828_v55 = vpop.f32.mrb[19].mxu1  ;;  %v7158_v60 = vpack.c.bf16 %v7148_v12, %v7147_v5 }
 0x50c   : > { %v12958_v0 = vadd.f32 %v6259_v58, %v6069_v57  ;;  %10046 = vmatmul.mubr.msk.bf16.gmra.mrb[124].mxu0 %vm228_vm3, %v7157_v37 }
 0x50d   : > { %10090 = vmatmul.mubr.msk.bf16.gmra.mrb[124].mxu1 %vm228_vm3, %v7366_v32  ;;  %10049 = vmatprep.mubr.msk.bf16.mxu0 %vm10199_vm1, %v10198_v2 }
 0x50e   : > { %10093 = vmatprep.mubr.msk.bf16.mxu1 %vm10199_vm1, %v10198_v2 }
 0x50f   : > { %v6073_v53 = vpop.f32.mrb[20].mxu0 }
 0x510   : > { %v6074_v6 = vadd.f32 %v6073_v53, %v12847_v41  ;;  %v6264_v28 = vpop.f32.mrb[20].mxu1  ;;  %v9787_v33 = vpop.f32.mrb[21].mxu0  ;;  %v7149_v41 = vld [vmem:[#allocation2 + $0x13a] sm:$0xff] }
 0x511   : > { %v9831_v25 = vpop.f32.mrb[21].mxu1  ;;  %v6076_v11 = vpop.f32.mrb[22].mxu0  ;;  %v7159_v1 = vpack.c.bf16 %v7150_v63, %v7149_v41 }
 0x512   : > { %v12967_v8 = vadd.f32 %v6264_v28, %v6074_v6  ;;  %v6077_v46 = vadd.f32 %v6076_v11, %v12851_v38  ;;  %v6267_v20 = vpop.f32.mrb[22].mxu1  ;;  %v9788_v14 = vpop.f32.mrb[23].mxu0  ;;  %v7358_v38 = vld [vmem:[#allocation2 + $0x13b] sm:$0xff] }
 0x513   : > { %v9832_v42 = vpop.f32.mrb[23].mxu1  ;;  %v7368_v56 = vpack.c.bf16 %v7359_v40, %v7358_v38 }
 0x514   : > { %v12970_v61 = vadd.f32 %v6267_v20, %v6077_v46  ;;  %10050 = vmatmul.mubr.msk.bf16.gmra.mrb[128].mxu0 %vm228_vm3, %v7158_v60 }
 0x515   : > { %10094 = vmatmul.mubr.msk.bf16.gmra.mrb[128].mxu1 %vm228_vm3, %v7367_v49  ;;  %10053 = vmatprep.mubr.msk.bf16.mxu0 %vm10199_vm1, %v10198_v2 }
 0x516   : > { %10097 = vmatprep.mubr.msk.bf16.mxu1 %vm10199_vm1, %v10198_v2 }
 0x517   : > { %v6081_v36 = vpop.f32.mrb[24].mxu0 }
 0x518   : > { %v6082_v31 = vadd.f32 %v6081_v36, %v12865_v50  ;;  %v6272_v7 = vpop.f32.mrb[24].mxu1  ;;  %v9791_v13 = vpop.f32.mrb[25].mxu0 }
 0x519   : > { %v9835_v10 = vpop.f32.mrb[25].mxu1  ;;  %v6084_v18 = vpop.f32.mrb[26].mxu0 }
 0x51a   : > { %v12979_v35 = vadd.f32 %v6272_v7, %v6082_v31  ;;  %v6085_v48 = vadd.f32 %v6084_v18, %v12869_v62  ;;  %v6275_v34 = vpop.f32.mrb[26].mxu1  ;;  %v9792_v29 = vpop.f32.mrb[27].mxu0 }
 0x51b   : > { %v9836_v26 = vpop.f32.mrb[27].mxu1 }
 0x51c   : > { %v12982_v3 = vadd.f32 %v6275_v34, %v6085_v48  ;;  %10054 = vmatmul.mubr.msk.bf16.gmra.mrb[132].mxu0 %vm228_vm3, %v7159_v1 }
 0x51d   : > { %10098 = vmatmul.mubr.msk.bf16.gmra.mrb[132].mxu1 %vm228_vm3, %v7368_v56 }
 0x51f   : > { %v6417_v2 = vpop.f32.mrb[28].mxu0 }
 0x520   : > { %v6488_v50 = vadd.f32 %v6417_v2, %v12883_v54  ;;  %v6626_v21 = vpop.f32.mrb[28].mxu1  ;;  %v9847_v52 = vpop.f32.mrb[29].mxu0 }
 0x521   : > { %v9891_v44 = vpop.f32.mrb[29].mxu1  ;;  %v6420_v45 = vpop.f32.mrb[30].mxu0 }
 0x522   : > { %v12987_v57 = vadd.f32 %v6626_v21, %v6488_v50  ;;  %v6489_v62 = vadd.f32 %v6420_v45, %v12886_v27  ;;  %v6629_v58 = vpop.f32.mrb[30].mxu1  ;;  %v9848_v15 = vpop.f32.mrb[31].mxu0 }
 0x523   : > { %v9892_v37 = vpop.f32.mrb[31].mxu1 }
 0x524   : > { %v12990_v51 = vadd.f32 %v6629_v58, %v6489_v62 }
 0x527   : > { %v6425_v55 = vpop.f32.mrb[32].mxu0 }
 0x528   : > { %v6490_v32 = vadd.f32 %v6425_v55, %v12895_v30  ;;  %v6634_v53 = vpop.f32.mrb[32].mxu1  ;;  %v9851_v5 = vpop.f32.mrb[33].mxu0 }
 0x529   : > { %v9895_v12 = vpop.f32.mrb[33].mxu1  ;;  %v6428_v54 = vpop.f32.mrb[34].mxu0 }
 0x52a   : > { %v12993_v6 = vadd.f32 %v6634_v53, %v6490_v32  ;;  %v6491_v28 = vadd.f32 %v6428_v54, %v12898_v9  ;;  %v6637_v33 = vpop.f32.mrb[34].mxu1  ;;  %v9852_v16 = vpop.f32.mrb[35].mxu0 }
 0x52b   : > { %v9896_v43 = vpop.f32.mrb[35].mxu1 }
 0x52c   : > { %v12996_v27 = vadd.f32 %v6637_v33, %v6491_v28 }
 0x52f   : > { %v6433_v25 = vpop.f32.mrb[36].mxu0 }
 0x530   : > { %v6492_v11 = vadd.f32 %v6433_v25, %v12907_v23  ;;  %v6642_v46 = vpop.f32.mrb[36].mxu1  ;;  %v9855_v20 = vpop.f32.mrb[37].mxu0 }
 0x531   : > { %v9899_v14 = vpop.f32.mrb[37].mxu1  ;;  %v6436_v30 = vpop.f32.mrb[38].mxu0 }
 0x532   : > { %v12999_v60 = vadd.f32 %v6642_v46, %v6492_v11  ;;  %v6493_v42 = vadd.f32 %v6436_v30, %v12910_v59  ;;  %v6645_v49 = vpop.f32.mrb[38].mxu1  ;;  %v9856_v41 = vpop.f32.mrb[39].mxu0 }
 0x533   : > { %v9900_v63 = vpop.f32.mrb[39].mxu1 }
 0x534   : > { %v13002_v9 = vadd.f32 %v6645_v49, %v6493_v42 }
 0x537   : > { %v6441_v38 = vpop.f32.mrb[40].mxu0 }
 0x538   : > { %v6494_v40 = vadd.f32 %v6441_v38, %v12919_v4  ;;  %v6650_v36 = vpop.f32.mrb[40].mxu1  ;;  %v9859_v31 = vpop.f32.mrb[41].mxu0 }
 0x539   : > { %v9903_v7 = vpop.f32.mrb[41].mxu1  ;;  %v6444_v23 = vpop.f32.mrb[42].mxu0 }
 0x53a   : > { %v13005_v13 = vadd.f32 %v6650_v36, %v6494_v40  ;;  %v6495_v1 = vadd.f32 %v6444_v23, %v12922_v17  ;;  %v6653_v10 = vpop.f32.mrb[42].mxu1  ;;  %v9860_v18 = vpop.f32.mrb[43].mxu0 }
 0x53b   : > { %v9904_v56 = vpop.f32.mrb[43].mxu1 }
 0x53c   : > { %v13008_v59 = vadd.f32 %v6653_v10, %v6495_v1 }
 0x53f   : > { %v6449_v48 = vpop.f32.mrb[44].mxu0 }
 0x540   : > { %v6496_v34 = vadd.f32 %v6449_v48, %v12931_v22  ;;  %v6658_v29 = vpop.f32.mrb[44].mxu1  ;;  %v9863_v26 = vpop.f32.mrb[45].mxu0 }
 0x541   : > { %v9907_v2 = vpop.f32.mrb[45].mxu1  ;;  %v6452_v4 = vpop.f32.mrb[46].mxu0 }
 0x542   : > { %v13011_v50 = vadd.f32 %v6658_v29, %v6496_v34  ;;  %v6497_v21 = vadd.f32 %v6452_v4, %v12934_v39  ;;  %v6661_v52 = vpop.f32.mrb[46].mxu1  ;;  %v9864_v44 = vpop.f32.mrb[47].mxu0 }
 0x543   : > { %v9908_v45 = vpop.f32.mrb[47].mxu1 }
 0x544   : > { %v13014_v17 = vadd.f32 %v6661_v52, %v6497_v21 }
 0x547   : > { %v6457_v62 = vpop.f32.mrb[48].mxu0 }
 0x548   : > { %v6498_v58 = vadd.f32 %v6457_v62, %v12943_v19  ;;  %v6666_v15 = vpop.f32.mrb[48].mxu1  ;;  %v9867_v37 = vpop.f32.mrb[49].mxu0 }
 0x549   : > { %v9911_v55 = vpop.f32.mrb[49].mxu1  ;;  %v6460_v22 = vpop.f32.mrb[50].mxu0 }
 0x54a   : > { %v13017_v32 = vadd.f32 %v6666_v15, %v6498_v58  ;;  %v6499_v53 = vadd.f32 %v6460_v22, %v12946_v47  ;;  %v6669_v5 = vpop.f32.mrb[50].mxu1  ;;  %v9868_v12 = vpop.f32.mrb[51].mxu0 }
 0x54b   : > { %v9912_v54 = vpop.f32.mrb[51].mxu1 }
 0x54c   : > { %v13020_v39 = vadd.f32 %v6669_v5, %v6499_v53 }
 0x54f   : > { %v6465_v28 = vpop.f32.mrb[52].mxu0 }
 0x550   : > { %v6500_v33 = vadd.f32 %v6465_v28, %v12955_v24  ;;  %v6674_v16 = vpop.f32.mrb[52].mxu1  ;;  %v9871_v43 = vpop.f32.mrb[53].mxu0 }
 0x551   : > { %v9915_v25 = vpop.f32.mrb[53].mxu1  ;;  %v6468_v19 = vpop.f32.mrb[54].mxu0 }
 0x552   : > { %v13023_v11 = vadd.f32 %v6674_v16, %v6500_v33  ;;  %v6501_v46 = vadd.f32 %v6468_v19, %v12958_v0  ;;  %v6677_v20 = vpop.f32.mrb[54].mxu1  ;;  %v9872_v14 = vpop.f32.mrb[55].mxu0 }
 0x553   : > { %v9916_v30 = vpop.f32.mrb[55].mxu1 }
 0x554   : > { %v13026_v47 = vadd.f32 %v6677_v20, %v6501_v46 }
 0x557   : > { %v6473_v42 = vpop.f32.mrb[56].mxu0 }
 0x558   : > { %v6502_v49 = vadd.f32 %v6473_v42, %v12967_v8  ;;  %v6682_v41 = vpop.f32.mrb[56].mxu1  ;;  %v9875_v63 = vpop.f32.mrb[57].mxu0 }
 0x559   : > { %v9919_v38 = vpop.f32.mrb[57].mxu1  ;;  %v6476_v24 = vpop.f32.mrb[58].mxu0 }
 0x55a   : > { %v13029_v40 = vadd.f32 %v6682_v41, %v6502_v49  ;;  %v6503_v36 = vadd.f32 %v6476_v24, %v12970_v61  ;;  %v6685_v31 = vpop.f32.mrb[58].mxu1  ;;  %v9876_v7 = vpop.f32.mrb[59].mxu0 }
 0x55b   : > { %v9920_v23 = vpop.f32.mrb[59].mxu1 }
 0x55c   : > { %v13032_v0 = vadd.f32 %v6685_v31, %v6503_v36 }
 0x55f   : > { %v6481_v1 = vpop.f32.mrb[60].mxu0 }
 0x560   : > { %v6504_v10 = vadd.f32 %v6481_v1, %v12979_v35  ;;  %v6690_v18 = vpop.f32.mrb[60].mxu1  ;;  %v9879_v56 = vpop.f32.mrb[61].mxu0 }
 0x561   : > { %v9923_v48 = vpop.f32.mrb[61].mxu1  ;;  %v6484_v8 = vpop.f32.mrb[62].mxu0 }
 0x562   : > { %v13035_v34 = vadd.f32 %v6690_v18, %v6504_v10  ;;  %v6505_v29 = vadd.f32 %v6484_v8, %v12982_v3  ;;  %v6693_v26 = vpop.f32.mrb[62].mxu1  ;;  %v9880_v2 = vpop.f32.mrb[63].mxu0 }
 0x563   : > { %v9924_v4 = vpop.f32.mrb[63].mxu1 }
 0x564   : > { %v13038_v61 = vadd.f32 %v6693_v26, %v6505_v29 }
 0x567   : > { %v6835_v21 = vpop.f32.mrb[64].mxu0 }
 0x568   : > { %v6906_v52 = vadd.f32 %v6835_v21, %v12987_v57  ;;  %v7044_v44 = vpop.f32.mrb[64].mxu1  ;;  %v9935_v45 = vpop.f32.mrb[65].mxu0 }
 0x569   : > { %v9979_v62 = vpop.f32.mrb[65].mxu1  ;;  %v6838_v35 = vpop.f32.mrb[66].mxu0 }
 0x56a   : > { %v13041_v58 = vadd.f32 %v7044_v44, %v6906_v52  ;;  %v6907_v15 = vadd.f32 %v6838_v35, %v12990_v51  ;;  %v7047_v37 = vpop.f32.mrb[66].mxu1  ;;  %v9936_v55 = vpop.f32.mrb[67].mxu0 }
 0x56b   : > { %v9980_v22 = vpop.f32.mrb[67].mxu1 }
 0x56c   : > { %v13044_v3 = vadd.f32 %v7047_v37, %v6907_v15 }
 0x56f   : > { %v6843_v53 = vpop.f32.mrb[68].mxu0 }
 0x570   : > { %v6908_v5 = vadd.f32 %v6843_v53, %v12993_v6  ;;  %v7052_v12 = vpop.f32.mrb[68].mxu1  ;;  %v9939_v54 = vpop.f32.mrb[69].mxu0 }
 0x571   : > { %v9983_v28 = vpop.f32.mrb[69].mxu1  ;;  %v6846_v57 = vpop.f32.mrb[70].mxu0 }
 0x572   : > { %v13047_v33 = vadd.f32 %v7052_v12, %v6908_v5  ;;  %v6909_v16 = vadd.f32 %v6846_v57, %v12996_v27  ;;  %v7055_v43 = vpop.f32.mrb[70].mxu1  ;;  %v9940_v25 = vpop.f32.mrb[71].mxu0 }
 0x573   : > { %v9984_v19 = vpop.f32.mrb[71].mxu1 }
 0x574   : > { %v13050_v51 = vadd.f32 %v7055_v43, %v6909_v16 }
 0x577   : > { %v6851_v46 = vpop.f32.mrb[72].mxu0 }
 0x578   : > { %v6910_v20 = vadd.f32 %v6851_v46, %v12999_v60  ;;  %v7060_v14 = vpop.f32.mrb[72].mxu1  ;;  %v9943_v30 = vpop.f32.mrb[73].mxu0 }
 0x579   : > { %v9987_v42 = vpop.f32.mrb[73].mxu1  ;;  %v6854_v6 = vpop.f32.mrb[74].mxu0 }
 0x57a   : > { %v13053_v49 = vadd.f32 %v7060_v14, %v6910_v20  ;;  %v6911_v41 = vadd.f32 %v6854_v6, %v13002_v9  ;;  %v7063_v63 = vpop.f32.mrb[74].mxu1  ;;  %v9944_v38 = vpop.f32.mrb[75].mxu0 }
 0x57b   : > { %v9988_v24 = vpop.f32.mrb[75].mxu1 }
 0x57c   : > { %v13056_v27 = vadd.f32 %v7063_v63, %v6911_v41 }
 0x57f   : > { %v6859_v36 = vpop.f32.mrb[76].mxu0 }
 0x580   : > { %v6912_v31 = vadd.f32 %v6859_v36, %v13005_v13  ;;  %v7068_v7 = vpop.f32.mrb[76].mxu1  ;;  %v9947_v23 = vpop.f32.mrb[77].mxu0 }
 0x581   : > { %v9991_v1 = vpop.f32.mrb[77].mxu1  ;;  %v6862_v60 = vpop.f32.mrb[78].mxu0 }
 0x582   : > { %v13059_v10 = vadd.f32 %v7068_v7, %v6912_v31  ;;  %v6913_v18 = vadd.f32 %v6862_v60, %v13008_v59  ;;  %v7071_v56 = vpop.f32.mrb[78].mxu1  ;;  %v9948_v48 = vpop.f32.mrb[79].mxu0 }
 0x583   : > { %v9992_v8 = vpop.f32.mrb[79].mxu1 }
 0x584   : > { %v13062_v9 = vadd.f32 %v7071_v56, %v6913_v18 }
 0x587   : > { %v6867_v29 = vpop.f32.mrb[80].mxu0 }
 0x588   : > { %v6914_v26 = vadd.f32 %v6867_v29, %v13011_v50  ;;  %v7076_v2 = vpop.f32.mrb[80].mxu1  ;;  %v9951_v4 = vpop.f32.mrb[81].mxu0 }
 0x589   : > { %v9995_v21 = vpop.f32.mrb[81].mxu1  ;;  %v6870_v13 = vpop.f32.mrb[82].mxu0 }
 0x58a   : > { %v13065_v52 = vadd.f32 %v7076_v2, %v6914_v26  ;;  %v6915_v44 = vadd.f32 %v6870_v13, %v13014_v17  ;;  %v7079_v45 = vpop.f32.mrb[82].mxu1  ;;  %v9952_v62 = vpop.f32.mrb[83].mxu0 }
 0x58b   : > { %v9996_v35 = vpop.f32.mrb[83].mxu1 }
 0x58c   : > { %v13068_v59 = vadd.f32 %v7079_v45, %v6915_v44 }
 0x58f   : > { %v6875_v15 = vpop.f32.mrb[84].mxu0 }
 0x590   : > { %v6916_v37 = vadd.f32 %v6875_v15, %v13017_v32  ;;  %v7084_v55 = vpop.f32.mrb[84].mxu1  ;;  %v9955_v22 = vpop.f32.mrb[85].mxu0 }
 0x591   : > { %v9999_v53 = vpop.f32.mrb[85].mxu1  ;;  %v6878_v50 = vpop.f32.mrb[86].mxu0 }
 0x592   : > { %v13071_v5 = vadd.f32 %v7084_v55, %v6916_v37  ;;  %v6917_v12 = vadd.f32 %v6878_v50, %v13020_v39  ;;  %v7087_v54 = vpop.f32.mrb[86].mxu1  ;;  %v9956_v28 = vpop.f32.mrb[87].mxu0  ;;  %v13099_v50 = vld [vmem:[%s13177_s3 + $0x1] ss:$0 sm:$0xff] }
 0x593   : > { %v10000_v57 = vpop.f32.mrb[87].mxu1 }
 0x594   : > { %v13074_v17 = vadd.f32 %v7087_v54, %v6917_v12 }
 0x597   : > { %v6883_v16 = vpop.f32.mrb[88].mxu0 }
 0x598   : > { %v6918_v43 = vadd.f32 %v6883_v16, %v13023_v11  ;;  %v7092_v25 = vpop.f32.mrb[88].mxu1  ;;  %v9959_v19 = vpop.f32.mrb[89].mxu0 }
 0x599   : > { %v10003_v46 = vpop.f32.mrb[89].mxu1  ;;  %v6886_v32 = vpop.f32.mrb[90].mxu0 }
 0x59a   : > { %v13077_v20 = vadd.f32 %v7092_v25, %v6918_v43  ;;  %v6919_v14 = vadd.f32 %v6886_v32, %v13026_v47  ;;  %v7095_v30 = vpop.f32.mrb[90].mxu1  ;;  %v9960_v42 = vpop.f32.mrb[91].mxu0 }
 0x59b   : > { %v10004_v6 = vpop.f32.mrb[91].mxu1 }
 0x59c   : > { %v13080_v39 = vadd.f32 %v7095_v30, %v6919_v14 }
 0x59f   : > { %v6891_v41 = vpop.f32.mrb[92].mxu0 }
 0x5a0   : > { %v6920_v63 = vadd.f32 %v6891_v41, %v13029_v40  ;;  %v7100_v38 = vpop.f32.mrb[92].mxu1  ;;  %v9963_v24 = vpop.f32.mrb[93].mxu0 }
 0x5a1   : > { %v10007_v36 = vpop.f32.mrb[93].mxu1  ;;  %v6894_v11 = vpop.f32.mrb[94].mxu0 }
 0x5a2   : > { %v13083_v31 = vadd.f32 %v7100_v38, %v6920_v63  ;;  %v6921_v7 = vadd.f32 %v6894_v11, %v13032_v0  ;;  %v7103_v23 = vpop.f32.mrb[94].mxu1  ;;  %v9964_v1 = vpop.f32.mrb[95].mxu0 }
 0x5a3   : > { %v10008_v60 = vpop.f32.mrb[95].mxu1 }
 0x5a4   : > { %v13086_v47 = vadd.f32 %v7103_v23, %v6921_v7 }
 0x5a7   : > { %v6899_v18 = vpop.f32.mrb[96].mxu0 }
 0x5a8   : > { %v6922_v56 = vadd.f32 %v6899_v18, %v13035_v34  ;;  %v7108_v48 = vpop.f32.mrb[96].mxu1  ;;  %v9967_v8 = vpop.f32.mrb[97].mxu0 }
 0x5a9   : > { %v10011_v29 = vpop.f32.mrb[97].mxu1  ;;  %v6902_v40 = vpop.f32.mrb[98].mxu0 }
 0x5aa   : > { %v13089_v26 = vadd.f32 %v7108_v48, %v6922_v56  ;;  %v6923_v2 = vadd.f32 %v6902_v40, %v13038_v61  ;;  %v7111_v4 = vpop.f32.mrb[98].mxu1  ;;  %v9968_v21 = vpop.f32.mrb[99].mxu0 }
 0x5ab   : > { %v10012_v13 = vpop.f32.mrb[99].mxu1 }
 0x5ac   : > { %v13092_v0 = vadd.f32 %v7111_v4, %v6923_v2 }
 0x5af   : > { %v7253_v44 = vpop.f32.mrb[100].mxu0 }
 0x5b0   : > { %v7324_v45 = vadd.f32 %v7253_v44, %v13041_v58  ;;  %v7462_v62 = vpop.f32.mrb[100].mxu1  ;;  %v10023_v35 = vpop.f32.mrb[101].mxu0 }
 0x5b1   : > { %v10067_v34 = vpop.f32.mrb[101].mxu1  ;;  %v7256_v15 = vpop.f32.mrb[102].mxu0 }
 0x5b2   : > { %v7533_v37 = vadd.f32 %v7462_v62, %v7324_v45  ;;  %v7325_v55 = vadd.f32 %v7256_v15, %v13044_v3  ;;  %v7465_v22 = vpop.f32.mrb[102].mxu1  ;;  %v10024_v53 = vpop.f32.mrb[103].mxu0 }
 0x5b3   : > { %v10068_v61 = vpop.f32.mrb[103].mxu1 }
 0x5b4   : > { %v7551_v12 = vadd.f32 %v13099_v50, %v7533_v37  ;;  %v7534_v58 = vadd.f32 %v7465_v22, %v7325_v55 }
 0x5b6   : > { %v7569_v54 = vmax.f32 %v7551_v12, 0.0  ;;  %v7552_v28 = vadd.f32 %v13099_v50, %v7534_v58 }
 0x5b7   : > { %v7261_v57 = vpop.f32.mrb[104].mxu0 }
 0x5b8   : > { %7587 = vst.msk [vmem:[%s12700_s23 + $0x90] sm:$0xff] %vm228_vm3, %v7569_v54  ;;  %v7570_v16 = vmax.f32 %v7552_v28, 0.0  ;;  %v7326_v3 = vadd.f32 %v7261_v57, %v13047_v33  ;;  %v7470_v43 = vpop.f32.mrb[104].mxu1  ;;  %v10027_v25 = vpop.f32.mrb[105].mxu0 }
 0x5b9   : > { %v10071_v19 = vpop.f32.mrb[105].mxu1  ;;  %v7264_v46 = vpop.f32.mrb[106].mxu0 }
 0x5ba   : > { %7588 = vst.msk [vmem:[%s12700_s23 + $0x98] sm:$0xff] %vm228_vm3, %v7570_v16  ;;  %v7535_v32 = vadd.f32 %v7470_v43, %v7326_v3  ;;  %v7327_v14 = vadd.f32 %v7264_v46, %v13050_v51  ;;  %v7473_v30 = vpop.f32.mrb[106].mxu1  ;;  %v10028_v42 = vpop.f32.mrb[107].mxu0 }
 0x5bb   : > { %v10072_v6 = vpop.f32.mrb[107].mxu1 }
 0x5bc   : > { %v7553_v41 = vadd.f32 %v13099_v50, %v7535_v32  ;;  %v7536_v63 = vadd.f32 %v7473_v30, %v7327_v14 }
 0x5be   : > { %v7571_v38 = vmax.f32 %v7553_v41, 0.0  ;;  %v7554_v33 = vadd.f32 %v13099_v50, %v7536_v63 }
 0x5bf   : > { %v7269_v24 = vpop.f32.mrb[108].mxu0 }
 0x5c0   : > { %7589 = vst.msk [vmem:[%s12700_s23 + $0xa0] sm:$0xff] %vm228_vm3, %v7571_v38  ;;  %v7572_v36 = vmax.f32 %v7554_v33, 0.0  ;;  %v7328_v11 = vadd.f32 %v7269_v24, %v13053_v49  ;;  %v7478_v7 = vpop.f32.mrb[108].mxu1  ;;  %v10031_v23 = vpop.f32.mrb[109].mxu0 }
 0x5c1   : > { %v10075_v51 = vpop.f32.mrb[109].mxu1  ;;  %v7272_v1 = vpop.f32.mrb[110].mxu0 }
 0x5c2   : > { %7590 = vst.msk [vmem:[%s12700_s23 + $0xa8] sm:$0xff] %vm228_vm3, %v7572_v36  ;;  %v7537_v60 = vadd.f32 %v7478_v7, %v7328_v11  ;;  %v7329_v18 = vadd.f32 %v7272_v1, %v13056_v27  ;;  %v7481_v56 = vpop.f32.mrb[110].mxu1  ;;  %v10032_v48 = vpop.f32.mrb[111].mxu0 }
 0x5c3   : > { %v10076_v8 = vpop.f32.mrb[111].mxu1 }
 0x5c4   : > { %v7555_v29 = vadd.f32 %v13099_v50, %v7537_v60  ;;  %v7538_v40 = vadd.f32 %v7481_v56, %v7329_v18 }
 0x5c6   : > { %v7573_v2 = vmax.f32 %v7555_v29, 0.0  ;;  %v7556_v49 = vadd.f32 %v13099_v50, %v7538_v40 }
 0x5c7   : > { %v7277_v4 = vpop.f32.mrb[112].mxu0 }
 0x5c8   : > { %7591 = vst.msk [vmem:[%s12700_s23 + $0xb0] sm:$0xff] %vm228_vm3, %v7573_v2  ;;  %v7574_v21 = vmax.f32 %v7556_v49, 0.0  ;;  %v7330_v13 = vadd.f32 %v7277_v4, %v13059_v10  ;;  %v7486_v44 = vpop.f32.mrb[112].mxu1  ;;  %v10035_v45 = vpop.f32.mrb[113].mxu0 }
 0x5c9   : > { %v10079_v27 = vpop.f32.mrb[113].mxu1  ;;  %v7280_v62 = vpop.f32.mrb[114].mxu0 }
 0x5ca   : > { %7592 = vst.msk [vmem:[%s12700_s23 + $0xb8] sm:$0xff] %vm228_vm3, %v7574_v21  ;;  %v7539_v35 = vadd.f32 %v7486_v44, %v7330_v13  ;;  %v7331_v34 = vadd.f32 %v7280_v62, %v13062_v9  ;;  %v7489_v15 = vpop.f32.mrb[114].mxu1  ;;  %v10036_v37 = vpop.f32.mrb[115].mxu0 }
 0x5cb   : > { %v10080_v55 = vpop.f32.mrb[115].mxu1 }
 0x5cc   : > { %v7557_v22 = vadd.f32 %v13099_v50, %v7539_v35  ;;  %v7540_v53 = vadd.f32 %v7489_v15, %v7331_v34 }
 0x5ce   : > { %v7575_v61 = vmax.f32 %v7557_v22, 0.0  ;;  %v7558_v10 = vadd.f32 %v13099_v50, %v7540_v53 }
 0x5cf   : > { %v7285_v12 = vpop.f32.mrb[116].mxu0 }
 0x5d0   : > { %7593 = vst.msk [vmem:[%s12700_s23 + $0xc0] sm:$0xff] %vm228_vm3, %v7575_v61  ;;  %v7576_v58 = vmax.f32 %v7558_v10, 0.0  ;;  %v7332_v54 = vadd.f32 %v7285_v12, %v13065_v52  ;;  %v7494_v28 = vpop.f32.mrb[116].mxu1  ;;  %v10039_v57 = vpop.f32.mrb[117].mxu0 }
 0x5d1   : > { %v10083_v9 = vpop.f32.mrb[117].mxu1  ;;  %v7288_v16 = vpop.f32.mrb[118].mxu0 }
 0x5d2   : > { %7594 = vst.msk [vmem:[%s12700_s23 + $0xc8] sm:$0xff] %vm228_vm3, %v7576_v58  ;;  %v7541_v3 = vadd.f32 %v7494_v28, %v7332_v54  ;;  %v7333_v43 = vadd.f32 %v7288_v16, %v13068_v59  ;;  %v7497_v25 = vpop.f32.mrb[118].mxu1  ;;  %v10040_v19 = vpop.f32.mrb[119].mxu0 }
 0x5d3   : > { %v10084_v46 = vpop.f32.mrb[119].mxu1 }
 0x5d4   : > { %v7559_v32 = vadd.f32 %v13099_v50, %v7541_v3  ;;  %v7542_v14 = vadd.f32 %v7497_v25, %v7333_v43 }
 0x5d6   : > { %v7577_v30 = vmax.f32 %v7559_v32, 0.0  ;;  %v7560_v52 = vadd.f32 %v13099_v50, %v7542_v14 }
 0x5d7   : > { %v7293_v42 = vpop.f32.mrb[120].mxu0 }
 0x5d8   : > { %7595 = vst.msk [vmem:[%s12700_s23 + $0xd0] sm:$0xff] %vm228_vm3, %v7577_v30  ;;  %v7578_v6 = vmax.f32 %v7560_v52, 0.0  ;;  %v7334_v41 = vadd.f32 %v7293_v42, %v13071_v5  ;;  %v7502_v63 = vpop.f32.mrb[120].mxu1  ;;  %v10043_v38 = vpop.f32.mrb[121].mxu0 }
 0x5d9   : > { %v10087_v59 = vpop.f32.mrb[121].mxu1  ;;  %v7296_v33 = vpop.f32.mrb[122].mxu0 }
 0x5da   : > { %7596 = vst.msk [vmem:[%s12700_s23 + $0xd8] sm:$0xff] %vm228_vm3, %v7578_v6  ;;  %v7543_v24 = vadd.f32 %v7502_v63, %v7334_v41  ;;  %v7335_v36 = vadd.f32 %v7296_v33, %v13074_v17  ;;  %v7505_v11 = vpop.f32.mrb[122].mxu1  ;;  %v10044_v7 = vpop.f32.mrb[123].mxu0 }
 0x5db   : > { %v10088_v23 = vpop.f32.mrb[123].mxu1 }
 0x5dc   : > { %v7561_v51 = vadd.f32 %v13099_v50, %v7543_v24  ;;  %v7544_v1 = vadd.f32 %v7505_v11, %v7335_v36 }
 0x5de   : > { %v7579_v60 = vmax.f32 %v7561_v51, 0.0  ;;  %v7562_v5 = vadd.f32 %v13099_v50, %v7544_v1 }
 0x5df   : > { %v7301_v18 = vpop.f32.mrb[124].mxu0 }
 0x5e0   : > { %7597 = vst.msk [vmem:[%s12700_s23 + $0xe0] sm:$0xff] %vm228_vm3, %v7579_v60  ;;  %v7580_v56 = vmax.f32 %v7562_v5, 0.0  ;;  %v7336_v48 = vadd.f32 %v7301_v18, %v13077_v20  ;;  %v7510_v8 = vpop.f32.mrb[124].mxu1  ;;  %v10047_v29 = vpop.f32.mrb[125].mxu0 }
 0x5e1   : > { %v10091_v17 = vpop.f32.mrb[125].mxu1  ;;  %v7304_v40 = vpop.f32.mrb[126].mxu0 }
 0x5e2   : > { %7598 = vst.msk [vmem:[%s12700_s23 + $0xe8] sm:$0xff] %vm228_vm3, %v7580_v56  ;;  %v7545_v2 = vadd.f32 %v7510_v8, %v7336_v48  ;;  %v7337_v49 = vadd.f32 %v7304_v40, %v13080_v39  ;;  %v7513_v4 = vpop.f32.mrb[126].mxu1  ;;  %v10048_v21 = vpop.f32.mrb[127].mxu0 }
 0x5e3   : > { %v10092_v13 = vpop.f32.mrb[127].mxu1 }
 0x5e4   : > { %v7563_v44 = vadd.f32 %v13099_v50, %v7545_v2  ;;  %v7546_v45 = vadd.f32 %v7513_v4, %v7337_v49 }
 0x5e6   : > { %v7581_v27 = vmax.f32 %v7563_v44, 0.0  ;;  %v7564_v20 = vadd.f32 %v13099_v50, %v7546_v45 }
 0x5e7   : > { %v7309_v62 = vpop.f32.mrb[128].mxu0 }
 0x5e8   : > { %7599 = vst.msk [vmem:[%s12700_s23 + $0xf0] sm:$0xff] %vm228_vm3, %v7581_v27  ;;  %v7582_v35 = vmax.f32 %v7564_v20, 0.0  ;;  %v7338_v34 = vadd.f32 %v7309_v62, %v13083_v31  ;;  %v7518_v15 = vpop.f32.mrb[128].mxu1  ;;  %v10051_v37 = vpop.f32.mrb[129].mxu0 }
 0x5e9   : > { %v10095_v39 = vpop.f32.mrb[129].mxu1  ;;  %v7312_v55 = vpop.f32.mrb[130].mxu0 }
 0x5ea   : > { %7600 = vst.msk [vmem:[%s12700_s23 + $0xf8] sm:$0xff] %vm228_vm3, %v7582_v35  ;;  %v7547_v22 = vadd.f32 %v7518_v15, %v7338_v34  ;;  %v7339_v53 = vadd.f32 %v7312_v55, %v13086_v47  ;;  %v7521_v61 = vpop.f32.mrb[130].mxu1  ;;  %v10052_v10 = vpop.f32.mrb[131].mxu0 }
 0x5eb   : > { %v10096_v12 = vpop.f32.mrb[131].mxu1 }
 0x5ec   : > { %v7565_v58 = vadd.f32 %v13099_v50, %v7547_v22  ;;  %v7548_v54 = vadd.f32 %v7521_v61, %v7339_v53 }
 0x5ee   : > { %v7583_v28 = vmax.f32 %v7565_v58, 0.0  ;;  %v7566_v31 = vadd.f32 %v13099_v50, %v7548_v54 }
 0x5ef   : > { %v7317_v57 = vpop.f32.mrb[132].mxu0 }
 0x5f0   : > { %7601 = vst.msk [vmem:[%s12700_s23 + $0x100] sm:$0xff] %vm228_vm3, %v7583_v28  ;;  %v7584_v9 = vmax.f32 %v7566_v31, 0.0  ;;  %v7340_v16 = vadd.f32 %v7317_v57, %v13089_v26  ;;  %v7526_v3 = vpop.f32.mrb[132].mxu1  ;;  %v10055_v47 = vpop.f32.mrb[133].mxu0 }
 0x5f1   : > { %v10099_v43 = vpop.f32.mrb[133].mxu1  ;;  %v7320_v25 = vpop.f32.mrb[134].mxu0 }
 0x5f2   : > { %7602 = vst.msk [vmem:[%s12700_s23 + $0x108] sm:$0xff] %vm228_vm3, %v7584_v9  ;;  %v7549_v19 = vadd.f32 %v7526_v3, %v7340_v16  ;;  %v7341_v46 = vadd.f32 %v7320_v25, %v13092_v0  ;;  %v7529_v32 = vpop.f32.mrb[134].mxu1  ;;  %v10056_v14 = vpop.f32.mrb[135].mxu0 }
 0x5f3   : > { %v10100_v30 = vpop.f32.mrb[135].mxu1 }
 0x5f4   : > { %v7567_v52 = vadd.f32 %v13099_v50, %v7549_v19  ;;  %v7550_v42 = vadd.f32 %v7529_v32, %v7341_v46 }
 0x5f6   : > { %v7585_v6 = vmax.f32 %v7567_v52, 0.0  ;;  %v7568_v41 = vadd.f32 %v13099_v50, %v7550_v42 }
 0x5f8   : > { %7603 = vst.msk [vmem:[%s12700_s23 + $0x110] sm:$0xff] %vm228_vm3, %v7585_v6  ;;  %v7586_v26 = vmax.f32 %v7568_v41, 0.0 }
 0x5fa   : > { %7604 = vst.msk [vmem:[%s12700_s23 + $0x118] sm:$0xff] %vm228_vm3, %v7586_v26 }
 0x5fb PF: > { %s15_s18 = sadd.s32 1, %s10196_s18  }
 0x5fc   : > { %p12_p4 = scmp.ge.s32.totalorder %s15_s18, 4  }
 0x5fe   :  { %14 = sbr.rel (!%p12_p4) target bundleno = 1 (0x1), region = 86 }

</bundles_post_ra>
